<compile_context>
chip_gen: v7x
topology: tpu7x:2x2x1
jax: 0.10.0
libtpu: 0.0.40
codegen_flags: <defaults>
</compile_context>

<pallas_src>
import functools

import jax
import jax.numpy as jnp
from jax.experimental import pallas as pl
from jax.experimental.pallas import tpu as pltpu

LANE = 128
_VMEM_LIMIT = 48 * 1024 * 1024


def _round_up(x, m):
    return (x + m - 1) // m * m


def _pad2d(x, rows, cols):
    r, c = x.shape
    if r == rows and c == cols:
        return x
    return jnp.pad(x, ((0, rows - r), (0, cols - c)))


def _choose_row_tile(m, kp):
    """(row_tile, padded_rows): tile is a multiple of 8, >=2 grid tiles."""
    big = 1024 if kp <= 256 else 512          # small-K layers get bigger row tiles
    if m >= 2 * big:
        return big, _round_up(m, big)
    if m >= 512:
        mp = _round_up(m, 256)
        return mp // 2, mp
    mp = _round_up(max(m, 16), 16)
    return mp // 2, mp


def _choose_ew_rows(r, c):
    """Row tile for the elementwise kernel: big tiles when C is narrow."""
    cap = 4096 if c <= 256 else (2048 if c <= 512 else 1024)
    best = 8
    for t in range(8, min(cap, max(r // 2, 8)) + 1, 8):
        if r % t == 0:
            best = t
    return best


# ---------------------------------------------------------------------------
# Kernel 1: tap-blocked GEMM with fused bias, optional tanh and optional fused
#           BatchNorm batch statistics.
#
#   grid = (phases, row_tiles, taps).  The tap axis is the K-reduction axis
#   (per-step K = lane-padded Cin) accumulated into a VMEM f32 scratch.  The A
#   BlockSpec picks, per (phase, tap), one of the 9 pre-shifted activation
#   views through a scalar-prefetched shift table, so the im2col "gather"
#   happens in the DMA index_map instead of as a materialized patch slab.
# ---------------------------------------------------------------------------
def _tap_gemm_kernel(tab_ref, a_ref, b_ref, bias_ref, *refs,
                     activation, with_stats):
    del tab_ref                               # only consumed by the index_maps
    if with_stats:
        out_ref, ssum_ref, ssq_ref, acc_ref = refs
    else:
        out_ref, acc_ref = refs
    t = pl.program_id(2)

    @pl.when(t == 0)
    def _():
        acc_ref[...] = jnp.zeros_like(acc_ref)

    acc_ref[...] += jnp.dot(a_ref[0], b_ref[0, 0],
                            preferred_element_type=jnp.float32)

    @pl.when(t == pl.num_programs(2) - 1)
    def _():
        acc = acc_ref[...] + bias_ref[...]
        if with_stats:
            # Per (phase, row-tile) partial sums for BatchNorm, replicated over
            # 8 sublanes so the stats block stays (8, 128) aligned.  bias == 0
            # whenever stats are requested, so zero-padded rows contribute 0.
            ps = jnp.sum(acc, axis=0, keepdims=True)
            pq = jnp.sum(acc * acc, axis=0, keepdims=True)
            ssum_ref[...] = jnp.broadcast_to(ps, ssum_ref.shape)
            ssq_ref[...] = jnp.broadcast_to(pq, ssq_ref.shape)
        if activation == "tanh":
            acc = jnp.tanh(acc)
        out_ref[0] = acc.astype(out_ref.dtype)


def pallas_tap_gemm(shift_tab, shifts, bmats, bias, *, activation=None,
                    with_stats=False, out_dtype=jnp.float32):
    """out[g] = act( sum_t shifts[shift_tab[g, t]] @ bmats[g, t] + bias ).

    shifts: (n_shifts, M, Kp) bf16, bmats: (G, T, Kp, Np) bf16, bias: (Np,) f32
    (bias must be all-zero when with_stats=True).  Returns (out (G, Mp, Np),
    stats) where stats is None or per-column (sum, sumsq) over all G * M rows.
    """
    n_shifts, M, Kp = shifts.shape
    G, T, Kp2, Np = bmats.shape
    assert Kp == Kp2 and Kp % LANE == 0 and Np % LANE == 0

    tm, Mp = _choose_row_tile(M, Kp)
    if Mp != M:
        shifts = jnp.pad(shifts, ((0, 0), (0, Mp - M), (0, 0)))
    n_tiles = Mp // tm
    bias2d = bias.astype(jnp.float32).reshape(1, Np)

    out_shape = [jax.ShapeDtypeStruct((G, Mp, Np), out_dtype)]
    out_specs = [pl.BlockSpec((1, tm, Np), lambda g, i, t, tab: (g, i, 0))]
    if with_stats:
        out_shape += [jax.ShapeDtypeStruct((G, n_tiles * 8, Np), jnp.float32)] * 2
        out_specs += [pl.BlockSpec((1, 8, Np), lambda g, i, t, tab: (g, i, 0))] * 2

    results = pl.pallas_call(
        functools.partial(_tap_gemm_kernel, activation=activation,
                          with_stats=with_stats),
        out_shape=tuple(out_shape) if with_stats else out_shape[0],
        grid_spec=pltpu.PrefetchScalarGridSpec(
            num_scalar_prefetch=1,
            grid=(G, n_tiles, T),
            in_specs=[
                # A: one of the 9 shifted activation views, chosen per tap.
                pl.BlockSpec((1, tm, Kp),
                             lambda g, i, t, tab: (tab[g, t], i, 0)),
                # B: per (phase, tap) weight matrix (Kp, Np).
                pl.BlockSpec((1, 1, Kp, Np),
                             lambda g, i, t, tab: (g, t, 0, 0)),
                pl.BlockSpec((1, Np), lambda g, i, t, tab: (0, 0)),
            ],
            out_specs=tuple(out_specs) if with_stats else out_specs[0],
            scratch_shapes=[pltpu.VMEM((tm, Np), jnp.float32)],
        ),
        compiler_params=pltpu.CompilerParams(
            dimension_semantics=("parallel", "parallel", "arbitrary"),
            vmem_limit_bytes=_VMEM_LIMIT),
    )(shift_tab, shifts, bmats, bias2d)

    if with_stats:
        out, s_parts, q_parts = results
        s = s_parts.reshape(G, n_tiles, 8, Np)[:, :, 0, :].sum(axis=(0, 1))
        q = q_parts.reshape(G, n_tiles, 8, Np)[:, :, 0, :].sum(axis=(0, 1))
        return out, (s, q)
    return results, None


# ---------------------------------------------------------------------------
# Kernel 2: elementwise per-channel scale/shift + ReLU (BatchNorm apply).
# ---------------------------------------------------------------------------
def _scale_shift_relu_kernel(x_ref, scale_ref, shift_ref, o_ref):
    y = x_ref[...].astype(jnp.float32) * scale_ref[...] + shift_ref[...]
    o_ref[...] = jnp.maximum(y, 0.0).astype(o_ref.dtype)


def pallas_scale_shift_relu(x2d, scale, shift, out_dtype=jnp.bfloat16):
    """x2d: (R, C) with C lane padded and R a multiple of 8."""
    R, C = x2d.shape
    assert R % 8 == 0 and C % LANE == 0
    tr = _choose_ew_rows(R, C)
    sc = scale.astype(jnp.float32).reshape(1, C)
    sh = shift.astype(jnp.float32).reshape(1, C)
    return pl.pallas_call(
        _scale_shift_relu_kernel,
        out_shape=jax.ShapeDtypeStruct((R, C), out_dtype),
        grid_spec=pltpu.PrefetchScalarGridSpec(
            num_scalar_prefetch=0,
            grid=(R // tr,),
            in_specs=[pl.BlockSpec((tr, C), lambda i: (i, 0)),
                      pl.BlockSpec((1, C), lambda i: (0, 0)),
                      pl.BlockSpec((1, C), lambda i: (0, 0))],
            out_specs=pl.BlockSpec((tr, C), lambda i: (i, 0)),
        ),
        compiler_params=pltpu.CompilerParams(
            dimension_semantics=("parallel",),
            vmem_limit_bytes=_VMEM_LIMIT),
    )(x2d, sc, sh)


# ---------------------------------------------------------------------------
# ConvTranspose2d layers (NHWC, lane-padded channels).
# ---------------------------------------------------------------------------
def conv_transpose_s2(x, w, bias=None, *, activation=None, with_stats=False,
                      out_dtype=jnp.float32):
    """Phase-decomposed ConvTranspose2d(k=4, stride=2, padding=1).

    x: (N, H, W, Cin_p) bf16, Cin_p lane padded (extra weight rows are zero).
    w: (Cin, Cout, 4, 4) PyTorch ConvTranspose2d layout.
    Output rows of phase g = 2*rh + rw are (n, a, b) row-major and correspond
    to output pixel (2a + rh, 2b + rw).
    Returns (out_ph (4, Mp, Coutp), (N, H, W, Coutp), M, stats).
    """
    N, H, W, Cinp = x.shape
    Cin, Cout, k, k2 = w.shape
    assert k == 4 and k2 == 4 and Cin <= Cinp
    assert not (with_stats and bias is not None), \
        "fused BN stats assume bias == 0 so zero-padded rows contribute zero"
    Coutp = _round_up(Cout, LANE)

    x = x.astype(jnp.bfloat16)
    x_pad = jnp.pad(x, ((0, 0), (1, 1), (1, 1), (0, 0)))     # halo = k - 1 - p = 1
    M = N * H * W

    # The only distinct A-slabs any (phase, tap) needs: 9 row/col shifted views.
    # TODO(synk): replace with element-offset index maps into x_pad itself.
    shifts = jnp.stack([x_pad[:, dh:dh + H, dw:dw + W, :].reshape(M, Cinp)
                        for dh in range(3) for dw in range(3)])

    # Tap (jh, jw) of phase (rh, rw) pairs input pixel (a+rh+jh-1, b+rw+jw-1)
    # with kernel tap (3-rh-2*jh, 3-rw-2*jw).
    wmats, tab = [], []
    for rh in range(2):
        for rw in range(2):
            row = []
            for jh in range(2):
                for jw in range(2):
                    wm = w[:, :, 3 - rh - 2 * jh, 3 - rw - 2 * jw]
                    wmats.append(_pad2d(wm.astype(jnp.float32), Cinp, Coutp))
                    row.append((rh + jh) * 3 + (rw + jw))
            tab.append(row)
    bmats = jnp.stack(wmats).reshape(4, 4, Cinp, Coutp).astype(jnp.bfloat16)
    shift_tab = jnp.array(tab, dtype=jnp.int32)

    bias_p = (jnp.zeros((Coutp,), jnp.float32) if bias is None else
              jnp.pad(bias.astype(jnp.float32), (0, Coutp - Cout)))

    out_ph, stats = pallas_tap_gemm(shift_tab, shifts, bmats, bias_p,
                                    activation=activation,
                                    with_stats=with_stats, out_dtype=out_dtype)
    return out_ph, (N, H, W, Coutp), M, stats


def conv_transpose_first(x2d, w, *, with_stats=True, out_dtype=jnp.bfloat16):
    """ConvTranspose2d(z, C, 4, 1, 0) on a 1x1 input == a GEMM whose output
    columns are (h, w, c) ordered, c lane padded.  x2d: (N, z_dim)."""
    Nb, zd = x2d.shape
    Cin, Cout, k, k2 = w.shape
    assert k == 4 and k2 == 4 and Cin == zd
    zdp = _round_up(zd, LANE)
    Coutp = _round_up(Cout, LANE)

    a = _pad2d(x2d.astype(jnp.bfloat16), Nb, zdp)[None]          # (1, N, zdp)
    wk = jnp.transpose(w.astype(jnp.float32), (0, 2, 3, 1))      # (Cin, 4, 4, Cout)
    wk = jnp.pad(wk, ((0, zdp - Cin), (0, 0), (0, 0), (0, Coutp - Cout)))
    bmats = wk.reshape(1, 1, zdp, 16 * Coutp).astype(jnp.bfloat16)
    shift_tab = jnp.zeros((1, 1), jnp.int32)
    bias_p = jnp.zeros((16 * Coutp,), jnp.float32)

    out, stats = pallas_tap_gemm(shift_tab, a, bmats, bias_p,
                                 activation=None, with_stats=with_stats,
                                 out_dtype=out_dtype)
    return out, Coutp, Nb, stats


def _interleave_phases(out_ph, n, h, w, cp):
    """(4, n*h*w, cp) phase-major -> (n, 2h, 2w, cp) spatially interleaved.
    TODO(synk): fold this transpose into the next layer's shift construction
    (or the BN-apply output indexing) to avoid the standalone XLA copy."""
    t = out_ph.reshape(2, 2, n, h, w, cp).transpose(2, 3, 0, 4, 1, 5)
    return t.reshape(n, 2 * h, 2 * w, cp)


def _bn_scale_shift(stats, count, gamma, beta, cp, eps):
    s, q = stats
    gamma_p = jnp.pad(gamma.astype(jnp.float32), (0, cp - gamma.shape[0]))
    beta_p = jnp.pad(beta.astype(jnp.float32), (0, cp - beta.shape[0]))
    mean = s / count
    # One-pass E[x^2]-E[x]^2 in f32 (guarded): error is well below the bf16
    # operand rounding already present in the matmuls.
    var = jnp.maximum(q / count - mean * mean, 0.0)
    inv = jax.lax.rsqrt(var + eps)
    scale = gamma_p * inv
    shift = beta_p - mean * scale
    return scale, shift


# ---------------------------------------------------------------------------
# Generator parameters + forward (matches the nn.Sequential structure).
# ---------------------------------------------------------------------------
def init_generator_params(key, z_dim, channels_img, features_g):
    fg = features_g
    cfg = [(z_dim, fg * 16), (fg * 16, fg * 8), (fg * 8, fg * 4), (fg * 4, fg * 2)]
    params = {"blocks": []}
    for cin, cout in cfg:
        key, wk = jax.random.split(key)
        params["blocks"].append(dict(
            w=jax.random.normal(wk, (cin, cout, 4, 4), jnp.float32) * 0.02,
            gamma=jnp.ones((cout,), jnp.float32),
            beta=jnp.zeros((cout,), jnp.float32)))
    key, wk, bk = jax.random.split(key, 3)
    params["final"] = dict(
        w=jax.random.normal(wk, (fg * 2, channels_img, 4, 4), jnp.float32) * 0.02,
        b=jax.random.normal(bk, (channels_img,), jnp.float32) * 0.02)
    return params


def generator_forward(x, params, eps=1e-5):
    """x: (N, z_dim, 1, 1) NCHW latent -> (N, channels_img, 64, 64) NCHW."""
    N = x.shape[0]
    z2d = x.reshape(N, -1).astype(jnp.float32)

    # Block 1: ConvT(z, fg*16, 4, 1, 0) (a pure GEMM) + BN + ReLU -> 4x4.
    blk = params["blocks"][0]
    out, coutp, m, stats = conv_transpose_first(z2d, blk["w"], with_stats=True)
    mp = out.shape[1]
    s16 = stats[0].reshape(16, coutp).sum(0)
    q16 = stats[1].reshape(16, coutp).sum(0)
    scale, shift = _bn_scale_shift((s16, q16), 16.0 * m, blk["gamma"],
                                   blk["beta"], coutp, eps)
    act = pallas_scale_shift_relu(out.reshape(mp, 16 * coutp),
                                  jnp.tile(scale, 16), jnp.tile(shift, 16))
    if mp != m:
        act = act[:m]
    h = act.reshape(N, 4, 4, coutp)                          # NHWC bf16, lane padded

    # Blocks 2-4: phase-decomposed ConvT(4, 2, 1) + BN + ReLU.
    for blk in params["blocks"][1:]:
        out_ph, (nb, hh, ww, coutp), m, stats = conv_transpose_s2(
            h, blk["w"], None, activation=None, with_stats=True,
            out_dtype=jnp.bfloat16)
        mp = out_ph.shape[1]
        scale, shift = _bn_scale_shift(stats, 4.0 * m, blk["gamma"],
                                       blk["beta"], coutp, eps)
        act = pallas_scale_shift_relu(out_ph.reshape(4 * mp, coutp), scale, shift)
        act = act.reshape(4, mp, coutp)
        if mp != m:
            act = act[:, :m, :]
        h = _interleave_phases(act, nb, hh, ww, coutp)       # (N, 2H, 2W, Cp) bf16

    # Final: phase-decomposed ConvT(4, 2, 1) + bias + Tanh -> 64x64.
    f = params["final"]
    out_ph, (nb, hh, ww, coutp), m, _ = conv_transpose_s2(
        h, f["w"], f["b"], activation="tanh", with_stats=False,
        out_dtype=jnp.float32)
    if out_ph.shape[1] != m:
        out_ph = out_ph[:, :m, :]
    img = _interleave_phases(out_ph, nb, hh, ww, coutp)      # (N, 64, 64, Cp)
    n_img = f["w"].shape[1]
    return img[..., :n_img].transpose(0, 3, 1, 2)            # NCHW (PyTorch parity)


# ---------------------------------------------------------------------------
# Pure-XLA f32 reference (mirrors the PyTorch module) for validation.
# ---------------------------------------------------------------------------
def reference_forward(x, params, eps=1e-5):
    def conv_t(h, w, b, stride, padding):
        k = w.shape[2]
        w_hwio = jnp.transpose(w[:, :, ::-1, ::-1], (2, 3, 0, 1))
        y = jax.lax.conv_general_dilated(
            h, w_hwio, window_strides=(1, 1),
            padding=[(k - 1 - padding, k - 1 - padding)] * 2,
            lhs_dilation=(stride, stride),
            dimension_numbers=("NHWC", "HWIO", "NHWC"))
        return y if b is None else y + b

    h = x.astype(jnp.float32).transpose(0, 2, 3, 1)
    strides = [(1, 0)] + [(2, 1)] * 3
    for blk, (s, p) in zip(params["blocks"], strides):
        y = conv_t(h, blk["w"], None, s, p)
        mean = y.mean(axis=(0, 1, 2))
        var = y.var(axis=(0, 1, 2))
        y = (y - mean) * jax.lax.rsqrt(var + eps) * blk["gamma"] + blk["beta"]
        h = jnp.maximum(y, 0.0)
    f = params["final"]
    return jnp.tanh(conv_t(h, f["w"], f["b"], 2, 1)).transpose(0, 3, 1, 2)


if __name__ == "__main__":
    key = jax.random.PRNGKey(0)
    pkey, xkey = jax.random.split(key)
    z_dim, channels_img, features_g = 32, 3, 8
    params = init_generator_params(pkey, z_dim, channels_img, features_g)
    x = jax.random.normal(xkey, (2, z_dim, 1, 1), jnp.float32)

    out = jax.block_until_ready(jax.jit(generator_forward)(x, params))
    assert out.shape == (2, channels_img, 64, 64), out.shape
    assert bool(jnp.all(jnp.isfinite(out)))

    ref = jax.block_until_ready(jax.jit(reference_forward)(x, params))
    max_err = float(jnp.max(jnp.abs(out - ref)))
    assert max_err < 0.1, f"mismatch vs reference: {max_err}"  # bf16 MXU operands
    print("KERNEL_OK")
</pallas_src>

<mosaic_0001>
module attributes {stable_mosaic.version = 11 : i64} {
  func.func @_tap_gemm_kernel(%arg0: i32, %arg1: i32, %arg2: i32, %arg3: memref<1x1xi32, #tpu.memory_space<smem>>, %arg4: memref<1x8x128xbf16, #tpu.memory_space<vmem>>, %arg5: memref<1x1x128x2048xbf16, #tpu.memory_space<vmem>>, %arg6: memref<1x2048xf32, #tpu.memory_space<vmem>>, %arg7: memref<1x8x2048xbf16, #tpu.memory_space<vmem>>, %arg8: memref<1x8x2048xf32, #tpu.memory_space<vmem>>, %arg9: memref<1x8x2048xf32, #tpu.memory_space<vmem>>, %arg10: memref<8x2048xf32, #tpu.memory_space<vmem>>) attributes {dimension_semantics = [#tpu.dimension_semantics<parallel>, #tpu.dimension_semantics<parallel>, #tpu.dimension_semantics<arbitrary>], iteration_bounds = array<i64: 1, 2, 1>, scalar_prefetch = 1 : i64, scratch_operands = 1 : i64, tpu.core_type = #tpu.core_type<tc>, window_params = [{transform_indices = @transform_0, window_bounds = array<i64: 1, 8, 128>}, {transform_indices = @transform_1, window_bounds = array<i64: 1, 1, 128, 2048>}, {pipeline_mode = #tpu.pipeline_mode<synchronous>, transform_indices = @transform_2, window_bounds = array<i64: 1, 2048>}, {transform_indices = @transform_3, window_bounds = array<i64: 1, 8, 2048>}, {transform_indices = @transform_4, window_bounds = array<i64: 1, 8, 2048>}, {transform_indices = @transform_5, window_bounds = array<i64: 1, 8, 2048>}]} {
    %c0_i32 = arith.constant 0 : i32
    %0 = arith.cmpi eq, %arg2, %c0_i32 : i32
    %1 = arith.extui %0 : i1 to i32
    %c0_i32_0 = arith.constant 0 : i32
    %2 = arith.cmpi ne, %1, %c0_i32_0 : i32
    scf.if %2 {
      %cst_13 = arith.constant 0.000000e+00 : f32
      %14 = vector.broadcast %cst_13 : f32 to vector<8x2048xf32>
      %c0_14 = arith.constant 0 : index
      %c0_15 = arith.constant 0 : index
      %15 = vector.load %arg10[%c0_14, %c0_15] : memref<8x2048xf32, #tpu.memory_space<vmem>>, vector<8x2048xf32>
      tpu.vector_store %arg10[%c0_14, %c0_15], %14 {strides = array<i32>} : memref<8x2048xf32, #tpu.memory_space<vmem>>, vector<8x2048xf32>,
    } else {
    }
    %c0 = arith.constant 0 : index
    %c0_1 = arith.constant 0 : index
    %3 = vector.load %arg10[%c0, %c0_1] : memref<8x2048xf32, #tpu.memory_space<vmem>>, vector<8x2048xf32>
    %c0_2 = arith.constant 0 : index
    %c0_3 = arith.constant 0 : index
    %c0_4 = arith.constant 0 : index
    %4 = vector.load %arg4[%c0_2, %c0_3, %c0_4] : memref<1x8x128xbf16, #tpu.memory_space<vmem>>, vector<1x8x128xbf16>
    %5 = vector.shape_cast %4 : vector<1x8x128xbf16> to vector<8x128xbf16>
    %c0_5 = arith.constant 0 : index
    %c0_6 = arith.constant 0 : index
    %c0_7 = arith.constant 0 : index
    %c0_8 = arith.constant 0 : index
    %6 = vector.load %arg5[%c0_5, %c0_6, %c0_7, %c0_8] : memref<1x1x128x2048xbf16, #tpu.memory_space<vmem>>, vector<1x1x128x2048xbf16>
    %7 = vector.shape_cast %6 : vector<1x1x128x2048xbf16> to vector<128x2048xbf16>
    %cst = arith.constant dense<0.000000e+00> : vector<8x2048xf32>
    %8 = tpu.matmul %5, %7, %cst {dimension_numbers = #tpu.dot_dimension_numbers<[1], [0], [0], [1], [0, 0, 1, 1], [], []>} : vector<8x128xbf16>, vector<128x2048xbf16>, vector<8x2048xf32> -> vector<8x2048xf32>
    %9 = arith.addf %3, %8 : vector<8x2048xf32>
    %c0_9 = arith.constant 0 : index
    %c0_10 = arith.constant 0 : index
    %10 = vector.load %arg10[%c0_9, %c0_10] : memref<8x2048xf32, #tpu.memory_space<vmem>>, vector<8x2048xf32>
    tpu.vector_store %arg10[%c0_9, %c0_10], %9 {strides = array<i32>} : memref<8x2048xf32, #tpu.memory_space<vmem>>, vector<8x2048xf32>,
    %c0_i32_11 = arith.constant 0 : i32
    %11 = arith.cmpi eq, %arg2, %c0_i32_11 : i32
    %12 = arith.extui %11 : i1 to i32
    %c0_i32_12 = arith.constant 0 : i32
    %13 = arith.cmpi ne, %12, %c0_i32_12 : i32
    scf.if %13 {
      %c0_13 = arith.constant 0 : index
      %c0_14 = arith.constant 0 : index
      %14 = vector.load %arg10[%c0_13, %c0_14] : memref<8x2048xf32, #tpu.memory_space<vmem>>, vector<8x2048xf32>
      %c0_15 = arith.constant 0 : index
      %c0_16 = arith.constant 0 : index
      %15 = vector.load %arg6[%c0_15, %c0_16] : memref<1x2048xf32, #tpu.memory_space<vmem>>, vector<1x2048xf32>
      %16 = vector.broadcast %15 : vector<1x2048xf32> to vector<8x2048xf32>
      %17 = arith.addf %14, %16 : vector<8x2048xf32>
      %cst_17 = arith.constant dense<0.000000e+00> : vector<2048xf32>
      %18 = vector.multi_reduction <add>, %17, %cst_17 [0] : vector<8x2048xf32> to vector<2048xf32>
      %19 = vector.shape_cast %18 : vector<2048xf32> to vector<1x2048xf32>
      %20 = arith.mulf %17, %17 : vector<8x2048xf32>
      %cst_18 = arith.constant dense<0.000000e+00> : vector<2048xf32>
      %21 = vector.multi_reduction <add>, %20, %cst_18 [0] : vector<8x2048xf32> to vector<2048xf32>
      %22 = vector.shape_cast %21 : vector<2048xf32> to vector<1x2048xf32>
      %23 = vector.shape_cast %19 : vector<1x2048xf32> to vector<1x1x2048xf32>
      %24 = vector.broadcast %23 : vector<1x1x2048xf32> to vector<1x8x2048xf32>
      %c0_19 = arith.constant 0 : index
      %c0_20 = arith.constant 0 : index
      %c0_21 = arith.constant 0 : index
      %25 = vector.load %arg8[%c0_19, %c0_20, %c0_21] : memref<1x8x2048xf32, #tpu.memory_space<vmem>>, vector<1x8x2048xf32>
      tpu.vector_store %arg8[%c0_19, %c0_20, %c0_21], %24 {strides = array<i32>} : memref<1x8x2048xf32, #tpu.memory_space<vmem>>, vector<1x8x2048xf32>,
      %26 = vector.shape_cast %22 : vector<1x2048xf32> to vector<1x1x2048xf32>
      %27 = vector.broadcast %26 : vector<1x1x2048xf32> to vector<1x8x2048xf32>
      %c0_22 = arith.constant 0 : index
      %c0_23 = arith.constant 0 : index
      %c0_24 = arith.constant 0 : index
      %28 = vector.load %arg9[%c0_22, %c0_23, %c0_24] : memref<1x8x2048xf32, #tpu.memory_space<vmem>>, vector<1x8x2048xf32>
      tpu.vector_store %arg9[%c0_22, %c0_23, %c0_24], %27 {strides = array<i32>} : memref<1x8x2048xf32, #tpu.memory_space<vmem>>, vector<1x8x2048xf32>,
      %29 = arith.truncf %17 : vector<8x2048xf32> to vector<8x2048xbf16>
      %c0_25 = arith.constant 0 : index
      %c0_26 = arith.constant 0 : index
      %c0_27 = arith.constant 0 : index
      %30 = vector.load %arg7[%c0_25, %c0_26, %c0_27] : memref<1x8x2048xbf16, #tpu.memory_space<vmem>>, vector<1x8x2048xbf16>
      %31 = vector.shape_cast %30 : vector<1x8x2048xbf16> to vector<8x2048xbf16>
      %32 = vector.shape_cast %29 : vector<8x2048xbf16> to vector<1x8x2048xbf16>
      tpu.vector_store %arg7[%c0_25, %c0_26, %c0_27], %32 {strides = array<i32>} : memref<1x8x2048xbf16, #tpu.memory_space<vmem>>, vector<1x8x2048xbf16>,
    } else {
    }
    return
  }
  func.func @transform_0(%arg0: i32, %arg1: i32, %arg2: i32, %arg3: memref<1x1xi32, #tpu.memory_space<smem>>) -> (i32, i32, i32) {
    %0 = arith.index_cast %arg0 : i32 to index
    %1 = arith.index_cast %arg2 : i32 to index
    %2 = memref.load %arg3[%0, %1] : memref<1x1xi32, #tpu.memory_space<smem>>
    %c0_i32 = arith.constant 0 : i32
    %c0_i32_0 = arith.constant 0 : i32
    return %2, %arg1, %c0_i32 : i32, i32, i32
  }
  func.func @transform_1(%arg0: i32, %arg1: i32, %arg2: i32, %arg3: memref<1x1xi32, #tpu.memory_space<smem>>) -> (i32, i32, i32, i32) {
    %c0_i32 = arith.constant 0 : i32
    %c0_i32_0 = arith.constant 0 : i32
    %c0_i32_1 = arith.constant 0 : i32
    return %arg0, %arg2, %c0_i32, %c0_i32_0 : i32, i32, i32, i32
  }
  func.func @transform_2(%arg0: i32, %arg1: i32, %arg2: i32, %arg3: memref<1x1xi32, #tpu.memory_space<smem>>) -> (i32, i32) {
    %c0_i32 = arith.constant 0 : i32
    %c0_i32_0 = arith.constant 0 : i32
    %c0_i32_1 = arith.constant 0 : i32
    return %c0_i32, %c0_i32_0 : i32, i32
  }
  func.func @transform_3(%arg0: i32, %arg1: i32, %arg2: i32, %arg3: memref<1x1xi32, #tpu.memory_space<smem>>) -> (i32, i32, i32) {
    %c0_i32 = arith.constant 0 : i32
    %c0_i32_0 = arith.constant 0 : i32
    return %arg0, %arg1, %c0_i32 : i32, i32, i32
  }
  func.func @transform_4(%arg0: i32, %arg1: i32, %arg2: i32, %arg3: memref<1x1xi32, #tpu.memory_space<smem>>) -> (i32, i32, i32) {
    %c0_i32 = arith.constant 0 : i32
    %c0_i32_0 = arith.constant 0 : i32
    return %arg0, %arg1, %c0_i32 : i32, i32, i32
  }
  func.func @transform_5(%arg0: i32, %arg1: i32, %arg2: i32, %arg3: memref<1x1xi32, #tpu.memory_space<smem>>) -> (i32, i32, i32) {
    %c0_i32 = arith.constant 0 : i32
    %c0_i32_0 = arith.constant 0 : i32
    return %arg0, %arg1, %c0_i32 : i32, i32, i32
  }
}

module attributes {stable_mosaic.version = 11 : i64} {
  func.func @_scale_shift_relu_kernel(%arg0: i32, %arg1: memref<8x2048xbf16, #tpu.memory_space<vmem>>, %arg2: memref<1x2048xf32, #tpu.memory_space<vmem>>, %arg3: memref<1x2048xf32, #tpu.memory_space<vmem>>, %arg4: memref<8x2048xbf16, #tpu.memory_space<vmem>>) attributes {dimension_semantics = [#tpu.dimension_semantics<parallel>], iteration_bounds = array<i64: 2>, scalar_prefetch = 0 : i64, scratch_operands = 0 : i64, tpu.core_type = #tpu.core_type<tc>, window_params = [{transform_indices = @transform_0, window_bounds = array<i64: 8, 2048>}, {pipeline_mode = #tpu.pipeline_mode<synchronous>, transform_indices = @transform_1, window_bounds = array<i64: 1, 2048>}, {pipeline_mode = #tpu.pipeline_mode<synchronous>, transform_indices = @transform_2, window_bounds = array<i64: 1, 2048>}, {transform_indices = @transform_3, window_bounds = array<i64: 8, 2048>}]} {
    %c0 = arith.constant 0 : index
    %c0_0 = arith.constant 0 : index
    %0 = vector.load %arg1[%c0, %c0_0] : memref<8x2048xbf16, #tpu.memory_space<vmem>>, vector<8x2048xbf16>
    %1 = arith.extf %0 : vector<8x2048xbf16> to vector<8x2048xf32>
    %c0_1 = arith.constant 0 : index
    %c0_2 = arith.constant 0 : index
    %2 = vector.load %arg2[%c0_1, %c0_2] : memref<1x2048xf32, #tpu.memory_space<vmem>>, vector<1x2048xf32>
    %3 = vector.broadcast %2 : vector<1x2048xf32> to vector<8x2048xf32>
    %4 = arith.mulf %1, %3 : vector<8x2048xf32>
    %c0_3 = arith.constant 0 : index
    %c0_4 = arith.constant 0 : index
    %5 = vector.load %arg3[%c0_3, %c0_4] : memref<1x2048xf32, #tpu.memory_space<vmem>>, vector<1x2048xf32>
    %6 = vector.broadcast %5 : vector<1x2048xf32> to vector<8x2048xf32>
    %7 = arith.addf %4, %6 : vector<8x2048xf32>
    %cst = arith.constant 0.000000e+00 : f32
    %8 = vector.broadcast %cst : f32 to vector<8x2048xf32>
    %9 = arith.maximumf %7, %8 : vector<8x2048xf32>
    %10 = arith.truncf %9 : vector<8x2048xf32> to vector<8x2048xbf16>
    %c0_5 = arith.constant 0 : index
    %c0_6 = arith.constant 0 : index
    %11 = vector.load %arg4[%c0_5, %c0_6] : memref<8x2048xbf16, #tpu.memory_space<vmem>>, vector<8x2048xbf16>
    tpu.vector_store %arg4[%c0_5, %c0_6], %10 {strides = array<i32>} : memref<8x2048xbf16, #tpu.memory_space<vmem>>, vector<8x2048xbf16>,
    return
  }
  func.func @transform_0(%arg0: i32) -> (i32, i32) {
    %c0_i32 = arith.constant 0 : i32
    %c0_i32_0 = arith.constant 0 : i32
    return %arg0, %c0_i32 : i32, i32
  }
  func.func @transform_1(%arg0: i32) -> (i32, i32) {
    %c0_i32 = arith.constant 0 : i32
    %c0_i32_0 = arith.constant 0 : i32
    %c0_i32_1 = arith.constant 0 : i32
    return %c0_i32, %c0_i32_0 : i32, i32
  }
  func.func @transform_2(%arg0: i32) -> (i32, i32) {
    %c0_i32 = arith.constant 0 : i32
    %c0_i32_0 = arith.constant 0 : i32
    %c0_i32_1 = arith.constant 0 : i32
    return %c0_i32, %c0_i32_0 : i32, i32
  }
  func.func @transform_3(%arg0: i32) -> (i32, i32) {
    %c0_i32 = arith.constant 0 : i32
    %c0_i32_0 = arith.constant 0 : i32
    return %arg0, %c0_i32 : i32, i32
  }
}

module attributes {stable_mosaic.version = 11 : i64} {
  func.func @_scale_shift_relu_kernel(%arg0: i32, %arg1: memref<64x128xbf16, #tpu.memory_space<vmem>>, %arg2: memref<1x128xf32, #tpu.memory_space<vmem>>, %arg3: memref<1x128xf32, #tpu.memory_space<vmem>>, %arg4: memref<64x128xbf16, #tpu.memory_space<vmem>>) attributes {dimension_semantics = [#tpu.dimension_semantics<parallel>], iteration_bounds = array<i64: 2>, scalar_prefetch = 0 : i64, scratch_operands = 0 : i64, tpu.core_type = #tpu.core_type<tc>, window_params = [{transform_indices = @transform_0, window_bounds = array<i64: 64, 128>}, {pipeline_mode = #tpu.pipeline_mode<synchronous>, transform_indices = @transform_1, window_bounds = array<i64: 1, 128>}, {pipeline_mode = #tpu.pipeline_mode<synchronous>, transform_indices = @transform_2, window_bounds = array<i64: 1, 128>}, {transform_indices = @transform_3, window_bounds = array<i64: 64, 128>}]} {
    %c0 = arith.constant 0 : index
    %c0_0 = arith.constant 0 : index
    %0 = vector.load %arg1[%c0, %c0_0] : memref<64x128xbf16, #tpu.memory_space<vmem>>, vector<64x128xbf16>
    %1 = arith.extf %0 : vector<64x128xbf16> to vector<64x128xf32>
    %c0_1 = arith.constant 0 : index
    %c0_2 = arith.constant 0 : index
    %2 = vector.load %arg2[%c0_1, %c0_2] : memref<1x128xf32, #tpu.memory_space<vmem>>, vector<1x128xf32>
    %3 = vector.broadcast %2 : vector<1x128xf32> to vector<64x128xf32>
    %4 = arith.mulf %1, %3 : vector<64x128xf32>
    %c0_3 = arith.constant 0 : index
    %c0_4 = arith.constant 0 : index
    %5 = vector.load %arg3[%c0_3, %c0_4] : memref<1x128xf32, #tpu.memory_space<vmem>>, vector<1x128xf32>
    %6 = vector.broadcast %5 : vector<1x128xf32> to vector<64x128xf32>
    %7 = arith.addf %4, %6 : vector<64x128xf32>
    %cst = arith.constant 0.000000e+00 : f32
    %8 = vector.broadcast %cst : f32 to vector<64x128xf32>
    %9 = arith.maximumf %7, %8 : vector<64x128xf32>
    %10 = arith.truncf %9 : vector<64x128xf32> to vector<64x128xbf16>
    %c0_5 = arith.constant 0 : index
    %c0_6 = arith.constant 0 : index
    %11 = vector.load %arg4[%c0_5, %c0_6] : memref<64x128xbf16, #tpu.memory_space<vmem>>, vector<64x128xbf16>
    tpu.vector_store %arg4[%c0_5, %c0_6], %10 {strides = array<i32>} : memref<64x128xbf16, #tpu.memory_space<vmem>>, vector<64x128xbf16>,
    return
  }
  func.func @transform_0(%arg0: i32) -> (i32, i32) {
    %c0_i32 = arith.constant 0 : i32
    %c0_i32_0 = arith.constant 0 : i32
    return %arg0, %c0_i32 : i32, i32
  }
  func.func @transform_1(%arg0: i32) -> (i32, i32) {
    %c0_i32 = arith.constant 0 : i32
    %c0_i32_0 = arith.constant 0 : i32
    %c0_i32_1 = arith.constant 0 : i32
    return %c0_i32, %c0_i32_0 : i32, i32
  }
  func.func @transform_2(%arg0: i32) -> (i32, i32) {
    %c0_i32 = arith.constant 0 : i32
    %c0_i32_0 = arith.constant 0 : i32
    %c0_i32_1 = arith.constant 0 : i32
    return %c0_i32, %c0_i32_0 : i32, i32
  }
  func.func @transform_3(%arg0: i32) -> (i32, i32) {
    %c0_i32 = arith.constant 0 : i32
    %c0_i32_0 = arith.constant 0 : i32
    return %arg0, %c0_i32 : i32, i32
  }
}

module attributes {stable_mosaic.version = 11 : i64} {
  func.func @_tap_gemm_kernel(%arg0: i32, %arg1: i32, %arg2: i32, %arg3: memref<4x4xi32, #tpu.memory_space<smem>>, %arg4: memref<1x16x128xbf16, #tpu.memory_space<vmem>>, %arg5: memref<1x1x128x128xbf16, #tpu.memory_space<vmem>>, %arg6: memref<1x128xf32, #tpu.memory_space<vmem>>, %arg7: memref<1x16x128xbf16, #tpu.memory_space<vmem>>, %arg8: memref<1x8x128xf32, #tpu.memory_space<vmem>>, %arg9: memref<1x8x128xf32, #tpu.memory_space<vmem>>, %arg10: memref<16x128xf32, #tpu.memory_space<vmem>>) attributes {dimension_semantics = [#tpu.dimension_semantics<parallel>, #tpu.dimension_semantics<parallel>, #tpu.dimension_semantics<arbitrary>], iteration_bounds = array<i64: 4, 2, 4>, scalar_prefetch = 1 : i64, scratch_operands = 1 : i64, tpu.core_type = #tpu.core_type<tc>, window_params = [{transform_indices = @transform_0, window_bounds = array<i64: 1, 16, 128>}, {transform_indices = @transform_1, window_bounds = array<i64: 1, 1, 128, 128>}, {pipeline_mode = #tpu.pipeline_mode<synchronous>, transform_indices = @transform_2, window_bounds = array<i64: 1, 128>}, {transform_indices = @transform_3, window_bounds = array<i64: 1, 16, 128>}, {transform_indices = @transform_4, window_bounds = array<i64: 1, 8, 128>}, {transform_indices = @transform_5, window_bounds = array<i64: 1, 8, 128>}]} {
    %c0_i32 = arith.constant 0 : i32
    %0 = arith.cmpi eq, %arg2, %c0_i32 : i32
    %1 = arith.extui %0 : i1 to i32
    %c0_i32_0 = arith.constant 0 : i32
    %2 = arith.cmpi ne, %1, %c0_i32_0 : i32
    scf.if %2 {
      %cst_12 = arith.constant 0.000000e+00 : f32
      %14 = vector.broadcast %cst_12 : f32 to vector<16x128xf32>
      %c0_13 = arith.constant 0 : index
      %c0_14 = arith.constant 0 : index
      %15 = vector.load %arg10[%c0_13, %c0_14] : memref<16x128xf32, #tpu.memory_space<vmem>>, vector<16x128xf32>
      tpu.vector_store %arg10[%c0_13, %c0_14], %14 {strides = array<i32>} : memref<16x128xf32, #tpu.memory_space<vmem>>, vector<16x128xf32>,
    } else {
    }
    %c0 = arith.constant 0 : index
    %c0_1 = arith.constant 0 : index
    %3 = vector.load %arg10[%c0, %c0_1] : memref<16x128xf32, #tpu.memory_space<vmem>>, vector<16x128xf32>
    %c0_2 = arith.constant 0 : index
    %c0_3 = arith.constant 0 : index
    %c0_4 = arith.constant 0 : index
    %4 = vector.load %arg4[%c0_2, %c0_3, %c0_4] : memref<1x16x128xbf16, #tpu.memory_space<vmem>>, vector<1x16x128xbf16>
    %5 = vector.shape_cast %4 : vector<1x16x128xbf16> to vector<16x128xbf16>
    %c0_5 = arith.constant 0 : index
    %c0_6 = arith.constant 0 : index
    %c0_7 = arith.constant 0 : index
    %c0_8 = arith.constant 0 : index
    %6 = vector.load %arg5[%c0_5, %c0_6, %c0_7, %c0_8] : memref<1x1x128x128xbf16, #tpu.memory_space<vmem>>, vector<1x1x128x128xbf16>
    %7 = vector.shape_cast %6 : vector<1x1x128x128xbf16> to vector<128x128xbf16>
    %cst = arith.constant dense<0.000000e+00> : vector<16x128xf32>
    %8 = tpu.matmul %5, %7, %cst {dimension_numbers = #tpu.dot_dimension_numbers<[1], [0], [0], [1], [0, 0, 1, 1], [], []>} : vector<16x128xbf16>, vector<128x128xbf16>, vector<16x128xf32> -> vector<16x128xf32>
    %9 = arith.addf %3, %8 : vector<16x128xf32>
    %c0_9 = arith.constant 0 : index
    %c0_10 = arith.constant 0 : index
    %10 = vector.load %arg10[%c0_9, %c0_10] : memref<16x128xf32, #tpu.memory_space<vmem>>, vector<16x128xf32>
    tpu.vector_store %arg10[%c0_9, %c0_10], %9 {strides = array<i32>} : memref<16x128xf32, #tpu.memory_space<vmem>>, vector<16x128xf32>,
    %c3_i32 = arith.constant 3 : i32
    %11 = arith.cmpi eq, %arg2, %c3_i32 : i32
    %12 = arith.extui %11 : i1 to i32
    %c0_i32_11 = arith.constant 0 : i32
    %13 = arith.cmpi ne, %12, %c0_i32_11 : i32
    scf.if %13 {
      %c0_12 = arith.constant 0 : index
      %c0_13 = arith.constant 0 : index
      %14 = vector.load %arg10[%c0_12, %c0_13] : memref<16x128xf32, #tpu.memory_space<vmem>>, vector<16x128xf32>
      %c0_14 = arith.constant 0 : index
      %c0_15 = arith.constant 0 : index
      %15 = vector.load %arg6[%c0_14, %c0_15] : memref<1x128xf32, #tpu.memory_space<vmem>>, vector<1x128xf32>
      %16 = vector.broadcast %15 : vector<1x128xf32> to vector<16x128xf32>
      %17 = arith.addf %14, %16 : vector<16x128xf32>
      %cst_16 = arith.constant dense<0.000000e+00> : vector<128xf32>
      %18 = vector.multi_reduction <add>, %17, %cst_16 [0] : vector<16x128xf32> to vector<128xf32>
      %19 = vector.shape_cast %18 : vector<128xf32> to vector<1x128xf32>
      %20 = arith.mulf %17, %17 : vector<16x128xf32>
      %cst_17 = arith.constant dense<0.000000e+00> : vector<128xf32>
      %21 = vector.multi_reduction <add>, %20, %cst_17 [0] : vector<16x128xf32> to vector<128xf32>
      %22 = vector.shape_cast %21 : vector<128xf32> to vector<1x128xf32>
      %23 = vector.shape_cast %19 : vector<1x128xf32> to vector<1x1x128xf32>
      %24 = vector.broadcast %23 : vector<1x1x128xf32> to vector<1x8x128xf32>
      %c0_18 = arith.constant 0 : index
      %c0_19 = arith.constant 0 : index
      %c0_20 = arith.constant 0 : index
      %25 = vector.load %arg8[%c0_18, %c0_19, %c0_20] : memref<1x8x128xf32, #tpu.memory_space<vmem>>, vector<1x8x128xf32>
      tpu.vector_store %arg8[%c0_18, %c0_19, %c0_20], %24 {strides = array<i32>} : memref<1x8x128xf32, #tpu.memory_space<vmem>>, vector<1x8x128xf32>,
      %26 = vector.shape_cast %22 : vector<1x128xf32> to vector<1x1x128xf32>
      %27 = vector.broadcast %26 : vector<1x1x128xf32> to vector<1x8x128xf32>
      %c0_21 = arith.constant 0 : index
      %c0_22 = arith.constant 0 : index
      %c0_23 = arith.constant 0 : index
      %28 = vector.load %arg9[%c0_21, %c0_22, %c0_23] : memref<1x8x128xf32, #tpu.memory_space<vmem>>, vector<1x8x128xf32>
      tpu.vector_store %arg9[%c0_21, %c0_22, %c0_23], %27 {strides = array<i32>} : memref<1x8x128xf32, #tpu.memory_space<vmem>>, vector<1x8x128xf32>,
      %29 = arith.truncf %17 : vector<16x128xf32> to vector<16x128xbf16>
      %c0_24 = arith.constant 0 : index
      %c0_25 = arith.constant 0 : index
      %c0_26 = arith.constant 0 : index
      %30 = vector.load %arg7[%c0_24, %c0_25, %c0_26] : memref<1x16x128xbf16, #tpu.memory_space<vmem>>, vector<1x16x128xbf16>
      %31 = vector.shape_cast %30 : vector<1x16x128xbf16> to vector<16x128xbf16>
      %32 = vector.shape_cast %29 : vector<16x128xbf16> to vector<1x16x128xbf16>
      tpu.vector_store %arg7[%c0_24, %c0_25, %c0_26], %32 {strides = array<i32>} : memref<1x16x128xbf16, #tpu.memory_space<vmem>>, vector<1x16x128xbf16>,
    } else {
    }
    return
  }
  func.func @transform_0(%arg0: i32, %arg1: i32, %arg2: i32, %arg3: memref<4x4xi32, #tpu.memory_space<smem>>) -> (i32, i32, i32) {
    %0 = arith.index_cast %arg0 : i32 to index
    %1 = arith.index_cast %arg2 : i32 to index
    %2 = memref.load %arg3[%0, %1] : memref<4x4xi32, #tpu.memory_space<smem>>
    %c0_i32 = arith.constant 0 : i32
    %c0_i32_0 = arith.constant 0 : i32
    return %2, %arg1, %c0_i32 : i32, i32, i32
  }
  func.func @transform_1(%arg0: i32, %arg1: i32, %arg2: i32, %arg3: memref<4x4xi32, #tpu.memory_space<smem>>) -> (i32, i32, i32, i32) {
    %c0_i32 = arith.constant 0 : i32
    %c0_i32_0 = arith.constant 0 : i32
    %c0_i32_1 = arith.constant 0 : i32
    return %arg0, %arg2, %c0_i32, %c0_i32_0 : i32, i32, i32, i32
  }
  func.func @transform_2(%arg0: i32, %arg1: i32, %arg2: i32, %arg3: memref<4x4xi32, #tpu.memory_space<smem>>) -> (i32, i32) {
    %c0_i32 = arith.constant 0 : i32
    %c0_i32_0 = arith.constant 0 : i32
    %c0_i32_1 = arith.constant 0 : i32
    return %c0_i32, %c0_i32_0 : i32, i32
  }
  func.func @transform_3(%arg0: i32, %arg1: i32, %arg2: i32, %arg3: memref<4x4xi32, #tpu.memory_space<smem>>) -> (i32, i32, i32) {
    %c0_i32 = arith.constant 0 : i32
    %c0_i32_0 = arith.constant 0 : i32
    return %arg0, %arg1, %c0_i32 : i32, i32, i32
  }
  func.func @transform_4(%arg0: i32, %arg1: i32, %arg2: i32, %arg3: memref<4x4xi32, #tpu.memory_space<smem>>) -> (i32, i32, i32) {
    %c0_i32 = arith.constant 0 : i32
    %c0_i32_0 = arith.constant 0 : i32
    return %arg0, %arg1, %c0_i32 : i32, i32, i32
  }
  func.func @transform_5(%arg0: i32, %arg1: i32, %arg2: i32, %arg3: memref<4x4xi32, #tpu.memory_space<smem>>) -> (i32, i32, i32) {
    %c0_i32 = arith.constant 0 : i32
    %c0_i32_0 = arith.constant 0 : i32
    return %arg0, %arg1, %c0_i32 : i32, i32, i32
  }
}

module attributes {stable_mosaic.version = 11 : i64} {
  func.func @_tap_gemm_kernel(%arg0: i32, %arg1: i32, %arg2: i32, %arg3: memref<4x4xi32, #tpu.memory_space<smem>>, %arg4: memref<1x64x128xbf16, #tpu.memory_space<vmem>>, %arg5: memref<1x1x128x128xbf16, #tpu.memory_space<vmem>>, %arg6: memref<1x128xf32, #tpu.memory_space<vmem>>, %arg7: memref<1x64x128xbf16, #tpu.memory_space<vmem>>, %arg8: memref<1x8x128xf32, #tpu.memory_space<vmem>>, %arg9: memref<1x8x128xf32, #tpu.memory_space<vmem>>, %arg10: memref<64x128xf32, #tpu.memory_space<vmem>>) attributes {dimension_semantics = [#tpu.dimension_semantics<parallel>, #tpu.dimension_semantics<parallel>, #tpu.dimension_semantics<arbitrary>], iteration_bounds = array<i64: 4, 2, 4>, scalar_prefetch = 1 : i64, scratch_operands = 1 : i64, tpu.core_type = #tpu.core_type<tc>, window_params = [{transform_indices = @transform_0, window_bounds = array<i64: 1, 64, 128>}, {transform_indices = @transform_1, window_bounds = array<i64: 1, 1, 128, 128>}, {pipeline_mode = #tpu.pipeline_mode<synchronous>, transform_indices = @transform_2, window_bounds = array<i64: 1, 128>}, {transform_indices = @transform_3, window_bounds = array<i64: 1, 64, 128>}, {transform_indices = @transform_4, window_bounds = array<i64: 1, 8, 128>}, {transform_indices = @transform_5, window_bounds = array<i64: 1, 8, 128>}]} {
    %c0_i32 = arith.constant 0 : i32
    %0 = arith.cmpi eq, %arg2, %c0_i32 : i32
    %1 = arith.extui %0 : i1 to i32
    %c0_i32_0 = arith.constant 0 : i32
    %2 = arith.cmpi ne, %1, %c0_i32_0 : i32
    scf.if %2 {
      %cst_12 = arith.constant 0.000000e+00 : f32
      %14 = vector.broadcast %cst_12 : f32 to vector<64x128xf32>
      %c0_13 = arith.constant 0 : index
      %c0_14 = arith.constant 0 : index
      %15 = vector.load %arg10[%c0_13, %c0_14] : memref<64x128xf32, #tpu.memory_space<vmem>>, vector<64x128xf32>
      tpu.vector_store %arg10[%c0_13, %c0_14], %14 {strides = array<i32>} : memref<64x128xf32, #tpu.memory_space<vmem>>, vector<64x128xf32>,
    } else {
    }
    %c0 = arith.constant 0 : index
    %c0_1 = arith.constant 0 : index
    %3 = vector.load %arg10[%c0, %c0_1] : memref<64x128xf32, #tpu.memory_space<vmem>>, vector<64x128xf32>
    %c0_2 = arith.constant 0 : index
    %c0_3 = arith.constant 0 : index
    %c0_4 = arith.constant 0 : index
    %4 = vector.load %arg4[%c0_2, %c0_3, %c0_4] : memref<1x64x128xbf16, #tpu.memory_space<vmem>>, vector<1x64x128xbf16>
    %5 = vector.shape_cast %4 : vector<1x64x128xbf16> to vector<64x128xbf16>
    %c0_5 = arith.constant 0 : index
    %c0_6 = arith.constant 0 : index
    %c0_7 = arith.constant 0 : index
    %c0_8 = arith.constant 0 : index
    %6 = vector.load %arg5[%c0_5, %c0_6, %c0_7, %c0_8] : memref<1x1x128x128xbf16, #tpu.memory_space<vmem>>, vector<1x1x128x128xbf16>
    %7 = vector.shape_cast %6 : vector<1x1x128x128xbf16> to vector<128x128xbf16>
    %cst = arith.constant dense<0.000000e+00> : vector<64x128xf32>
    %8 = tpu.matmul %5, %7, %cst {dimension_numbers = #tpu.dot_dimension_numbers<[1], [0], [0], [1], [0, 0, 1, 1], [], []>} : vector<64x128xbf16>, vector<128x128xbf16>, vector<64x128xf32> -> vector<64x128xf32>
    %9 = arith.addf %3, %8 : vector<64x128xf32>
    %c0_9 = arith.constant 0 : index
    %c0_10 = arith.constant 0 : index
    %10 = vector.load %arg10[%c0_9, %c0_10] : memref<64x128xf32, #tpu.memory_space<vmem>>, vector<64x128xf32>
    tpu.vector_store %arg10[%c0_9, %c0_10], %9 {strides = array<i32>} : memref<64x128xf32, #tpu.memory_space<vmem>>, vector<64x128xf32>,
    %c3_i32 = arith.constant 3 : i32
    %11 = arith.cmpi eq, %arg2, %c3_i32 : i32
    %12 = arith.extui %11 : i1 to i32
    %c0_i32_11 = arith.constant 0 : i32
    %13 = arith.cmpi ne, %12, %c0_i32_11 : i32
    scf.if %13 {
      %c0_12 = arith.constant 0 : index
      %c0_13 = arith.constant 0 : index
      %14 = vector.load %arg10[%c0_12, %c0_13] : memref<64x128xf32, #tpu.memory_space<vmem>>, vector<64x128xf32>
      %c0_14 = arith.constant 0 : index
      %c0_15 = arith.constant 0 : index
      %15 = vector.load %arg6[%c0_14, %c0_15] : memref<1x128xf32, #tpu.memory_space<vmem>>, vector<1x128xf32>
      %16 = vector.broadcast %15 : vector<1x128xf32> to vector<64x128xf32>
      %17 = arith.addf %14, %16 : vector<64x128xf32>
      %cst_16 = arith.constant dense<0.000000e+00> : vector<128xf32>
      %18 = vector.multi_reduction <add>, %17, %cst_16 [0] : vector<64x128xf32> to vector<128xf32>
      %19 = vector.shape_cast %18 : vector<128xf32> to vector<1x128xf32>
      %20 = arith.mulf %17, %17 : vector<64x128xf32>
      %cst_17 = arith.constant dense<0.000000e+00> : vector<128xf32>
      %21 = vector.multi_reduction <add>, %20, %cst_17 [0] : vector<64x128xf32> to vector<128xf32>
      %22 = vector.shape_cast %21 : vector<128xf32> to vector<1x128xf32>
      %23 = vector.shape_cast %19 : vector<1x128xf32> to vector<1x1x128xf32>
      %24 = vector.broadcast %23 : vector<1x1x128xf32> to vector<1x8x128xf32>
      %c0_18 = arith.constant 0 : index
      %c0_19 = arith.constant 0 : index
      %c0_20 = arith.constant 0 : index
      %25 = vector.load %arg8[%c0_18, %c0_19, %c0_20] : memref<1x8x128xf32, #tpu.memory_space<vmem>>, vector<1x8x128xf32>
      tpu.vector_store %arg8[%c0_18, %c0_19, %c0_20], %24 {strides = array<i32>} : memref<1x8x128xf32, #tpu.memory_space<vmem>>, vector<1x8x128xf32>,
      %26 = vector.shape_cast %22 : vector<1x128xf32> to vector<1x1x128xf32>
      %27 = vector.broadcast %26 : vector<1x1x128xf32> to vector<1x8x128xf32>
      %c0_21 = arith.constant 0 : index
      %c0_22 = arith.constant 0 : index
      %c0_23 = arith.constant 0 : index
      %28 = vector.load %arg9[%c0_21, %c0_22, %c0_23] : memref<1x8x128xf32, #tpu.memory_space<vmem>>, vector<1x8x128xf32>
      tpu.vector_store %arg9[%c0_21, %c0_22, %c0_23], %27 {strides = array<i32>} : memref<1x8x128xf32, #tpu.memory_space<vmem>>, vector<1x8x128xf32>,
      %29 = arith.truncf %17 : vector<64x128xf32> to vector<64x128xbf16>
      %c0_24 = arith.constant 0 : index
      %c0_25 = arith.constant 0 : index
      %c0_26 = arith.constant 0 : index
      %30 = vector.load %arg7[%c0_24, %c0_25, %c0_26] : memref<1x64x128xbf16, #tpu.memory_space<vmem>>, vector<1x64x128xbf16>
      %31 = vector.shape_cast %30 : vector<1x64x128xbf16> to vector<64x128xbf16>
      %32 = vector.shape_cast %29 : vector<64x128xbf16> to vector<1x64x128xbf16>
      tpu.vector_store %arg7[%c0_24, %c0_25, %c0_26], %32 {strides = array<i32>} : memref<1x64x128xbf16, #tpu.memory_space<vmem>>, vector<1x64x128xbf16>,
    } else {
    }
    return
  }
  func.func @transform_0(%arg0: i32, %arg1: i32, %arg2: i32, %arg3: memref<4x4xi32, #tpu.memory_space<smem>>) -> (i32, i32, i32) {
    %0 = arith.index_cast %arg0 : i32 to index
    %1 = arith.index_cast %arg2 : i32 to index
    %2 = memref.load %arg3[%0, %1] : memref<4x4xi32, #tpu.memory_space<smem>>
    %c0_i32 = arith.constant 0 : i32
    %c0_i32_0 = arith.constant 0 : i32
    return %2, %arg1, %c0_i32 : i32, i32, i32
  }
  func.func @transform_1(%arg0: i32, %arg1: i32, %arg2: i32, %arg3: memref<4x4xi32, #tpu.memory_space<smem>>) -> (i32, i32, i32, i32) {
    %c0_i32 = arith.constant 0 : i32
    %c0_i32_0 = arith.constant 0 : i32
    %c0_i32_1 = arith.constant 0 : i32
    return %arg0, %arg2, %c0_i32, %c0_i32_0 : i32, i32, i32, i32
  }
  func.func @transform_2(%arg0: i32, %arg1: i32, %arg2: i32, %arg3: memref<4x4xi32, #tpu.memory_space<smem>>) -> (i32, i32) {
    %c0_i32 = arith.constant 0 : i32
    %c0_i32_0 = arith.constant 0 : i32
    %c0_i32_1 = arith.constant 0 : i32
    return %c0_i32, %c0_i32_0 : i32, i32
  }
  func.func @transform_3(%arg0: i32, %arg1: i32, %arg2: i32, %arg3: memref<4x4xi32, #tpu.memory_space<smem>>) -> (i32, i32, i32) {
    %c0_i32 = arith.constant 0 : i32
    %c0_i32_0 = arith.constant 0 : i32
    return %arg0, %arg1, %c0_i32 : i32, i32, i32
  }
  func.func @transform_4(%arg0: i32, %arg1: i32, %arg2: i32, %arg3: memref<4x4xi32, #tpu.memory_space<smem>>) -> (i32, i32, i32) {
    %c0_i32 = arith.constant 0 : i32
    %c0_i32_0 = arith.constant 0 : i32
    return %arg0, %arg1, %c0_i32 : i32, i32, i32
  }
  func.func @transform_5(%arg0: i32, %arg1: i32, %arg2: i32, %arg3: memref<4x4xi32, #tpu.memory_space<smem>>) -> (i32, i32, i32) {
    %c0_i32 = arith.constant 0 : i32
    %c0_i32_0 = arith.constant 0 : i32
    return %arg0, %arg1, %c0_i32 : i32, i32, i32
  }
}

module attributes {stable_mosaic.version = 11 : i64} {
  func.func @_scale_shift_relu_kernel(%arg0: i32, %arg1: memref<256x128xbf16, #tpu.memory_space<vmem>>, %arg2: memref<1x128xf32, #tpu.memory_space<vmem>>, %arg3: memref<1x128xf32, #tpu.memory_space<vmem>>, %arg4: memref<256x128xbf16, #tpu.memory_space<vmem>>) attributes {dimension_semantics = [#tpu.dimension_semantics<parallel>], iteration_bounds = array<i64: 2>, scalar_prefetch = 0 : i64, scratch_operands = 0 : i64, tpu.core_type = #tpu.core_type<tc>, window_params = [{transform_indices = @transform_0, window_bounds = array<i64: 256, 128>}, {pipeline_mode = #tpu.pipeline_mode<synchronous>, transform_indices = @transform_1, window_bounds = array<i64: 1, 128>}, {pipeline_mode = #tpu.pipeline_mode<synchronous>, transform_indices = @transform_2, window_bounds = array<i64: 1, 128>}, {transform_indices = @transform_3, window_bounds = array<i64: 256, 128>}]} {
    %c0 = arith.constant 0 : index
    %c0_0 = arith.constant 0 : index
    %0 = vector.load %arg1[%c0, %c0_0] : memref<256x128xbf16, #tpu.memory_space<vmem>>, vector<256x128xbf16>
    %1 = arith.extf %0 : vector<256x128xbf16> to vector<256x128xf32>
    %c0_1 = arith.constant 0 : index
    %c0_2 = arith.constant 0 : index
    %2 = vector.load %arg2[%c0_1, %c0_2] : memref<1x128xf32, #tpu.memory_space<vmem>>, vector<1x128xf32>
    %3 = vector.broadcast %2 : vector<1x128xf32> to vector<256x128xf32>
    %4 = arith.mulf %1, %3 : vector<256x128xf32>
    %c0_3 = arith.constant 0 : index
    %c0_4 = arith.constant 0 : index
    %5 = vector.load %arg3[%c0_3, %c0_4] : memref<1x128xf32, #tpu.memory_space<vmem>>, vector<1x128xf32>
    %6 = vector.broadcast %5 : vector<1x128xf32> to vector<256x128xf32>
    %7 = arith.addf %4, %6 : vector<256x128xf32>
    %cst = arith.constant 0.000000e+00 : f32
    %8 = vector.broadcast %cst : f32 to vector<256x128xf32>
    %9 = arith.maximumf %7, %8 : vector<256x128xf32>
    %10 = arith.truncf %9 : vector<256x128xf32> to vector<256x128xbf16>
    %c0_5 = arith.constant 0 : index
    %c0_6 = arith.constant 0 : index
    %11 = vector.load %arg4[%c0_5, %c0_6] : memref<256x128xbf16, #tpu.memory_space<vmem>>, vector<256x128xbf16>
    tpu.vector_store %arg4[%c0_5, %c0_6], %10 {strides = array<i32>} : memref<256x128xbf16, #tpu.memory_space<vmem>>, vector<256x128xbf16>,
    return
  }
  func.func @transform_0(%arg0: i32) -> (i32, i32) {
    %c0_i32 = arith.constant 0 : i32
    %c0_i32_0 = arith.constant 0 : i32
    return %arg0, %c0_i32 : i32, i32
  }
  func.func @transform_1(%arg0: i32) -> (i32, i32) {
    %c0_i32 = arith.constant 0 : i32
    %c0_i32_0 = arith.constant 0 : i32
    %c0_i32_1 = arith.constant 0 : i32
    return %c0_i32, %c0_i32_0 : i32, i32
  }
  func.func @transform_2(%arg0: i32) -> (i32, i32) {
    %c0_i32 = arith.constant 0 : i32
    %c0_i32_0 = arith.constant 0 : i32
    %c0_i32_1 = arith.constant 0 : i32
    return %c0_i32, %c0_i32_0 : i32, i32
  }
  func.func @transform_3(%arg0: i32) -> (i32, i32) {
    %c0_i32 = arith.constant 0 : i32
    %c0_i32_0 = arith.constant 0 : i32
    return %arg0, %c0_i32 : i32, i32
  }
}

module attributes {stable_mosaic.version = 11 : i64} {
  func.func @_tap_gemm_kernel(%arg0: i32, %arg1: i32, %arg2: i32, %arg3: memref<4x4xi32, #tpu.memory_space<smem>>, %arg4: memref<1x256x128xbf16, #tpu.memory_space<vmem>>, %arg5: memref<1x1x128x128xbf16, #tpu.memory_space<vmem>>, %arg6: memref<1x128xf32, #tpu.memory_space<vmem>>, %arg7: memref<1x256x128xbf16, #tpu.memory_space<vmem>>, %arg8: memref<1x8x128xf32, #tpu.memory_space<vmem>>, %arg9: memref<1x8x128xf32, #tpu.memory_space<vmem>>, %arg10: memref<256x128xf32, #tpu.memory_space<vmem>>) attributes {dimension_semantics = [#tpu.dimension_semantics<parallel>, #tpu.dimension_semantics<parallel>, #tpu.dimension_semantics<arbitrary>], iteration_bounds = array<i64: 4, 2, 4>, scalar_prefetch = 1 : i64, scratch_operands = 1 : i64, tpu.core_type = #tpu.core_type<tc>, window_params = [{transform_indices = @transform_0, window_bounds = array<i64: 1, 256, 128>}, {transform_indices = @transform_1, window_bounds = array<i64: 1, 1, 128, 128>}, {pipeline_mode = #tpu.pipeline_mode<synchronous>, transform_indices = @transform_2, window_bounds = array<i64: 1, 128>}, {transform_indices = @transform_3, window_bounds = array<i64: 1, 256, 128>}, {transform_indices = @transform_4, window_bounds = array<i64: 1, 8, 128>}, {transform_indices = @transform_5, window_bounds = array<i64: 1, 8, 128>}]} {
    %c0_i32 = arith.constant 0 : i32
    %0 = arith.cmpi eq, %arg2, %c0_i32 : i32
    %1 = arith.extui %0 : i1 to i32
    %c0_i32_0 = arith.constant 0 : i32
    %2 = arith.cmpi ne, %1, %c0_i32_0 : i32
    scf.if %2 {
      %cst_12 = arith.constant 0.000000e+00 : f32
      %14 = vector.broadcast %cst_12 : f32 to vector<256x128xf32>
      %c0_13 = arith.constant 0 : index
      %c0_14 = arith.constant 0 : index
      %15 = vector.load %arg10[%c0_13, %c0_14] : memref<256x128xf32, #tpu.memory_space<vmem>>, vector<256x128xf32>
      tpu.vector_store %arg10[%c0_13, %c0_14], %14 {strides = array<i32>} : memref<256x128xf32, #tpu.memory_space<vmem>>, vector<256x128xf32>,
    } else {
    }
    %c0 = arith.constant 0 : index
    %c0_1 = arith.constant 0 : index
    %3 = vector.load %arg10[%c0, %c0_1] : memref<256x128xf32, #tpu.memory_space<vmem>>, vector<256x128xf32>
    %c0_2 = arith.constant 0 : index
    %c0_3 = arith.constant 0 : index
    %c0_4 = arith.constant 0 : index
    %4 = vector.load %arg4[%c0_2, %c0_3, %c0_4] : memref<1x256x128xbf16, #tpu.memory_space<vmem>>, vector<1x256x128xbf16>
    %5 = vector.shape_cast %4 : vector<1x256x128xbf16> to vector<256x128xbf16>
    %c0_5 = arith.constant 0 : index
    %c0_6 = arith.constant 0 : index
    %c0_7 = arith.constant 0 : index
    %c0_8 = arith.constant 0 : index
    %6 = vector.load %arg5[%c0_5, %c0_6, %c0_7, %c0_8] : memref<1x1x128x128xbf16, #tpu.memory_space<vmem>>, vector<1x1x128x128xbf16>
    %7 = vector.shape_cast %6 : vector<1x1x128x128xbf16> to vector<128x128xbf16>
    %cst = arith.constant dense<0.000000e+00> : vector<256x128xf32>
    %8 = tpu.matmul %5, %7, %cst {dimension_numbers = #tpu.dot_dimension_numbers<[1], [0], [0], [1], [0, 0, 1, 1], [], []>} : vector<256x128xbf16>, vector<128x128xbf16>, vector<256x128xf32> -> vector<256x128xf32>
    %9 = arith.addf %3, %8 : vector<256x128xf32>
    %c0_9 = arith.constant 0 : index
    %c0_10 = arith.constant 0 : index
    %10 = vector.load %arg10[%c0_9, %c0_10] : memref<256x128xf32, #tpu.memory_space<vmem>>, vector<256x128xf32>
    tpu.vector_store %arg10[%c0_9, %c0_10], %9 {strides = array<i32>} : memref<256x128xf32, #tpu.memory_space<vmem>>, vector<256x128xf32>,
    %c3_i32 = arith.constant 3 : i32
    %11 = arith.cmpi eq, %arg2, %c3_i32 : i32
    %12 = arith.extui %11 : i1 to i32
    %c0_i32_11 = arith.constant 0 : i32
    %13 = arith.cmpi ne, %12, %c0_i32_11 : i32
    scf.if %13 {
      %c0_12 = arith.constant 0 : index
      %c0_13 = arith.constant 0 : index
      %14 = vector.load %arg10[%c0_12, %c0_13] : memref<256x128xf32, #tpu.memory_space<vmem>>, vector<256x128xf32>
      %c0_14 = arith.constant 0 : index
      %c0_15 = arith.constant 0 : index
      %15 = vector.load %arg6[%c0_14, %c0_15] : memref<1x128xf32, #tpu.memory_space<vmem>>, vector<1x128xf32>
      %16 = vector.broadcast %15 : vector<1x128xf32> to vector<256x128xf32>
      %17 = arith.addf %14, %16 : vector<256x128xf32>
      %cst_16 = arith.constant dense<0.000000e+00> : vector<128xf32>
      %18 = vector.multi_reduction <add>, %17, %cst_16 [0] : vector<256x128xf32> to vector<128xf32>
      %19 = vector.shape_cast %18 : vector<128xf32> to vector<1x128xf32>
      %20 = arith.mulf %17, %17 : vector<256x128xf32>
      %cst_17 = arith.constant dense<0.000000e+00> : vector<128xf32>
      %21 = vector.multi_reduction <add>, %20, %cst_17 [0] : vector<256x128xf32> to vector<128xf32>
      %22 = vector.shape_cast %21 : vector<128xf32> to vector<1x128xf32>
      %23 = vector.shape_cast %19 : vector<1x128xf32> to vector<1x1x128xf32>
      %24 = vector.broadcast %23 : vector<1x1x128xf32> to vector<1x8x128xf32>
      %c0_18 = arith.constant 0 : index
      %c0_19 = arith.constant 0 : index
      %c0_20 = arith.constant 0 : index
      %25 = vector.load %arg8[%c0_18, %c0_19, %c0_20] : memref<1x8x128xf32, #tpu.memory_space<vmem>>, vector<1x8x128xf32>
      tpu.vector_store %arg8[%c0_18, %c0_19, %c0_20], %24 {strides = array<i32>} : memref<1x8x128xf32, #tpu.memory_space<vmem>>, vector<1x8x128xf32>,
      %26 = vector.shape_cast %22 : vector<1x128xf32> to vector<1x1x128xf32>
      %27 = vector.broadcast %26 : vector<1x1x128xf32> to vector<1x8x128xf32>
      %c0_21 = arith.constant 0 : index
      %c0_22 = arith.constant 0 : index
      %c0_23 = arith.constant 0 : index
      %28 = vector.load %arg9[%c0_21, %c0_22, %c0_23] : memref<1x8x128xf32, #tpu.memory_space<vmem>>, vector<1x8x128xf32>
      tpu.vector_store %arg9[%c0_21, %c0_22, %c0_23], %27 {strides = array<i32>} : memref<1x8x128xf32, #tpu.memory_space<vmem>>, vector<1x8x128xf32>,
      %29 = arith.truncf %17 : vector<256x128xf32> to vector<256x128xbf16>
      %c0_24 = arith.constant 0 : index
      %c0_25 = arith.constant 0 : index
      %c0_26 = arith.constant 0 : index
      %30 = vector.load %arg7[%c0_24, %c0_25, %c0_26] : memref<1x256x128xbf16, #tpu.memory_space<vmem>>, vector<1x256x128xbf16>
      %31 = vector.shape_cast %30 : vector<1x256x128xbf16> to vector<256x128xbf16>
      %32 = vector.shape_cast %29 : vector<256x128xbf16> to vector<1x256x128xbf16>
      tpu.vector_store %arg7[%c0_24, %c0_25, %c0_26], %32 {strides = array<i32>} : memref<1x256x128xbf16, #tpu.memory_space<vmem>>, vector<1x256x128xbf16>,
    } else {
    }
    return
  }
  func.func @transform_0(%arg0: i32, %arg1: i32, %arg2: i32, %arg3: memref<4x4xi32, #tpu.memory_space<smem>>) -> (i32, i32, i32) {
    %0 = arith.index_cast %arg0 : i32 to index
    %1 = arith.index_cast %arg2 : i32 to index
    %2 = memref.load %arg3[%0, %1] : memref<4x4xi32, #tpu.memory_space<smem>>
    %c0_i32 = arith.constant 0 : i32
    %c0_i32_0 = arith.constant 0 : i32
    return %2, %arg1, %c0_i32 : i32, i32, i32
  }
  func.func @transform_1(%arg0: i32, %arg1: i32, %arg2: i32, %arg3: memref<4x4xi32, #tpu.memory_space<smem>>) -> (i32, i32, i32, i32) {
    %c0_i32 = arith.constant 0 : i32
    %c0_i32_0 = arith.constant 0 : i32
    %c0_i32_1 = arith.constant 0 : i32
    return %arg0, %arg2, %c0_i32, %c0_i32_0 : i32, i32, i32, i32
  }
  func.func @transform_2(%arg0: i32, %arg1: i32, %arg2: i32, %arg3: memref<4x4xi32, #tpu.memory_space<smem>>) -> (i32, i32) {
    %c0_i32 = arith.constant 0 : i32
    %c0_i32_0 = arith.constant 0 : i32
    %c0_i32_1 = arith.constant 0 : i32
    return %c0_i32, %c0_i32_0 : i32, i32
  }
  func.func @transform_3(%arg0: i32, %arg1: i32, %arg2: i32, %arg3: memref<4x4xi32, #tpu.memory_space<smem>>) -> (i32, i32, i32) {
    %c0_i32 = arith.constant 0 : i32
    %c0_i32_0 = arith.constant 0 : i32
    return %arg0, %arg1, %c0_i32 : i32, i32, i32
  }
  func.func @transform_4(%arg0: i32, %arg1: i32, %arg2: i32, %arg3: memref<4x4xi32, #tpu.memory_space<smem>>) -> (i32, i32, i32) {
    %c0_i32 = arith.constant 0 : i32
    %c0_i32_0 = arith.constant 0 : i32
    return %arg0, %arg1, %c0_i32 : i32, i32, i32
  }
  func.func @transform_5(%arg0: i32, %arg1: i32, %arg2: i32, %arg3: memref<4x4xi32, #tpu.memory_space<smem>>) -> (i32, i32, i32) {
    %c0_i32 = arith.constant 0 : i32
    %c0_i32_0 = arith.constant 0 : i32
    return %arg0, %arg1, %c0_i32 : i32, i32, i32
  }
}

module attributes {stable_mosaic.version = 11 : i64} {
  func.func @_scale_shift_relu_kernel(%arg0: i32, %arg1: memref<1024x128xbf16, #tpu.memory_space<vmem>>, %arg2: memref<1x128xf32, #tpu.memory_space<vmem>>, %arg3: memref<1x128xf32, #tpu.memory_space<vmem>>, %arg4: memref<1024x128xbf16, #tpu.memory_space<vmem>>) attributes {dimension_semantics = [#tpu.dimension_semantics<parallel>], iteration_bounds = array<i64: 2>, scalar_prefetch = 0 : i64, scratch_operands = 0 : i64, tpu.core_type = #tpu.core_type<tc>, window_params = [{transform_indices = @transform_0, window_bounds = array<i64: 1024, 128>}, {pipeline_mode = #tpu.pipeline_mode<synchronous>, transform_indices = @transform_1, window_bounds = array<i64: 1, 128>}, {pipeline_mode = #tpu.pipeline_mode<synchronous>, transform_indices = @transform_2, window_bounds = array<i64: 1, 128>}, {transform_indices = @transform_3, window_bounds = array<i64: 1024, 128>}]} {
    %c0 = arith.constant 0 : index
    %c0_0 = arith.constant 0 : index
    %0 = vector.load %arg1[%c0, %c0_0] : memref<1024x128xbf16, #tpu.memory_space<vmem>>, vector<1024x128xbf16>
    %1 = arith.extf %0 : vector<1024x128xbf16> to vector<1024x128xf32>
    %c0_1 = arith.constant 0 : index
    %c0_2 = arith.constant 0 : index
    %2 = vector.load %arg2[%c0_1, %c0_2] : memref<1x128xf32, #tpu.memory_space<vmem>>, vector<1x128xf32>
    %3 = vector.broadcast %2 : vector<1x128xf32> to vector<1024x128xf32>
    %4 = arith.mulf %1, %3 : vector<1024x128xf32>
    %c0_3 = arith.constant 0 : index
    %c0_4 = arith.constant 0 : index
    %5 = vector.load %arg3[%c0_3, %c0_4] : memref<1x128xf32, #tpu.memory_space<vmem>>, vector<1x128xf32>
    %6 = vector.broadcast %5 : vector<1x128xf32> to vector<1024x128xf32>
    %7 = arith.addf %4, %6 : vector<1024x128xf32>
    %cst = arith.constant 0.000000e+00 : f32
    %8 = vector.broadcast %cst : f32 to vector<1024x128xf32>
    %9 = arith.maximumf %7, %8 : vector<1024x128xf32>
    %10 = arith.truncf %9 : vector<1024x128xf32> to vector<1024x128xbf16>
    %c0_5 = arith.constant 0 : index
    %c0_6 = arith.constant 0 : index
    %11 = vector.load %arg4[%c0_5, %c0_6] : memref<1024x128xbf16, #tpu.memory_space<vmem>>, vector<1024x128xbf16>
    tpu.vector_store %arg4[%c0_5, %c0_6], %10 {strides = array<i32>} : memref<1024x128xbf16, #tpu.memory_space<vmem>>, vector<1024x128xbf16>,
    return
  }
  func.func @transform_0(%arg0: i32) -> (i32, i32) {
    %c0_i32 = arith.constant 0 : i32
    %c0_i32_0 = arith.constant 0 : i32
    return %arg0, %c0_i32 : i32, i32
  }
  func.func @transform_1(%arg0: i32) -> (i32, i32) {
    %c0_i32 = arith.constant 0 : i32
    %c0_i32_0 = arith.constant 0 : i32
    %c0_i32_1 = arith.constant 0 : i32
    return %c0_i32, %c0_i32_0 : i32, i32
  }
  func.func @transform_2(%arg0: i32) -> (i32, i32) {
    %c0_i32 = arith.constant 0 : i32
    %c0_i32_0 = arith.constant 0 : i32
    %c0_i32_1 = arith.constant 0 : i32
    return %c0_i32, %c0_i32_0 : i32, i32
  }
  func.func @transform_3(%arg0: i32) -> (i32, i32) {
    %c0_i32 = arith.constant 0 : i32
    %c0_i32_0 = arith.constant 0 : i32
    return %arg0, %c0_i32 : i32, i32
  }
}

module attributes {stable_mosaic.version = 11 : i64} {
  func.func @_tap_gemm_kernel(%arg0: i32, %arg1: i32, %arg2: i32, %arg3: memref<4x4xi32, #tpu.memory_space<smem>>, %arg4: memref<1x1024x128xbf16, #tpu.memory_space<vmem>>, %arg5: memref<1x1x128x128xbf16, #tpu.memory_space<vmem>>, %arg6: memref<1x128xf32, #tpu.memory_space<vmem>>, %arg7: memref<1x1024x128xf32, #tpu.memory_space<vmem>>, %arg8: memref<1024x128xf32, #tpu.memory_space<vmem>>) attributes {dimension_semantics = [#tpu.dimension_semantics<parallel>, #tpu.dimension_semantics<parallel>, #tpu.dimension_semantics<arbitrary>], iteration_bounds = array<i64: 4, 2, 4>, scalar_prefetch = 1 : i64, scratch_operands = 1 : i64, tpu.core_type = #tpu.core_type<tc>, window_params = [{transform_indices = @transform_0, window_bounds = array<i64: 1, 1024, 128>}, {transform_indices = @transform_1, window_bounds = array<i64: 1, 1, 128, 128>}, {pipeline_mode = #tpu.pipeline_mode<synchronous>, transform_indices = @transform_2, window_bounds = array<i64: 1, 128>}, {transform_indices = @transform_3, window_bounds = array<i64: 1, 1024, 128>}]} {
    %c0_i32 = arith.constant 0 : i32
    %0 = arith.cmpi eq, %arg2, %c0_i32 : i32
    %1 = arith.extui %0 : i1 to i32
    %c0_i32_0 = arith.constant 0 : i32
    %2 = arith.cmpi ne, %1, %c0_i32_0 : i32
    scf.if %2 {
      %cst_12 = arith.constant 0.000000e+00 : f32
      %14 = vector.broadcast %cst_12 : f32 to vector<1024x128xf32>
      %c0_13 = arith.constant 0 : index
      %c0_14 = arith.constant 0 : index
      %15 = vector.load %arg8[%c0_13, %c0_14] : memref<1024x128xf32, #tpu.memory_space<vmem>>, vector<1024x128xf32>
      tpu.vector_store %arg8[%c0_13, %c0_14], %14 {strides = array<i32>} : memref<1024x128xf32, #tpu.memory_space<vmem>>, vector<1024x128xf32>,
    } else {
    }
    %c0 = arith.constant 0 : index
    %c0_1 = arith.constant 0 : index
    %3 = vector.load %arg8[%c0, %c0_1] : memref<1024x128xf32, #tpu.memory_space<vmem>>, vector<1024x128xf32>
    %c0_2 = arith.constant 0 : index
    %c0_3 = arith.constant 0 : index
    %c0_4 = arith.constant 0 : index
    %4 = vector.load %arg4[%c0_2, %c0_3, %c0_4] : memref<1x1024x128xbf16, #tpu.memory_space<vmem>>, vector<1x1024x128xbf16>
    %5 = vector.shape_cast %4 : vector<1x1024x128xbf16> to vector<1024x128xbf16>
    %c0_5 = arith.constant 0 : index
    %c0_6 = arith.constant 0 : index
    %c0_7 = arith.constant 0 : index
    %c0_8 = arith.constant 0 : index
    %6 = vector.load %arg5[%c0_5, %c0_6, %c0_7, %c0_8] : memref<1x1x128x128xbf16, #tpu.memory_space<vmem>>, vector<1x1x128x128xbf16>
    %7 = vector.shape_cast %6 : vector<1x1x128x128xbf16> to vector<128x128xbf16>
    %cst = arith.constant dense<0.000000e+00> : vector<1024x128xf32>
    %8 = tpu.matmul %5, %7, %cst {dimension_numbers = #tpu.dot_dimension_numbers<[1], [0], [0], [1], [0, 0, 1, 1], [], []>} : vector<1024x128xbf16>, vector<128x128xbf16>, vector<1024x128xf32> -> vector<1024x128xf32>
    %9 = arith.addf %3, %8 : vector<1024x128xf32>
    %c0_9 = arith.constant 0 : index
    %c0_10 = arith.constant 0 : index
    %10 = vector.load %arg8[%c0_9, %c0_10] : memref<1024x128xf32, #tpu.memory_space<vmem>>, vector<1024x128xf32>
    tpu.vector_store %arg8[%c0_9, %c0_10], %9 {strides = array<i32>} : memref<1024x128xf32, #tpu.memory_space<vmem>>, vector<1024x128xf32>,
    %c3_i32 = arith.constant 3 : i32
    %11 = arith.cmpi eq, %arg2, %c3_i32 : i32
    %12 = arith.extui %11 : i1 to i32
    %c0_i32_11 = arith.constant 0 : i32
    %13 = arith.cmpi ne, %12, %c0_i32_11 : i32
    scf.if %13 {
      %c0_12 = arith.constant 0 : index
      %c0_13 = arith.constant 0 : index
      %14 = vector.load %arg8[%c0_12, %c0_13] : memref<1024x128xf32, #tpu.memory_space<vmem>>, vector<1024x128xf32>
      %c0_14 = arith.constant 0 : index
      %c0_15 = arith.constant 0 : index
      %15 = vector.load %arg6[%c0_14, %c0_15] : memref<1x128xf32, #tpu.memory_space<vmem>>, vector<1x128xf32>
      %16 = vector.broadcast %15 : vector<1x128xf32> to vector<1024x128xf32>
      %17 = arith.addf %14, %16 : vector<1024x128xf32>
      %18 = math.tanh %17 : vector<1024x128xf32>
      %c0_16 = arith.constant 0 : index
      %c0_17 = arith.constant 0 : index
      %c0_18 = arith.constant 0 : index
      %19 = vector.load %arg7[%c0_16, %c0_17, %c0_18] : memref<1x1024x128xf32, #tpu.memory_space<vmem>>, vector<1x1024x128xf32>
      %20 = vector.shape_cast %19 : vector<1x1024x128xf32> to vector<1024x128xf32>
      %21 = vector.shape_cast %18 : vector<1024x128xf32> to vector<1x1024x128xf32>
      tpu.vector_store %arg7[%c0_16, %c0_17, %c0_18], %21 {strides = array<i32>} : memref<1x1024x128xf32, #tpu.memory_space<vmem>>, vector<1x1024x128xf32>,
    } else {
    }
    return
  }
  func.func @transform_0(%arg0: i32, %arg1: i32, %arg2: i32, %arg3: memref<4x4xi32, #tpu.memory_space<smem>>) -> (i32, i32, i32) {
    %0 = arith.index_cast %arg0 : i32 to index
    %1 = arith.index_cast %arg2 : i32 to index
    %2 = memref.load %arg3[%0, %1] : memref<4x4xi32, #tpu.memory_space<smem>>
    %c0_i32 = arith.constant 0 : i32
    %c0_i32_0 = arith.constant 0 : i32
    return %2, %arg1, %c0_i32 : i32, i32, i32
  }
  func.func @transform_1(%arg0: i32, %arg1: i32, %arg2: i32, %arg3: memref<4x4xi32, #tpu.memory_space<smem>>) -> (i32, i32, i32, i32) {
    %c0_i32 = arith.constant 0 : i32
    %c0_i32_0 = arith.constant 0 : i32
    %c0_i32_1 = arith.constant 0 : i32
    return %arg0, %arg2, %c0_i32, %c0_i32_0 : i32, i32, i32, i32
  }
  func.func @transform_2(%arg0: i32, %arg1: i32, %arg2: i32, %arg3: memref<4x4xi32, #tpu.memory_space<smem>>) -> (i32, i32) {
    %c0_i32 = arith.constant 0 : i32
    %c0_i32_0 = arith.constant 0 : i32
    %c0_i32_1 = arith.constant 0 : i32
    return %c0_i32, %c0_i32_0 : i32, i32
  }
  func.func @transform_3(%arg0: i32, %arg1: i32, %arg2: i32, %arg3: memref<4x4xi32, #tpu.memory_space<smem>>) -> (i32, i32, i32) {
    %c0_i32 = arith.constant 0 : i32
    %c0_i32_0 = arith.constant 0 : i32
    return %arg0, %arg1, %c0_i32 : i32, i32, i32
  }
}

</mosaic_0001>

<bundles_post_ra>
// kernel: tile.13
= control target key start
LH: loop header
LB: loop body
LE: loop exit
PB: predicated region body
PF: predicated region fallthrough
CT: control target
= control target key end

     0   :  { %s28_s0 = inlined_call_operand.vmem [shape: f32[128], index: 0, kind: input, shape index: {}]   ;;  %s29_s1 = inlined_call_operand.vmem [shape: f32[16,128], index: 1, kind: output, shape index: {}]  }
   0x1   :  { %v4_v0 = vld [vmem:[%s28_s0] ss:$0 sm:$0xff] }
   0x2   :  { %5 = vst [vmem:[%s29_s1] sm:$0xff] %v4_v0  ;;  %8 = vst [vmem:[%s29_s1 + $0x8] sm:$0xff] %v4_v0 }

// kernel: generator_forward.10
= control target key start
LH: loop header
LB: loop body
LE: loop exit
PB: predicated region body
PF: predicated region fallthrough
CT: control target
= control target key end

     0   :  { %s603_s12 = smov 0   ;;  %s747_s0 = inlined_call_operand.vmem [shape: bf16[16,2048], index: 0, kind: input, shape index: {}]   ;;  %s748_s1 = inlined_call_operand.vmem [shape: f32[1,2048], index: 1, kind: input, shape index: {}]   ;;  %s749_s2 = inlined_call_operand.vmem [shape: f32[1,2048], index: 2, kind: input, shape index: {}]   ;;  %s750_s3 = inlined_call_operand.vmem [shape: bf16[16,2048], index: 3, kind: output, shape index: {}]  }
   0x1 LB: > { %s538_s13 = sadd.s32 4294967295, %s581_s12   ;;  %p542_p0 = scmp.ge.s32.totalorder %s581_s12, 1  ;;  %s581_s12 = sphi %s603_s12, %s13_s12  }
   0x2   : > { %p137_p1 = scmp.lt.s32.totalorder %s581_s12, 3 }
   0x4   : > { %p138_p2 = pnand %p542_p0, %p137_p1 }
   0x5   : > { %p161_p3 = scmp.lt.s32.totalorder (!%p138_p2), %s538_s13, 1  ;;  %v199_v0 = vlaneseq (!%p138_p2)  ;;  %v616_v2 = vld [vmem:[%s748_s1] sm:$0xff] (!%p138_p2)  ;;  %v692_v57 = vld [vmem:[%s748_s1 + $0x8] sm:$0xff] (!%p138_p2) }
   0x6   : > { %141 = sbr.rel (%p138_p2) target bundleno = 46 (0x2e), region = 32  ;;  %v621_v3 = vld [vmem:[%s749_s2] sm:$0xff] (!%p138_p2)  ;;  %v697_v58 = vld [vmem:[%s749_s2 + $0x8] sm:$0xff] (!%p138_p2) }
   0x7   : > { %v200_v1 = vshrl.u32 (!%p138_p2), %v199_v0, 7 }
   0x9   : > { %v624_v4 = vsub.s32 (!%p138_p2), 0, %v200_v1  ;;  %v626_v5 = vsub.s32 (!%p138_p2), 1, %v200_v1  ;;  %v628_v6 = vsub.s32 (!%p138_p2), 2, %v200_v1  ;;  %v630_v7 = vsub.s32 (!%p138_p2), 3, %v200_v1 }
   0xa   : > { %v639_v8 = vsub.s32 (!%p138_p2), 4, %v200_v1  ;;  %v641_v9 = vsub.s32 (!%p138_p2), 5, %v200_v1  ;;  %v643_v10 = vsub.s32 (!%p138_p2), 6, %v200_v1  ;;  %v645_v11 = vsub.s32 (!%p138_p2), 7, %v200_v1 }
   0xb   : > { %v202_v13 = vrot.slane (!%p138_p2), %v616_v2, %v624_v4  ;;  %v206_v14 = vrot.slane (!%p138_p2), %v616_v2, %v626_v5  ;;  %v302_v15 = vrot.slane (!%p138_p2), %v621_v3, %v624_v4  ;;  %v306_v16 = vrot.slane (!%p138_p2), %v621_v3, %v626_v5 }
   0xc   : > { %v210_v23 = vrot.slane (!%p138_p2), %v616_v2, %v628_v6  ;;  %v214_v24 = vrot.slane (!%p138_p2), %v616_v2, %v630_v7  ;;  %v310_v25 = vrot.slane (!%p138_p2), %v621_v3, %v628_v6  ;;  %v314_v26 = vrot.slane (!%p138_p2), %v621_v3, %v630_v7 }
   0xd   : > { %s752_s13 = smov (!%p161_p3, %s538_s13), 1  ;;  %v218_v33 = vrot.slane %v616_v2, %v639_v8  ;;  %v222_v34 = vrot.slane %v616_v2, %v641_v9  ;;  %v318_v38 = vrot.slane %v621_v3, %v639_v8  ;;  %v322_v39 = vrot.slane %v621_v3, %v641_v9 }
   0xe   : > { %s557_s18 = sshll.u32 %s752_s13, 6  ;;  %v226_v54 = vrot.slane %v616_v2, %v643_v10  ;;  %v230_v55 = vrot.slane %v616_v2, %v645_v11  ;;  %v326_v56 = vrot.slane %v621_v3, %v643_v10  ;;  %v330_v62 = vrot.slane %v621_v3, %v645_v11 }
   0xf   : > { %s637_s21 = scalar_lea.vmem %s747_s0, %s557_s18  ;;  %s680_s24 = scalar_lea.vmem %s750_s3, %s557_s18 }
  0x10   : > { %v171_v12 = vld [vmem:[%s637_s21] sm:$0xff]  ;;  %v172_v17 = vld [vmem:[%s637_s21 + $0x8] sm:$0xff]  ;;  %v173_v18 = vld [vmem:[%s637_s21 + $0x10] sm:$0xff] }
  0x11   : > { %v179_v19 = vunpack.c.l.bf16 %v171_v12  ;;  %v180_v20 = vunpack.c.h.bf16 %v171_v12  ;;  %v181_v21 = vunpack.c.l.bf16 %v172_v17  ;;  %v182_v22 = vunpack.c.h.bf16 %v172_v17  ;;  %v174_v35 = vld [vmem:[%s637_s21 + $0x18] sm:$0xff]  ;;  %v175_v52 = vld [vmem:[%s637_s21 + $0x20] sm:$0xff]  ;;  %v176_v63 = vld [vmem:[%s637_s21 + $0x28] sm:$0xff] }
  0x12   : > { %v183_v29 = vunpack.c.l.bf16 %v173_v18  ;;  %v184_v30 = vunpack.c.h.bf16 %v173_v18  ;;  %v185_v46 = vunpack.c.l.bf16 %v174_v35  ;;  %v186_v47 = vunpack.c.h.bf16 %v174_v35  ;;  %v178_v35 = vld [vmem:[%s637_s21 + $0x38] sm:$0xff] }
  0x13   : > { %v279_v27 = vmul.f32 %v202_v13, %v179_v19  ;;  %v280_v28 = vmul.f32 %v206_v14, %v180_v20  ;;  %v281_v31 = vmul.f32 %v210_v23, %v181_v21  ;;  %v282_v32 = vmul.f32 %v214_v24, %v182_v22  ;;  %v177_v24 = vld [vmem:[%s637_s21 + $0x30] sm:$0xff] }
  0x14   : > { %v283_v42 = vmul.f32 %v218_v33, %v183_v29  ;;  %v284_v43 = vmul.f32 %v222_v34, %v184_v30  ;;  %v285_v0 = vmul.f32 %v226_v54, %v185_v46  ;;  %v286_v1 = vmul.f32 %v230_v55, %v186_v47 }
  0x15   : > { %v379_v36 = vadd.f32 %v302_v15, %v279_v27  ;;  %v380_v37 = vadd.f32 %v306_v16, %v280_v28  ;;  %v381_v40 = vadd.f32 %v310_v25, %v281_v31  ;;  %v382_v41 = vadd.f32 %v314_v26, %v282_v32 }
  0x16   : > { %v383_v50 = vadd.f32 %v318_v38, %v283_v42  ;;  %v384_v51 = vadd.f32 %v322_v39, %v284_v43  ;;  %v187_v2 = vunpack.c.l.bf16 %v175_v52  ;;  %v188_v12 = vunpack.c.h.bf16 %v175_v52 }
  0x17   : > { %v395_v44 = vmax.f32 %v379_v36, 0.0  ;;  %v396_v45 = vmax.f32 %v380_v37, 0.0  ;;  %v397_v48 = vmax.f32 %v381_v40, 0.0  ;;  %v398_v49 = vmax.f32 %v382_v41, 0.0 }
  0x18   : > { %v399_v60 = vmax.f32 %v383_v50, 0.0  ;;  %v400_v61 = vmax.f32 %v384_v51, 0.0  ;;  %v234_v14 = vrot.slane %v692_v57, %v624_v4  ;;  %v238_v15 = vrot.slane %v692_v57, %v626_v5 }
  0x19   : > { %v559_v53 = vpack.c.bf16 %v396_v45, %v395_v44  ;;  %v560_v59 = vpack.c.bf16 %v398_v49, %v397_v48  ;;  %v334_v16 = vrot.slane %v697_v58, %v624_v4  ;;  %v385_v3 = vadd.f32 %v326_v56, %v285_v0 }
  0x1a   : > { %v561_v13 = vpack.c.bf16 %v400_v61, %v399_v60  ;;  %v386_v17 = vadd.f32 %v330_v62, %v286_v1  ;;  %v338_v18 = vrot.slane %v697_v58, %v626_v5  ;;  %v189_v19 = vunpack.c.l.bf16 %v176_v63 }
  0x1b   : > { %475 = vst [vmem:[%s680_s24] sm:$0xff] %v559_v53  ;;  %476 = vst [vmem:[%s680_s24 + $0x8] sm:$0xff] %v560_v59  ;;  %v287_v20 = vmul.f32 %v234_v14, %v187_v2  ;;  %v288_v21 = vmul.f32 %v238_v15, %v188_v12  ;;  %v190_v22 = vunpack.c.h.bf16 %v176_v63  ;;  %v242_v23 = vrot.slane %v692_v57, %v628_v6 }
  0x1c   : > { %477 = vst [vmem:[%s680_s24 + $0x10] sm:$0xff] %v561_v13  ;;  %v401_v25 = vmax.f32 %v385_v3, 0.0  ;;  %v402_v26 = vmax.f32 %v386_v17, 0.0  ;;  %v246_v4 = vrot.slane %v692_v57, %v630_v7  ;;  %v342_v27 = vrot.slane %v697_v58, %v628_v6 }
  0x1d   : > { %v387_v5 = vadd.f32 %v334_v16, %v287_v20  ;;  %v388_v28 = vadd.f32 %v338_v18, %v288_v21  ;;  %v289_v29 = vmul.f32 %v242_v23, %v189_v19  ;;  %v346_v30 = vrot.slane %v697_v58, %v630_v7 }
  0x1e   : > { %v562_v31 = vpack.c.bf16 %v402_v26, %v401_v25  ;;  %v290_v32 = vmul.f32 %v246_v4, %v190_v22  ;;  %v191_v33 = vunpack.c.l.bf16 %v177_v24  ;;  %v192_v34 = vunpack.c.h.bf16 %v177_v24 }
  0x1f   : > { %v403_v36 = vmax.f32 %v387_v5, 0.0  ;;  %v404_v37 = vmax.f32 %v388_v28, 0.0  ;;  %v389_v38 = vadd.f32 %v342_v27, %v289_v29  ;;  %v250_v39 = vrot.slane %v692_v57, %v639_v8 }
  0x20   : > { %478 = vst [vmem:[%s680_s24 + $0x18] sm:$0xff] %v562_v31  ;;  %v390_v6 = vadd.f32 %v346_v30, %v290_v32  ;;  %v254_v40 = vrot.slane %v692_v57, %v641_v9  ;;  %v350_v7 = vrot.slane %v697_v58, %v639_v8  ;;  %v354_v41 = vrot.slane %v697_v58, %v641_v9 }
  0x21   : > { %v563_v42 = vpack.c.bf16 %v404_v37, %v403_v36  ;;  %v405_v43 = vmax.f32 %v389_v38, 0.0  ;;  %v291_v44 = vmul.f32 %v250_v39, %v191_v33  ;;  %v193_v45 = vunpack.c.l.bf16 %v178_v35 }
  0x22   : > { %v406_v46 = vmax.f32 %v390_v6, 0.0  ;;  %v292_v47 = vmul.f32 %v254_v40, %v192_v34  ;;  %v194_v48 = vunpack.c.h.bf16 %v178_v35  ;;  %v258_v49 = vrot.slane %v692_v57, %v643_v10 }
  0x23   : > { %479 = vst [vmem:[%s680_s24 + $0x20] sm:$0xff] %v563_v42  ;;  %v391_v50 = vadd.f32 %v350_v7, %v291_v44  ;;  %v262_v8 = vrot.slane %v692_v57, %v645_v11  ;;  %v358_v9 = vrot.slane %v697_v58, %v643_v10  ;;  %v362_v51 = vrot.slane %v697_v58, %v645_v11 }
  0x24   : > { %v564_v52 = vpack.c.bf16 %v406_v46, %v405_v43  ;;  %v392_v53 = vadd.f32 %v354_v41, %v292_v47  ;;  %v293_v54 = vmul.f32 %v258_v49, %v193_v45 }
  0x25   : > { %v407_v55 = vmax.f32 %v391_v50, 0.0  ;;  %v294_v56 = vmul.f32 %v262_v8, %v194_v48 }
  0x26   : > { %480 = vst [vmem:[%s680_s24 + $0x28] sm:$0xff] %v564_v52  ;;  %v408_v59 = vmax.f32 %v392_v53, 0.0  ;;  %v393_v60 = vadd.f32 %v358_v9, %v293_v54 }
  0x27   : > { %v394_v61 = vadd.f32 %v362_v51, %v294_v56 }
  0x28   : > { %v565_v62 = vpack.c.bf16 %v408_v59, %v407_v55  ;;  %v409_v63 = vmax.f32 %v393_v60, 0.0 }
  0x29   : > { %v410_v0 = vmax.f32 %v394_v61, 0.0 }
  0x2a   : > { %481 = vst [vmem:[%s680_s24 + $0x30] sm:$0xff] %v565_v62 }
  0x2b   : > { %v566_v57 = vpack.c.bf16 %v410_v0, %v409_v63 }
  0x2d   : > { %482 = vst [vmem:[%s680_s24 + $0x38] sm:$0xff] %v566_v57 }
  0x2e PF: > { %s13_s12 = sadd.s32 1, %s581_s12  }
  0x2f   : > { %p10_p4 = scmp.ge.s32.totalorder %s13_s12, 4  }
  0x31   :  { %12 = sbr.rel (!%p10_p4) target bundleno = 1 (0x1), region = 62 }

// kernel: generator_forward.9
= control target key start
LH: loop header
LB: loop body
LE: loop exit
PB: predicated region body
PF: predicated region fallthrough
CT: control target
= control target key end

     0   :  { %s2473_s23 = smov 0   ;;  %s2475_s24 = smov 0   ;;  %s3080_s0 = inlined_call_operand.<no memory space> [shape: s32[1,1], index: 0, kind: input, shape index: {}]   ;;  %s3081_s1 = inlined_call_operand.vmem [shape: bf16[1,16,128], index: 1, kind: input, shape index: {}]   ;;  %s3082_s2 = inlined_call_operand.vmem [shape: bf16[1,1,128,2048], index: 2, kind: input, shape index: {}]   ;;  %s3083_s3 = inlined_call_operand.vmem [shape: f32[1,2048], index: 3, kind: input, shape index: {}]   ;;  %s3084_s4 = inlined_call_operand.vmem [shape: bf16[1,16,2048], index: 4, kind: output, shape index: {0}]   ;;  %s3085_s5 = inlined_call_operand.vmem [shape: f32[1,16,2048], index: 5, kind: output, shape index: {1}]   ;;  %s3086_s6 = inlined_call_operand.vmem [shape: f32[1,16,2048], index: 6, kind: output, shape index: {2}]  }
   0x1   :  { %12 = sst [smem:[#allocation4]] %s3080_s0  ;;  %s2477_s25 = smov 0  }
   0x2 LB: > { %s33_s0 = sadd.s32 1, %s2428_s24  ;;  %p2227_p0 = scmp.ge.s32.totalorder %s2432_s25, 1  ;;  %s2432_s25 = sphi %s2477_s25, %s18_s25   ;;  %s2428_s24 = sphi %s2475_s24, %s3088_s24   ;;  %s2424_s23 = sphi %s2473_s23, %s3087_s23  }
   0x3   : > { %p35_p1 = scmp.ge.s32.totalorder %s33_s0, 2  ;;  %p272_p2 = scmp.lt.s32.totalorder %s2432_s25, 3 }
   0x5   : > { %s3090_s0 = smov (%p35_p1, %s33_s0), 0  ;;  %p273_p3 = pnand %p2227_p0, %p272_p2 }
   0x6   : > { %v440_v0 = vld [vmem:[%s3082_s2] sm:$0xff] (!%p273_p3)  ;;  %v441_v2 = vld [vmem:[%s3082_s2 + $0x8] sm:$0xff] (!%p273_p3)  ;;  %v2434_v8 = vmov (!%p273_p3), 0   ;;  %s2531_s29 = sld [smem:[#allocation4]] (!%p273_p3)  ;;  %p352_p5 = scmp.lt.s32.totalorder (!%p273_p3), %s2424_s23, 1  ;;  %v442_v63 = vld [vmem:[%s3082_s2 + $0x10] sm:$0xff] (!%p273_p3) }
   0x7   : > { %276 = sbr.rel (%p273_p3) target bundleno = 370 (0x172), region = 32  ;;  %v448_v1 = vld [vmem:[%s3082_s2 + $0x40] sm:$0xff] (!%p273_p3)  ;;  %v449_v4 = vld [vmem:[%s3082_s2 + $0x48] sm:$0xff] (!%p273_p3)  ;;  %1240 = vmatprep.mubr.bf16.mxu0 (!%p273_p3), %v2434_v8  ;;  %1281 = vmatprep.mubr.bf16.mxu1 (!%p273_p3), %v2434_v8 }
   0x8   : > { %v2237_v3 = vcombine.high (!%p273_p3), %v440_v0, %v448_v1  ;;  %v2236_v5 = vcombine.low (!%p273_p3), %v440_v0, %v448_v1  ;;  %v456_v6 = vld [vmem:[%s3082_s2 + $0x80] sm:$0xff] (!%p273_p3)  ;;  %v2239_v9 = vcombine.high (!%p273_p3), %v441_v2, %v449_v4  ;;  %v2238_v10 = vcombine.low (!%p273_p3), %v441_v2, %v449_v4  ;;  %v457_v12 = vld [vmem:[%s3082_s2 + $0x88] sm:$0xff] (!%p273_p3)  ;;  %v450_v0 = vld [vmem:[%s3082_s2 + $0x50] sm:$0xff] (!%p273_p3) }
   0x9   : > { %v464_v7 = vld [vmem:[%s3082_s2 + $0xc0] sm:$0xff] (!%p273_p3)  ;;  %v465_v13 = vld [vmem:[%s3082_s2 + $0xc8] sm:$0xff] (!%p273_p3)  ;;  %v443_v1 = vld [vmem:[%s3082_s2 + $0x18] sm:$0xff] (!%p273_p3) }
   0xa   : > { %v2253_v11 = vcombine.high (!%p273_p3), %v456_v6, %v464_v7  ;;  %v472_v14 = vld [vmem:[%s3082_s2 + $0x100] sm:$0xff] (!%p273_p3)  ;;  %1208 = vmatprep.subr.bf16.mxu0 (!%p273_p3), %v2237_v3  ;;  %v2255_v15 = vcombine.high (!%p273_p3), %v457_v12, %v465_v13  ;;  %v473_v17 = vld [vmem:[%s3082_s2 + $0x108] sm:$0xff] (!%p273_p3)  ;;  %1249 = vmatprep.subr.bf16.mxu1 (!%p273_p3), %v2239_v9  ;;  %v2252_v19 = vcombine.low (!%p273_p3), %v456_v6, %v464_v7  ;;  %v451_v2 = vld [vmem:[%s3082_s2 + $0x58] sm:$0xff] (!%p273_p3) }
   0xb   : > { %v480_v16 = vld [vmem:[%s3082_s2 + $0x140] sm:$0xff] (!%p273_p3)  ;;  %v481_v18 = vld [vmem:[%s3082_s2 + $0x148] sm:$0xff] (!%p273_p3)  ;;  %1209 = vmatpush1.bf16.msra.mxu0 (!%p273_p3), %v2236_v5  ;;  %1250 = vmatpush1.bf16.msra.mxu1 (!%p273_p3), %v2238_v10  ;;  %v2254_v20 = vcombine.low (!%p273_p3), %v457_v12, %v465_v13  ;;  %v2241_v5 = vcombine.high (!%p273_p3), %v442_v63, %v450_v0  ;;  %v2243_v6 = vcombine.high (!%p273_p3), %v443_v1, %v451_v2  ;;  %v458_v7 = vld [vmem:[%s3082_s2 + $0x90] sm:$0xff] (!%p273_p3) }
   0xc   : > { %1210 = vmatprep.subr.bf16.mxu0 (!%p273_p3), %v2253_v11  ;;  %v2269_v21 = vcombine.high (!%p273_p3), %v472_v14, %v480_v16  ;;  %1251 = vmatprep.subr.bf16.mxu1 (!%p273_p3), %v2255_v15  ;;  %v2271_v22 = vcombine.high (!%p273_p3), %v473_v17, %v481_v18  ;;  %v488_v23 = vld [vmem:[%s3082_s2 + $0x180] sm:$0xff] (!%p273_p3)  ;;  %v489_v25 = vld [vmem:[%s3082_s2 + $0x188] sm:$0xff] (!%p273_p3)  ;;  %v2268_v27 = vcombine.low (!%p273_p3), %v472_v14, %v480_v16  ;;  %p350_p4 = scmp.lt.s32.totalorder (!%p273_p3), %s2531_s29, 0  ;;  %v466_v9 = vld [vmem:[%s3082_s2 + $0xd0] sm:$0xff] (!%p273_p3) }
   0xd   : > { %v496_v24 = vld [vmem:[%s3082_s2 + $0x1c0] sm:$0xff] (!%p273_p3)  ;;  %v497_v26 = vld [vmem:[%s3082_s2 + $0x1c8] sm:$0xff] (!%p273_p3)  ;;  %v2270_v28 = vcombine.low (!%p273_p3), %v473_v17, %v481_v18  ;;  %v459_v10 = vld [vmem:[%s3082_s2 + $0x98] sm:$0xff] (!%p273_p3)  ;;  %v2240_v13 = vcombine.low (!%p273_p3), %v442_v63, %v450_v0  ;;  %v2242_v14 = vcombine.low (!%p273_p3), %v443_v1, %v451_v2  ;;  %v2257_v15 = vcombine.high (!%p273_p3), %v458_v7, %v466_v9 }
   0xe   : > { %v2285_v29 = vcombine.high %v488_v23, %v496_v24  ;;  %v2287_v30 = vcombine.high %v489_v25, %v497_v26  ;;  %v504_v31 = vld [vmem:[%s3082_s2 + $0x200] sm:$0xff]  ;;  %v505_v33 = vld [vmem:[%s3082_s2 + $0x208] sm:$0xff]  ;;  %v2284_v35 = vcombine.low %v488_v23, %v496_v24  ;;  %v2286_v36 = vcombine.low %v489_v25, %v497_v26  ;;  %s3092_s29 = smov (!%p350_p4, %s2531_s29), 0  ;;  %s3094_s23 = smov (!%p352_p5, %s2424_s23), 1  ;;  %v467_v11 = vld [vmem:[%s3082_s2 + $0xd8] sm:$0xff] }
   0xf   : > { %1211 = vmatpush1.bf16.msra.mxu0 %v2252_v19  ;;  %1252 = vmatpush1.bf16.msra.mxu1 %v2254_v20  ;;  %v512_v32 = vld [vmem:[%s3082_s2 + $0x240] sm:$0xff]  ;;  %v513_v34 = vld [vmem:[%s3082_s2 + $0x248] sm:$0xff]  ;;  %s2228_s18 = sshll.u32 %s3092_s29, 1  ;;  %v2259_v16 = vcombine.high %v459_v10, %v467_v11  ;;  %v474_v17 = vld [vmem:[%s3082_s2 + $0x110] sm:$0xff]  ;;  %s2374_s16 = sshll.u32 %s3094_s23, 6 }
  0x10   : > { %1212 = vmatprep.subr.bf16.mxu0 %v2269_v21  ;;  %1253 = vmatprep.subr.bf16.mxu1 %v2271_v22  ;;  %v2301_v37 = vcombine.high %v504_v31, %v512_v32  ;;  %v2303_v38 = vcombine.high %v505_v33, %v513_v34  ;;  %v520_v39 = vld [vmem:[%s3082_s2 + $0x280] sm:$0xff]  ;;  %v521_v41 = vld [vmem:[%s3082_s2 + $0x288] sm:$0xff]  ;;  %v2300_v43 = vcombine.low %v504_v31, %v512_v32  ;;  %s355_s30 = sadd.s32 %s2228_s18, %s3094_s23  ;;  %v482_v18 = vld [vmem:[%s3082_s2 + $0x150] sm:$0xff]  ;;  %s2942_s19 = scalar_lea.vmem %s3084_s4, %s2374_s16 }
  0x11   : > { %v528_v40 = vld [vmem:[%s3082_s2 + $0x2c0] sm:$0xff]  ;;  %v529_v42 = vld [vmem:[%s3082_s2 + $0x2c8] sm:$0xff]  ;;  %v2302_v44 = vcombine.low %v505_v33, %v513_v34  ;;  %s2229_s7 = sshll.u32 %s355_s30, 2  ;;  %v475_v19 = vld [vmem:[%s3082_s2 + $0x118] sm:$0xff]  ;;  %v2256_v21 = vcombine.low %v458_v7, %v466_v9  ;;  %v2258_v22 = vcombine.low %v459_v10, %v467_v11  ;;  %v2273_v23 = vcombine.high %v474_v17, %v482_v18  ;;  %s2375_s20 = sshll.u32 %s3094_s23, 7 }
  0x12   : > { %v2317_v45 = vcombine.high %v520_v39, %v528_v40  ;;  %v2319_v46 = vcombine.high %v521_v41, %v529_v42  ;;  %v536_v47 = vld [vmem:[%s3082_s2 + $0x300] sm:$0xff]  ;;  %v537_v49 = vld [vmem:[%s3082_s2 + $0x308] sm:$0xff]  ;;  %v2316_v51 = vcombine.low %v520_v39, %v528_v40  ;;  %v2318_v52 = vcombine.low %v521_v41, %v529_v42  ;;  %s357_s18 = scalar_lea.vmem %s3081_s1, %s2229_s7  ;;  %v483_v20 = vld [vmem:[%s3082_s2 + $0x158] sm:$0xff]  ;;  %s2957_s26 = scalar_lea.vmem %s3085_s5, %s2375_s20 }
  0x13   : > { %1213 = vmatpush1.bf16.msra.mxu0 %v2268_v27  ;;  %1254 = vmatpush1.bf16.msra.mxu1 %v2270_v28  ;;  %v544_v48 = vld [vmem:[%s3082_s2 + $0x340] sm:$0xff]  ;;  %v545_v50 = vld [vmem:[%s3082_s2 + $0x348] sm:$0xff]  ;;  %v2275_v24 = vcombine.high %v475_v19, %v483_v20  ;;  %v490_v25 = vld [vmem:[%s3082_s2 + $0x190] sm:$0xff]  ;;  %s2962_s28 = scalar_lea.vmem %s3086_s6, %s2375_s20 }
  0x14   : > { %1214 = vmatprep.subr.bf16.mxu0 %v2285_v29  ;;  %1255 = vmatprep.subr.bf16.mxu1 %v2287_v30  ;;  %v2333_v53 = vcombine.high %v536_v47, %v544_v48  ;;  %v2335_v54 = vcombine.high %v537_v49, %v545_v50  ;;  %v552_v55 = vld [vmem:[%s3082_s2 + $0x380] sm:$0xff]  ;;  %v553_v57 = vld [vmem:[%s3082_s2 + $0x388] sm:$0xff]  ;;  %v2332_v59 = vcombine.low %v536_v47, %v544_v48  ;;  %v498_v26 = vld [vmem:[%s3082_s2 + $0x1d0] sm:$0xff] }
  0x15   : > { %v560_v56 = vld [vmem:[%s3082_s2 + $0x3c0] sm:$0xff]  ;;  %v561_v58 = vld [vmem:[%s3082_s2 + $0x3c8] sm:$0xff]  ;;  %v2334_v60 = vcombine.low %v537_v49, %v545_v50  ;;  %v491_v27 = vld [vmem:[%s3082_s2 + $0x198] sm:$0xff]  ;;  %v2272_v29 = vcombine.low %v474_v17, %v482_v18  ;;  %v2274_v30 = vcombine.low %v475_v19, %v483_v20  ;;  %v2289_v31 = vcombine.high %v490_v25, %v498_v26 }
  0x16   : > { %v2349_v61 = vcombine.high %v552_v55, %v560_v56  ;;  %v2351_v62 = vcombine.high %v553_v57, %v561_v58  ;;  %v2348_v3 = vcombine.low %v552_v55, %v560_v56  ;;  %v2350_v4 = vcombine.low %v553_v57, %v561_v58  ;;  %v2631_v12 = vld [vmem:[%s357_s18] sm:$0xf]  ;;  %v499_v28 = vld [vmem:[%s3082_s2 + $0x1d8] sm:$0xff]  ;;  %v506_v33 = vld [vmem:[%s3082_s2 + $0x210] sm:$0xff] }
  0x17   : > { %1215 = vmatpush1.bf16.msra.mxu0 %v2284_v35  ;;  %1256 = vmatpush1.bf16.msra.mxu1 %v2286_v36  ;;  %v2291_v32 = vcombine.high %v491_v27, %v499_v28  ;;  %v514_v34 = vld [vmem:[%s3082_s2 + $0x250] sm:$0xff]  ;;  %v507_v35 = vld [vmem:[%s3082_s2 + $0x218] sm:$0xff]  ;;  %v444_v1 = vld [vmem:[%s3082_s2 + $0x20] sm:$0xff] }
  0x18   : > { %1216 = vmatprep.subr.bf16.mxu0 %v2301_v37  ;;  %1257 = vmatprep.subr.bf16.mxu1 %v2303_v38  ;;  %v515_v36 = vld [vmem:[%s3082_s2 + $0x258] sm:$0xff]  ;;  %v2288_v37 = vcombine.low %v490_v25, %v498_v26  ;;  %v2290_v38 = vcombine.low %v491_v27, %v499_v28  ;;  %v2305_v39 = vcombine.high %v506_v33, %v514_v34  ;;  %v522_v41 = vld [vmem:[%s3082_s2 + $0x290] sm:$0xff]  ;;  %v452_v2 = vld [vmem:[%s3082_s2 + $0x60] sm:$0xff] }
  0x19   : > { %v2307_v40 = vcombine.high %v507_v35, %v515_v36  ;;  %v530_v42 = vld [vmem:[%s3082_s2 + $0x2d0] sm:$0xff]  ;;  %v2245_v7 = vcombine.high %v444_v1, %v452_v2  ;;  %v460_v10 = vld [vmem:[%s3082_s2 + $0xa0] sm:$0xff] }
  0x1a   : > { %v2321_v47 = vcombine.high %v522_v41, %v530_v42  ;;  %v538_v49 = vld [vmem:[%s3082_s2 + $0x310] sm:$0xff]  ;;  %v468_v11 = vld [vmem:[%s3082_s2 + $0xe0] sm:$0xff] }
  0x1b   : > { %1217 = vmatpush1.bf16.msra.mxu0 %v2300_v43  ;;  %1258 = vmatpush1.bf16.msra.mxu1 %v2302_v44  ;;  %v523_v43 = vld [vmem:[%s3082_s2 + $0x298] sm:$0xff]  ;;  %v546_v50 = vld [vmem:[%s3082_s2 + $0x350] sm:$0xff]  ;;  %v2261_v17 = vcombine.high %v460_v10, %v468_v11  ;;  %v476_v19 = vld [vmem:[%s3082_s2 + $0x120] sm:$0xff] }
  0x1c   : > { %1218 = vmatprep.subr.bf16.mxu0 %v2317_v45  ;;  %1259 = vmatprep.subr.bf16.mxu1 %v2319_v46  ;;  %v531_v44 = vld [vmem:[%s3082_s2 + $0x2d8] sm:$0xff]  ;;  %v2304_v45 = vcombine.low %v506_v33, %v514_v34  ;;  %v2306_v46 = vcombine.low %v507_v35, %v515_v36  ;;  %v2337_v55 = vcombine.high %v538_v49, %v546_v50  ;;  %v554_v57 = vld [vmem:[%s3082_s2 + $0x390] sm:$0xff]  ;;  %v484_v20 = vld [vmem:[%s3082_s2 + $0x160] sm:$0xff] }
  0x1d   : > { %v2323_v48 = vcombine.high %v523_v43, %v531_v44  ;;  %v562_v58 = vld [vmem:[%s3082_s2 + $0x3d0] sm:$0xff]  ;;  %v2277_v25 = vcombine.high %v476_v19, %v484_v20  ;;  %v492_v27 = vld [vmem:[%s3082_s2 + $0x1a0] sm:$0xff] }
  0x1e   : > { %v2353_v63 = vcombine.high %v554_v57, %v562_v58  ;;  %v500_v28 = vld [vmem:[%s3082_s2 + $0x1e0] sm:$0xff] }
  0x1f   : > { %1219 = vmatpush1.bf16.msra.mxu0 %v2316_v51  ;;  %1260 = vmatpush1.bf16.msra.mxu1 %v2318_v52  ;;  %v539_v51 = vld [vmem:[%s3082_s2 + $0x318] sm:$0xff]  ;;  %v2293_v33 = vcombine.high %v492_v27, %v500_v28  ;;  %v508_v35 = vld [vmem:[%s3082_s2 + $0x220] sm:$0xff] }
  0x20   : > { %1220 = vmatprep.subr.bf16.mxu0 %v2333_v53  ;;  %1261 = vmatprep.subr.bf16.mxu1 %v2335_v54  ;;  %v547_v52 = vld [vmem:[%s3082_s2 + $0x358] sm:$0xff]  ;;  %v2320_v53 = vcombine.low %v522_v41, %v530_v42  ;;  %v2322_v54 = vcombine.low %v523_v43, %v531_v44  ;;  %v516_v36 = vld [vmem:[%s3082_s2 + $0x260] sm:$0xff] }
  0x21   : > { %v2339_v56 = vcombine.high %v539_v51, %v547_v52  ;;  %v2309_v41 = vcombine.high %v508_v35, %v516_v36  ;;  %v524_v43 = vld [vmem:[%s3082_s2 + $0x2a0] sm:$0xff] }
  0x22   : > { %v532_v44 = vld [vmem:[%s3082_s2 + $0x2e0] sm:$0xff] }
  0x23   : > { %1221 = vmatpush1.bf16.msra.mxu0 %v2332_v59  ;;  %1262 = vmatpush1.bf16.msra.mxu1 %v2334_v60  ;;  %v555_v59 = vld [vmem:[%s3082_s2 + $0x398] sm:$0xff] }
  0x24   : > { %1222 = vmatprep.subr.bf16.mxu0 %v2349_v61  ;;  %1263 = vmatprep.subr.bf16.mxu1 %v2351_v62  ;;  %v563_v60 = vld [vmem:[%s3082_s2 + $0x3d8] sm:$0xff]  ;;  %v2336_v61 = vcombine.low %v538_v49, %v546_v50  ;;  %v2338_v62 = vcombine.low %v539_v51, %v547_v52  ;;  %v2325_v49 = vcombine.high %v524_v43, %v532_v44  ;;  %v540_v51 = vld [vmem:[%s3082_s2 + $0x320] sm:$0xff] }
  0x25   : > { %v2355_v0 = vcombine.high %v555_v59, %v563_v60  ;;  %v548_v52 = vld [vmem:[%s3082_s2 + $0x360] sm:$0xff] }
  0x27   : > { %1223 = vmatpush1.bf16.msra.mxu0 %v2348_v3  ;;  %1264 = vmatpush1.bf16.msra.mxu1 %v2350_v4  ;;  %v445_v3 = vld [vmem:[%s3082_s2 + $0x28] sm:$0xff] }
  0x28   : > { %1290 = vmatprep.subr.bf16.mxu0 %v2241_v5  ;;  %1331 = vmatprep.subr.bf16.mxu1 %v2243_v6  ;;  %v453_v4 = vld [vmem:[%s3082_s2 + $0x68] sm:$0xff]  ;;  %v2352_v5 = vcombine.low %v554_v57, %v562_v58  ;;  %v2354_v6 = vcombine.low %v555_v59, %v563_v60  ;;  %v2341_v57 = vcombine.high %v540_v51, %v548_v52  ;;  %v556_v59 = vld [vmem:[%s3082_s2 + $0x3a0] sm:$0xff] }
  0x29   : > { %v2247_v9 = vcombine.high %v445_v3, %v453_v4  ;;  %v564_v60 = vld [vmem:[%s3082_s2 + $0x3e0] sm:$0xff] }
  0x2a   : > { %1241 = vmatmul.mubr.bf16.vlgmr.msra.gmra.mrb[0].mxu0 %v2631_v12  ;;  %1282 = vmatmul.mubr.bf16.vlgmr.msra.gmra.mrb[0].mxu1 %v2631_v12 }
  0x2b   : > { %1291 = vmatpush1.bf16.msra.mxu0 %v2240_v13  ;;  %1332 = vmatpush1.bf16.msra.mxu1 %v2242_v14  ;;  %v461_v13 = vld [vmem:[%s3082_s2 + $0xa8] sm:$0xff] }
  0x2c   : > { %1292 = vmatprep.subr.bf16.mxu0 %v2257_v15  ;;  %1333 = vmatprep.subr.bf16.mxu1 %v2259_v16  ;;  %v469_v14 = vld [vmem:[%s3082_s2 + $0xe8] sm:$0xff]  ;;  %v2244_v15 = vcombine.low %v444_v1, %v452_v2  ;;  %v2246_v16 = vcombine.low %v445_v3, %v453_v4  ;;  %v2357_v1 = vcombine.high %v556_v59, %v564_v60  ;;  %v446_v3 = vld [vmem:[%s3082_s2 + $0x30] sm:$0xff] }
  0x2d   : > { %1322 = vmatprep.mubr.bf16.mxu0 %v2434_v8  ;;  %1363 = vmatprep.mubr.bf16.mxu1 %v2434_v8  ;;  %v2263_v18 = vcombine.high %v461_v13, %v469_v14  ;;  %v454_v4 = vld [vmem:[%s3082_s2 + $0x70] sm:$0xff] }
  0x2f   : > { %1293 = vmatpush1.bf16.msra.mxu0 %v2256_v21  ;;  %1334 = vmatpush1.bf16.msra.mxu1 %v2258_v22  ;;  %v477_v21 = vld [vmem:[%s3082_s2 + $0x128] sm:$0xff] }
  0x30   : > { %1294 = vmatprep.subr.bf16.mxu0 %v2273_v23  ;;  %1335 = vmatprep.subr.bf16.mxu1 %v2275_v24  ;;  %v485_v22 = vld [vmem:[%s3082_s2 + $0x168] sm:$0xff]  ;;  %v2260_v23 = vcombine.low %v460_v10, %v468_v11  ;;  %v2262_v24 = vcombine.low %v461_v13, %v469_v14  ;;  %v2249_v10 = vcombine.high %v446_v3, %v454_v4  ;;  %v462_v13 = vld [vmem:[%s3082_s2 + $0xb0] sm:$0xff] }
  0x31   : > { %v2279_v26 = vcombine.high %v477_v21, %v485_v22  ;;  %v470_v14 = vld [vmem:[%s3082_s2 + $0xf0] sm:$0xff] }
  0x33   : > { %1295 = vmatpush1.bf16.msra.mxu0 %v2272_v29  ;;  %1336 = vmatpush1.bf16.msra.mxu1 %v2274_v30  ;;  %v493_v29 = vld [vmem:[%s3082_s2 + $0x1a8] sm:$0xff] }
  0x34   : > { %1296 = vmatprep.subr.bf16.mxu0 %v2289_v31  ;;  %1337 = vmatprep.subr.bf16.mxu1 %v2291_v32  ;;  %v501_v30 = vld [vmem:[%s3082_s2 + $0x1e8] sm:$0xff]  ;;  %v2276_v31 = vcombine.low %v476_v19, %v484_v20  ;;  %v2278_v32 = vcombine.low %v477_v21, %v485_v22  ;;  %v2265_v19 = vcombine.high %v462_v13, %v470_v14  ;;  %v478_v21 = vld [vmem:[%s3082_s2 + $0x130] sm:$0xff] }
  0x35   : > { %v2295_v34 = vcombine.high %v493_v29, %v501_v30  ;;  %v486_v22 = vld [vmem:[%s3082_s2 + $0x170] sm:$0xff] }
  0x37   : > { %1297 = vmatpush1.bf16.msra.mxu0 %v2288_v37  ;;  %1338 = vmatpush1.bf16.msra.mxu1 %v2290_v38  ;;  %v509_v37 = vld [vmem:[%s3082_s2 + $0x228] sm:$0xff] }
  0x38   : > { %1298 = vmatprep.subr.bf16.mxu0 %v2305_v39  ;;  %1339 = vmatprep.subr.bf16.mxu1 %v2307_v40  ;;  %v517_v38 = vld [vmem:[%s3082_s2 + $0x268] sm:$0xff]  ;;  %v2292_v39 = vcombine.low %v492_v27, %v500_v28  ;;  %v2294_v40 = vcombine.low %v493_v29, %v501_v30  ;;  %v2281_v27 = vcombine.high %v478_v21, %v486_v22  ;;  %v494_v29 = vld [vmem:[%s3082_s2 + $0x1b0] sm:$0xff] }
  0x39   : > { %v2311_v42 = vcombine.high %v509_v37, %v517_v38  ;;  %v502_v30 = vld [vmem:[%s3082_s2 + $0x1f0] sm:$0xff] }
  0x3b   : > { %1299 = vmatpush1.bf16.msra.mxu0 %v2304_v45  ;;  %1340 = vmatpush1.bf16.msra.mxu1 %v2306_v46  ;;  %v525_v45 = vld [vmem:[%s3082_s2 + $0x2a8] sm:$0xff] }
  0x3c   : > { %1300 = vmatprep.subr.bf16.mxu0 %v2321_v47  ;;  %1341 = vmatprep.subr.bf16.mxu1 %v2323_v48  ;;  %v533_v46 = vld [vmem:[%s3082_s2 + $0x2e8] sm:$0xff]  ;;  %v2308_v47 = vcombine.low %v508_v35, %v516_v36  ;;  %v2310_v48 = vcombine.low %v509_v37, %v517_v38  ;;  %v2297_v35 = vcombine.high %v494_v29, %v502_v30  ;;  %v510_v37 = vld [vmem:[%s3082_s2 + $0x230] sm:$0xff] }
  0x3d   : > { %v2327_v50 = vcombine.high %v525_v45, %v533_v46  ;;  %v518_v38 = vld [vmem:[%s3082_s2 + $0x270] sm:$0xff] }
  0x3f   : > { %1301 = vmatpush1.bf16.msra.mxu0 %v2320_v53  ;;  %1342 = vmatpush1.bf16.msra.mxu1 %v2322_v54  ;;  %v541_v53 = vld [vmem:[%s3082_s2 + $0x328] sm:$0xff] }
  0x40   : > { %1302 = vmatprep.subr.bf16.mxu0 %v2337_v55  ;;  %1343 = vmatprep.subr.bf16.mxu1 %v2339_v56  ;;  %v549_v54 = vld [vmem:[%s3082_s2 + $0x368] sm:$0xff]  ;;  %v2324_v55 = vcombine.low %v524_v43, %v532_v44  ;;  %v2326_v56 = vcombine.low %v525_v45, %v533_v46  ;;  %v526_v44 = vld [vmem:[%s3082_s2 + $0x2b0] sm:$0xff]  ;;  %v527_v46 = vld [vmem:[%s3082_s2 + $0x2b8] sm:$0xff] }
  0x41   : > { %v2343_v58 = vcombine.high %v541_v53, %v549_v54  ;;  %v534_v45 = vld [vmem:[%s3082_s2 + $0x2f0] sm:$0xff] }
  0x43   : > { %1303 = vmatpush1.bf16.msra.mxu0 %v2336_v61  ;;  %1344 = vmatpush1.bf16.msra.mxu1 %v2338_v62  ;;  %v557_v61 = vld [vmem:[%s3082_s2 + $0x3a8] sm:$0xff] }
  0x44   : > { %1304 = vmatprep.subr.bf16.mxu0 %v2353_v63  ;;  %1345 = vmatprep.subr.bf16.mxu1 %v2355_v0  ;;  %v565_v62 = vld [vmem:[%s3082_s2 + $0x3e8] sm:$0xff]  ;;  %v2340_v63 = vcombine.low %v540_v51, %v548_v52  ;;  %v2342_v0 = vcombine.low %v541_v53, %v549_v54  ;;  %v542_v52 = vld [vmem:[%s3082_s2 + $0x330] sm:$0xff]  ;;  %v543_v54 = vld [vmem:[%s3082_s2 + $0x338] sm:$0xff] }
  0x45   : > { %v2359_v2 = vcombine.high %v557_v61, %v565_v62  ;;  %v550_v53 = vld [vmem:[%s3082_s2 + $0x370] sm:$0xff] }
  0x47   : > { %1305 = vmatpush1.bf16.msra.mxu0 %v2352_v5  ;;  %1346 = vmatpush1.bf16.msra.mxu1 %v2354_v6  ;;  %v447_v5 = vld [vmem:[%s3082_s2 + $0x38] sm:$0xff] }
  0x48   : > { %1372 = vmatprep.subr.bf16.mxu0 %v2245_v7  ;;  %1413 = vmatprep.subr.bf16.mxu1 %v2247_v9  ;;  %v455_v6 = vld [vmem:[%s3082_s2 + $0x78] sm:$0xff]  ;;  %v2356_v7 = vcombine.low %v556_v59, %v564_v60  ;;  %v2358_v9 = vcombine.low %v557_v61, %v565_v62  ;;  %v558_v60 = vld [vmem:[%s3082_s2 + $0x3b0] sm:$0xff] }
  0x49   : > { %v2251_v11 = vcombine.high %v447_v5, %v455_v6  ;;  %v566_v61 = vld [vmem:[%s3082_s2 + $0x3f0] sm:$0xff]  ;;  %v559_v62 = vld [vmem:[%s3082_s2 + $0x3b8] sm:$0xff] }
  0x4a   : > { %1323 = vmatmul.mubr.bf16.vlgmr.msra.gmra.mrb[4].mxu0 %v2631_v12  ;;  %1364 = vmatmul.mubr.bf16.vlgmr.msra.gmra.mrb[4].mxu1 %v2631_v12 }
  0x4b   : > { %1373 = vmatpush1.bf16.msra.mxu0 %v2244_v15  ;;  %1414 = vmatpush1.bf16.msra.mxu1 %v2246_v16  ;;  %v463_v15 = vld [vmem:[%s3082_s2 + $0xb8] sm:$0xff] }
  0x4c   : > { %1374 = vmatprep.subr.bf16.mxu0 %v2261_v17  ;;  %1415 = vmatprep.subr.bf16.mxu1 %v2263_v18  ;;  %v471_v16 = vld [vmem:[%s3082_s2 + $0xf8] sm:$0xff]  ;;  %v2248_v17 = vcombine.low %v446_v3, %v454_v4  ;;  %v2250_v18 = vcombine.low %v447_v5, %v455_v6  ;;  %v2360_v4 = vcombine.low %v558_v60, %v566_v61  ;;  %v1591_v6 = vlaneseq }
  0x4d   : > { %1404 = vmatprep.mubr.bf16.mxu0 %v2434_v8  ;;  %1445 = vmatprep.mubr.bf16.mxu1 %v2434_v8  ;;  %v2267_v20 = vcombine.high %v463_v15, %v471_v16 }
  0x4f   : > { %1375 = vmatpush1.bf16.msra.mxu0 %v2260_v23  ;;  %1416 = vmatpush1.bf16.msra.mxu1 %v2262_v24  ;;  %v479_v23 = vld [vmem:[%s3082_s2 + $0x138] sm:$0xff] }
  0x50   : > { %1376 = vmatprep.subr.bf16.mxu0 %v2277_v25  ;;  %1417 = vmatprep.subr.bf16.mxu1 %v2279_v26  ;;  %v487_v24 = vld [vmem:[%s3082_s2 + $0x178] sm:$0xff]  ;;  %v2264_v25 = vcombine.low %v462_v13, %v470_v14  ;;  %v2266_v26 = vcombine.low %v463_v15, %v471_v16 }
  0x51   : > { %v2283_v28 = vcombine.high %v479_v23, %v487_v24 }
  0x53   : > { %1377 = vmatpush1.bf16.msra.mxu0 %v2276_v31  ;;  %1418 = vmatpush1.bf16.msra.mxu1 %v2278_v32  ;;  %v495_v31 = vld [vmem:[%s3082_s2 + $0x1b8] sm:$0xff] }
  0x54   : > { %1378 = vmatprep.subr.bf16.mxu0 %v2293_v33  ;;  %1419 = vmatprep.subr.bf16.mxu1 %v2295_v34  ;;  %v503_v32 = vld [vmem:[%s3082_s2 + $0x1f8] sm:$0xff]  ;;  %v2280_v33 = vcombine.low %v478_v21, %v486_v22  ;;  %v2282_v34 = vcombine.low %v479_v23, %v487_v24 }
  0x55   : > { %v2299_v36 = vcombine.high %v495_v31, %v503_v32 }
  0x57   : > { %1379 = vmatpush1.bf16.msra.mxu0 %v2292_v39  ;;  %1420 = vmatpush1.bf16.msra.mxu1 %v2294_v40  ;;  %v519_v39 = vld [vmem:[%s3082_s2 + $0x278] sm:$0xff]  ;;  %v2296_v40 = vcombine.low %v494_v29, %v502_v30 }
  0x58   : > { %1380 = vmatprep.subr.bf16.mxu0 %v2309_v41  ;;  %1421 = vmatprep.subr.bf16.mxu1 %v2311_v42  ;;  %v2298_v41 = vcombine.low %v495_v31, %v503_v32  ;;  %v2313_v42 = vcombine.high %v510_v37, %v518_v38 }
  0x5b   : > { %1381 = vmatpush1.bf16.msra.mxu0 %v2308_v47  ;;  %1422 = vmatpush1.bf16.msra.mxu1 %v2310_v48  ;;  %v535_v47 = vld [vmem:[%s3082_s2 + $0x2f8] sm:$0xff]  ;;  %v2312_v48 = vcombine.low %v510_v37, %v518_v38 }
  0x5c   : > { %1382 = vmatprep.subr.bf16.mxu0 %v2325_v49  ;;  %1423 = vmatprep.subr.bf16.mxu1 %v2327_v50  ;;  %v2329_v50 = vcombine.high %v526_v44, %v534_v45  ;;  %v2331_v51 = vcombine.high %v527_v46, %v535_v47 }
  0x5f   : > { %1383 = vmatpush1.bf16.msra.mxu0 %v2324_v55  ;;  %1424 = vmatpush1.bf16.msra.mxu1 %v2326_v56  ;;  %v551_v55 = vld [vmem:[%s3082_s2 + $0x378] sm:$0xff]  ;;  %v2328_v56 = vcombine.low %v526_v44, %v534_v45 }
  0x60   : > { %1384 = vmatprep.subr.bf16.mxu0 %v2341_v57  ;;  %1425 = vmatprep.subr.bf16.mxu1 %v2343_v58  ;;  %v2330_v57 = vcombine.low %v527_v46, %v535_v47  ;;  %v2345_v58 = vcombine.high %v542_v52, %v550_v53  ;;  %v2347_v59 = vcombine.high %v543_v54, %v551_v55 }
  0x63   : > { %1385 = vmatpush1.bf16.msra.mxu0 %v2340_v63  ;;  %1426 = vmatpush1.bf16.msra.mxu1 %v2342_v0  ;;  %v567_v63 = vld [vmem:[%s3082_s2 + $0x3f8] sm:$0xff]  ;;  %v2344_v0 = vcombine.low %v542_v52, %v550_v53 }
  0x64   : > { %1386 = vmatprep.subr.bf16.mxu0 %v2357_v1  ;;  %1427 = vmatprep.subr.bf16.mxu1 %v2359_v2  ;;  %v2346_v1 = vcombine.low %v543_v54, %v551_v55  ;;  %v2361_v2 = vcombine.high %v558_v60, %v566_v61  ;;  %v2363_v3 = vcombine.high %v559_v62, %v567_v63 }
  0x65   : > { %v2362_v5 = vcombine.low %v559_v62, %v567_v63 }
  0x67   : > { %1387 = vmatpush1.bf16.msra.mxu0 %v2356_v7  ;;  %1428 = vmatpush1.bf16.msra.mxu1 %v2358_v9  ;;  %v2911_v7 = vshrl.u32 %v1591_v6, 7 }
  0x68   : > { %1454 = vmatprep.subr.bf16.mxu0 %v2249_v10  ;;  %1495 = vmatprep.subr.bf16.mxu1 %v2251_v11  ;;  %v2917_v10 = vld [vmem:[%s3083_s3] sm:$0xff] }
  0x69   : > { %v1593_v9 = vsub.s32 0, %v2911_v7  ;;  %v1601_v11 = vsub.s32 2, %v2911_v7  ;;  %v1597_v13 = vsub.s32 1, %v2911_v7  ;;  %v1605_v14 = vsub.s32 3, %v2911_v7 }
  0x6a   : > { %1405 = vmatmul.mubr.bf16.vlgmr.msra.gmra.mrb[8].mxu0 %v2631_v12  ;;  %1446 = vmatmul.mubr.bf16.vlgmr.msra.gmra.mrb[8].mxu1 %v2631_v12 }
  0x6b   : > { %1455 = vmatpush1.bf16.msra.mxu0 %v2248_v17  ;;  %1496 = vmatpush1.bf16.msra.mxu1 %v2250_v18  ;;  %v1602_v15 = vrot.slane %v2917_v10, %v1601_v11  ;;  %v1598_v16 = vrot.slane %v2917_v10, %v1597_v13  ;;  %v1606_v17 = vrot.slane %v2917_v10, %v1605_v14 }
  0x6c   : > { %1456 = vmatprep.subr.bf16.mxu0 %v2265_v19  ;;  %1497 = vmatprep.subr.bf16.mxu1 %v2267_v20 }
  0x6d   : > { %1486 = vmatprep.mubr.bf16.mxu0 %v2434_v8  ;;  %1527 = vmatprep.mubr.bf16.mxu1 %v2434_v8  ;;  %v511_v8 = vld [vmem:[%s3082_s2 + $0x238] sm:$0xff] }
  0x6e   : > { %v2315_v43 = vcombine.high %v511_v8, %v519_v39  ;;  %v2314_v49 = vcombine.low %v511_v8, %v519_v39 }
  0x6f   : > { %1457 = vmatpush1.bf16.msra.mxu0 %v2264_v25  ;;  %1498 = vmatpush1.bf16.msra.mxu1 %v2266_v26 }
  0x70   : > { %1458 = vmatprep.subr.bf16.mxu0 %v2281_v27  ;;  %1499 = vmatprep.subr.bf16.mxu1 %v2283_v28 }
  0x73   : > { %1459 = vmatpush1.bf16.msra.mxu0 %v2280_v33  ;;  %1500 = vmatpush1.bf16.msra.mxu1 %v2282_v34 }
  0x74   : > { %1460 = vmatprep.subr.bf16.mxu0 %v2297_v35  ;;  %1501 = vmatprep.subr.bf16.mxu1 %v2299_v36 }
  0x77   : > { %1461 = vmatpush1.bf16.msra.mxu0 %v2296_v40  ;;  %1502 = vmatpush1.bf16.msra.mxu1 %v2298_v41 }
  0x78   : > { %1462 = vmatprep.subr.bf16.mxu0 %v2313_v42  ;;  %1503 = vmatprep.subr.bf16.mxu1 %v2315_v43 }
  0x7b   : > { %1463 = vmatpush1.bf16.msra.mxu0 %v2312_v48  ;;  %1504 = vmatpush1.bf16.msra.mxu1 %v2314_v49 }
  0x7c   : > { %1464 = vmatprep.subr.bf16.mxu0 %v2329_v50  ;;  %1505 = vmatprep.subr.bf16.mxu1 %v2331_v51 }
  0x7f   : > { %1465 = vmatpush1.bf16.msra.mxu0 %v2328_v56  ;;  %1506 = vmatpush1.bf16.msra.mxu1 %v2330_v57 }
  0x80   : > { %1466 = vmatprep.subr.bf16.mxu0 %v2345_v58  ;;  %1507 = vmatprep.subr.bf16.mxu1 %v2347_v59 }
  0x83   : > { %1467 = vmatpush1.bf16.msra.mxu0 %v2344_v0  ;;  %1508 = vmatpush1.bf16.msra.mxu1 %v2346_v1 }
  0x84   : > { %1468 = vmatprep.subr.bf16.mxu0 %v2361_v2  ;;  %1509 = vmatprep.subr.bf16.mxu1 %v2363_v3 }
  0x87   : > { %1469 = vmatpush1.bf16.msra.mxu0 %v2360_v4  ;;  %1510 = vmatpush1.bf16.msra.mxu1 %v2362_v5 }
  0x8a   : > { %1487 = vmatmul.mubr.bf16.vlgmr.msra.gmra.mrb[12].mxu0 %v2631_v12  ;;  %1528 = vmatmul.mubr.bf16.vlgmr.msra.gmra.mrb[12].mxu1 %v2631_v12  ;;  %v1594_v12 = vrot.slane %v2917_v10, %v1593_v9 }
  0xfd   : > { %v1242_v18 = vpop.f32.mrb[0].mxu0  ;;  %v1283_v20 = vpop.f32.mrb[0].mxu1 }
  0xfe   : > { %v1671_v19 = vadd.f32 %v1594_v12, %v1242_v18  ;;  %v1244_v21 = vpop.f32.mrb[1].mxu0  ;;  %v2935_v22 = vadd.f32 %v1602_v15, %v1283_v20  ;;  %v1285_v24 = vpop.f32.mrb[1].mxu1 }
  0xff   : > { %v1672_v23 = vadd.f32 %v1598_v16, %v1244_v21  ;;  %v1246_v25 = vpop.f32.mrb[2].mxu0  ;;  %v2937_v28 = vadd.f32 %v1606_v17, %v1285_v24  ;;  %v1287_v29 = vpop.f32.mrb[2].mxu1 }
 0x100   : > { %v1687_v26 = vrot.slane %v1671_v19, 4  ;;  %v1783_v27 = vmul.f32 %v1671_v19, %v1671_v19  ;;  %v1247_v30 = vpop.f32.mrb[3].mxu0  ;;  %v1699_v31 = vrot.slane %v2935_v22, 4  ;;  %v1785_v32 = vmul.f32 %v2935_v22, %v2935_v22  ;;  %v1288_v35 = vpop.f32.mrb[3].mxu1 }
 0x101   : > { %v1693_v33 = vrot.slane %v1672_v23, 4  ;;  %v1784_v34 = vmul.f32 %v1672_v23, %v1672_v23  ;;  %v2377_v38 = vpack.c.bf16 %v1672_v23, %v1671_v19  ;;  %v1705_v8 = vrot.slane %v2937_v28, 4 }
 0x102   : > { %v1688_v36 = vadd.f32 %v1687_v26, %v1671_v19  ;;  %v1799_v37 = vrot.slane %v1783_v27, 4  ;;  %v1700_v39 = vadd.f32 %v1699_v31, %v2935_v22  ;;  %v1811_v40 = vrot.slane %v1785_v32, 4 }
 0x103   : > { %v1694_v41 = vadd.f32 %v1693_v33, %v1672_v23  ;;  %v1805_v42 = vrot.slane %v1784_v34, 4  ;;  %1991 = vst [vmem:[%s2942_s19] sm:$0xff] %v2377_v38  ;;  %v1706_v45 = vadd.f32 %v1705_v8, %v2937_v28  ;;  %v1786_v46 = vmul.f32 %v2937_v28, %v2937_v28 }
 0x104   : > { %v1689_v43 = vrot.slane %v1688_v36, 2  ;;  %v1800_v44 = vadd.f32 %v1799_v37, %v1783_v27  ;;  %v1701_v47 = vrot.slane %v1700_v39, 2  ;;  %v1812_v48 = vadd.f32 %v1811_v40, %v1785_v32 }
 0x105   : > { %v1695_v49 = vrot.slane %v1694_v41, 2  ;;  %v1806_v50 = vadd.f32 %v1805_v42, %v1784_v34  ;;  %v1707_v53 = vrot.slane %v1706_v45, 2  ;;  %v1817_v54 = vrot.slane %v1786_v46, 4 }
 0x106   : > { %v1690_v51 = vadd.f32 %v1689_v43, %v1688_v36  ;;  %v1801_v52 = vrot.slane %v1800_v44, 2  ;;  %v1702_v55 = vadd.f32 %v1701_v47, %v1700_v39  ;;  %v1813_v56 = vrot.slane %v1812_v48, 2 }
 0x107   : > { %v1696_v57 = vadd.f32 %v1695_v49, %v1694_v41  ;;  %v1807_v58 = vrot.slane %v1806_v50, 2  ;;  %v1708_v61 = vadd.f32 %v1707_v53, %v1706_v45  ;;  %v1818_v62 = vadd.f32 %v1817_v54, %v1786_v46 }
 0x108   : > { %v1691_v59 = vrot.slane %v1690_v51, 1  ;;  %v1802_v60 = vadd.f32 %v1801_v52, %v1800_v44  ;;  %v1703_v63 = vrot.slane %v1702_v55, 1  ;;  %v1814_v0 = vadd.f32 %v1813_v56, %v1812_v48 }
 0x109   : > { %v1697_v1 = vrot.slane %v1696_v57, 1  ;;  %v1808_v2 = vadd.f32 %v1807_v58, %v1806_v50  ;;  %v1709_v5 = vrot.slane %v1708_v61, 1  ;;  %v1819_v6 = vrot.slane %v1818_v62, 2 }
 0x10a   : > { %v1692_v3 = vadd.f32 %v1691_v59, %v1690_v51  ;;  %v1803_v4 = vrot.slane %v1802_v60, 1  ;;  %v1704_v12 = vadd.f32 %v1703_v63, %v1702_v55  ;;  %v1815_v15 = vrot.slane %v1814_v0, 1 }
 0x10b   : > { %v1698_v16 = vadd.f32 %v1697_v1, %v1696_v57  ;;  %v1809_v17 = vrot.slane %v1808_v2, 1  ;;  %v1710_v19 = vadd.f32 %v1709_v5, %v1708_v61  ;;  %v1820_v20 = vadd.f32 %v1819_v6, %v1818_v62 }
 0x10c   : > { %v1804_v18 = vadd.f32 %v1803_v4, %v1802_v60  ;;  %1895 = vst [vmem:[%s2957_s26] sm:$0xff] %v1692_v3  ;;  %v2378_v21 = vpack.c.bf16 %v2937_v28, %v2935_v22  ;;  %v1816_v23 = vadd.f32 %v1815_v15, %v1814_v0  ;;  %1897 = vst [vmem:[%s2957_s26 + $0x10] sm:$0xff] %v1704_v12  ;;  %v1609_v27 = vsub.s32 4, %v2911_v7 }
 0x10d   : > { %v1810_v24 = vadd.f32 %v1809_v17, %v1808_v2  ;;  %1896 = vst [vmem:[%s2957_s26 + $0x8] sm:$0xff] %v1698_v16  ;;  %v1821_v25 = vrot.slane %v1820_v20, 1  ;;  %1898 = vst [vmem:[%s2957_s26 + $0x18] sm:$0xff] %v1710_v19  ;;  %v1617_v29 = vsub.s32 6, %v2911_v7  ;;  %v1613_v30 = vsub.s32 5, %v2911_v7 }
 0x10e   : > { %1911 = vst [vmem:[%s2962_s28] sm:$0xff] %v1804_v18  ;;  %1992 = vst [vmem:[%s2942_s19 + $0x8] sm:$0xff] %v2378_v21  ;;  %v1621_v22 = vsub.s32 7, %v2911_v7  ;;  %v1610_v28 = vrot.slane %v2917_v10, %v1609_v27 }
 0x10f   : > { %1913 = vst [vmem:[%s2962_s28 + $0x10] sm:$0xff] %v1816_v23  ;;  %1912 = vst [vmem:[%s2962_s28 + $0x8] sm:$0xff] %v1810_v24  ;;  %v1822_v26 = vadd.f32 %v1821_v25, %v1820_v20  ;;  %v1618_v31 = vrot.slane %v2917_v10, %v1617_v29  ;;  %v1614_v32 = vrot.slane %v2917_v10, %v1613_v30 }
 0x110   : > { %v1622_v33 = vrot.slane %v2917_v10, %v1621_v22 }
 0x111   : > { %1914 = vst [vmem:[%s2962_s28 + $0x18] sm:$0xff] %v1822_v26 }
 0x11d   : > { %v1324_v34 = vpop.f32.mrb[4].mxu0  ;;  %v1365_v36 = vpop.f32.mrb[4].mxu1 }
 0x11e   : > { %v1675_v35 = vadd.f32 %v1610_v28, %v1324_v34  ;;  %v1326_v37 = vpop.f32.mrb[5].mxu0  ;;  %v2991_v38 = vadd.f32 %v1618_v31, %v1365_v36  ;;  %v1367_v39 = vpop.f32.mrb[5].mxu1 }
 0x11f   : > { %v1676_v8 = vadd.f32 %v1614_v32, %v1326_v37  ;;  %v1328_v40 = vpop.f32.mrb[6].mxu0  ;;  %v1678_v43 = vadd.f32 %v1622_v33, %v1367_v39  ;;  %v1369_v44 = vpop.f32.mrb[6].mxu1 }
 0x120   : > { %v1711_v41 = vrot.slane %v1675_v35, 4  ;;  %v1787_v42 = vmul.f32 %v1675_v35, %v1675_v35  ;;  %v1329_v45 = vpop.f32.mrb[7].mxu0  ;;  %v1723_v46 = vrot.slane %v2991_v38, 4  ;;  %v1789_v10 = vmul.f32 %v2991_v38, %v2991_v38  ;;  %v1370_v49 = vpop.f32.mrb[7].mxu1 }
 0x121   : > { %v1717_v47 = vrot.slane %v1676_v8, 4  ;;  %v1788_v48 = vmul.f32 %v1676_v8, %v1676_v8  ;;  %v2379_v52 = vpack.c.bf16 %v1676_v8, %v1675_v35  ;;  %v1729_v53 = vrot.slane %v1678_v43, 4 }
 0x122   : > { %v1712_v50 = vadd.f32 %v1711_v41, %v1675_v35  ;;  %v1823_v51 = vrot.slane %v1787_v42, 4  ;;  %v1724_v54 = vadd.f32 %v1723_v46, %v2991_v38  ;;  %v1835_v55 = vrot.slane %v1789_v10, 4  ;;  %v3011_v46 = vld [vmem:[%s3083_s3 + $0x8] sm:$0xff] }
 0x123   : > { %v1718_v56 = vadd.f32 %v1717_v47, %v1676_v8  ;;  %v1829_v57 = vrot.slane %v1788_v48, 4  ;;  %1993 = vst [vmem:[%s2942_s19 + $0x10] sm:$0xff] %v2379_v52  ;;  %v1730_v60 = vadd.f32 %v1729_v53, %v1678_v43  ;;  %v1790_v61 = vmul.f32 %v1678_v43, %v1678_v43 }
 0x124   : > { %v1713_v58 = vrot.slane %v1712_v50, 2  ;;  %v1824_v59 = vadd.f32 %v1823_v51, %v1787_v42  ;;  %v1725_v62 = vrot.slane %v1724_v54, 2  ;;  %v1836_v63 = vadd.f32 %v1835_v55, %v1789_v10 }
 0x125   : > { %v1719_v0 = vrot.slane %v1718_v56, 2  ;;  %v1830_v1 = vadd.f32 %v1829_v57, %v1788_v48  ;;  %v1731_v4 = vrot.slane %v1730_v60, 2  ;;  %v1841_v5 = vrot.slane %v1790_v61, 4 }
 0x126   : > { %v1714_v2 = vadd.f32 %v1713_v58, %v1712_v50  ;;  %v1825_v3 = vrot.slane %v1824_v59, 2  ;;  %v1726_v6 = vadd.f32 %v1725_v62, %v1724_v54  ;;  %v1837_v12 = vrot.slane %v1836_v63, 2 }
 0x127   : > { %v1720_v15 = vadd.f32 %v1719_v0, %v1718_v56  ;;  %v1831_v16 = vrot.slane %v1830_v1, 2  ;;  %v1732_v19 = vadd.f32 %v1731_v4, %v1730_v60  ;;  %v1842_v20 = vadd.f32 %v1841_v5, %v1790_v61 }
 0x128   : > { %v1715_v17 = vrot.slane %v1714_v2, 1  ;;  %v1826_v18 = vadd.f32 %v1825_v3, %v1824_v59  ;;  %v1727_v21 = vrot.slane %v1726_v6, 1  ;;  %v1838_v23 = vadd.f32 %v1837_v12, %v1836_v63 }
 0x129   : > { %v1721_v24 = vrot.slane %v1720_v15, 1  ;;  %v1832_v25 = vadd.f32 %v1831_v16, %v1830_v1  ;;  %v1733_v31 = vrot.slane %v1732_v19, 1  ;;  %v1843_v32 = vrot.slane %v1842_v20, 2 }
 0x12a   : > { %v1716_v26 = vadd.f32 %v1715_v17, %v1714_v2  ;;  %v1827_v28 = vrot.slane %v1826_v18, 1  ;;  %v1728_v33 = vadd.f32 %v1727_v21, %v1726_v6  ;;  %v1839_v34 = vrot.slane %v1838_v23, 1 }
 0x12b   : > { %v1722_v35 = vadd.f32 %v1721_v24, %v1720_v15  ;;  %v1833_v36 = vrot.slane %v1832_v25, 1  ;;  %v1734_v8 = vadd.f32 %v1733_v31, %v1732_v19  ;;  %v1844_v39 = vadd.f32 %v1843_v32, %v1842_v20 }
 0x12c   : > { %v1828_v37 = vadd.f32 %v1827_v28, %v1826_v18  ;;  %1899 = vst [vmem:[%s2957_s26 + $0x20] sm:$0xff] %v1716_v26  ;;  %v2380_v40 = vpack.c.bf16 %v1678_v43, %v2991_v38  ;;  %v1840_v41 = vadd.f32 %v1839_v34, %v1838_v23  ;;  %1901 = vst [vmem:[%s2957_s26 + $0x30] sm:$0xff] %v1728_v33 }
 0x12d   : > { %v1834_v42 = vadd.f32 %v1833_v36, %v1832_v25  ;;  %1900 = vst [vmem:[%s2957_s26 + $0x28] sm:$0xff] %v1722_v35  ;;  %v1845_v44 = vrot.slane %v1844_v39, 1  ;;  %1902 = vst [vmem:[%s2957_s26 + $0x38] sm:$0xff] %v1734_v8  ;;  %v1626_v38 = vrot.slane %v3011_v46, %v1593_v9  ;;  %v1634_v43 = vrot.slane %v3011_v46, %v1601_v11 }
 0x12e   : > { %1915 = vst [vmem:[%s2962_s28 + $0x20] sm:$0xff] %v1828_v37  ;;  %1994 = vst [vmem:[%s2942_s19 + $0x18] sm:$0xff] %v2380_v40  ;;  %v1630_v10 = vrot.slane %v3011_v46, %v1597_v13  ;;  %v1638_v47 = vrot.slane %v3011_v46, %v1605_v14 }
 0x12f   : > { %1917 = vst [vmem:[%s2962_s28 + $0x30] sm:$0xff] %v1840_v41  ;;  %1916 = vst [vmem:[%s2962_s28 + $0x28] sm:$0xff] %v1834_v42  ;;  %v1846_v45 = vadd.f32 %v1845_v44, %v1844_v39 }
 0x131   : > { %1918 = vst [vmem:[%s2962_s28 + $0x38] sm:$0xff] %v1846_v45 }
 0x13d   : > { %v1406_v48 = vpop.f32.mrb[8].mxu0  ;;  %v1447_v50 = vpop.f32.mrb[8].mxu1 }
 0x13e   : > { %v1679_v49 = vadd.f32 %v1626_v38, %v1406_v48  ;;  %v1408_v51 = vpop.f32.mrb[9].mxu0  ;;  %v3025_v52 = vadd.f32 %v1634_v43, %v1447_v50  ;;  %v1449_v9 = vpop.f32.mrb[9].mxu1 }
 0x13f   : > { %v1680_v53 = vadd.f32 %v1630_v10, %v1408_v51  ;;  %v1410_v54 = vpop.f32.mrb[10].mxu0  ;;  %v1682_v11 = vadd.f32 %v1638_v47, %v1449_v9  ;;  %v1451_v57 = vpop.f32.mrb[10].mxu1 }
 0x140   : > { %v1735_v55 = vrot.slane %v1679_v49, 4  ;;  %v1791_v56 = vmul.f32 %v1679_v49, %v1679_v49  ;;  %v1411_v58 = vpop.f32.mrb[11].mxu0  ;;  %v1747_v13 = vrot.slane %v3025_v52, 4  ;;  %v1793_v14 = vmul.f32 %v3025_v52, %v3025_v52  ;;  %v1452_v61 = vpop.f32.mrb[11].mxu1 }
 0x141   : > { %v1741_v59 = vrot.slane %v1680_v53, 4  ;;  %v1792_v60 = vmul.f32 %v1680_v53, %v1680_v53  ;;  %v2381_v0 = vpack.c.bf16 %v1680_v53, %v1679_v49  ;;  %v1753_v1 = vrot.slane %v1682_v11, 4 }
 0x142   : > { %v1736_v62 = vadd.f32 %v1735_v55, %v1679_v49  ;;  %v1847_v63 = vrot.slane %v1791_v56, 4  ;;  %v1748_v2 = vadd.f32 %v1747_v13, %v3025_v52  ;;  %v1859_v3 = vrot.slane %v1793_v14, 4 }
 0x143   : > { %v1742_v4 = vadd.f32 %v1741_v59, %v1680_v53  ;;  %v1853_v5 = vrot.slane %v1792_v60, 4  ;;  %1995 = vst [vmem:[%s2942_s19 + $0x20] sm:$0xff] %v2381_v0  ;;  %v1754_v15 = vadd.f32 %v1753_v1, %v1682_v11  ;;  %v1794_v16 = vmul.f32 %v1682_v11, %v1682_v11 }
 0x144   : > { %v1737_v6 = vrot.slane %v1736_v62, 2  ;;  %v1848_v12 = vadd.f32 %v1847_v63, %v1791_v56  ;;  %v1749_v17 = vrot.slane %v1748_v2, 2  ;;  %v1860_v18 = vadd.f32 %v1859_v3, %v1793_v14 }
 0x145   : > { %v1743_v19 = vrot.slane %v1742_v4, 2  ;;  %v1854_v20 = vadd.f32 %v1853_v5, %v1792_v60  ;;  %v1755_v24 = vrot.slane %v1754_v15, 2  ;;  %v1865_v25 = vrot.slane %v1794_v16, 4 }
 0x146   : > { %v1738_v21 = vadd.f32 %v1737_v6, %v1736_v62  ;;  %v1849_v23 = vrot.slane %v1848_v12, 2  ;;  %v1750_v26 = vadd.f32 %v1749_v17, %v1748_v2  ;;  %v1861_v28 = vrot.slane %v1860_v18, 2 }
 0x147   : > { %v1744_v31 = vadd.f32 %v1743_v19, %v1742_v4  ;;  %v1855_v32 = vrot.slane %v1854_v20, 2  ;;  %v1756_v35 = vadd.f32 %v1755_v24, %v1754_v15  ;;  %v1866_v36 = vadd.f32 %v1865_v25, %v1794_v16 }
 0x148   : > { %v1739_v33 = vrot.slane %v1738_v21, 1  ;;  %v1850_v34 = vadd.f32 %v1849_v23, %v1848_v12  ;;  %v1751_v37 = vrot.slane %v1750_v26, 1  ;;  %v1862_v8 = vadd.f32 %v1861_v28, %v1860_v18 }
 0x149   : > { %v1745_v39 = vrot.slane %v1744_v31, 1  ;;  %v1856_v40 = vadd.f32 %v1855_v32, %v1854_v20  ;;  %v1757_v44 = vrot.slane %v1756_v35, 1  ;;  %v1867_v45 = vrot.slane %v1866_v36, 2 }
 0x14a   : > { %v1740_v41 = vadd.f32 %v1739_v33, %v1738_v21  ;;  %v1851_v42 = vrot.slane %v1850_v34, 1  ;;  %v1752_v38 = vadd.f32 %v1751_v37, %v1750_v26  ;;  %v1863_v43 = vrot.slane %v1862_v8, 1 }
 0x14b   : > { %v1746_v10 = vadd.f32 %v1745_v39, %v1744_v31  ;;  %v1857_v47 = vrot.slane %v1856_v40, 1  ;;  %v1758_v49 = vadd.f32 %v1757_v44, %v1756_v35  ;;  %v1868_v50 = vadd.f32 %v1867_v45, %v1866_v36 }
 0x14c   : > { %v1852_v48 = vadd.f32 %v1851_v42, %v1850_v34  ;;  %1903 = vst [vmem:[%s2957_s26 + $0x40] sm:$0xff] %v1740_v41  ;;  %v2382_v51 = vpack.c.bf16 %v1682_v11, %v3025_v52  ;;  %v1864_v53 = vadd.f32 %v1863_v43, %v1862_v8  ;;  %1905 = vst [vmem:[%s2957_s26 + $0x50] sm:$0xff] %v1752_v38 }
 0x14d   : > { %v1858_v9 = vadd.f32 %v1857_v47, %v1856_v40  ;;  %1904 = vst [vmem:[%s2957_s26 + $0x48] sm:$0xff] %v1746_v10  ;;  %v1869_v54 = vrot.slane %v1868_v50, 1  ;;  %1906 = vst [vmem:[%s2957_s26 + $0x58] sm:$0xff] %v1758_v49  ;;  %v1642_v56 = vrot.slane %v3011_v46, %v1609_v27  ;;  %v1650_v52 = vrot.slane %v3011_v46, %v1617_v29 }
 0x14e   : > { %1919 = vst [vmem:[%s2962_s28 + $0x40] sm:$0xff] %v1852_v48  ;;  %1996 = vst [vmem:[%s2942_s19 + $0x28] sm:$0xff] %v2382_v51  ;;  %v1646_v11 = vrot.slane %v3011_v46, %v1613_v30  ;;  %v1654_v57 = vrot.slane %v3011_v46, %v1621_v22 }
 0x14f   : > { %1921 = vst [vmem:[%s2962_s28 + $0x50] sm:$0xff] %v1864_v53  ;;  %1920 = vst [vmem:[%s2962_s28 + $0x48] sm:$0xff] %v1858_v9  ;;  %v1870_v55 = vadd.f32 %v1869_v54, %v1868_v50 }
 0x151   : > { %1922 = vst [vmem:[%s2962_s28 + $0x58] sm:$0xff] %v1870_v55 }
 0x15d   : > { %v1488_v58 = vpop.f32.mrb[12].mxu0  ;;  %v1529_v14 = vpop.f32.mrb[12].mxu1 }
 0x15e   : > { %v1683_v13 = vadd.f32 %v1642_v56, %v1488_v58  ;;  %v1490_v59 = vpop.f32.mrb[13].mxu0  ;;  %v3054_v60 = vadd.f32 %v1650_v52, %v1529_v14  ;;  %v1531_v27 = vpop.f32.mrb[13].mxu1 }
 0x15f   : > { %v1684_v61 = vadd.f32 %v1646_v11, %v1490_v59  ;;  %v1492_v62 = vpop.f32.mrb[14].mxu0  ;;  %v1686_v29 = vadd.f32 %v1654_v57, %v1531_v27  ;;  %v1533_v1 = vpop.f32.mrb[14].mxu1 }
 0x160   : > { %v1759_v63 = vrot.slane %v1683_v13, 4  ;;  %v1795_v0 = vmul.f32 %v1683_v13, %v1683_v13  ;;  %v1493_v2 = vpop.f32.mrb[15].mxu0  ;;  %v1771_v30 = vrot.slane %v3054_v60, 4  ;;  %v1797_v7 = vmul.f32 %v3054_v60, %v3054_v60  ;;  %v1534_v3 = vpop.f32.mrb[15].mxu1 }
 0x161   : > { %v1765_v22 = vrot.slane %v1684_v61, 4  ;;  %v1796_v46 = vmul.f32 %v1684_v61, %v1684_v61  ;;  %v2383_v6 = vpack.c.bf16 %v1684_v61, %v1683_v13  ;;  %v1777_v12 = vrot.slane %v1686_v29, 4 }
 0x162   : > { %v1760_v4 = vadd.f32 %v1759_v63, %v1683_v13  ;;  %v1871_v5 = vrot.slane %v1795_v0, 4  ;;  %v1772_v15 = vadd.f32 %v1771_v30, %v3054_v60  ;;  %v1883_v16 = vrot.slane %v1797_v7, 4 }
 0x163   : > { %v1766_v17 = vadd.f32 %v1765_v22, %v1684_v61  ;;  %v1877_v18 = vrot.slane %v1796_v46, 4  ;;  %1997 = vst [vmem:[%s2942_s19 + $0x30] sm:$0xff] %v2383_v6  ;;  %v1778_v21 = vadd.f32 %v1777_v12, %v1686_v29  ;;  %v1798_v23 = vmul.f32 %v1686_v29, %v1686_v29 }
 0x164   : > { %v1761_v19 = vrot.slane %v1760_v4, 2  ;;  %v1872_v20 = vadd.f32 %v1871_v5, %v1795_v0  ;;  %v1773_v24 = vrot.slane %v1772_v15, 2  ;;  %v1884_v25 = vadd.f32 %v1883_v16, %v1797_v7 }
 0x165   : > { %v1767_v26 = vrot.slane %v1766_v17, 2  ;;  %v1878_v28 = vadd.f32 %v1877_v18, %v1796_v46  ;;  %v1779_v33 = vrot.slane %v1778_v21, 2  ;;  %v1889_v34 = vrot.slane %v1798_v23, 4 }
 0x166   : > { %v1762_v31 = vadd.f32 %v1761_v19, %v1760_v4  ;;  %v1873_v32 = vrot.slane %v1872_v20, 2  ;;  %v1774_v35 = vadd.f32 %v1773_v24, %v1772_v15  ;;  %v1885_v36 = vrot.slane %v1884_v25, 2 }
 0x167   : > { %v1768_v37 = vadd.f32 %v1767_v26, %v1766_v17  ;;  %v1879_v8 = vrot.slane %v1878_v28, 2  ;;  %v1780_v41 = vadd.f32 %v1779_v33, %v1778_v21  ;;  %v1890_v42 = vadd.f32 %v1889_v34, %v1798_v23 }
 0x168   : > { %v1763_v39 = vrot.slane %v1762_v31, 1  ;;  %v1874_v40 = vadd.f32 %v1873_v32, %v1872_v20  ;;  %v1775_v44 = vrot.slane %v1774_v35, 1  ;;  %v1886_v45 = vadd.f32 %v1885_v36, %v1884_v25 }
 0x169   : > { %v1769_v38 = vrot.slane %v1768_v37, 1  ;;  %v1880_v43 = vadd.f32 %v1879_v8, %v1878_v28  ;;  %v1781_v48 = vrot.slane %v1780_v41, 1  ;;  %v1891_v49 = vrot.slane %v1890_v42, 2 }
 0x16a   : > { %v1764_v10 = vadd.f32 %v1763_v39, %v1762_v31  ;;  %v1875_v47 = vrot.slane %v1874_v40, 1  ;;  %v1776_v50 = vadd.f32 %v1775_v44, %v1774_v35  ;;  %v1887_v51 = vrot.slane %v1886_v45, 1 }
 0x16b   : > { %v1770_v53 = vadd.f32 %v1769_v38, %v1768_v37  ;;  %v1881_v9 = vrot.slane %v1880_v43, 1  ;;  %v1782_v55 = vadd.f32 %v1781_v48, %v1780_v41  ;;  %v1892_v56 = vadd.f32 %v1891_v49, %v1890_v42 }
 0x16c   : > { %v1876_v54 = vadd.f32 %v1875_v47, %v1874_v40  ;;  %1907 = vst [vmem:[%s2957_s26 + $0x60] sm:$0xff] %v1764_v10  ;;  %v2384_v52 = vpack.c.bf16 %v1686_v29, %v3054_v60  ;;  %v1888_v11 = vadd.f32 %v1887_v51, %v1886_v45  ;;  %1909 = vst [vmem:[%s2957_s26 + $0x70] sm:$0xff] %v1776_v50 }
 0x16d   : > { %v1882_v57 = vadd.f32 %v1881_v9, %v1880_v43  ;;  %1908 = vst [vmem:[%s2957_s26 + $0x68] sm:$0xff] %v1770_v53  ;;  %v1893_v58 = vrot.slane %v1892_v56, 1  ;;  %1910 = vst [vmem:[%s2957_s26 + $0x78] sm:$0xff] %v1782_v55 }
 0x16e   : > { %1923 = vst [vmem:[%s2962_s28 + $0x60] sm:$0xff] %v1876_v54  ;;  %1998 = vst [vmem:[%s2942_s19 + $0x38] sm:$0xff] %v2384_v52 }
 0x16f   : > { %1925 = vst [vmem:[%s2962_s28 + $0x70] sm:$0xff] %v1888_v11  ;;  %1924 = vst [vmem:[%s2962_s28 + $0x68] sm:$0xff] %v1882_v57  ;;  %v1894_v13 = vadd.f32 %v1893_v58, %v1892_v56 }
 0x171   : > { %1926 = vst [vmem:[%s2962_s28 + $0x78] sm:$0xff] %v1894_v13 }
 0x172 PF: > { %s18_s25 = sadd.s32 1, %s2432_s25   ;;  %s3087_s23 = smov %s2428_s24 }
 0x173   : > { %p15_p6 = scmp.ge.s32.totalorder %s18_s25, 4   ;;  %s3088_s24 = smov %s3090_s0 }
 0x175   :  { %17 = sbr.rel (!%p15_p6) target bundleno = 2 (0x2), region = 97 }

// kernel: generator_forward.12
= control target key start
LH: loop header
LB: loop body
LE: loop exit
PB: predicated region body
PF: predicated region fallthrough
CT: control target
= control target key end

     0   :  { %s431_s12 = smov 0   ;;  %s461_s0 = inlined_call_operand.vmem [shape: bf16[128,128], index: 0, kind: input, shape index: {}]   ;;  %s462_s1 = inlined_call_operand.vmem [shape: f32[1,128], index: 1, kind: input, shape index: {}]   ;;  %s463_s2 = inlined_call_operand.vmem [shape: f32[1,128], index: 2, kind: input, shape index: {}]   ;;  %s464_s3 = inlined_call_operand.vmem [shape: bf16[128,128], index: 3, kind: output, shape index: {}]  }
   0x1 LB: > { %s324_s13 = sadd.s32 4294967295, %s409_s12   ;;  %p328_p0 = scmp.ge.s32.totalorder %s409_s12, 1  ;;  %s409_s12 = sphi %s431_s12, %s13_s12  }
   0x2   : > { %p138_p1 = scmp.lt.s32.totalorder %s409_s12, 3 }
   0x4   : > { %p139_p2 = pnand %p328_p0, %p138_p1 }
   0x5   : > { %s329_s14 = sshll.u32 (!%p139_p2), %s324_s13, 3  ;;  %v333_v0 = vld [vmem:[%s462_s1] ss:$0 sm:$0xff] (!%p139_p2) }
   0x6   : > { %142 = sbr.rel (%p139_p2) target bundleno = 29 (0x1d), region = 32  ;;  %p163_p3 = scmp.lt.s32.totalorder (!%p139_p2), %s329_s14, 15  ;;  %v334_v9 = vld [vmem:[%s463_s2] ss:$0 sm:$0xff] (!%p139_p2) }
   0xd   : > { %s466_s14 = smov (!%p163_p3, %s329_s14), 15 }
   0xe   : > { %s330_s15 = sshll.u32 %s466_s14, 2 }
   0xf   : > { %s166_s18 = scalar_lea.vmem %s461_s0, %s330_s15  ;;  %s172_s25 = scalar_lea.vmem %s464_s3, %s330_s15 }
  0x10   : > { %v354_v1 = vld [vmem:[%s166_s18] sm:$0xff]   ;;  %v389_v2 = vld [vmem:[%s166_s18 + $0x8] sm:$0xff]   ;;  %v390_v3 = vld [vmem:[%s166_s18 + $0x10] sm:$0xff]  }
  0x11   : > { %v355_v4 = vunpack.c.l.bf16 %v354_v1  ;;  %v356_v5 = vunpack.c.h.bf16 %v354_v1  ;;  %v359_v6 = vunpack.c.l.bf16 %v389_v2  ;;  %v360_v7 = vunpack.c.h.bf16 %v389_v2  ;;  %v391_v8 = vld [vmem:[%s166_s18 + $0x18] sm:$0xff]  }
  0x12   : > { %v363_v10 = vunpack.c.l.bf16 %v390_v3  ;;  %v364_v11 = vunpack.c.h.bf16 %v390_v3  ;;  %v367_v12 = vunpack.c.l.bf16 %v391_v8  ;;  %v368_v13 = vunpack.c.h.bf16 %v391_v8 }
  0x13   : > { %v197_v14 = vmul.f32 %v355_v4, %v333_v0  ;;  %v198_v15 = vmul.f32 %v356_v5, %v333_v0  ;;  %v199_v16 = vmul.f32 %v359_v6, %v333_v0  ;;  %v200_v17 = vmul.f32 %v360_v7, %v333_v0 }
  0x14   : > { %v201_v18 = vmul.f32 %v363_v10, %v333_v0  ;;  %v202_v19 = vmul.f32 %v364_v11, %v333_v0  ;;  %v203_v20 = vmul.f32 %v367_v12, %v333_v0  ;;  %v204_v21 = vmul.f32 %v368_v13, %v333_v0 }
  0x15   : > { %v212_v22 = vadd.f32 %v334_v9, %v197_v14  ;;  %v213_v23 = vadd.f32 %v334_v9, %v198_v15  ;;  %v214_v24 = vadd.f32 %v334_v9, %v199_v16  ;;  %v215_v25 = vadd.f32 %v334_v9, %v200_v17 }
  0x16   : > { %v216_v26 = vadd.f32 %v334_v9, %v201_v18  ;;  %v217_v27 = vadd.f32 %v334_v9, %v202_v19  ;;  %v218_v28 = vadd.f32 %v334_v9, %v203_v20  ;;  %v219_v29 = vadd.f32 %v334_v9, %v204_v21 }
  0x17   : > { %v220_v30 = vmax.f32 %v212_v22, 0.0  ;;  %v221_v31 = vmax.f32 %v213_v23, 0.0  ;;  %v222_v32 = vmax.f32 %v214_v24, 0.0  ;;  %v223_v33 = vmax.f32 %v215_v25, 0.0 }
  0x18   : > { %v224_v34 = vmax.f32 %v216_v26, 0.0  ;;  %v225_v35 = vmax.f32 %v217_v27, 0.0  ;;  %v226_v36 = vmax.f32 %v218_v28, 0.0  ;;  %v227_v37 = vmax.f32 %v219_v29, 0.0 }
  0x19   : > { %v372_v38 = vpack.c.bf16 %v221_v31, %v220_v30  ;;  %v377_v39 = vpack.c.bf16 %v223_v33, %v222_v32 }
  0x1a   : > { %v382_v40 = vpack.c.bf16 %v225_v35, %v224_v34  ;;  %v387_v41 = vpack.c.bf16 %v227_v37, %v226_v36 }
  0x1b   : > { %373 = vst [vmem:[%s172_s25] sm:$0xff] %v372_v38   ;;  %392 = vst [vmem:[%s172_s25 + $0x8] sm:$0xff] %v377_v39  }
  0x1c   : > { %393 = vst [vmem:[%s172_s25 + $0x10] sm:$0xff] %v382_v40   ;;  %394 = vst [vmem:[%s172_s25 + $0x18] sm:$0xff] %v387_v41  }
  0x1d PF: > { %s13_s12 = sadd.s32 1, %s409_s12  }
  0x1e   : > { %p10_p4 = scmp.ge.s32.totalorder %s13_s12, 4  }
  0x20   :  { %12 = sbr.rel (!%p10_p4) target bundleno = 1 (0x1), region = 62 }

// kernel: generator_forward.11
= control target key start
LH: loop header
LB: loop body
LE: loop exit
PB: predicated region body
PF: predicated region fallthrough
CT: control target
= control target key end

     0   :  { %s1164_s0 = inlined_call_operand.vmem [shape: s32[4,4], index: 0, kind: input, shape index: {}]   ;;  %s1165_s1 = inlined_call_operand.vmem [shape: bf16[9,32,128], index: 1, kind: input, shape index: {}]   ;;  %s1166_s2 = inlined_call_operand.vmem [shape: bf16[4,4,128,128], index: 2, kind: input, shape index: {}]   ;;  %s1167_s3 = inlined_call_operand.vmem [shape: f32[1,128], index: 3, kind: input, shape index: {}]   ;;  %s1168_s4 = inlined_call_operand.vmem [shape: bf16[4,32,128], index: 4, kind: output, shape index: {0}]   ;;  %s1169_s5 = inlined_call_operand.vmem [shape: f32[4,16,128], index: 5, kind: output, shape index: {1}]   ;;  %s1170_s6 = inlined_call_operand.vmem [shape: f32[4,16,128], index: 6, kind: output, shape index: {2}]  }
   0x1   :  { %s12_s23 = sshll.u32 %s1164_s0, 4  ;;  %s13_s23 = int_to_ptr.vmem [resolvable:$true] %s12_s23 }
   0x2   :  { %s931_s24 = scalar_lea.vmem %s13_s23, 64  ;;  %p936_p1 = scmp.lt.s32.totalorder %s13_s23, %s13_s23 }
   0x3   :  { %p932_p0 = scmp.ne.s32.totalorder %s13_s23, %s931_s24  ;;  %p937_p2 = scmp.lt.s32.totalorder %s931_s24, %s931_s24 }
   0x5   :  { %p938_p3 = por %p937_p2, %p936_p1 }
   0x7   :  { %p939_p4 = pnand %p938_p3, %p932_p0 }
   0x9   :  { %942 = shalt.err (!%p939_p4)  }
   0xa   :  { %s1001_s25 = smov [#allocation4]  }
   0xb   :  { %15 = dma.vmem_to_smem %s13_s23, 64, %s1001_s25, [#allocation3] }
   0xc   :  { %971 = dma.done.wait [#allocation3], 64 }
   0xd   :  { %972 = vsyncadd [#allocation3], 4294967232 }
   0xe   :  { %17 = sfence }
   0xf   :  { %s1043_s26 = smov 0   ;;  %s1045_s27 = smov 0  }
  0x10   :  { %s1047_s28 = smov 0   ;;  %s1049_s0 = smov 0  }
  0x11   :  { %s1051_s29 = smov 0   ;;  %s1053_s30 = smov 0  }
  0x12   :  { %s1055_s7 = smov 0  }
  0x13 LB: > { %1172 = sst [smem:[#allocation6_spill]] %s995_s30  ;;  %s35_s8 = sadd.s32 1, %s987_s0  ;;  %s999_s7 = sphi %s1055_s7, %s23_s7   ;;  %s995_s30 = sphi %s1053_s30, %s1184_s30   ;;  %s991_s29 = sphi %s1051_s29, %s1183_s29   ;;  %s987_s0 = sphi %s1049_s0, %s1182_s0   ;;  %s983_s28 = sphi %s1047_s28, %s1176_s28   ;;  %s979_s27 = sphi %s1045_s27, %s1181_s27   ;;  %s975_s26 = sphi %s1043_s26, %s1180_s26  }
  0x14   : > { %p36_p5 = scmp.ge.s32.totalorder %s35_s8, 4  ;;  %s38_s9 = sadd.s32 1, %s991_s29 }
  0x15   : > { %p795_p6 = scmp.ge.s32.totalorder %s999_s7, 1  ;;  %p279_p7 = scmp.lt.s32.totalorder %s999_s7, 33 }
  0x16   : > { %s1186_s8 = smov (%p36_p5, %s35_s8), 0  ;;  %s1188_s9 = smov (!%p36_p5, %s38_s9), %s991_s29 }
  0x17   : > { %1173 = sst [smem:[#allocation7_spill]] %s1186_s8  ;;  %p280_p8 = pnand %p795_p6, %p279_p7 }
  0x18   : > { %p40_p9 = scmp.ge.s32.totalorder %s1188_s9, 2  ;;  %s42_s10 = sadd.s32 1, %s995_s30 }
  0x19   : > { %283 = sbr.rel (%p280_p8) target bundleno = 330 (0x14a), region = 32  ;;  %s348_s11 = sshra.s32 (!%p280_p8), %s975_s26, 7 }
  0x1a   : > { %s1190_s9 = smov (%p40_p9, %s1188_s9), 0  ;;  %s1192_s10 = smov (!%p40_p9, %s42_s10), %s995_s30 }
  0x1b   : > { %1174 = sst [smem:[#allocation8_spill]] %s1190_s9  ;;  %p44_p10 = scmp.ge.s32.totalorder %s1192_s10, 4 }
  0x1c   : > { %s353_s12 = sand.u32 (!%p280_p8), 127, %s975_s26  ;;  %s350_s13 = sadd.s32 (!%p280_p8), %s983_s28, %s348_s11 }
  0x1d   : > { %s1194_s10 = smov (%p44_p10, %s1192_s10), 0  ;;  %s797_s14 = sshll.u32 (!%p280_p8), %s979_s27, 1 }
  0x1e   : > { %1175 = sst [smem:[#allocation9_spill]] %s1194_s10  ;;  %s796_s15 = sshll.u32 (!%p280_p8), %s350_s13, 7 }
  0x1f   : > { %p359_p11 = scmp.lt.s32.totalorder (!%p280_p8), %s797_s14, 3  ;;  %s354_s16 = sadd.s32 (!%p280_p8), %s796_s15, %s353_s12 }
  0x20   : > { %p374_p12 = scmp.lt.s32.totalorder %s983_s28, 3  ;;  %s355_s17 = sld [smem:[#allocation4 + %s354_s16]] }
  0x21   : > { %p376_p13 = scmp.lt.s32.totalorder %s975_s26, 3  ;;  %s1196_s14 = smov (!%p359_p11, %s797_s14), 3 }
  0x22   : > { %s1198_s28 = smov (!%p374_p12, %s983_s28), 3  ;;  %p395_p1 = scmp.lt.s32.totalorder %s979_s27, 1 }
  0x23   : > { %s377_s18 = scalar_select %p376_p13, %s975_s26, 3 }
  0x24   : > { %s801_s19 = sshll.u32 %s1198_s28, 6  ;;  %s804_s20 = sshll.u32 %s1198_s28, 2 }
  0x25   : > { %s800_s21 = sshll.u32 %s377_s18, 4  ;;  %s389_s22 = sadd.s32 %s804_s20, %s1196_s14 }
  0x26   : > { %p357_p0 = scmp.lt.s32.totalorder %s355_s17, 8  ;;  %s380_s23 = sadd.s32 %s801_s19, %s800_s21 }
  0x27   : > { %s802_s24 = sshll.u32 %s380_s23, 2  ;;  %s805_s25 = sshll.u32 %s389_s22, 2 }
  0x28   : > { %s1200_s17 = smov (!%p357_p0, %s355_s17), 8  ;;  %s1102_s12 = scalar_lea.vmem %s1166_s2, %s802_s24 }
  0x29   : > { %s1107_s10 = scalar_lea.vmem %s1168_s4, %s805_s25  ;;  %s798_s9 = sshll.u32 %s1200_s17, 2 }
  0x2a   : > { %s362_s8 = sadd.s32 %s798_s9, %s1196_s14  ;;  %s806_s21 = sshll.u32 %s1198_s28, 1 }
  0x2b   : > { %s799_s18 = sshll.u32 %s362_s8, 2  ;;  %s1202_s27 = smov (!%p395_p1, %s979_s27), 1 }
  0x2c   : > { %s1113_s19 = scalar_lea.vmem %s1165_s1, %s799_s18  ;;  %s398_s22 = sadd.s32 %s806_s21, %s1202_s27 }
  0x2d   : > { %s807_s23 = sshll.u32 %s398_s22, 3  ;;  %p810_p2 = scmp.ne.s32.totalorder %s975_s26, 0 }
  0x2e   : > { %s1119_s13 = scalar_lea.vmem %s1169_s5, %s807_s23  ;;  %s1124_s17 = scalar_lea.vmem %s1170_s6, %s807_s23  ;;  %v1002_v0 = vmov (!%p810_p2), 0.0  }
  0x2f   : > { %413 = sbr.rel (%p810_p2) target bundleno = 54 (0x36), region = 36  ;;  %414 = vst [vmem:[#allocation2] sm:$0xff] (!%p810_p2), %v1002_v0  ;;  %415 = vst [vmem:[#allocation2 + $0x8] sm:$0xff] (!%p810_p2), %v1002_v0 }
  0x36 PF: > { %v922_v1 = vld [vmem:[%s1102_s12] sm:$0xff]   ;;  %v1003_v2 = vmov 0.0   ;;  %v923_v3 = vld [vmem:[%s1102_s12 + $0x8] sm:$0xff]   ;;  %vm1004_vm0 = vmmov 0   ;;  %v924_v4 = vld [vmem:[%s1102_s12 + $0x10] sm:$0xff]   ;;  %p820_p3 = scmp.ne.s32.totalorder %s975_s26, 3 }
  0x37   : > { %842 = vmatprep.subr.bf16.mxu0 %v1003_v2  ;;  %858 = vmatprep.mubr.msk.bf16.mxu0 %vm1004_vm0, %v1003_v2  ;;  %v925_v5 = vld [vmem:[%s1102_s12 + $0x18] sm:$0xff]   ;;  %v926_v6 = vld [vmem:[%s1102_s12 + $0x20] sm:$0xff]   ;;  %v927_v7 = vld [vmem:[%s1102_s12 + $0x28] sm:$0xff]  }
  0x38   : > { %843 = vmatpush3.bf16.msra.mxu0 %v922_v1  ;;  %v928_v8 = vld [vmem:[%s1102_s12 + $0x30] sm:$0xff]   ;;  %v929_v9 = vld [vmem:[%s1102_s12 + $0x38] sm:$0xff]   ;;  %v930_v10 = vld [vmem:[%s1113_s19] sm:$0xff]  }
  0x39   : > { %844 = vmatprep.subr.bf16.mxu0 %v1003_v2  ;;  %v416_v11 = vld [vmem:[#allocation2] sm:$0xff]  ;;  %v417_v13 = vld [vmem:[#allocation2 + $0x8] sm:$0xff] }
  0x3a   : > { %v821_v21 = vld [vmem:[%s1167_s3] ss:$0 sm:$0xff] (!%p820_p3) }
  0x3c   : > { %845 = vmatpush3.bf16.msra.mxu0 %v923_v3 }
  0x3d   : > { %846 = vmatprep.subr.bf16.mxu0 %v1003_v2 }
  0x40   : > { %847 = vmatpush3.bf16.msra.mxu0 %v924_v4 }
  0x41   : > { %848 = vmatprep.subr.bf16.mxu0 %v1003_v2 }
  0x44   : > { %849 = vmatpush3.bf16.msra.mxu0 %v925_v5 }
  0x45   : > { %850 = vmatprep.subr.bf16.mxu0 %v1003_v2 }
  0x48   : > { %851 = vmatpush3.bf16.msra.mxu0 %v926_v6 }
  0x49   : > { %852 = vmatprep.subr.bf16.mxu0 %v1003_v2 }
  0x4c   : > { %853 = vmatpush3.bf16.msra.mxu0 %v927_v7 }
  0x4d   : > { %854 = vmatprep.subr.bf16.mxu0 %v1003_v2 }
  0x50   : > { %855 = vmatpush3.bf16.msra.mxu0 %v928_v8 }
  0x51   : > { %856 = vmatprep.subr.bf16.mxu0 %v1003_v2 }
  0x54   : > { %857 = vmatpush3.bf16.msra.mxu0 %v929_v9 }
  0x57   : > { %859 = vmatmul.mubr.bf16.vlgmr.msra.gmra.mrb[0].mxu0 %v930_v10 }
 0x129   : > { %538 = sbr.rel (%p820_p3) target bundleno = 330 (0x14a), region = 40 }
 0x12a   : > { %v524_v12 = vpop.f32.mrb[0].mxu0 }
 0x12b   : > { %v531_v14 = vadd.f32 %v524_v12, %v416_v11  ;;  %v860_v15 = vpop.f32.mrb[1].mxu0 }
 0x12c   : > { %v527_v16 = vpop.f32.mrb[2].mxu0 }
 0x12d   : > { %533 = vst [vmem:[#allocation2] sm:$0xff] %v531_v14  ;;  %v532_v17 = vadd.f32 %v527_v16, %v417_v13  ;;  %v861_v18 = vpop.f32.mrb[3].mxu0 }
 0x12f   : > { %534 = vst [vmem:[#allocation2 + $0x8] sm:$0xff] %v532_v17 }
 0x134   : > { %v539_v19 = vld [vmem:[#allocation2] sm:$0xff] }
 0x135   : > { %v548_v22 = vadd.f32 %v821_v21, %v539_v19 }
 0x136   : > { %v540_v20 = vld [vmem:[#allocation2 + $0x8] sm:$0xff] }
 0x137   : > { %v549_v23 = vadd.f32 %v821_v21, %v540_v20  ;;  %v557_v25 = vmul.f32 %v548_v22, %v548_v22 }
 0x139   : > { %v550_v24 = vadd.f32 %v549_v23, %v548_v22  ;;  %v558_v26 = vmul.f32 %v549_v23, %v549_v23  ;;  %v831_v27 = vpack.c.bf16 %v549_v23, %v548_v22 }
 0x13b   : > { %v551_v28 = vrot.slane %v550_v24, 4  ;;  %v559_v29 = vadd.f32 %v558_v26, %v557_v25  ;;  %832 = vst [vmem:[%s1107_s10] sm:$0xff] %v831_v27  }
 0x13d   : > { %v552_v30 = vadd.f32 %v551_v28, %v550_v24  ;;  %v560_v31 = vrot.slane %v559_v29, 4 }
 0x13f   : > { %v553_v32 = vrot.slane %v552_v30, 2  ;;  %v561_v33 = vadd.f32 %v560_v31, %v559_v29 }
 0x141   : > { %v554_v34 = vadd.f32 %v553_v32, %v552_v30  ;;  %v562_v35 = vrot.slane %v561_v33, 2 }
 0x143   : > { %v555_v36 = vrot.slane %v554_v34, 1  ;;  %v563_v37 = vadd.f32 %v562_v35, %v561_v33 }
 0x145   : > { %v556_v38 = vadd.f32 %v555_v36, %v554_v34  ;;  %v564_v39 = vrot.slane %v563_v37, 1 }
 0x147   : > { %566 = vst [vmem:[%s1119_s13] sm:$0xff] %v556_v38  ;;  %v565_v40 = vadd.f32 %v564_v39, %v563_v37 }
 0x149   : > { %567 = vst [vmem:[%s1124_s17] sm:$0xff] %v565_v40 }
 0x14a PF: > { %s23_s7 = sadd.s32 1, %s999_s7   ;;  %s1176_s28 = sld [smem:[#allocation6_spill]] }
 0x14b   : > { %p20_p4 = scmp.ge.s32.totalorder %s23_s7, 34   ;;  %s1177_s30 = sld [smem:[#allocation7_spill]] }
 0x14c   : > { %s1178_s8 = sld [smem:[#allocation8_spill]]  ;;  %s1179_s9 = sld [smem:[#allocation9_spill]] }
 0x14d   : > { %s1180_s26 = smov %s987_s0  ;;  %s1181_s27 = smov %s991_s29 }
 0x14e   :  { %22 = sbr.rel (!%p20_p4) target bundleno = 19 (0x13), region = 97 }
 0x151   : > { %s1182_s0 = smov %s1177_s30 }
 0x152   : > { %s1183_s29 = smov %s1178_s8  ;;  %s1184_s30 = smov %s1179_s9 }

// kernel: generator_forward.14
= control target key start
LH: loop header
LB: loop body
LE: loop exit
PB: predicated region body
PF: predicated region fallthrough
CT: control target
= control target key end

     0   :  { %s851_s12 = smov 0   ;;  %s985_s0 = inlined_call_operand.vmem [shape: bf16[512,128], index: 0, kind: input, shape index: {}]   ;;  %s986_s1 = inlined_call_operand.vmem [shape: f32[1,128], index: 1, kind: input, shape index: {}]   ;;  %s987_s2 = inlined_call_operand.vmem [shape: f32[1,128], index: 2, kind: input, shape index: {}]   ;;  %s988_s3 = inlined_call_operand.vmem [shape: bf16[512,128], index: 3, kind: output, shape index: {}]  }
   0x1 LB: > { %s564_s13 = sadd.s32 4294967295, %s829_s12   ;;  %p568_p0 = scmp.ge.s32.totalorder %s829_s12, 1  ;;  %s829_s12 = sphi %s851_s12, %s13_s12  }
   0x2   : > { %p138_p1 = scmp.lt.s32.totalorder %s829_s12, 3 }
   0x4   : > { %p139_p2 = pnand %p568_p0, %p138_p1 }
   0x5   : > { %s569_s14 = sshll.u32 (!%p139_p2), %s564_s13, 5  ;;  %v872_v0 = vld [vmem:[%s986_s1] ss:$0 sm:$0xff] (!%p139_p2) }
   0x6   : > { %142 = sbr.rel (%p139_p2) target bundleno = 59 (0x3b), region = 32  ;;  %p163_p3 = scmp.lt.s32.totalorder (!%p139_p2), %s569_s14, 63  ;;  %v881_v9 = vld [vmem:[%s987_s2] ss:$0 sm:$0xff] (!%p139_p2) }
   0xd   : > { %s990_s14 = smov (!%p163_p3, %s569_s14), 63 }
   0xe   : > { %s570_s15 = sshll.u32 %s990_s14, 2 }
   0xf   : > { %s867_s18 = scalar_lea.vmem %s985_s0, %s570_s15  ;;  %s906_s25 = scalar_lea.vmem %s988_s3, %s570_s15 }
  0x10   : > { %v642_v1 = vld [vmem:[%s867_s18] sm:$0xff]   ;;  %v785_v2 = vld [vmem:[%s867_s18 + $0x8] sm:$0xff]   ;;  %v786_v3 = vld [vmem:[%s867_s18 + $0x10] sm:$0xff]  }
  0x11   : > { %v643_v4 = vunpack.c.l.bf16 %v642_v1  ;;  %v644_v5 = vunpack.c.h.bf16 %v642_v1  ;;  %v647_v6 = vunpack.c.l.bf16 %v785_v2  ;;  %v648_v7 = vunpack.c.h.bf16 %v785_v2  ;;  %v787_v8 = vld [vmem:[%s867_s18 + $0x18] sm:$0xff]   ;;  %v788_v30 = vld [vmem:[%s867_s18 + $0x20] sm:$0xff]   ;;  %v789_v35 = vld [vmem:[%s867_s18 + $0x28] sm:$0xff]  }
  0x12   : > { %v651_v10 = vunpack.c.l.bf16 %v786_v3  ;;  %v652_v11 = vunpack.c.h.bf16 %v786_v3  ;;  %v655_v12 = vunpack.c.l.bf16 %v787_v8  ;;  %v656_v13 = vunpack.c.h.bf16 %v787_v8  ;;  %v790_v40 = vld [vmem:[%s867_s18 + $0x30] sm:$0xff]   ;;  %v791_v45 = vld [vmem:[%s867_s18 + $0x38] sm:$0xff]   ;;  %v792_v3 = vld [vmem:[%s867_s18 + $0x40] sm:$0xff]  }
  0x13   : > { %v245_v14 = vmul.f32 %v643_v4, %v872_v0  ;;  %v246_v15 = vmul.f32 %v644_v5, %v872_v0  ;;  %v247_v16 = vmul.f32 %v647_v6, %v872_v0  ;;  %v248_v17 = vmul.f32 %v648_v7, %v872_v0 }
  0x14   : > { %v249_v18 = vmul.f32 %v651_v10, %v872_v0  ;;  %v250_v19 = vmul.f32 %v652_v11, %v872_v0  ;;  %v251_v20 = vmul.f32 %v655_v12, %v872_v0  ;;  %v252_v21 = vmul.f32 %v656_v13, %v872_v0  ;;  %v793_v13 = vld [vmem:[%s867_s18 + $0x48] sm:$0xff]  }
  0x15   : > { %v284_v22 = vadd.f32 %v881_v9, %v245_v14  ;;  %v285_v23 = vadd.f32 %v881_v9, %v246_v15  ;;  %v286_v24 = vadd.f32 %v881_v9, %v247_v16  ;;  %v287_v25 = vadd.f32 %v881_v9, %v248_v17 }
  0x16   : > { %v288_v26 = vadd.f32 %v881_v9, %v249_v18  ;;  %v289_v27 = vadd.f32 %v881_v9, %v250_v19  ;;  %v290_v28 = vadd.f32 %v881_v9, %v251_v20  ;;  %v291_v29 = vadd.f32 %v881_v9, %v252_v21  ;;  %v794_v18 = vld [vmem:[%s867_s18 + $0x50] sm:$0xff]  }
  0x17   : > { %v316_v31 = vmax.f32 %v284_v22, 0.0  ;;  %v317_v32 = vmax.f32 %v285_v23, 0.0  ;;  %v318_v33 = vmax.f32 %v286_v24, 0.0  ;;  %v319_v34 = vmax.f32 %v287_v25, 0.0  ;;  %v795_v23 = vld [vmem:[%s867_s18 + $0x58] sm:$0xff]  }
  0x18   : > { %v320_v36 = vmax.f32 %v288_v26, 0.0  ;;  %v321_v37 = vmax.f32 %v289_v27, 0.0  ;;  %v322_v38 = vmax.f32 %v290_v28, 0.0  ;;  %v323_v39 = vmax.f32 %v291_v29, 0.0 }
  0x19   : > { %v708_v41 = vpack.c.bf16 %v317_v32, %v316_v31  ;;  %v713_v42 = vpack.c.bf16 %v319_v34, %v318_v33  ;;  %v659_v43 = vunpack.c.l.bf16 %v788_v30  ;;  %v660_v44 = vunpack.c.h.bf16 %v788_v30 }
  0x1a   : > { %v718_v46 = vpack.c.bf16 %v321_v37, %v320_v36  ;;  %v723_v47 = vpack.c.bf16 %v323_v39, %v322_v38  ;;  %v663_v48 = vunpack.c.l.bf16 %v789_v35  ;;  %v664_v49 = vunpack.c.h.bf16 %v789_v35 }
  0x1b   : > { %709 = vst [vmem:[%s906_s25] sm:$0xff] %v708_v41   ;;  %800 = vst [vmem:[%s906_s25 + $0x8] sm:$0xff] %v713_v42   ;;  %v253_v50 = vmul.f32 %v659_v43, %v872_v0  ;;  %v254_v51 = vmul.f32 %v660_v44, %v872_v0  ;;  %v667_v52 = vunpack.c.l.bf16 %v790_v40  ;;  %v668_v53 = vunpack.c.h.bf16 %v790_v40  ;;  %v796_v40 = vld [vmem:[%s867_s18 + $0x60] sm:$0xff]  }
  0x1c   : > { %801 = vst [vmem:[%s906_s25 + $0x10] sm:$0xff] %v718_v46   ;;  %802 = vst [vmem:[%s906_s25 + $0x18] sm:$0xff] %v723_v47   ;;  %v255_v54 = vmul.f32 %v663_v48, %v872_v0  ;;  %v256_v55 = vmul.f32 %v664_v49, %v872_v0  ;;  %v671_v56 = vunpack.c.l.bf16 %v791_v45  ;;  %v672_v57 = vunpack.c.h.bf16 %v791_v45 }
  0x1d   : > { %v292_v58 = vadd.f32 %v881_v9, %v253_v50  ;;  %v293_v59 = vadd.f32 %v881_v9, %v254_v51  ;;  %v257_v60 = vmul.f32 %v667_v52, %v872_v0  ;;  %v258_v61 = vmul.f32 %v668_v53, %v872_v0  ;;  %v797_v53 = vld [vmem:[%s867_s18 + $0x68] sm:$0xff]  }
  0x1e   : > { %v294_v62 = vadd.f32 %v881_v9, %v255_v54  ;;  %v295_v63 = vadd.f32 %v881_v9, %v256_v55  ;;  %v259_v1 = vmul.f32 %v671_v56, %v872_v0  ;;  %v260_v2 = vmul.f32 %v672_v57, %v872_v0 }
  0x1f   : > { %v324_v4 = vmax.f32 %v292_v58, 0.0  ;;  %v325_v5 = vmax.f32 %v293_v59, 0.0  ;;  %v296_v6 = vadd.f32 %v881_v9, %v257_v60  ;;  %v297_v7 = vadd.f32 %v881_v9, %v258_v61  ;;  %v798_v58 = vld [vmem:[%s867_s18 + $0x70] sm:$0xff]  }
  0x20   : > { %v326_v8 = vmax.f32 %v294_v62, 0.0  ;;  %v327_v10 = vmax.f32 %v295_v63, 0.0  ;;  %v298_v11 = vadd.f32 %v881_v9, %v259_v1  ;;  %v299_v12 = vadd.f32 %v881_v9, %v260_v2  ;;  %v799_v63 = vld [vmem:[%s867_s18 + $0x78] sm:$0xff]  }
  0x21   : > { %v728_v14 = vpack.c.bf16 %v325_v5, %v324_v4  ;;  %v328_v15 = vmax.f32 %v296_v6, 0.0  ;;  %v329_v16 = vmax.f32 %v297_v7, 0.0  ;;  %v675_v17 = vunpack.c.l.bf16 %v792_v3 }
  0x22   : > { %v733_v19 = vpack.c.bf16 %v327_v10, %v326_v8  ;;  %v330_v20 = vmax.f32 %v298_v11, 0.0  ;;  %v331_v21 = vmax.f32 %v299_v12, 0.0  ;;  %v676_v22 = vunpack.c.h.bf16 %v792_v3 }
  0x23   : > { %803 = vst [vmem:[%s906_s25 + $0x20] sm:$0xff] %v728_v14   ;;  %v738_v24 = vpack.c.bf16 %v329_v16, %v328_v15  ;;  %v261_v25 = vmul.f32 %v675_v17, %v872_v0  ;;  %v679_v26 = vunpack.c.l.bf16 %v793_v13  ;;  %v680_v27 = vunpack.c.h.bf16 %v793_v13 }
  0x24   : > { %804 = vst [vmem:[%s906_s25 + $0x28] sm:$0xff] %v733_v19   ;;  %v743_v28 = vpack.c.bf16 %v331_v21, %v330_v20  ;;  %v262_v29 = vmul.f32 %v676_v22, %v872_v0  ;;  %v683_v30 = vunpack.c.l.bf16 %v794_v18  ;;  %v684_v31 = vunpack.c.h.bf16 %v794_v18 }
  0x25   : > { %805 = vst [vmem:[%s906_s25 + $0x30] sm:$0xff] %v738_v24   ;;  %v300_v32 = vadd.f32 %v881_v9, %v261_v25  ;;  %v263_v33 = vmul.f32 %v679_v26, %v872_v0  ;;  %v264_v34 = vmul.f32 %v680_v27, %v872_v0  ;;  %v687_v35 = vunpack.c.l.bf16 %v795_v23 }
  0x26   : > { %806 = vst [vmem:[%s906_s25 + $0x38] sm:$0xff] %v743_v28   ;;  %v301_v36 = vadd.f32 %v881_v9, %v262_v29  ;;  %v265_v37 = vmul.f32 %v683_v30, %v872_v0  ;;  %v266_v38 = vmul.f32 %v684_v31, %v872_v0  ;;  %v688_v39 = vunpack.c.h.bf16 %v795_v23 }
  0x27   : > { %v332_v41 = vmax.f32 %v300_v32, 0.0  ;;  %v302_v42 = vadd.f32 %v881_v9, %v263_v33  ;;  %v303_v43 = vadd.f32 %v881_v9, %v264_v34  ;;  %v267_v44 = vmul.f32 %v687_v35, %v872_v0 }
  0x28   : > { %v333_v45 = vmax.f32 %v301_v36, 0.0  ;;  %v304_v46 = vadd.f32 %v881_v9, %v265_v37  ;;  %v305_v47 = vadd.f32 %v881_v9, %v266_v38  ;;  %v268_v48 = vmul.f32 %v688_v39, %v872_v0 }
  0x29   : > { %v334_v49 = vmax.f32 %v302_v42, 0.0  ;;  %v335_v50 = vmax.f32 %v303_v43, 0.0  ;;  %v306_v51 = vadd.f32 %v881_v9, %v267_v44  ;;  %v691_v52 = vunpack.c.l.bf16 %v796_v40 }
  0x2a   : > { %v748_v54 = vpack.c.bf16 %v333_v45, %v332_v41  ;;  %v336_v55 = vmax.f32 %v304_v46, 0.0  ;;  %v337_v56 = vmax.f32 %v305_v47, 0.0  ;;  %v307_v57 = vadd.f32 %v881_v9, %v268_v48 }
  0x2b   : > { %v753_v59 = vpack.c.bf16 %v335_v50, %v334_v49  ;;  %v338_v60 = vmax.f32 %v306_v51, 0.0  ;;  %v692_v61 = vunpack.c.h.bf16 %v796_v40  ;;  %v269_v62 = vmul.f32 %v691_v52, %v872_v0 }
  0x2c   : > { %807 = vst [vmem:[%s906_s25 + $0x40] sm:$0xff] %v748_v54   ;;  %v758_v1 = vpack.c.bf16 %v337_v56, %v336_v55  ;;  %v339_v2 = vmax.f32 %v307_v57, 0.0  ;;  %v695_v3 = vunpack.c.l.bf16 %v797_v53  ;;  %v696_v4 = vunpack.c.h.bf16 %v797_v53 }
  0x2d   : > { %808 = vst [vmem:[%s906_s25 + $0x48] sm:$0xff] %v753_v59   ;;  %v270_v5 = vmul.f32 %v692_v61, %v872_v0  ;;  %v308_v6 = vadd.f32 %v881_v9, %v269_v62  ;;  %v699_v7 = vunpack.c.l.bf16 %v798_v58  ;;  %v700_v8 = vunpack.c.h.bf16 %v798_v58 }
  0x2e   : > { %809 = vst [vmem:[%s906_s25 + $0x50] sm:$0xff] %v758_v1   ;;  %v763_v10 = vpack.c.bf16 %v339_v2, %v338_v60  ;;  %v271_v11 = vmul.f32 %v695_v3, %v872_v0  ;;  %v272_v12 = vmul.f32 %v696_v4, %v872_v0  ;;  %v703_v13 = vunpack.c.l.bf16 %v799_v63 }
  0x2f   : > { %v309_v14 = vadd.f32 %v881_v9, %v270_v5  ;;  %v340_v15 = vmax.f32 %v308_v6, 0.0  ;;  %v273_v16 = vmul.f32 %v699_v7, %v872_v0  ;;  %v274_v17 = vmul.f32 %v700_v8, %v872_v0 }
  0x30   : > { %810 = vst [vmem:[%s906_s25 + $0x58] sm:$0xff] %v763_v10   ;;  %v310_v18 = vadd.f32 %v881_v9, %v271_v11  ;;  %v311_v19 = vadd.f32 %v881_v9, %v272_v12  ;;  %v704_v20 = vunpack.c.h.bf16 %v799_v63  ;;  %v275_v21 = vmul.f32 %v703_v13, %v872_v0 }
  0x31   : > { %v341_v22 = vmax.f32 %v309_v14, 0.0  ;;  %v312_v23 = vadd.f32 %v881_v9, %v273_v16  ;;  %v313_v24 = vadd.f32 %v881_v9, %v274_v17 }
  0x32   : > { %v342_v25 = vmax.f32 %v310_v18, 0.0  ;;  %v343_v26 = vmax.f32 %v311_v19, 0.0  ;;  %v276_v27 = vmul.f32 %v704_v20, %v872_v0  ;;  %v314_v28 = vadd.f32 %v881_v9, %v275_v21 }
  0x33   : > { %v768_v29 = vpack.c.bf16 %v341_v22, %v340_v15  ;;  %v344_v30 = vmax.f32 %v312_v23, 0.0  ;;  %v345_v31 = vmax.f32 %v313_v24, 0.0 }
  0x34   : > { %v773_v32 = vpack.c.bf16 %v343_v26, %v342_v25  ;;  %v315_v33 = vadd.f32 %v881_v9, %v276_v27  ;;  %v346_v34 = vmax.f32 %v314_v28, 0.0 }
  0x35   : > { %811 = vst [vmem:[%s906_s25 + $0x60] sm:$0xff] %v768_v29   ;;  %v778_v35 = vpack.c.bf16 %v345_v31, %v344_v30 }
  0x36   : > { %812 = vst [vmem:[%s906_s25 + $0x68] sm:$0xff] %v773_v32   ;;  %v347_v36 = vmax.f32 %v315_v33, 0.0 }
  0x37   : > { %813 = vst [vmem:[%s906_s25 + $0x70] sm:$0xff] %v778_v35  }
  0x38   : > { %v783_v37 = vpack.c.bf16 %v347_v36, %v346_v34 }
  0x3a   : > { %814 = vst [vmem:[%s906_s25 + $0x78] sm:$0xff] %v783_v37  }
  0x3b PF: > { %s13_s12 = sadd.s32 1, %s829_s12  }
  0x3c   : > { %p10_p4 = scmp.ge.s32.totalorder %s13_s12, 4  }
  0x3e   :  { %12 = sbr.rel (!%p10_p4) target bundleno = 1 (0x1), region = 62 }

// kernel: generator_forward.13
= control target key start
LH: loop header
LB: loop body
LE: loop exit
PB: predicated region body
PF: predicated region fallthrough
CT: control target
= control target key end

     0   :  { %s1357_s0 = inlined_call_operand.vmem [shape: s32[4,4], index: 0, kind: input, shape index: {}]   ;;  %s1358_s1 = inlined_call_operand.vmem [shape: bf16[9,128,128], index: 1, kind: input, shape index: {}]   ;;  %s1359_s2 = inlined_call_operand.vmem [shape: bf16[4,4,128,128], index: 2, kind: input, shape index: {}]   ;;  %s1360_s3 = inlined_call_operand.vmem [shape: f32[1,128], index: 3, kind: input, shape index: {}]   ;;  %s1361_s4 = inlined_call_operand.vmem [shape: bf16[4,128,128], index: 4, kind: output, shape index: {0}]   ;;  %s1362_s5 = inlined_call_operand.vmem [shape: f32[4,16,128], index: 5, kind: output, shape index: {1}]   ;;  %s1363_s6 = inlined_call_operand.vmem [shape: f32[4,16,128], index: 6, kind: output, shape index: {2}]  }
   0x1   :  { %s12_s23 = sshll.u32 %s1357_s0, 4  ;;  %s13_s23 = int_to_ptr.vmem [resolvable:$true] %s12_s23 }
   0x2   :  { %s1120_s24 = scalar_lea.vmem %s13_s23, 64  ;;  %p1125_p1 = scmp.lt.s32.totalorder %s13_s23, %s13_s23 }
   0x3   :  { %p1121_p0 = scmp.ne.s32.totalorder %s13_s23, %s1120_s24  ;;  %p1126_p2 = scmp.lt.s32.totalorder %s1120_s24, %s1120_s24 }
   0x5   :  { %p1127_p3 = por %p1126_p2, %p1125_p1 }
   0x7   :  { %p1128_p4 = pnand %p1127_p3, %p1121_p0 }
   0x9   :  { %1131 = shalt.err (!%p1128_p4)  }
   0xa   :  { %s1190_s25 = smov [#allocation4]  }
   0xb   :  { %15 = dma.vmem_to_smem %s13_s23, 64, %s1190_s25, [#allocation3] }
   0xc   :  { %1160 = dma.done.wait [#allocation3], 64 }
   0xd   :  { %1161 = vsyncadd [#allocation3], 4294967232 }
   0xe   :  { %17 = sfence }
   0xf   :  { %s1230_s26 = smov 0   ;;  %s1232_s27 = smov 0  }
  0x10   :  { %s1234_s28 = smov 0   ;;  %s1236_s0 = smov 0  }
  0x11   :  { %s1238_s29 = smov 0   ;;  %s1240_s30 = smov 0  }
  0x12   :  { %s1242_s7 = smov 0  }
  0x13 LB: > { %1365 = sst [smem:[#allocation6_spill]] %s1184_s30  ;;  %s35_s8 = sadd.s32 1, %s1176_s0  ;;  %s1188_s7 = sphi %s1242_s7, %s23_s7   ;;  %s1184_s30 = sphi %s1240_s30, %s1377_s30   ;;  %s1180_s29 = sphi %s1238_s29, %s1376_s29   ;;  %s1176_s0 = sphi %s1236_s0, %s1375_s0   ;;  %s1172_s28 = sphi %s1234_s28, %s1369_s28   ;;  %s1168_s27 = sphi %s1232_s27, %s1374_s27   ;;  %s1164_s26 = sphi %s1230_s26, %s1373_s26  }
  0x14   : > { %p36_p5 = scmp.ge.s32.totalorder %s35_s8, 4  ;;  %s38_s9 = sadd.s32 1, %s1180_s29 }
  0x15   : > { %p927_p6 = scmp.ge.s32.totalorder %s1188_s7, 1  ;;  %p279_p7 = scmp.lt.s32.totalorder %s1188_s7, 33 }
  0x16   : > { %s1379_s8 = smov (%p36_p5, %s35_s8), 0  ;;  %s1381_s9 = smov (!%p36_p5, %s38_s9), %s1180_s29 }
  0x17   : > { %1366 = sst [smem:[#allocation7_spill]] %s1379_s8  ;;  %p280_p8 = pnand %p927_p6, %p279_p7 }
  0x18   : > { %p40_p9 = scmp.ge.s32.totalorder %s1381_s9, 2  ;;  %s42_s10 = sadd.s32 1, %s1184_s30 }
  0x19   : > { %283 = sbr.rel (%p280_p8) target bundleno = 343 (0x157), region = 32  ;;  %s348_s11 = sshra.s32 (!%p280_p8), %s1164_s26, 7 }
  0x1a   : > { %s1383_s9 = smov (%p40_p9, %s1381_s9), 0  ;;  %s1385_s10 = smov (!%p40_p9, %s42_s10), %s1184_s30 }
  0x1b   : > { %1367 = sst [smem:[#allocation8_spill]] %s1383_s9  ;;  %p44_p10 = scmp.ge.s32.totalorder %s1385_s10, 4 }
  0x1c   : > { %s353_s12 = sand.u32 (!%p280_p8), 127, %s1164_s26  ;;  %s350_s13 = sadd.s32 (!%p280_p8), %s1172_s28, %s348_s11 }
  0x1d   : > { %s1387_s10 = smov (%p44_p10, %s1385_s10), 0  ;;  %s929_s14 = sshll.u32 (!%p280_p8), %s1168_s27, 3 }
  0x1e   : > { %1368 = sst [smem:[#allocation9_spill]] %s1387_s10  ;;  %s928_s15 = sshll.u32 (!%p280_p8), %s350_s13, 7 }
  0x1f   : > { %p359_p11 = scmp.lt.s32.totalorder (!%p280_p8), %s929_s14, 15  ;;  %s354_s16 = sadd.s32 (!%p280_p8), %s928_s15, %s353_s12 }
  0x20   : > { %p374_p12 = scmp.lt.s32.totalorder %s1172_s28, 3  ;;  %s355_s17 = sld [smem:[#allocation4 + %s354_s16]] }
  0x21   : > { %p376_p13 = scmp.lt.s32.totalorder %s1164_s26, 3  ;;  %s1389_s14 = smov (!%p359_p11, %s929_s14), 15 }
  0x22   : > { %s1391_s28 = smov (!%p374_p12, %s1172_s28), 3  ;;  %p395_p1 = scmp.lt.s32.totalorder %s1168_s27, 1 }
  0x23   : > { %s377_s18 = scalar_select %p376_p13, %s1164_s26, 3 }
  0x24   : > { %s933_s19 = sshll.u32 %s1391_s28, 6  ;;  %s936_s20 = sshll.u32 %s1391_s28, 4 }
  0x25   : > { %s932_s21 = sshll.u32 %s377_s18, 4  ;;  %s389_s22 = sadd.s32 %s936_s20, %s1389_s14 }
  0x26   : > { %p357_p0 = scmp.lt.s32.totalorder %s355_s17, 8  ;;  %s380_s23 = sadd.s32 %s933_s19, %s932_s21 }
  0x27   : > { %s934_s24 = sshll.u32 %s380_s23, 2  ;;  %s937_s25 = sshll.u32 %s389_s22, 2 }
  0x28   : > { %s1393_s17 = smov (!%p357_p0, %s355_s17), 8  ;;  %s1289_s12 = scalar_lea.vmem %s1359_s2, %s934_s24 }
  0x29   : > { %s1294_s10 = scalar_lea.vmem %s1361_s4, %s937_s25  ;;  %s930_s9 = sshll.u32 %s1393_s17, 4 }
  0x2a   : > { %s362_s8 = sadd.s32 %s930_s9, %s1389_s14  ;;  %s938_s21 = sshll.u32 %s1391_s28, 1 }
  0x2b   : > { %s931_s18 = sshll.u32 %s362_s8, 2  ;;  %s1395_s27 = smov (!%p395_p1, %s1168_s27), 1 }
  0x2c   : > { %s1300_s19 = scalar_lea.vmem %s1358_s1, %s931_s18  ;;  %s398_s22 = sadd.s32 %s938_s21, %s1395_s27 }
  0x2d   : > { %s939_s23 = sshll.u32 %s398_s22, 3  ;;  %p942_p2 = scmp.ne.s32.totalorder %s1164_s26, 0 }
  0x2e   : > { %s1306_s13 = scalar_lea.vmem %s1362_s5, %s939_s23  ;;  %s1311_s17 = scalar_lea.vmem %s1363_s6, %s939_s23  ;;  %v1191_v0 = vmov (!%p942_p2), 0.0  }
  0x2f   : > { %413 = sbr.rel (%p942_p2) target bundleno = 54 (0x36), region = 36  ;;  %414 = vst [vmem:[#allocation2] sm:$0xff] (!%p942_p2), %v1191_v0  ;;  %415 = vst [vmem:[#allocation2 + $0x8] sm:$0xff] (!%p942_p2), %v1191_v0 }
  0x30   : > { %416 = vst [vmem:[#allocation2 + $0x10] sm:$0xff] (!%p942_p2), %v1191_v0  ;;  %417 = vst [vmem:[#allocation2 + $0x18] sm:$0xff] (!%p942_p2), %v1191_v0 }
  0x31   : > { %418 = vst [vmem:[#allocation2 + $0x20] sm:$0xff] (!%p942_p2), %v1191_v0  ;;  %419 = vst [vmem:[#allocation2 + $0x28] sm:$0xff] (!%p942_p2), %v1191_v0 }
  0x32   : > { %420 = vst [vmem:[#allocation2 + $0x30] sm:$0xff] (!%p942_p2), %v1191_v0  ;;  %421 = vst [vmem:[#allocation2 + $0x38] sm:$0xff] (!%p942_p2), %v1191_v0 }
  0x36 PF: > { %v1108_v1 = vld [vmem:[%s1289_s12] sm:$0xff]   ;;  %v1109_v2 = vld [vmem:[%s1289_s12 + $0x8] sm:$0xff]   ;;  %v1110_v3 = vld [vmem:[%s1289_s12 + $0x10] sm:$0xff]   ;;  %p955_p3 = scmp.ne.s32.totalorder %s1164_s26, 3 }
  0x37   : > { %1010 = vmatprep.subr.bf16.mxu0 %v1108_v1  ;;  %1034 = vmatprep.subr.bf16.mxu1 %v1108_v1  ;;  %v1111_v4 = vld [vmem:[%s1289_s12 + $0x18] sm:$0xff]   ;;  %v1116_v5 = vld [vmem:[%s1300_s19] sm:$0xff]   ;;  %v1117_v6 = vld [vmem:[%s1300_s19 + $0x10] sm:$0xff]  }
  0x38   : > { %1011 = vmatpush3.bf16.msra.mxu0 %v1108_v1  ;;  %1042 = vmatpush3.bf16.msra.mxu1 %v1108_v1  ;;  %v1112_v7 = vld [vmem:[%s1289_s12 + $0x20] sm:$0xff]   ;;  %v1113_v8 = vld [vmem:[%s1289_s12 + $0x28] sm:$0xff]   ;;  %v1114_v9 = vld [vmem:[%s1289_s12 + $0x30] sm:$0xff]  }
  0x39   : > { %1012 = vmatprep.subr.bf16.mxu0 %v1109_v2  ;;  %1035 = vmatprep.subr.bf16.mxu1 %v1109_v2  ;;  %v1115_v10 = vld [vmem:[%s1289_s12 + $0x38] sm:$0xff]   ;;  %v1118_v11 = vld [vmem:[%s1300_s19 + $0x8] sm:$0xff]   ;;  %v424_v13 = vld [vmem:[#allocation2 + $0x10] sm:$0xff] }
  0x3a   : > { %1026 = vmatprep.mubr.bf16.mxu0 %v1116_v5  ;;  %1030 = vmatprep.mubr.bf16.mxu1 %v1117_v6  ;;  %v1119_v12 = vld [vmem:[%s1300_s19 + $0x18] sm:$0xff]   ;;  %v428_v14 = vld [vmem:[#allocation2 + $0x30] sm:$0xff]  ;;  %v422_v15 = vld [vmem:[#allocation2] sm:$0xff] }
  0x3b   : > { %v426_v16 = vld [vmem:[#allocation2 + $0x20] sm:$0xff]  ;;  %v425_v19 = vld [vmem:[#allocation2 + $0x18] sm:$0xff]  ;;  %v423_v25 = vld [vmem:[#allocation2 + $0x8] sm:$0xff] }
  0x3c   : > { %1013 = vmatpush3.bf16.msra.mxu0 %v1109_v2  ;;  %1043 = vmatpush3.bf16.msra.mxu1 %v1109_v2  ;;  %v429_v20 = vld [vmem:[#allocation2 + $0x38] sm:$0xff]  ;;  %v427_v26 = vld [vmem:[#allocation2 + $0x28] sm:$0xff]  ;;  %v956_v42 = vld [vmem:[%s1360_s3] ss:$0 sm:$0xff] (!%p955_p3) }
  0x3d   : > { %1014 = vmatprep.subr.bf16.mxu0 %v1110_v3  ;;  %1036 = vmatprep.subr.bf16.mxu1 %v1110_v3 }
  0x40   : > { %1015 = vmatpush3.bf16.msra.mxu0 %v1110_v3  ;;  %1044 = vmatpush3.bf16.msra.mxu1 %v1110_v3 }
  0x41   : > { %1016 = vmatprep.subr.bf16.mxu0 %v1111_v4  ;;  %1037 = vmatprep.subr.bf16.mxu1 %v1111_v4 }
  0x44   : > { %1017 = vmatpush3.bf16.msra.mxu0 %v1111_v4  ;;  %1045 = vmatpush3.bf16.msra.mxu1 %v1111_v4 }
  0x45   : > { %1018 = vmatprep.subr.bf16.mxu0 %v1112_v7  ;;  %1038 = vmatprep.subr.bf16.mxu1 %v1112_v7 }
  0x48   : > { %1019 = vmatpush3.bf16.msra.mxu0 %v1112_v7  ;;  %1046 = vmatpush3.bf16.msra.mxu1 %v1112_v7 }
  0x49   : > { %1020 = vmatprep.subr.bf16.mxu0 %v1113_v8  ;;  %1039 = vmatprep.subr.bf16.mxu1 %v1113_v8 }
  0x4c   : > { %1021 = vmatpush3.bf16.msra.mxu0 %v1113_v8  ;;  %1047 = vmatpush3.bf16.msra.mxu1 %v1113_v8 }
  0x4d   : > { %1022 = vmatprep.subr.bf16.mxu0 %v1114_v9  ;;  %1040 = vmatprep.subr.bf16.mxu1 %v1114_v9 }
  0x50   : > { %1023 = vmatpush3.bf16.msra.mxu0 %v1114_v9  ;;  %1048 = vmatpush3.bf16.msra.mxu1 %v1114_v9 }
  0x51   : > { %1024 = vmatprep.subr.bf16.mxu0 %v1115_v10  ;;  %1041 = vmatprep.subr.bf16.mxu1 %v1115_v10 }
  0x54   : > { %1025 = vmatpush3.bf16.msra.mxu0 %v1115_v10  ;;  %1049 = vmatpush3.bf16.msra.mxu1 %v1115_v10 }
  0x57   : > { %1027 = vmatmul.mubr.bf16.vlgmr.msra.gmra.mrb[0].mxu0 %v1118_v11  ;;  %1031 = vmatmul.mubr.bf16.vlgmr.msra.gmra.mrb[0].mxu1 %v1119_v12 }
 0x12a   : > { %v1028_v17 = vpop.f32.mrb[0].mxu0  ;;  %v1032_v18 = vpop.f32.mrb[0].mxu1  ;;  %610 = sbr.rel (%p955_p3) target bundleno = 343 (0x157), region = 40 }
 0x12b   : > { %v593_v21 = vadd.f32 %v1028_v17, %v424_v13  ;;  %v597_v22 = vadd.f32 %v1032_v18, %v428_v14  ;;  %v560_v23 = vpop.f32.mrb[1].mxu0  ;;  %v576_v24 = vpop.f32.mrb[1].mxu1 }
 0x12c   : > { %v591_v27 = vadd.f32 %v560_v23, %v422_v15  ;;  %v595_v28 = vadd.f32 %v576_v24, %v426_v16  ;;  %v1029_v29 = vpop.f32.mrb[2].mxu0  ;;  %v1033_v30 = vpop.f32.mrb[2].mxu1 }
 0x12d   : > { %601 = vst [vmem:[#allocation2 + $0x10] sm:$0xff] %v593_v21  ;;  %605 = vst [vmem:[#allocation2 + $0x30] sm:$0xff] %v597_v22  ;;  %v594_v31 = vadd.f32 %v1029_v29, %v425_v19  ;;  %v598_v32 = vadd.f32 %v1033_v30, %v429_v20  ;;  %v563_v33 = vpop.f32.mrb[3].mxu0  ;;  %v579_v34 = vpop.f32.mrb[3].mxu1 }
 0x12e   : > { %599 = vst [vmem:[#allocation2] sm:$0xff] %v591_v27  ;;  %603 = vst [vmem:[#allocation2 + $0x20] sm:$0xff] %v595_v28  ;;  %v592_v35 = vadd.f32 %v563_v33, %v423_v25  ;;  %v596_v36 = vadd.f32 %v579_v34, %v427_v26 }
 0x12f   : > { %602 = vst [vmem:[#allocation2 + $0x18] sm:$0xff] %v594_v31  ;;  %606 = vst [vmem:[#allocation2 + $0x38] sm:$0xff] %v598_v32 }
 0x130   : > { %600 = vst [vmem:[#allocation2 + $0x8] sm:$0xff] %v592_v35  ;;  %604 = vst [vmem:[#allocation2 + $0x28] sm:$0xff] %v596_v36 }
 0x134   : > { %v613_v39 = vld [vmem:[#allocation2 + $0x10] sm:$0xff] }
 0x135   : > { %v611_v37 = vld [vmem:[#allocation2] sm:$0xff]  ;;  %v617_v44 = vld [vmem:[#allocation2 + $0x30] sm:$0xff]  ;;  %v628_v48 = vadd.f32 %v956_v42, %v613_v39 }
 0x136   : > { %v614_v40 = vld [vmem:[#allocation2 + $0x18] sm:$0xff]  ;;  %v615_v41 = vld [vmem:[#allocation2 + $0x20] sm:$0xff]  ;;  %v626_v46 = vadd.f32 %v956_v42, %v611_v37  ;;  %v632_v56 = vadd.f32 %v956_v42, %v617_v44 }
 0x137   : > { %v612_v38 = vld [vmem:[#allocation2 + $0x8] sm:$0xff]  ;;  %v618_v45 = vld [vmem:[#allocation2 + $0x38] sm:$0xff]  ;;  %v629_v49 = vadd.f32 %v956_v42, %v614_v40  ;;  %v630_v50 = vadd.f32 %v956_v42, %v615_v41  ;;  %v649_v54 = vmul.f32 %v628_v48, %v628_v48 }
 0x138   : > { %v616_v43 = vld [vmem:[#allocation2 + $0x28] sm:$0xff]  ;;  %v627_v47 = vadd.f32 %v956_v42, %v612_v38  ;;  %v647_v52 = vmul.f32 %v626_v46, %v626_v46  ;;  %v633_v57 = vadd.f32 %v956_v42, %v618_v45  ;;  %v653_v8 = vmul.f32 %v632_v56, %v632_v56 }
 0x139   : > { %v631_v55 = vadd.f32 %v956_v42, %v616_v43  ;;  %v650_v59 = vmul.f32 %v629_v49, %v629_v49  ;;  %v983_v62 = vpack.c.bf16 %v629_v49, %v628_v48  ;;  %v651_v2 = vmul.f32 %v630_v50, %v630_v50 }
 0x13a   : > { %v634_v51 = vadd.f32 %v627_v47, %v626_v46  ;;  %v648_v53 = vmul.f32 %v627_v47, %v627_v47  ;;  %v978_v61 = vpack.c.bf16 %v627_v47, %v626_v46  ;;  %v993_v0 = vpack.c.bf16 %v633_v57, %v632_v56 }
 0x13b   : > { %v988_v63 = vpack.c.bf16 %v631_v55, %v630_v50  ;;  %995 = vst [vmem:[%s1294_s10 + $0x8] sm:$0xff] %v983_v62   ;;  %v652_v5 = vmul.f32 %v631_v55, %v631_v55  ;;  %v654_v11 = vmul.f32 %v633_v57, %v633_v57 }
 0x13c   : > { %v635_v58 = vadd.f32 %v634_v51, %v628_v48  ;;  %v655_v60 = vadd.f32 %v648_v53, %v647_v52  ;;  %979 = vst [vmem:[%s1294_s10] sm:$0xff] %v978_v61   ;;  %997 = vst [vmem:[%s1294_s10 + $0x18] sm:$0xff] %v993_v0  }
 0x13d   : > { %996 = vst [vmem:[%s1294_s10 + $0x10] sm:$0xff] %v988_v63  }
 0x13e   : > { %v636_v1 = vadd.f32 %v635_v58, %v629_v49  ;;  %v656_v3 = vadd.f32 %v655_v60, %v649_v54 }
 0x140   : > { %v637_v4 = vadd.f32 %v636_v1, %v630_v50  ;;  %v657_v6 = vadd.f32 %v656_v3, %v650_v59 }
 0x142   : > { %v638_v7 = vadd.f32 %v637_v4, %v631_v55  ;;  %v658_v9 = vadd.f32 %v657_v6, %v651_v2 }
 0x144   : > { %v639_v10 = vadd.f32 %v638_v7, %v632_v56  ;;  %v659_v12 = vadd.f32 %v658_v9, %v652_v5 }
 0x146   : > { %v640_v13 = vadd.f32 %v639_v10, %v633_v57  ;;  %v660_v14 = vadd.f32 %v659_v12, %v653_v8 }
 0x148   : > { %v641_v15 = vrot.slane %v640_v13, 4  ;;  %v661_v16 = vadd.f32 %v660_v14, %v654_v11 }
 0x14a   : > { %v642_v17 = vadd.f32 %v641_v15, %v640_v13  ;;  %v662_v18 = vrot.slane %v661_v16, 4 }
 0x14c   : > { %v643_v19 = vrot.slane %v642_v17, 2  ;;  %v663_v20 = vadd.f32 %v662_v18, %v661_v16 }
 0x14e   : > { %v644_v21 = vadd.f32 %v643_v19, %v642_v17  ;;  %v664_v22 = vrot.slane %v663_v20, 2 }
 0x150   : > { %v645_v23 = vrot.slane %v644_v21, 1  ;;  %v665_v24 = vadd.f32 %v664_v22, %v663_v20 }
 0x152   : > { %v646_v25 = vadd.f32 %v645_v23, %v644_v21  ;;  %v666_v26 = vrot.slane %v665_v24, 1 }
 0x154   : > { %668 = vst [vmem:[%s1306_s13] sm:$0xff] %v646_v25  ;;  %v667_v27 = vadd.f32 %v666_v26, %v665_v24 }
 0x156   : > { %669 = vst [vmem:[%s1311_s17] sm:$0xff] %v667_v27 }
 0x157 PF: > { %s23_s7 = sadd.s32 1, %s1188_s7   ;;  %s1369_s28 = sld [smem:[#allocation6_spill]] }
 0x158   : > { %p20_p4 = scmp.ge.s32.totalorder %s23_s7, 34   ;;  %s1370_s30 = sld [smem:[#allocation7_spill]] }
 0x159   : > { %s1371_s8 = sld [smem:[#allocation8_spill]]  ;;  %s1372_s9 = sld [smem:[#allocation9_spill]] }
 0x15a   : > { %s1373_s26 = smov %s1176_s0  ;;  %s1374_s27 = smov %s1180_s29 }
 0x15b   :  { %22 = sbr.rel (!%p20_p4) target bundleno = 19 (0x13), region = 97 }
 0x15e   : > { %s1375_s0 = smov %s1370_s30 }
 0x15f   : > { %s1376_s29 = smov %s1371_s8  ;;  %s1377_s30 = smov %s1372_s9 }

// kernel: generator_forward.15
= control target key start
LH: loop header
LB: loop body
LE: loop exit
PB: predicated region body
PF: predicated region fallthrough
CT: control target
= control target key end

     0   :  { %s2315_s0 = inlined_call_operand.vmem [shape: s32[4,4], index: 0, kind: input, shape index: {}]   ;;  %s2316_s1 = inlined_call_operand.vmem [shape: bf16[9,512,128], index: 1, kind: input, shape index: {}]   ;;  %s2317_s2 = inlined_call_operand.vmem [shape: bf16[4,4,128,128], index: 2, kind: input, shape index: {}]   ;;  %s2318_s3 = inlined_call_operand.vmem [shape: f32[1,128], index: 3, kind: input, shape index: {}]   ;;  %s2319_s4 = inlined_call_operand.vmem [shape: bf16[4,512,128], index: 4, kind: output, shape index: {0}]   ;;  %s2320_s5 = inlined_call_operand.vmem [shape: f32[4,16,128], index: 5, kind: output, shape index: {1}]   ;;  %s2321_s6 = inlined_call_operand.vmem [shape: f32[4,16,128], index: 6, kind: output, shape index: {2}]  }
   0x1   :  { %s12_s23 = sshll.u32 %s2315_s0, 4  ;;  %s13_s23 = int_to_ptr.vmem [resolvable:$true] %s12_s23 }
   0x2   :  { %s1828_s24 = scalar_lea.vmem %s13_s23, 64  ;;  %p1833_p1 = scmp.lt.s32.totalorder %s13_s23, %s13_s23 }
   0x3   :  { %p1829_p0 = scmp.ne.s32.totalorder %s13_s23, %s1828_s24  ;;  %p1834_p2 = scmp.lt.s32.totalorder %s1828_s24, %s1828_s24 }
   0x5   :  { %p1835_p3 = por %p1834_p2, %p1833_p1 }
   0x7   :  { %p1836_p4 = pnand %p1835_p3, %p1829_p0 }
   0x9   :  { %1839 = shalt.err (!%p1836_p4)  }
   0xa   :  { %s1898_s25 = smov [#allocation4]  }
   0xb   :  { %15 = dma.vmem_to_smem %s13_s23, 64, %s1898_s25, [#allocation3] }
   0xc   :  { %1868 = dma.done.wait [#allocation3], 64 }
   0xd   :  { %1869 = vsyncadd [#allocation3], 4294967232 }
   0xe   :  { %17 = sfence }
   0xf   :  { %s1938_s26 = smov 0   ;;  %s1940_s27 = smov 0  }
  0x10   :  { %s1942_s28 = smov 0   ;;  %s1944_s0 = smov 0  }
  0x11   :  { %s1946_s29 = smov 0   ;;  %s1948_s30 = smov 0  }
  0x12   :  { %s1950_s7 = smov 0  }
  0x13 LB: > { %2323 = sst [smem:[#allocation6_spill]] %s1892_s30  ;;  %s35_s8 = sadd.s32 1, %s1884_s0  ;;  %s1896_s7 = sphi %s1950_s7, %s23_s7   ;;  %s1892_s30 = sphi %s1948_s30, %s2335_s30   ;;  %s1888_s29 = sphi %s1946_s29, %s2334_s29   ;;  %s1884_s0 = sphi %s1944_s0, %s2333_s0   ;;  %s1880_s28 = sphi %s1942_s28, %s2327_s28   ;;  %s1876_s27 = sphi %s1940_s27, %s2332_s27   ;;  %s1872_s26 = sphi %s1938_s26, %s2331_s26  }
  0x14   : > { %p36_p5 = scmp.ge.s32.totalorder %s35_s8, 4  ;;  %s38_s9 = sadd.s32 1, %s1888_s29 }
  0x15   : > { %p1455_p6 = scmp.ge.s32.totalorder %s1896_s7, 1  ;;  %p279_p7 = scmp.lt.s32.totalorder %s1896_s7, 33 }
  0x16   : > { %s2337_s8 = smov (%p36_p5, %s35_s8), 0  ;;  %s2339_s9 = smov (!%p36_p5, %s38_s9), %s1888_s29 }
  0x17   : > { %2324 = sst [smem:[#allocation7_spill]] %s2337_s8  ;;  %p280_p8 = pnand %p1455_p6, %p279_p7 }
  0x18   : > { %p40_p9 = scmp.ge.s32.totalorder %s2339_s9, 2  ;;  %s42_s10 = sadd.s32 1, %s1892_s30 }
  0x19   : > { %283 = sbr.rel (%p280_p8) target bundleno = 420 (0x1a4), region = 32  ;;  %s348_s11 = sshra.s32 (!%p280_p8), %s1872_s26, 7 }
  0x1a   : > { %s2341_s9 = smov (%p40_p9, %s2339_s9), 0  ;;  %s2343_s10 = smov (!%p40_p9, %s42_s10), %s1892_s30 }
  0x1b   : > { %2325 = sst [smem:[#allocation8_spill]] %s2341_s9  ;;  %p44_p10 = scmp.ge.s32.totalorder %s2343_s10, 4 }
  0x1c   : > { %s353_s12 = sand.u32 (!%p280_p8), 127, %s1872_s26  ;;  %s350_s13 = sadd.s32 (!%p280_p8), %s1880_s28, %s348_s11 }
  0x1d   : > { %s2345_s10 = smov (%p44_p10, %s2343_s10), 0  ;;  %s1457_s14 = sshll.u32 (!%p280_p8), %s1876_s27, 5 }
  0x1e   : > { %2326 = sst [smem:[#allocation9_spill]] %s2345_s10  ;;  %s1456_s15 = sshll.u32 (!%p280_p8), %s350_s13, 7 }
  0x1f   : > { %p359_p11 = scmp.lt.s32.totalorder (!%p280_p8), %s1457_s14, 63  ;;  %s354_s16 = sadd.s32 (!%p280_p8), %s1456_s15, %s353_s12 }
  0x20   : > { %p374_p12 = scmp.lt.s32.totalorder %s1880_s28, 3  ;;  %s355_s17 = sld [smem:[#allocation4 + %s354_s16]] }
  0x21   : > { %p376_p13 = scmp.lt.s32.totalorder %s1872_s26, 3  ;;  %s2347_s14 = smov (!%p359_p11, %s1457_s14), 63 }
  0x22   : > { %s2349_s28 = smov (!%p374_p12, %s1880_s28), 3  ;;  %p395_p1 = scmp.lt.s32.totalorder %s1876_s27, 1 }
  0x23   : > { %s377_s18 = scalar_select %p376_p13, %s1872_s26, 3 }
  0x24   : > { %s1461_s19 = sshll.u32 %s2349_s28, 6  ;;  %s2353_s27 = smov (!%p395_p1, %s1876_s27), 1 }
  0x25   : > { %s1460_s20 = sshll.u32 %s377_s18, 4  ;;  %s389_s21 = sadd.s32 %s1461_s19, %s2347_s14 }
  0x26   : > { %p357_p0 = scmp.lt.s32.totalorder %s355_s17, 8  ;;  %s380_s22 = sadd.s32 %s1461_s19, %s1460_s20 }
  0x27   : > { %s1462_s23 = sshll.u32 %s380_s22, 2  ;;  %s1465_s24 = sshll.u32 %s389_s21, 2 }
  0x28   : > { %s2351_s17 = smov (!%p357_p0, %s355_s17), 8  ;;  %s1997_s12 = scalar_lea.vmem %s2317_s2, %s1462_s23 }
  0x29   : > { %s2002_s16 = scalar_lea.vmem %s2319_s4, %s1465_s24  ;;  %s1458_s10 = sshll.u32 %s2351_s17, 6 }
  0x2a   : > { %s362_s9 = sadd.s32 %s1458_s10, %s2347_s14  ;;  %s1466_s20 = sshll.u32 %s2349_s28, 1 }
  0x2b   : > { %s1459_s18 = sshll.u32 %s362_s9, 2  ;;  %s398_s21 = sadd.s32 %s1466_s20, %s2353_s27 }
  0x2c   : > { %s2008_s19 = scalar_lea.vmem %s2316_s1, %s1459_s18  ;;  %s1467_s22 = sshll.u32 %s398_s21, 3 }
  0x2d   : > { %s2014_s11 = scalar_lea.vmem %s2320_s5, %s1467_s22  ;;  %s2019_s17 = scalar_lea.vmem %s2321_s6, %s1467_s22 }
  0x2e   : > { %p1470_p2 = scmp.ne.s32.totalorder %s1872_s26, 0 }
  0x2f   : > { %v1899_v0 = vmov (!%p1470_p2), 0.0  }
  0x30   : > { %413 = sbr.rel (%p1470_p2) target bundleno = 64 (0x40), region = 36  ;;  %414 = vst [vmem:[#allocation2] sm:$0xff] (!%p1470_p2), %v1899_v0  ;;  %415 = vst [vmem:[#allocation2 + $0x8] sm:$0xff] (!%p1470_p2), %v1899_v0 }
  0x31   : > { %416 = vst [vmem:[#allocation2 + $0x10] sm:$0xff] (!%p1470_p2), %v1899_v0  ;;  %417 = vst [vmem:[#allocation2 + $0x18] sm:$0xff] (!%p1470_p2), %v1899_v0 }
  0x32   : > { %418 = vst [vmem:[#allocation2 + $0x20] sm:$0xff] (!%p1470_p2), %v1899_v0  ;;  %419 = vst [vmem:[#allocation2 + $0x28] sm:$0xff] (!%p1470_p2), %v1899_v0 }
  0x33   : > { %420 = vst [vmem:[#allocation2 + $0x30] sm:$0xff] (!%p1470_p2), %v1899_v0  ;;  %421 = vst [vmem:[#allocation2 + $0x38] sm:$0xff] (!%p1470_p2), %v1899_v0 }
  0x34   : > { %422 = vst [vmem:[#allocation2 + $0x40] sm:$0xff] (!%p1470_p2), %v1899_v0  ;;  %423 = vst [vmem:[#allocation2 + $0x48] sm:$0xff] (!%p1470_p2), %v1899_v0 }
  0x35   : > { %424 = vst [vmem:[#allocation2 + $0x50] sm:$0xff] (!%p1470_p2), %v1899_v0  ;;  %425 = vst [vmem:[#allocation2 + $0x58] sm:$0xff] (!%p1470_p2), %v1899_v0 }
  0x36   : > { %426 = vst [vmem:[#allocation2 + $0x60] sm:$0xff] (!%p1470_p2), %v1899_v0  ;;  %427 = vst [vmem:[#allocation2 + $0x68] sm:$0xff] (!%p1470_p2), %v1899_v0 }
  0x37   : > { %428 = vst [vmem:[#allocation2 + $0x70] sm:$0xff] %v1899_v0  ;;  %429 = vst [vmem:[#allocation2 + $0x78] sm:$0xff] %v1899_v0 }
  0x38   : > { %430 = vst [vmem:[#allocation2 + $0x80] sm:$0xff] %v1899_v0  ;;  %431 = vst [vmem:[#allocation2 + $0x88] sm:$0xff] %v1899_v0 }
  0x39   : > { %432 = vst [vmem:[#allocation2 + $0x90] sm:$0xff] %v1899_v0  ;;  %433 = vst [vmem:[#allocation2 + $0x98] sm:$0xff] %v1899_v0 }
  0x3a   : > { %434 = vst [vmem:[#allocation2 + $0xa0] sm:$0xff] %v1899_v0  ;;  %435 = vst [vmem:[#allocation2 + $0xa8] sm:$0xff] %v1899_v0 }
  0x3b   : > { %436 = vst [vmem:[#allocation2 + $0xb0] sm:$0xff] %v1899_v0  ;;  %437 = vst [vmem:[#allocation2 + $0xb8] sm:$0xff] %v1899_v0 }
  0x3c   : > { %438 = vst [vmem:[#allocation2 + $0xc0] sm:$0xff] %v1899_v0  ;;  %439 = vst [vmem:[#allocation2 + $0xc8] sm:$0xff] %v1899_v0 }
  0x3d   : > { %440 = vst [vmem:[#allocation2 + $0xd0] sm:$0xff] %v1899_v0  ;;  %441 = vst [vmem:[#allocation2 + $0xd8] sm:$0xff] %v1899_v0 }
  0x3e   : > { %442 = vst [vmem:[#allocation2 + $0xe0] sm:$0xff] %v1899_v0  ;;  %443 = vst [vmem:[#allocation2 + $0xe8] sm:$0xff] %v1899_v0 }
  0x3f   : > { %444 = vst [vmem:[#allocation2 + $0xf0] sm:$0xff] %v1899_v0  ;;  %445 = vst [vmem:[#allocation2 + $0xf8] sm:$0xff] %v1899_v0 }
  0x40 PF: > { %v1804_v1 = vld [vmem:[%s1997_s12] sm:$0xff]   ;;  %v1805_v2 = vld [vmem:[%s1997_s12 + $0x8] sm:$0xff]   ;;  %v1806_v3 = vld [vmem:[%s1997_s12 + $0x10] sm:$0xff]   ;;  %p1495_p3 = scmp.ne.s32.totalorder %s1872_s26, 3 }
  0x41   : > { %1682 = vmatprep.subr.bf16.mxu0 %v1804_v1  ;;  %1730 = vmatprep.subr.bf16.mxu1 %v1804_v1  ;;  %v1807_v4 = vld [vmem:[%s1997_s12 + $0x18] sm:$0xff]   ;;  %v1812_v5 = vld [vmem:[%s2008_s19] sm:$0xff]   ;;  %v1809_v8 = vld [vmem:[%s1997_s12 + $0x28] sm:$0xff]  }
  0x42   : > { %1683 = vmatpush3.bf16.msra.mxu0 %v1804_v1  ;;  %1738 = vmatpush3.bf16.msra.mxu1 %v1804_v1  ;;  %v1813_v6 = vld [vmem:[%s2008_s19 + $0x40] sm:$0xff]   ;;  %v1810_v9 = vld [vmem:[%s1997_s12 + $0x30] sm:$0xff]   ;;  %v1811_v10 = vld [vmem:[%s1997_s12 + $0x38] sm:$0xff]  }
  0x43   : > { %1684 = vmatprep.subr.bf16.mxu0 %v1805_v2  ;;  %1731 = vmatprep.subr.bf16.mxu1 %v1805_v2  ;;  %v1808_v7 = vld [vmem:[%s1997_s12 + $0x20] sm:$0xff]   ;;  %v1814_v11 = vld [vmem:[%s2008_s19 + $0x8] sm:$0xff]   ;;  %v1816_v13 = vld [vmem:[%s2008_s19 + $0x10] sm:$0xff]  }
  0x44   : > { %1698 = vmatprep.mubr.bf16.mxu0 %v1812_v5  ;;  %1714 = vmatprep.mubr.bf16.mxu1 %v1813_v6  ;;  %v1815_v12 = vld [vmem:[%s2008_s19 + $0x48] sm:$0xff]   ;;  %v1817_v14 = vld [vmem:[%s2008_s19 + $0x50] sm:$0xff]   ;;  %v1818_v15 = vld [vmem:[%s2008_s19 + $0x18] sm:$0xff]  }
  0x45   : > { %v1819_v16 = vld [vmem:[%s2008_s19 + $0x58] sm:$0xff]   ;;  %v1820_v17 = vld [vmem:[%s2008_s19 + $0x20] sm:$0xff]   ;;  %v1822_v19 = vld [vmem:[%s2008_s19 + $0x28] sm:$0xff]  }
  0x46   : > { %1685 = vmatpush3.bf16.msra.mxu0 %v1805_v2  ;;  %1739 = vmatpush3.bf16.msra.mxu1 %v1805_v2  ;;  %v1821_v18 = vld [vmem:[%s2008_s19 + $0x60] sm:$0xff]   ;;  %v1823_v20 = vld [vmem:[%s2008_s19 + $0x68] sm:$0xff]   ;;  %v1824_v21 = vld [vmem:[%s2008_s19 + $0x30] sm:$0xff]  }
  0x47   : > { %1686 = vmatprep.subr.bf16.mxu0 %v1806_v3  ;;  %1732 = vmatprep.subr.bf16.mxu1 %v1806_v3  ;;  %v1825_v22 = vld [vmem:[%s2008_s19 + $0x70] sm:$0xff]   ;;  %v1826_v23 = vld [vmem:[%s2008_s19 + $0x38] sm:$0xff]   ;;  %v446_v27 = vld [vmem:[#allocation2] sm:$0xff] }
  0x48   : > { %v1827_v24 = vld [vmem:[%s2008_s19 + $0x78] sm:$0xff]   ;;  %v448_v25 = vld [vmem:[#allocation2 + $0x10] sm:$0xff]  ;;  %v462_v28 = vld [vmem:[#allocation2 + $0x80] sm:$0xff] }
  0x49   : > { %v464_v26 = vld [vmem:[#allocation2 + $0x90] sm:$0xff]  ;;  %v449_v31 = vld [vmem:[#allocation2 + $0x18] sm:$0xff]  ;;  %v447_v37 = vld [vmem:[#allocation2 + $0x8] sm:$0xff] }
  0x4a   : > { %1687 = vmatpush3.bf16.msra.mxu0 %v1806_v3  ;;  %1740 = vmatpush3.bf16.msra.mxu1 %v1806_v3  ;;  %v465_v32 = vld [vmem:[#allocation2 + $0x98] sm:$0xff]  ;;  %v463_v38 = vld [vmem:[#allocation2 + $0x88] sm:$0xff]  ;;  %v452_v49 = vld [vmem:[#allocation2 + $0x30] sm:$0xff] }
  0x4b   : > { %1688 = vmatprep.subr.bf16.mxu0 %v1807_v4  ;;  %1733 = vmatprep.subr.bf16.mxu1 %v1807_v4  ;;  %v468_v50 = vld [vmem:[#allocation2 + $0xb0] sm:$0xff]  ;;  %v450_v51 = vld [vmem:[#allocation2 + $0x20] sm:$0xff]  ;;  %v453_v55 = vld [vmem:[#allocation2 + $0x38] sm:$0xff] }
  0x4c   : > { %v466_v52 = vld [vmem:[#allocation2 + $0xa0] sm:$0xff]  ;;  %v469_v56 = vld [vmem:[#allocation2 + $0xb8] sm:$0xff]  ;;  %v451_v61 = vld [vmem:[#allocation2 + $0x28] sm:$0xff] }
  0x4d   : > { %v467_v62 = vld [vmem:[#allocation2 + $0xa8] sm:$0xff] }
  0x4e   : > { %1689 = vmatpush3.bf16.msra.mxu0 %v1807_v4  ;;  %1741 = vmatpush3.bf16.msra.mxu1 %v1807_v4 }
  0x4f   : > { %1690 = vmatprep.subr.bf16.mxu0 %v1808_v7  ;;  %1734 = vmatprep.subr.bf16.mxu1 %v1808_v7 }
  0x52   : > { %1691 = vmatpush3.bf16.msra.mxu0 %v1808_v7  ;;  %1742 = vmatpush3.bf16.msra.mxu1 %v1808_v7 }
  0x53   : > { %1692 = vmatprep.subr.bf16.mxu0 %v1809_v8  ;;  %1735 = vmatprep.subr.bf16.mxu1 %v1809_v8 }
  0x56   : > { %1693 = vmatpush3.bf16.msra.mxu0 %v1809_v8  ;;  %1743 = vmatpush3.bf16.msra.mxu1 %v1809_v8 }
  0x57   : > { %1694 = vmatprep.subr.bf16.mxu0 %v1810_v9  ;;  %1736 = vmatprep.subr.bf16.mxu1 %v1810_v9 }
  0x5a   : > { %1695 = vmatpush3.bf16.msra.mxu0 %v1810_v9  ;;  %1744 = vmatpush3.bf16.msra.mxu1 %v1810_v9  ;;  %v456_v9 = vld [vmem:[#allocation2 + $0x50] sm:$0xff] }
  0x5b   : > { %1696 = vmatprep.subr.bf16.mxu0 %v1811_v10  ;;  %1737 = vmatprep.subr.bf16.mxu1 %v1811_v10 }
  0x5e   : > { %1697 = vmatpush3.bf16.msra.mxu0 %v1811_v10  ;;  %1745 = vmatpush3.bf16.msra.mxu1 %v1811_v10  ;;  %v472_v10 = vld [vmem:[#allocation2 + $0xd0] sm:$0xff] }
  0x61   : > { %1699 = vmatmul.mubr.bf16.vlgmr.msra.gmra.mrb[0].mxu0 %v1814_v11  ;;  %1715 = vmatmul.mubr.bf16.vlgmr.msra.gmra.mrb[0].mxu1 %v1815_v12  ;;  %v454_v11 = vld [vmem:[#allocation2 + $0x40] sm:$0xff] }
  0x62   : > { %1702 = vmatprep.mubr.bf16.mxu0 %v1816_v13  ;;  %1718 = vmatprep.mubr.bf16.mxu1 %v1817_v14  ;;  %v470_v12 = vld [vmem:[#allocation2 + $0xc0] sm:$0xff] }
  0x69   : > { %1703 = vmatmul.mubr.bf16.gmra.mrb[4].mxu0 %v1818_v15  ;;  %1719 = vmatmul.mubr.bf16.gmra.mrb[4].mxu1 %v1819_v16  ;;  %v457_v15 = vld [vmem:[#allocation2 + $0x58] sm:$0xff] }
  0x6a   : > { %1706 = vmatprep.mubr.bf16.mxu0 %v1820_v17  ;;  %1722 = vmatprep.mubr.bf16.mxu1 %v1821_v18  ;;  %v473_v16 = vld [vmem:[#allocation2 + $0xd8] sm:$0xff] }
  0x71   : > { %1707 = vmatmul.mubr.bf16.gmra.mrb[8].mxu0 %v1822_v19  ;;  %1723 = vmatmul.mubr.bf16.gmra.mrb[8].mxu1 %v1823_v20 }
  0x72   : > { %1710 = vmatprep.mubr.bf16.mxu0 %v1824_v21  ;;  %1726 = vmatprep.mubr.bf16.mxu1 %v1825_v22  ;;  %v455_v21 = vld [vmem:[#allocation2 + $0x48] sm:$0xff] }
  0x73   : > { %v471_v22 = vld [vmem:[#allocation2 + $0xc8] sm:$0xff] }
  0x79   : > { %1711 = vmatmul.mubr.bf16.gmra.mrb[12].mxu0 %v1826_v23  ;;  %1727 = vmatmul.mubr.bf16.gmra.mrb[12].mxu1 %v1827_v24 }
 0x134   : > { %v1700_v29 = vpop.f32.mrb[0].mxu0  ;;  %v1716_v30 = vpop.f32.mrb[0].mxu1 }
 0x135   : > { %v833_v33 = vadd.f32 %v1700_v29, %v448_v25  ;;  %v849_v34 = vadd.f32 %v1716_v30, %v464_v26  ;;  %v704_v35 = vpop.f32.mrb[1].mxu0  ;;  %v768_v36 = vpop.f32.mrb[1].mxu1 }
 0x136   : > { %v831_v39 = vadd.f32 %v704_v35, %v446_v27  ;;  %v847_v40 = vadd.f32 %v768_v36, %v462_v28  ;;  %v1701_v41 = vpop.f32.mrb[2].mxu0  ;;  %v1717_v42 = vpop.f32.mrb[2].mxu1  ;;  %v458_v35 = vld [vmem:[#allocation2 + $0x60] sm:$0xff] }
 0x137   : > { %865 = vst [vmem:[#allocation2 + $0x10] sm:$0xff] %v833_v33  ;;  %881 = vst [vmem:[#allocation2 + $0x90] sm:$0xff] %v849_v34  ;;  %v834_v43 = vadd.f32 %v1701_v41, %v449_v31  ;;  %v850_v44 = vadd.f32 %v1717_v42, %v465_v32  ;;  %v707_v45 = vpop.f32.mrb[3].mxu0  ;;  %v771_v46 = vpop.f32.mrb[3].mxu1  ;;  %v460_v33 = vld [vmem:[#allocation2 + $0x70] sm:$0xff]  ;;  %v474_v36 = vld [vmem:[#allocation2 + $0xe0] sm:$0xff] }
 0x138   : > { %863 = vst [vmem:[#allocation2] sm:$0xff] %v831_v39  ;;  %879 = vst [vmem:[#allocation2 + $0x80] sm:$0xff] %v847_v40  ;;  %v832_v47 = vadd.f32 %v707_v45, %v447_v37  ;;  %v848_v48 = vadd.f32 %v771_v46, %v463_v38  ;;  %v476_v34 = vld [vmem:[#allocation2 + $0xf0] sm:$0xff]  ;;  %v461_v39 = vld [vmem:[#allocation2 + $0x78] sm:$0xff] }
 0x139   : > { %866 = vst [vmem:[#allocation2 + $0x18] sm:$0xff] %v834_v43  ;;  %882 = vst [vmem:[#allocation2 + $0x98] sm:$0xff] %v850_v44  ;;  %v477_v40 = vld [vmem:[#allocation2 + $0xf8] sm:$0xff]  ;;  %v459_v45 = vld [vmem:[#allocation2 + $0x68] sm:$0xff] }
 0x13a   : > { %864 = vst [vmem:[#allocation2 + $0x8] sm:$0xff] %v832_v47  ;;  %880 = vst [vmem:[#allocation2 + $0x88] sm:$0xff] %v848_v48  ;;  %v475_v46 = vld [vmem:[#allocation2 + $0xe8] sm:$0xff] }
 0x13c   : > { %v1704_v53 = vpop.f32.mrb[4].mxu0  ;;  %v1720_v54 = vpop.f32.mrb[4].mxu1 }
 0x13d   : > { %v837_v57 = vadd.f32 %v1704_v53, %v452_v49  ;;  %v853_v58 = vadd.f32 %v1720_v54, %v468_v50  ;;  %v720_v59 = vpop.f32.mrb[5].mxu0  ;;  %v784_v60 = vpop.f32.mrb[5].mxu1 }
 0x13e   : > { %v835_v63 = vadd.f32 %v720_v59, %v450_v51  ;;  %v851_v0 = vadd.f32 %v784_v60, %v466_v52  ;;  %v1705_v1 = vpop.f32.mrb[6].mxu0  ;;  %v1721_v2 = vpop.f32.mrb[6].mxu1  ;;  %v901_v59 = vld [vmem:[#allocation2 + $0x10] sm:$0xff] (!%p1495_p3) }
 0x13f   : > { %869 = vst [vmem:[#allocation2 + $0x30] sm:$0xff] %v837_v57  ;;  %885 = vst [vmem:[#allocation2 + $0xb0] sm:$0xff] %v853_v58  ;;  %v838_v3 = vadd.f32 %v1705_v1, %v453_v55  ;;  %v854_v4 = vadd.f32 %v1721_v2, %v469_v56  ;;  %v723_v5 = vpop.f32.mrb[7].mxu0  ;;  %v787_v6 = vpop.f32.mrb[7].mxu1  ;;  %v899_v57 = vld [vmem:[#allocation2] sm:$0xff] (!%p1495_p3) }
 0x140   : > { %867 = vst [vmem:[#allocation2 + $0x20] sm:$0xff] %v835_v63  ;;  %883 = vst [vmem:[#allocation2 + $0xa0] sm:$0xff] %v851_v0  ;;  %v836_v7 = vadd.f32 %v723_v5, %v451_v61  ;;  %v852_v8 = vadd.f32 %v787_v6, %v467_v62  ;;  %v902_v60 = vld [vmem:[#allocation2 + $0x18] sm:$0xff] (!%p1495_p3)  ;;  %v2050_v62 = vld [vmem:[%s2318_s3] ss:$0 sm:$0xff] (!%p1495_p3) }
 0x141   : > { %870 = vst [vmem:[#allocation2 + $0x38] sm:$0xff] %v838_v3  ;;  %886 = vst [vmem:[#allocation2 + $0xb8] sm:$0xff] %v854_v4  ;;  %v900_v58 = vld [vmem:[#allocation2 + $0x8] sm:$0xff] (!%p1495_p3) }
 0x142   : > { %868 = vst [vmem:[#allocation2 + $0x28] sm:$0xff] %v836_v7  ;;  %884 = vst [vmem:[#allocation2 + $0xa8] sm:$0xff] %v852_v8  ;;  %v2053_v8 = vadd.f32 (!%p1495_p3), %v2050_v62, %v899_v57 }
 0x144   : > { %v1708_v13 = vpop.f32.mrb[8].mxu0  ;;  %v1724_v14 = vpop.f32.mrb[8].mxu1 }
 0x145   : > { %v841_v17 = vadd.f32 %v1708_v13, %v456_v9  ;;  %v857_v18 = vadd.f32 %v1724_v14, %v472_v10  ;;  %v736_v19 = vpop.f32.mrb[9].mxu0  ;;  %v800_v20 = vpop.f32.mrb[9].mxu1  ;;  %v2056_v9 = vadd.f32 (!%p1495_p3), %v2050_v62, %v900_v58  ;;  %v2059_v13 = vadd.f32 (!%p1495_p3), %v2050_v62, %v901_v59 }
 0x146   : > { %v839_v23 = vadd.f32 %v736_v19, %v454_v11  ;;  %v855_v24 = vadd.f32 %v800_v20, %v470_v12  ;;  %v1709_v25 = vpop.f32.mrb[10].mxu0  ;;  %v1725_v26 = vpop.f32.mrb[10].mxu1  ;;  %v905_v0 = vld [vmem:[#allocation2 + $0x30] sm:$0xff] (!%p1495_p3)  ;;  %v915_v12 = vld [vmem:[#allocation2 + $0x80] sm:$0xff] (!%p1495_p3)  ;;  %v2062_v14 = vadd.f32 (!%p1495_p3), %v2050_v62, %v902_v60  ;;  %v918_v19 = vld [vmem:[#allocation2 + $0x98] sm:$0xff] (!%p1495_p3) }
 0x147   : > { %873 = vst [vmem:[#allocation2 + $0x50] sm:$0xff] %v841_v17  ;;  %889 = vst [vmem:[#allocation2 + $0xd0] sm:$0xff] %v857_v18  ;;  %v842_v27 = vadd.f32 %v1709_v25, %v457_v15  ;;  %v858_v28 = vadd.f32 %v1725_v26, %v473_v16  ;;  %v739_v29 = vpop.f32.mrb[11].mxu0  ;;  %v803_v30 = vpop.f32.mrb[11].mxu1  ;;  %v903_v61 = vld [vmem:[#allocation2 + $0x20] sm:$0xff] (!%p1495_p3)  ;;  %v916_v17 = vld [vmem:[#allocation2 + $0x88] sm:$0xff] (!%p1495_p3)  ;;  %v2071_v20 = vadd.f32 (!%p1495_p3), %v2050_v62, %v905_v0 }
 0x148   : > { %871 = vst [vmem:[#allocation2 + $0x40] sm:$0xff] %v839_v23  ;;  %887 = vst [vmem:[#allocation2 + $0xc0] sm:$0xff] %v855_v24  ;;  %v840_v31 = vadd.f32 %v739_v29, %v455_v21  ;;  %v856_v32 = vadd.f32 %v803_v30, %v471_v22  ;;  %v906_v1 = vld [vmem:[#allocation2 + $0x38] sm:$0xff] (!%p1495_p3)  ;;  %v2065_v15 = vadd.f32 (!%p1495_p3), %v2050_v62, %v903_v61  ;;  %v917_v18 = vld [vmem:[#allocation2 + $0x90] sm:$0xff] (!%p1495_p3) }
 0x149   : > { %874 = vst [vmem:[#allocation2 + $0x58] sm:$0xff] %v842_v27  ;;  %890 = vst [vmem:[#allocation2 + $0xd8] sm:$0xff] %v858_v28  ;;  %v904_v63 = vld [vmem:[#allocation2 + $0x28] sm:$0xff] (!%p1495_p3)  ;;  %v2074_v21 = vadd.f32 (!%p1495_p3), %v2050_v62, %v906_v1  ;;  %v970_v23 = vadd.f32 (!%p1495_p3), %v2056_v9, %v2053_v8  ;;  %v919_v24 = vld [vmem:[#allocation2 + $0xa0] sm:$0xff] (!%p1495_p3)  ;;  %v1009_v0 = vmul.f32 (!%p1495_p3), %v2059_v13, %v2059_v13 }
 0x14a   : > { %872 = vst [vmem:[#allocation2 + $0x48] sm:$0xff] %v840_v31  ;;  %888 = vst [vmem:[#allocation2 + $0xc8] sm:$0xff] %v856_v32  ;;  %v2068_v16 = vadd.f32 (!%p1495_p3), %v2050_v62, %v904_v63  ;;  %v920_v25 = vld [vmem:[#allocation2 + $0xa8] sm:$0xff] (!%p1495_p3)  ;;  %v921_v26 = vld [vmem:[#allocation2 + $0xb0] sm:$0xff] (!%p1495_p3) }
 0x14b   : > { %v922_v31 = vld [vmem:[#allocation2 + $0xb8] sm:$0xff] (!%p1495_p3) }
 0x14c   : > { %v1712_v37 = vpop.f32.mrb[12].mxu0  ;;  %v1728_v38 = vpop.f32.mrb[12].mxu1  ;;  %898 = sbr.rel (%p1495_p3) target bundleno = 420 (0x1a4), region = 40 }
 0x14d   : > { %v845_v41 = vadd.f32 %v1712_v37, %v460_v33  ;;  %v861_v42 = vadd.f32 %v1728_v38, %v476_v34  ;;  %v752_v43 = vpop.f32.mrb[13].mxu0  ;;  %v816_v44 = vpop.f32.mrb[13].mxu1 }
 0x14e   : > { %v843_v47 = vadd.f32 %v752_v43, %v458_v35  ;;  %v859_v48 = vadd.f32 %v816_v44, %v474_v36  ;;  %v1713_v49 = vpop.f32.mrb[14].mxu0  ;;  %v1729_v50 = vpop.f32.mrb[14].mxu1  ;;  %v909_v4 = vld [vmem:[#allocation2 + $0x50] sm:$0xff] (!%p1495_p3)  ;;  %v971_v36 = vadd.f32 (!%p1495_p3), %v970_v23, %v2059_v13  ;;  %v2113_v43 = vadd.f32 (!%p1495_p3), %v2050_v62, %v918_v19 }
 0x14f   : > { %877 = vst [vmem:[#allocation2 + $0x70] sm:$0xff] %v845_v41  ;;  %893 = vst [vmem:[#allocation2 + $0xf0] sm:$0xff] %v861_v42  ;;  %v846_v51 = vadd.f32 %v1713_v49, %v461_v39  ;;  %v862_v52 = vadd.f32 %v1729_v50, %v477_v40  ;;  %v755_v53 = vpop.f32.mrb[15].mxu0  ;;  %v819_v54 = vpop.f32.mrb[15].mxu1  ;;  %v907_v2 = vld [vmem:[#allocation2 + $0x40] sm:$0xff] (!%p1495_p3)  ;;  %v2085_v28 = vadd.f32 (!%p1495_p3), %v2050_v62, %v909_v4  ;;  %v925_v38 = vld [vmem:[#allocation2 + $0xd0] sm:$0xff] (!%p1495_p3) }
 0x150   : > { %875 = vst [vmem:[#allocation2 + $0x60] sm:$0xff] %v843_v47  ;;  %891 = vst [vmem:[#allocation2 + $0xe0] sm:$0xff] %v859_v48  ;;  %v844_v55 = vadd.f32 %v755_v53, %v459_v45  ;;  %v860_v56 = vadd.f32 %v819_v54, %v475_v46  ;;  %v910_v5 = vld [vmem:[#allocation2 + $0x58] sm:$0xff] (!%p1495_p3)  ;;  %v2077_v22 = vadd.f32 (!%p1495_p3), %v2050_v62, %v907_v2  ;;  %v923_v32 = vld [vmem:[#allocation2 + $0xc0] sm:$0xff] (!%p1495_p3) }
 0x151   : > { %878 = vst [vmem:[#allocation2 + $0x78] sm:$0xff] %v846_v51  ;;  %894 = vst [vmem:[#allocation2 + $0xf8] sm:$0xff] %v862_v52  ;;  %v908_v3 = vld [vmem:[#allocation2 + $0x48] sm:$0xff] (!%p1495_p3)  ;;  %v2088_v29 = vadd.f32 (!%p1495_p3), %v2050_v62, %v910_v5  ;;  %v926_v39 = vld [vmem:[#allocation2 + $0xd8] sm:$0xff] (!%p1495_p3)  ;;  %v2104_v40 = vadd.f32 (!%p1495_p3), %v2050_v62, %v915_v12  ;;  %v2107_v41 = vadd.f32 (!%p1495_p3), %v2050_v62, %v916_v17 }
 0x152   : > { %876 = vst [vmem:[#allocation2 + $0x68] sm:$0xff] %v844_v55  ;;  %892 = vst [vmem:[#allocation2 + $0xe8] sm:$0xff] %v860_v56  ;;  %v2082_v27 = vadd.f32 (!%p1495_p3), %v2050_v62, %v908_v3  ;;  %v924_v37 = vld [vmem:[#allocation2 + $0xc8] sm:$0xff] (!%p1495_p3)  ;;  %v2110_v42 = vadd.f32 (!%p1495_p3), %v2050_v62, %v917_v18  ;;  %v2116_v47 = vadd.f32 (!%p1495_p3), %v2050_v62, %v919_v24 }
 0x153   : > { %v2119_v48 = vadd.f32 %v2050_v62, %v920_v25  ;;  %v2122_v49 = vadd.f32 %v2050_v62, %v921_v26  ;;  %v972_v50 = vadd.f32 %v971_v36, %v2062_v14  ;;  %v2126_v52 = vadd.f32 %v2050_v62, %v922_v31 }
 0x154   : > { %v2129_v53 = vadd.f32 %v2050_v62, %v923_v32  ;;  %v1007_v54 = vmul.f32 %v2053_v8, %v2053_v8  ;;  %v1008_v55 = vmul.f32 %v2056_v9, %v2056_v9  ;;  %v2136_v56 = vadd.f32 %v2050_v62, %v924_v37 }
 0x155   : > { %v2139_v57 = vadd.f32 %v2050_v62, %v925_v38  ;;  %v2142_v58 = vadd.f32 %v2050_v62, %v926_v39  ;;  %v973_v59 = vadd.f32 %v972_v50, %v2065_v15  ;;  %v1010_v3 = vmul.f32 %v2062_v14, %v2062_v14 }
 0x156   : > { %v913_v10 = vld [vmem:[#allocation2 + $0x70] sm:$0xff]  ;;  %v1011_v4 = vmul.f32 %v2065_v15, %v2065_v15  ;;  %v1012_v5 = vmul.f32 %v2068_v16, %v2068_v16  ;;  %v1581_v12 = vpack.c.bf16 %v2074_v21, %v2071_v20  ;;  %v1586_v17 = vpack.c.bf16 %v2082_v27, %v2077_v22 }
 0x157   : > { %v911_v6 = vld [vmem:[#allocation2 + $0x60] sm:$0xff]  ;;  %v2097_v34 = vadd.f32 %v2050_v62, %v913_v10  ;;  %v929_v46 = vld [vmem:[#allocation2 + $0xf0] sm:$0xff]  ;;  %v974_v2 = vadd.f32 %v973_v59, %v2068_v16  ;;  %v1616_v19 = vpack.c.bf16 %v2119_v48, %v2116_v47  ;;  %v1621_v24 = vpack.c.bf16 %v2126_v52, %v2122_v49 }
 0x158   : > { %v914_v11 = vld [vmem:[#allocation2 + $0x78] sm:$0xff]  ;;  %v2091_v30 = vadd.f32 %v2050_v62, %v911_v6  ;;  %v927_v44 = vld [vmem:[#allocation2 + $0xe0] sm:$0xff]  ;;  %v2152_v63 = vadd.f32 %v2050_v62, %v929_v46  ;;  %v1039_v6 = vadd.f32 %v1008_v55, %v1007_v54  ;;  %1645 = vst [vmem:[%s2002_s16 + $0x18] sm:$0xff] %v1581_v12   ;;  %1646 = vst [vmem:[%s2002_s16 + $0x20] sm:$0xff] %v1586_v17  }
 0x159   : > { %v912_v7 = vld [vmem:[#allocation2 + $0x68] sm:$0xff]  ;;  %v2100_v35 = vadd.f32 %v2050_v62, %v914_v11  ;;  %v930_v51 = vld [vmem:[#allocation2 + $0xf8] sm:$0xff]  ;;  %v2146_v60 = vadd.f32 %v2050_v62, %v927_v44  ;;  %v975_v10 = vadd.f32 %v974_v2, %v2071_v20  ;;  %v1576_v11 = vpack.c.bf16 %v2068_v16, %v2065_v15  ;;  %1652 = vst [vmem:[%s2002_s16 + $0x50] sm:$0xff] %v1616_v19  }
 0x15a   : > { %v2094_v33 = vadd.f32 %v2050_v62, %v912_v7  ;;  %v928_v45 = vld [vmem:[#allocation2 + $0xe8] sm:$0xff]  ;;  %v2157_v1 = vadd.f32 %v2050_v62, %v930_v51  ;;  %v1566_v7 = vpack.c.bf16 %v2056_v9, %v2053_v8  ;;  %v1040_v18 = vadd.f32 %v1039_v6, %v1009_v0  ;;  %1653 = vst [vmem:[%s2002_s16 + $0x58] sm:$0xff] %v1621_v24  }
 0x15b   : > { %v2149_v61 = vadd.f32 %v2050_v62, %v928_v45  ;;  %v1571_v62 = vpack.c.bf16 %v2062_v14, %v2059_v13  ;;  %v1591_v8 = vpack.c.bf16 %v2088_v29, %v2085_v28  ;;  %v1601_v13 = vpack.c.bf16 %v2100_v35, %v2097_v34  ;;  %1644 = vst [vmem:[%s2002_s16 + $0x10] sm:$0xff] %v1576_v11  }
 0x15c   : > { %1567 = vst [vmem:[%s2002_s16] sm:$0xff] %v1566_v7   ;;  %v1596_v9 = vpack.c.bf16 %v2094_v33, %v2091_v30  ;;  %v976_v14 = vadd.f32 %v975_v10, %v2074_v21  ;;  %v1606_v15 = vpack.c.bf16 %v2107_v41, %v2104_v40  ;;  %v1611_v16 = vpack.c.bf16 %v2113_v43, %v2110_v42 }
 0x15d   : > { %1643 = vst [vmem:[%s2002_s16 + $0x8] sm:$0xff] %v1571_v62   ;;  %v1041_v23 = vadd.f32 %v1040_v18, %v1010_v3  ;;  %1647 = vst [vmem:[%s2002_s16 + $0x28] sm:$0xff] %v1591_v8   ;;  %v1626_v25 = vpack.c.bf16 %v2136_v56, %v2129_v53  ;;  %v1631_v26 = vpack.c.bf16 %v2142_v58, %v2139_v57 }
 0x15e   : > { %1648 = vst [vmem:[%s2002_s16 + $0x30] sm:$0xff] %v1596_v9   ;;  %1649 = vst [vmem:[%s2002_s16 + $0x38] sm:$0xff] %v1601_v13   ;;  %v977_v31 = vadd.f32 %v976_v14, %v2077_v22  ;;  %v1636_v32 = vpack.c.bf16 %v2149_v61, %v2146_v60  ;;  %v1641_v36 = vpack.c.bf16 %v2157_v1, %v2152_v63 }
 0x15f   : > { %1650 = vst [vmem:[%s2002_s16 + $0x40] sm:$0xff] %v1606_v15   ;;  %1651 = vst [vmem:[%s2002_s16 + $0x48] sm:$0xff] %v1611_v16   ;;  %v1013_v37 = vmul.f32 %v2071_v20, %v2071_v20  ;;  %v1042_v38 = vadd.f32 %v1041_v23, %v1011_v4  ;;  %v1014_v44 = vmul.f32 %v2074_v21, %v2074_v21 }
 0x160   : > { %1654 = vst [vmem:[%s2002_s16 + $0x60] sm:$0xff] %v1626_v25   ;;  %1655 = vst [vmem:[%s2002_s16 + $0x68] sm:$0xff] %v1631_v26   ;;  %v978_v39 = vadd.f32 %v977_v31, %v2082_v27  ;;  %v1015_v50 = vmul.f32 %v2077_v22, %v2077_v22  ;;  %v1016_v54 = vmul.f32 %v2082_v27, %v2082_v27 }
 0x161   : > { %1656 = vst [vmem:[%s2002_s16 + $0x70] sm:$0xff] %v1636_v32   ;;  %1657 = vst [vmem:[%s2002_s16 + $0x78] sm:$0xff] %v1641_v36   ;;  %v1043_v45 = vadd.f32 %v1042_v38, %v1012_v5  ;;  %v1017_v0 = vmul.f32 %v2085_v28, %v2085_v28  ;;  %v1018_v3 = vmul.f32 %v2088_v29, %v2088_v29 }
 0x162   : > { %v979_v46 = vadd.f32 %v978_v39, %v2085_v28  ;;  %v1019_v5 = vmul.f32 %v2091_v30, %v2091_v30  ;;  %v1020_v7 = vmul.f32 %v2094_v33, %v2094_v33  ;;  %v1021_v10 = vmul.f32 %v2097_v34, %v2097_v34 }
 0x163   : > { %v1044_v51 = vadd.f32 %v1043_v45, %v1013_v37  ;;  %v1022_v12 = vmul.f32 %v2100_v35, %v2100_v35  ;;  %v1023_v18 = vmul.f32 %v2104_v40, %v2104_v40  ;;  %v1024_v9 = vmul.f32 %v2107_v41, %v2107_v41 }
 0x164   : > { %v980_v20 = vadd.f32 %v979_v46, %v2088_v29  ;;  %v1025_v14 = vmul.f32 %v2110_v42, %v2110_v42  ;;  %v1026_v16 = vmul.f32 %v2113_v43, %v2113_v43  ;;  %v1027_v23 = vmul.f32 %v2116_v47, %v2116_v47 }
 0x165   : > { %v1045_v55 = vadd.f32 %v1044_v51, %v1014_v44  ;;  %v1028_v25 = vmul.f32 %v2119_v48, %v2119_v48  ;;  %v1029_v31 = vmul.f32 %v2122_v49, %v2122_v49  ;;  %v1030_v36 = vmul.f32 %v2126_v52, %v2126_v52 }
 0x166   : > { %v981_v59 = vadd.f32 %v980_v20, %v2091_v30  ;;  %v1031_v38 = vmul.f32 %v2129_v53, %v2129_v53  ;;  %v1032_v44 = vmul.f32 %v2136_v56, %v2136_v56  ;;  %v1033_v46 = vmul.f32 %v2139_v57, %v2139_v57 }
 0x167   : > { %v1046_v2 = vadd.f32 %v1045_v55, %v1015_v50  ;;  %v1034_v51 = vmul.f32 %v2142_v58, %v2142_v58 }
 0x168   : > { %v982_v21 = vadd.f32 %v981_v59, %v2094_v33  ;;  %v1036_v59 = vmul.f32 %v2149_v61, %v2149_v61 }
 0x169   : > { %v1047_v4 = vadd.f32 %v1046_v2, %v1016_v54  ;;  %v1035_v54 = vmul.f32 %v2146_v60, %v2146_v60  ;;  %v1037_v2 = vmul.f32 %v2152_v63, %v2152_v63 }
 0x16a   : > { %v983_v22 = vadd.f32 %v982_v21, %v2097_v34 }
 0x16b   : > { %v1048_v6 = vadd.f32 %v1047_v4, %v1017_v0 }
 0x16c   : > { %v984_v27 = vadd.f32 %v983_v22, %v2100_v35 }
 0x16d   : > { %v1049_v62 = vadd.f32 %v1048_v6, %v1018_v3  ;;  %v1038_v3 = vmul.f32 %v2157_v1, %v2157_v1 }
 0x16e   : > { %v985_v28 = vadd.f32 %v984_v27, %v2104_v40 }
 0x16f   : > { %v1050_v11 = vadd.f32 %v1049_v62, %v1019_v5 }
 0x170   : > { %v986_v29 = vadd.f32 %v985_v28, %v2107_v41 }
 0x171   : > { %v1051_v17 = vadd.f32 %v1050_v11, %v1020_v7 }
 0x172   : > { %v987_v30 = vadd.f32 %v986_v29, %v2110_v42 }
 0x173   : > { %v1052_v8 = vadd.f32 %v1051_v17, %v1021_v10 }
 0x174   : > { %v988_v33 = vadd.f32 %v987_v30, %v2113_v43 }
 0x175   : > { %v1053_v13 = vadd.f32 %v1052_v8, %v1022_v12 }
 0x176   : > { %v989_v34 = vadd.f32 %v988_v33, %v2116_v47 }
 0x177   : > { %v1054_v15 = vadd.f32 %v1053_v13, %v1023_v18 }
 0x178   : > { %v990_v35 = vadd.f32 %v989_v34, %v2119_v48 }
 0x179   : > { %v1055_v19 = vadd.f32 %v1054_v15, %v1024_v9 }
 0x17a   : > { %v991_v40 = vadd.f32 %v990_v35, %v2122_v49 }
 0x17b   : > { %v1056_v24 = vadd.f32 %v1055_v19, %v1025_v14 }
 0x17c   : > { %v992_v41 = vadd.f32 %v991_v40, %v2126_v52 }
 0x17d   : > { %v1057_v26 = vadd.f32 %v1056_v24, %v1026_v16 }
 0x17e   : > { %v993_v42 = vadd.f32 %v992_v41, %v2129_v53 }
 0x17f   : > { %v1058_v32 = vadd.f32 %v1057_v26, %v1027_v23 }
 0x180   : > { %v994_v43 = vadd.f32 %v993_v42, %v2136_v56 }
 0x181   : > { %v1059_v37 = vadd.f32 %v1058_v32, %v1028_v25 }
 0x182   : > { %v995_v47 = vadd.f32 %v994_v43, %v2139_v57 }
 0x183   : > { %v1060_v39 = vadd.f32 %v1059_v37, %v1029_v31 }
 0x184   : > { %v996_v48 = vadd.f32 %v995_v47, %v2142_v58 }
 0x185   : > { %v1061_v45 = vadd.f32 %v1060_v39, %v1030_v36 }
 0x186   : > { %v997_v49 = vadd.f32 %v996_v48, %v2146_v60 }
 0x187   : > { %v1062_v50 = vadd.f32 %v1061_v45, %v1031_v38 }
 0x188   : > { %v998_v52 = vadd.f32 %v997_v49, %v2149_v61 }
 0x189   : > { %v1063_v20 = vadd.f32 %v1062_v50, %v1032_v44 }
 0x18a   : > { %v999_v53 = vadd.f32 %v998_v52, %v2152_v63 }
 0x18b   : > { %v1064_v55 = vadd.f32 %v1063_v20, %v1033_v46 }
 0x18c   : > { %v1000_v56 = vadd.f32 %v999_v53, %v2157_v1 }
 0x18d   : > { %v1065_v57 = vadd.f32 %v1064_v55, %v1034_v51 }
 0x18e   : > { %v1001_v0 = vrot.slane %v1000_v56, 4 }
 0x18f   : > { %v1066_v21 = vadd.f32 %v1065_v57, %v1035_v54 }
 0x190   : > { %v1002_v58 = vadd.f32 %v1001_v0, %v1000_v56 }
 0x191   : > { %v1067_v4 = vadd.f32 %v1066_v21, %v1036_v59 }
 0x192   : > { %v1003_v60 = vrot.slane %v1002_v58, 2 }
 0x193   : > { %v1068_v22 = vadd.f32 %v1067_v4, %v1037_v2 }
 0x194   : > { %v1004_v5 = vadd.f32 %v1003_v60, %v1002_v58 }
 0x195   : > { %v1069_v6 = vadd.f32 %v1068_v22, %v1038_v3 }
 0x196   : > { %v1005_v27 = vrot.slane %v1004_v5, 1 }
 0x197   : > { %v1070_v7 = vrot.slane %v1069_v6, 4 }
 0x198   : > { %v1006_v61 = vadd.f32 %v1005_v27, %v1004_v5 }
 0x199   : > { %v1071_v62 = vadd.f32 %v1070_v7, %v1069_v6 }
 0x19a   : > { %1076 = vst [vmem:[%s2014_s11] sm:$0xff] %v1006_v61 }
 0x19b   : > { %v1072_v28 = vrot.slane %v1071_v62, 2 }
 0x19d   : > { %v1073_v10 = vadd.f32 %v1072_v28, %v1071_v62 }
 0x19f   : > { %v1074_v11 = vrot.slane %v1073_v10, 1 }
 0x1a1   : > { %v1075_v63 = vadd.f32 %v1074_v11, %v1073_v10 }
 0x1a3   : > { %1077 = vst [vmem:[%s2019_s17] sm:$0xff] %v1075_v63 }
 0x1a4 PF: > { %s23_s7 = sadd.s32 1, %s1896_s7   ;;  %s2327_s28 = sld [smem:[#allocation6_spill]] }
 0x1a5   : > { %p20_p4 = scmp.ge.s32.totalorder %s23_s7, 34   ;;  %s2328_s30 = sld [smem:[#allocation7_spill]] }
 0x1a6   : > { %s2329_s8 = sld [smem:[#allocation8_spill]]  ;;  %s2330_s9 = sld [smem:[#allocation9_spill]] }
 0x1a7   : > { %s2331_s26 = smov %s1884_s0  ;;  %s2332_s27 = smov %s1888_s29 }
 0x1a8   :  { %22 = sbr.rel (!%p20_p4) target bundleno = 19 (0x13), region = 97 }
 0x1ab   : > { %s2333_s0 = smov %s2328_s30 }
 0x1ac   : > { %s2334_s29 = smov %s2329_s8  ;;  %s2335_s30 = smov %s2330_s9 }

// kernel: generator_forward.16
= control target key start
LH: loop header
LB: loop body
LE: loop exit
PB: predicated region body
PF: predicated region fallthrough
CT: control target
= control target key end

     0   :  { %s2533_s12 = smov 0   ;;  %s2965_s0 = inlined_call_operand.vmem [shape: bf16[2048,128], index: 0, kind: input, shape index: {}]   ;;  %s2966_s1 = inlined_call_operand.vmem [shape: f32[1,128], index: 1, kind: input, shape index: {}]   ;;  %s2967_s2 = inlined_call_operand.vmem [shape: f32[1,128], index: 2, kind: input, shape index: {}]   ;;  %s2968_s3 = inlined_call_operand.vmem [shape: bf16[2048,128], index: 3, kind: output, shape index: {}]  }
   0x1 LB: > { %s1524_s13 = sadd.s32 4294967295, %s2511_s12   ;;  %p1528_p0 = scmp.ge.s32.totalorder %s2511_s12, 1  ;;  %s2511_s12 = sphi %s2533_s12, %s13_s12  }
   0x2   : > { %p138_p1 = scmp.lt.s32.totalorder %s2511_s12, 3 }
   0x4   : > { %p139_p2 = pnand %p1528_p0, %p138_p1 }
   0x5   : > { %s1529_s14 = sshll.u32 (!%p139_p2), %s1524_s13, 7  ;;  %v2554_v0 = vld [vmem:[%s2966_s1] ss:$0 sm:$0xff] (!%p139_p2) }
   0x6   : > { %142 = sbr.rel (%p139_p2) target bundleno = 167 (0xa7), region = 32  ;;  %p163_p3 = scmp.lt.s32.totalorder (!%p139_p2), %s1529_s14, 255  ;;  %v2563_v9 = vld [vmem:[%s2967_s2] ss:$0 sm:$0xff] (!%p139_p2) }
   0xd   : > { %s2970_s14 = smov (!%p163_p3, %s1529_s14), 255 }
   0xe   : > { %s1530_s15 = sshll.u32 %s2970_s14, 2 }
   0xf   : > { %s2549_s18 = scalar_lea.vmem %s2965_s0, %s1530_s15  ;;  %s2588_s25 = scalar_lea.vmem %s2968_s3, %s1530_s15 }
  0x10   : > { %v1794_v1 = vld [vmem:[%s2549_s18] sm:$0xff]   ;;  %v2369_v2 = vld [vmem:[%s2549_s18 + $0x8] sm:$0xff]   ;;  %v2370_v3 = vld [vmem:[%s2549_s18 + $0x10] sm:$0xff]  }
  0x11   : > { %v1795_v4 = vunpack.c.l.bf16 %v1794_v1  ;;  %v1796_v5 = vunpack.c.h.bf16 %v1794_v1  ;;  %v1799_v6 = vunpack.c.l.bf16 %v2369_v2  ;;  %v1800_v7 = vunpack.c.h.bf16 %v2369_v2  ;;  %v2371_v8 = vld [vmem:[%s2549_s18 + $0x18] sm:$0xff]   ;;  %v2372_v30 = vld [vmem:[%s2549_s18 + $0x20] sm:$0xff]   ;;  %v2373_v35 = vld [vmem:[%s2549_s18 + $0x28] sm:$0xff]  }
  0x12   : > { %v1803_v10 = vunpack.c.l.bf16 %v2370_v3  ;;  %v1804_v11 = vunpack.c.h.bf16 %v2370_v3  ;;  %v1807_v12 = vunpack.c.l.bf16 %v2371_v8  ;;  %v1808_v13 = vunpack.c.h.bf16 %v2371_v8  ;;  %v2374_v40 = vld [vmem:[%s2549_s18 + $0x30] sm:$0xff]   ;;  %v2375_v45 = vld [vmem:[%s2549_s18 + $0x38] sm:$0xff]   ;;  %v2376_v3 = vld [vmem:[%s2549_s18 + $0x40] sm:$0xff]  }
  0x13   : > { %v437_v14 = vmul.f32 %v1795_v4, %v2554_v0  ;;  %v438_v15 = vmul.f32 %v1796_v5, %v2554_v0  ;;  %v439_v16 = vmul.f32 %v1799_v6, %v2554_v0  ;;  %v440_v17 = vmul.f32 %v1800_v7, %v2554_v0 }
  0x14   : > { %v441_v18 = vmul.f32 %v1803_v10, %v2554_v0  ;;  %v442_v19 = vmul.f32 %v1804_v11, %v2554_v0  ;;  %v443_v20 = vmul.f32 %v1807_v12, %v2554_v0  ;;  %v444_v21 = vmul.f32 %v1808_v13, %v2554_v0  ;;  %v2377_v13 = vld [vmem:[%s2549_s18 + $0x48] sm:$0xff]  }
  0x15   : > { %v572_v22 = vadd.f32 %v2563_v9, %v437_v14  ;;  %v573_v23 = vadd.f32 %v2563_v9, %v438_v15  ;;  %v574_v24 = vadd.f32 %v2563_v9, %v439_v16  ;;  %v575_v25 = vadd.f32 %v2563_v9, %v440_v17 }
  0x16   : > { %v576_v26 = vadd.f32 %v2563_v9, %v441_v18  ;;  %v577_v27 = vadd.f32 %v2563_v9, %v442_v19  ;;  %v578_v28 = vadd.f32 %v2563_v9, %v443_v20  ;;  %v579_v29 = vadd.f32 %v2563_v9, %v444_v21  ;;  %v2378_v18 = vld [vmem:[%s2549_s18 + $0x50] sm:$0xff]  }
  0x17   : > { %v700_v31 = vmax.f32 %v572_v22, 0.0  ;;  %v701_v32 = vmax.f32 %v573_v23, 0.0  ;;  %v702_v33 = vmax.f32 %v574_v24, 0.0  ;;  %v703_v34 = vmax.f32 %v575_v25, 0.0  ;;  %v2379_v23 = vld [vmem:[%s2549_s18 + $0x58] sm:$0xff]  }
  0x18   : > { %v704_v36 = vmax.f32 %v576_v26, 0.0  ;;  %v705_v37 = vmax.f32 %v577_v27, 0.0  ;;  %v706_v38 = vmax.f32 %v578_v28, 0.0  ;;  %v707_v39 = vmax.f32 %v579_v29, 0.0 }
  0x19   : > { %v2052_v41 = vpack.c.bf16 %v701_v32, %v700_v31  ;;  %v2057_v42 = vpack.c.bf16 %v703_v34, %v702_v33  ;;  %v1811_v43 = vunpack.c.l.bf16 %v2372_v30  ;;  %v1812_v44 = vunpack.c.h.bf16 %v2372_v30 }
  0x1a   : > { %v2062_v46 = vpack.c.bf16 %v705_v37, %v704_v36  ;;  %v2067_v47 = vpack.c.bf16 %v707_v39, %v706_v38  ;;  %v1815_v48 = vunpack.c.l.bf16 %v2373_v35  ;;  %v1816_v49 = vunpack.c.h.bf16 %v2373_v35 }
  0x1b   : > { %2053 = vst [vmem:[%s2588_s25] sm:$0xff] %v2052_v41   ;;  %2432 = vst [vmem:[%s2588_s25 + $0x8] sm:$0xff] %v2057_v42   ;;  %v445_v50 = vmul.f32 %v1811_v43, %v2554_v0  ;;  %v446_v51 = vmul.f32 %v1812_v44, %v2554_v0  ;;  %v1819_v52 = vunpack.c.l.bf16 %v2374_v40  ;;  %v1820_v53 = vunpack.c.h.bf16 %v2374_v40  ;;  %v2380_v40 = vld [vmem:[%s2549_s18 + $0x60] sm:$0xff]  }
  0x1c   : > { %2433 = vst [vmem:[%s2588_s25 + $0x10] sm:$0xff] %v2062_v46   ;;  %2434 = vst [vmem:[%s2588_s25 + $0x18] sm:$0xff] %v2067_v47   ;;  %v447_v54 = vmul.f32 %v1815_v48, %v2554_v0  ;;  %v448_v55 = vmul.f32 %v1816_v49, %v2554_v0  ;;  %v1823_v56 = vunpack.c.l.bf16 %v2375_v45  ;;  %v1824_v57 = vunpack.c.h.bf16 %v2375_v45 }
  0x1d   : > { %v580_v58 = vadd.f32 %v2563_v9, %v445_v50  ;;  %v581_v59 = vadd.f32 %v2563_v9, %v446_v51  ;;  %v449_v60 = vmul.f32 %v1819_v52, %v2554_v0  ;;  %v450_v61 = vmul.f32 %v1820_v53, %v2554_v0  ;;  %v2381_v53 = vld [vmem:[%s2549_s18 + $0x68] sm:$0xff]  }
  0x1e   : > { %v582_v62 = vadd.f32 %v2563_v9, %v447_v54  ;;  %v583_v63 = vadd.f32 %v2563_v9, %v448_v55  ;;  %v451_v1 = vmul.f32 %v1823_v56, %v2554_v0  ;;  %v452_v2 = vmul.f32 %v1824_v57, %v2554_v0 }
  0x1f   : > { %v708_v4 = vmax.f32 %v580_v58, 0.0  ;;  %v709_v5 = vmax.f32 %v581_v59, 0.0  ;;  %v584_v6 = vadd.f32 %v2563_v9, %v449_v60  ;;  %v585_v7 = vadd.f32 %v2563_v9, %v450_v61  ;;  %v2382_v58 = vld [vmem:[%s2549_s18 + $0x70] sm:$0xff]  }
  0x20   : > { %v710_v8 = vmax.f32 %v582_v62, 0.0  ;;  %v711_v10 = vmax.f32 %v583_v63, 0.0  ;;  %v586_v11 = vadd.f32 %v2563_v9, %v451_v1  ;;  %v587_v12 = vadd.f32 %v2563_v9, %v452_v2  ;;  %v2383_v63 = vld [vmem:[%s2549_s18 + $0x78] sm:$0xff]  }
  0x21   : > { %v2072_v14 = vpack.c.bf16 %v709_v5, %v708_v4  ;;  %v712_v15 = vmax.f32 %v584_v6, 0.0  ;;  %v713_v16 = vmax.f32 %v585_v7, 0.0  ;;  %v1827_v17 = vunpack.c.l.bf16 %v2376_v3 }
  0x22   : > { %v2077_v19 = vpack.c.bf16 %v711_v10, %v710_v8  ;;  %v714_v20 = vmax.f32 %v586_v11, 0.0  ;;  %v715_v21 = vmax.f32 %v587_v12, 0.0  ;;  %v1828_v22 = vunpack.c.h.bf16 %v2376_v3 }
  0x23   : > { %2435 = vst [vmem:[%s2588_s25 + $0x20] sm:$0xff] %v2072_v14   ;;  %v2082_v24 = vpack.c.bf16 %v713_v16, %v712_v15  ;;  %v453_v25 = vmul.f32 %v1827_v17, %v2554_v0  ;;  %v1831_v26 = vunpack.c.l.bf16 %v2377_v13  ;;  %v1832_v27 = vunpack.c.h.bf16 %v2377_v13  ;;  %v2384_v14 = vld [vmem:[%s2549_s18 + $0x80] sm:$0xff]  }
  0x24   : > { %2436 = vst [vmem:[%s2588_s25 + $0x28] sm:$0xff] %v2077_v19   ;;  %v2087_v28 = vpack.c.bf16 %v715_v21, %v714_v20  ;;  %v454_v29 = vmul.f32 %v1828_v22, %v2554_v0  ;;  %v1835_v30 = vunpack.c.l.bf16 %v2378_v18  ;;  %v1836_v31 = vunpack.c.h.bf16 %v2378_v18 }
  0x25   : > { %2437 = vst [vmem:[%s2588_s25 + $0x30] sm:$0xff] %v2082_v24   ;;  %v588_v32 = vadd.f32 %v2563_v9, %v453_v25  ;;  %v455_v33 = vmul.f32 %v1831_v26, %v2554_v0  ;;  %v456_v34 = vmul.f32 %v1832_v27, %v2554_v0  ;;  %v1839_v35 = vunpack.c.l.bf16 %v2379_v23 }
  0x26   : > { %2438 = vst [vmem:[%s2588_s25 + $0x38] sm:$0xff] %v2087_v28   ;;  %v589_v36 = vadd.f32 %v2563_v9, %v454_v29  ;;  %v457_v37 = vmul.f32 %v1835_v30, %v2554_v0  ;;  %v458_v38 = vmul.f32 %v1836_v31, %v2554_v0  ;;  %v1840_v39 = vunpack.c.h.bf16 %v2379_v23  ;;  %v2385_v31 = vld [vmem:[%s2549_s18 + $0x88] sm:$0xff]  }
  0x27   : > { %v716_v41 = vmax.f32 %v588_v32, 0.0  ;;  %v590_v42 = vadd.f32 %v2563_v9, %v455_v33  ;;  %v591_v43 = vadd.f32 %v2563_v9, %v456_v34  ;;  %v459_v44 = vmul.f32 %v1839_v35, %v2554_v0 }
  0x28   : > { %v717_v45 = vmax.f32 %v589_v36, 0.0  ;;  %v592_v46 = vadd.f32 %v2563_v9, %v457_v37  ;;  %v593_v47 = vadd.f32 %v2563_v9, %v458_v38  ;;  %v460_v48 = vmul.f32 %v1840_v39, %v2554_v0  ;;  %v2386_v36 = vld [vmem:[%s2549_s18 + $0x90] sm:$0xff]  }
  0x29   : > { %v718_v49 = vmax.f32 %v590_v42, 0.0  ;;  %v719_v50 = vmax.f32 %v591_v43, 0.0  ;;  %v594_v51 = vadd.f32 %v2563_v9, %v459_v44  ;;  %v1843_v52 = vunpack.c.l.bf16 %v2380_v40 }
  0x2a   : > { %v2092_v54 = vpack.c.bf16 %v717_v45, %v716_v41  ;;  %v720_v55 = vmax.f32 %v592_v46, 0.0  ;;  %v721_v56 = vmax.f32 %v593_v47, 0.0  ;;  %v595_v57 = vadd.f32 %v2563_v9, %v460_v48  ;;  %v2387_v41 = vld [vmem:[%s2549_s18 + $0x98] sm:$0xff]  }
  0x2b   : > { %v2097_v59 = vpack.c.bf16 %v719_v50, %v718_v49  ;;  %v722_v60 = vmax.f32 %v594_v51, 0.0  ;;  %v1844_v61 = vunpack.c.h.bf16 %v2380_v40  ;;  %v461_v62 = vmul.f32 %v1843_v52, %v2554_v0 }
  0x2c   : > { %2439 = vst [vmem:[%s2588_s25 + $0x40] sm:$0xff] %v2092_v54   ;;  %v2102_v1 = vpack.c.bf16 %v721_v56, %v720_v55  ;;  %v723_v2 = vmax.f32 %v595_v57, 0.0  ;;  %v1847_v3 = vunpack.c.l.bf16 %v2381_v53  ;;  %v1848_v4 = vunpack.c.h.bf16 %v2381_v53  ;;  %v2388_v54 = vld [vmem:[%s2549_s18 + $0xa0] sm:$0xff]  }
  0x2d   : > { %2440 = vst [vmem:[%s2588_s25 + $0x48] sm:$0xff] %v2097_v59   ;;  %v462_v5 = vmul.f32 %v1844_v61, %v2554_v0  ;;  %v596_v6 = vadd.f32 %v2563_v9, %v461_v62  ;;  %v1851_v7 = vunpack.c.l.bf16 %v2382_v58  ;;  %v1852_v8 = vunpack.c.h.bf16 %v2382_v58 }
  0x2e   : > { %2441 = vst [vmem:[%s2588_s25 + $0x50] sm:$0xff] %v2102_v1   ;;  %v2107_v10 = vpack.c.bf16 %v723_v2, %v722_v60  ;;  %v463_v11 = vmul.f32 %v1847_v3, %v2554_v0  ;;  %v464_v12 = vmul.f32 %v1848_v4, %v2554_v0  ;;  %v1855_v13 = vunpack.c.l.bf16 %v2383_v63  ;;  %v2389_v4 = vld [vmem:[%s2549_s18 + $0xa8] sm:$0xff]  }
  0x2f   : > { %v597_v15 = vadd.f32 %v2563_v9, %v462_v5  ;;  %v724_v16 = vmax.f32 %v596_v6, 0.0  ;;  %v465_v17 = vmul.f32 %v1851_v7, %v2554_v0  ;;  %v466_v18 = vmul.f32 %v1852_v8, %v2554_v0 }
  0x30   : > { %2442 = vst [vmem:[%s2588_s25 + $0x58] sm:$0xff] %v2107_v10   ;;  %v598_v19 = vadd.f32 %v2563_v9, %v463_v11  ;;  %v599_v20 = vadd.f32 %v2563_v9, %v464_v12  ;;  %v1856_v21 = vunpack.c.h.bf16 %v2383_v63  ;;  %v467_v22 = vmul.f32 %v1855_v13, %v2554_v0 }
  0x31   : > { %v725_v23 = vmax.f32 %v597_v15, 0.0  ;;  %v600_v24 = vadd.f32 %v2563_v9, %v465_v17  ;;  %v601_v25 = vadd.f32 %v2563_v9, %v466_v18  ;;  %v1859_v26 = vunpack.c.l.bf16 %v2384_v14 }
  0x32   : > { %v726_v27 = vmax.f32 %v598_v19, 0.0  ;;  %v727_v28 = vmax.f32 %v599_v20, 0.0  ;;  %v468_v29 = vmul.f32 %v1856_v21, %v2554_v0  ;;  %v602_v30 = vadd.f32 %v2563_v9, %v467_v22  ;;  %v2391_v19 = vld [vmem:[%s2549_s18 + $0xb8] sm:$0xff]  }
  0x33   : > { %v2112_v32 = vpack.c.bf16 %v725_v23, %v724_v16  ;;  %v728_v33 = vmax.f32 %v600_v24, 0.0  ;;  %v729_v34 = vmax.f32 %v601_v25, 0.0  ;;  %v1860_v35 = vunpack.c.h.bf16 %v2384_v14  ;;  %v2390_v14 = vld [vmem:[%s2549_s18 + $0xb0] sm:$0xff]  }
  0x34   : > { %v2117_v37 = vpack.c.bf16 %v727_v28, %v726_v27  ;;  %v603_v38 = vadd.f32 %v2563_v9, %v468_v29  ;;  %v730_v39 = vmax.f32 %v602_v30, 0.0  ;;  %v469_v40 = vmul.f32 %v1859_v26, %v2554_v0 }
  0x35   : > { %2443 = vst [vmem:[%s2588_s25 + $0x60] sm:$0xff] %v2112_v32   ;;  %v2122_v42 = vpack.c.bf16 %v729_v34, %v728_v33  ;;  %v470_v43 = vmul.f32 %v1860_v35, %v2554_v0  ;;  %v1863_v44 = vunpack.c.l.bf16 %v2385_v31  ;;  %v1864_v45 = vunpack.c.h.bf16 %v2385_v31  ;;  %v2392_v32 = vld [vmem:[%s2549_s18 + $0xc0] sm:$0xff]  }
  0x36   : > { %2444 = vst [vmem:[%s2588_s25 + $0x68] sm:$0xff] %v2117_v37   ;;  %v731_v46 = vmax.f32 %v603_v38, 0.0  ;;  %v604_v47 = vadd.f32 %v2563_v9, %v469_v40  ;;  %v1867_v48 = vunpack.c.l.bf16 %v2386_v36  ;;  %v1868_v49 = vunpack.c.h.bf16 %v2386_v36 }
  0x37   : > { %2445 = vst [vmem:[%s2588_s25 + $0x70] sm:$0xff] %v2122_v42   ;;  %v605_v50 = vadd.f32 %v2563_v9, %v470_v43  ;;  %v471_v51 = vmul.f32 %v1863_v44, %v2554_v0  ;;  %v472_v52 = vmul.f32 %v1864_v45, %v2554_v0  ;;  %v1871_v53 = vunpack.c.l.bf16 %v2387_v41  ;;  %v2393_v45 = vld [vmem:[%s2549_s18 + $0xc8] sm:$0xff]  }
  0x38   : > { %v2127_v55 = vpack.c.bf16 %v731_v46, %v730_v39  ;;  %v732_v56 = vmax.f32 %v604_v47, 0.0  ;;  %v473_v57 = vmul.f32 %v1867_v48, %v2554_v0  ;;  %v474_v58 = vmul.f32 %v1868_v49, %v2554_v0 }
  0x39   : > { %v733_v59 = vmax.f32 %v605_v50, 0.0  ;;  %v606_v60 = vadd.f32 %v2563_v9, %v471_v51  ;;  %v607_v61 = vadd.f32 %v2563_v9, %v472_v52  ;;  %v1872_v62 = vunpack.c.h.bf16 %v2387_v41 }
  0x3a   : > { %2446 = vst [vmem:[%s2588_s25 + $0x78] sm:$0xff] %v2127_v55   ;;  %v608_v63 = vadd.f32 %v2563_v9, %v473_v57  ;;  %v609_v1 = vadd.f32 %v2563_v9, %v474_v58  ;;  %v475_v2 = vmul.f32 %v1871_v53, %v2554_v0  ;;  %v1875_v3 = vunpack.c.l.bf16 %v2388_v54 }
  0x3b   : > { %v2132_v5 = vpack.c.bf16 %v733_v59, %v732_v56  ;;  %v734_v6 = vmax.f32 %v606_v60, 0.0  ;;  %v735_v7 = vmax.f32 %v607_v61, 0.0  ;;  %v476_v8 = vmul.f32 %v1872_v62, %v2554_v0 }
  0x3c   : > { %v736_v10 = vmax.f32 %v608_v63, 0.0  ;;  %v737_v11 = vmax.f32 %v609_v1, 0.0  ;;  %v610_v12 = vadd.f32 %v2563_v9, %v475_v2  ;;  %v1876_v13 = vunpack.c.h.bf16 %v2388_v54  ;;  %v2394_v54 = vld [vmem:[%s2549_s18 + $0xd0] sm:$0xff]   ;;  %v2395_v63 = vld [vmem:[%s2549_s18 + $0xd8] sm:$0xff]  }
  0x3d   : > { %2447 = vst [vmem:[%s2588_s25 + $0x80] sm:$0xff] %v2132_v5   ;;  %v2137_v15 = vpack.c.bf16 %v735_v7, %v734_v6  ;;  %v611_v16 = vadd.f32 %v2563_v9, %v476_v8  ;;  %v477_v17 = vmul.f32 %v1875_v3, %v2554_v0  ;;  %v1879_v18 = vunpack.c.l.bf16 %v2389_v4 }
  0x3e   : > { %v2142_v20 = vpack.c.bf16 %v737_v11, %v736_v10  ;;  %v738_v21 = vmax.f32 %v610_v12, 0.0  ;;  %v478_v22 = vmul.f32 %v1876_v13, %v2554_v0  ;;  %v1880_v23 = vunpack.c.h.bf16 %v2389_v4  ;;  %v2396_v10 = vld [vmem:[%s2549_s18 + $0xe0] sm:$0xff]  }
  0x3f   : > { %2448 = vst [vmem:[%s2588_s25 + $0x88] sm:$0xff] %v2137_v15   ;;  %v739_v24 = vmax.f32 %v611_v16, 0.0  ;;  %v612_v25 = vadd.f32 %v2563_v9, %v477_v17  ;;  %v479_v26 = vmul.f32 %v1879_v18, %v2554_v0  ;;  %v1883_v27 = vunpack.c.l.bf16 %v2390_v14 }
  0x40   : > { %2449 = vst [vmem:[%s2588_s25 + $0x90] sm:$0xff] %v2142_v20   ;;  %v613_v28 = vadd.f32 %v2563_v9, %v478_v22  ;;  %v480_v29 = vmul.f32 %v1880_v23, %v2554_v0  ;;  %v1884_v30 = vunpack.c.h.bf16 %v2390_v14  ;;  %v1887_v31 = vunpack.c.l.bf16 %v2391_v19  ;;  %v2397_v23 = vld [vmem:[%s2549_s18 + $0xe8] sm:$0xff]  }
  0x41   : > { %v2147_v33 = vpack.c.bf16 %v739_v24, %v738_v21  ;;  %v740_v34 = vmax.f32 %v612_v25, 0.0  ;;  %v614_v35 = vadd.f32 %v2563_v9, %v479_v26  ;;  %v481_v36 = vmul.f32 %v1883_v27, %v2554_v0 }
  0x42   : > { %v741_v37 = vmax.f32 %v613_v28, 0.0  ;;  %v615_v38 = vadd.f32 %v2563_v9, %v480_v29  ;;  %v482_v39 = vmul.f32 %v1884_v30, %v2554_v0  ;;  %v1888_v40 = vunpack.c.h.bf16 %v2391_v19 }
  0x43   : > { %2450 = vst [vmem:[%s2588_s25 + $0x98] sm:$0xff] %v2147_v33   ;;  %v742_v41 = vmax.f32 %v614_v35, 0.0  ;;  %v616_v42 = vadd.f32 %v2563_v9, %v481_v36  ;;  %v483_v43 = vmul.f32 %v1887_v31, %v2554_v0  ;;  %v1891_v44 = vunpack.c.l.bf16 %v2392_v32 }
  0x44   : > { %v2152_v46 = vpack.c.bf16 %v741_v37, %v740_v34  ;;  %v743_v47 = vmax.f32 %v615_v38, 0.0  ;;  %v617_v48 = vadd.f32 %v2563_v9, %v482_v39  ;;  %v484_v49 = vmul.f32 %v1888_v40, %v2554_v0 }
  0x45   : > { %v744_v50 = vmax.f32 %v616_v42, 0.0  ;;  %v618_v51 = vadd.f32 %v2563_v9, %v483_v43  ;;  %v1892_v52 = vunpack.c.h.bf16 %v2392_v32  ;;  %v485_v53 = vmul.f32 %v1891_v44, %v2554_v0  ;;  %v2398_v32 = vld [vmem:[%s2549_s18 + $0xf0] sm:$0xff]  }
  0x46   : > { %2451 = vst [vmem:[%s2588_s25 + $0xa0] sm:$0xff] %v2152_v46   ;;  %v2157_v55 = vpack.c.bf16 %v743_v47, %v742_v41  ;;  %v745_v56 = vmax.f32 %v617_v48, 0.0  ;;  %v619_v57 = vadd.f32 %v2563_v9, %v484_v49  ;;  %v1895_v58 = vunpack.c.l.bf16 %v2393_v45  ;;  %v2399_v41 = vld [vmem:[%s2549_s18 + $0xf8] sm:$0xff]  }
  0x47   : > { %v746_v59 = vmax.f32 %v618_v51, 0.0  ;;  %v486_v60 = vmul.f32 %v1892_v52, %v2554_v0  ;;  %v620_v61 = vadd.f32 %v2563_v9, %v485_v53  ;;  %v1896_v62 = vunpack.c.h.bf16 %v2393_v45 }
  0x48   : > { %2452 = vst [vmem:[%s2588_s25 + $0xa8] sm:$0xff] %v2157_v55   ;;  %v2162_v1 = vpack.c.bf16 %v745_v56, %v744_v50  ;;  %v747_v2 = vmax.f32 %v619_v57, 0.0  ;;  %v487_v3 = vmul.f32 %v1895_v58, %v2554_v0  ;;  %v1899_v4 = vunpack.c.l.bf16 %v2394_v54  ;;  %v2400_v50 = vld [vmem:[%s2549_s18 + $0x100] sm:$0xff]  }
  0x49   : > { %v621_v5 = vadd.f32 %v2563_v9, %v486_v60  ;;  %v748_v6 = vmax.f32 %v620_v61, 0.0  ;;  %v488_v7 = vmul.f32 %v1896_v62, %v2554_v0  ;;  %v1900_v8 = vunpack.c.h.bf16 %v2394_v54 }
  0x4a   : > { %2453 = vst [vmem:[%s2588_s25 + $0xb0] sm:$0xff] %v2162_v1   ;;  %v2167_v11 = vpack.c.bf16 %v747_v2, %v746_v59  ;;  %v622_v12 = vadd.f32 %v2563_v9, %v487_v3  ;;  %v489_v13 = vmul.f32 %v1899_v4, %v2554_v0  ;;  %v1903_v14 = vunpack.c.l.bf16 %v2395_v63 }
  0x4b   : > { %v749_v15 = vmax.f32 %v621_v5, 0.0  ;;  %v623_v16 = vadd.f32 %v2563_v9, %v488_v7  ;;  %v490_v17 = vmul.f32 %v1900_v8, %v2554_v0  ;;  %v1904_v18 = vunpack.c.h.bf16 %v2395_v63  ;;  %v2401_v63 = vld [vmem:[%s2549_s18 + $0x108] sm:$0xff]  }
  0x4c   : > { %2454 = vst [vmem:[%s2588_s25 + $0xb8] sm:$0xff] %v2167_v11   ;;  %v750_v19 = vmax.f32 %v622_v12, 0.0  ;;  %v624_v20 = vadd.f32 %v2563_v9, %v489_v13  ;;  %v491_v21 = vmul.f32 %v1903_v14, %v2554_v0  ;;  %v1907_v22 = vunpack.c.l.bf16 %v2396_v10 }
  0x4d   : > { %v2172_v24 = vpack.c.bf16 %v749_v15, %v748_v6  ;;  %v751_v25 = vmax.f32 %v623_v16, 0.0  ;;  %v625_v26 = vadd.f32 %v2563_v9, %v490_v17  ;;  %v492_v27 = vmul.f32 %v1904_v18, %v2554_v0 }
  0x4e   : > { %v752_v28 = vmax.f32 %v624_v20, 0.0  ;;  %v626_v29 = vadd.f32 %v2563_v9, %v491_v21  ;;  %v1908_v30 = vunpack.c.h.bf16 %v2396_v10  ;;  %v493_v31 = vmul.f32 %v1907_v22, %v2554_v0  ;;  %v2402_v10 = vld [vmem:[%s2549_s18 + $0x110] sm:$0xff]  }
  0x4f   : > { %2455 = vst [vmem:[%s2588_s25 + $0xc0] sm:$0xff] %v2172_v24   ;;  %v2177_v33 = vpack.c.bf16 %v751_v25, %v750_v19  ;;  %v753_v34 = vmax.f32 %v625_v26, 0.0  ;;  %v627_v35 = vadd.f32 %v2563_v9, %v492_v27  ;;  %v1911_v36 = vunpack.c.l.bf16 %v2397_v23  ;;  %v2403_v19 = vld [vmem:[%s2549_s18 + $0x118] sm:$0xff]  }
  0x50   : > { %v754_v37 = vmax.f32 %v626_v29, 0.0  ;;  %v494_v38 = vmul.f32 %v1908_v30, %v2554_v0  ;;  %v628_v39 = vadd.f32 %v2563_v9, %v493_v31  ;;  %v1912_v40 = vunpack.c.h.bf16 %v2397_v23 }
  0x51   : > { %2456 = vst [vmem:[%s2588_s25 + $0xc8] sm:$0xff] %v2177_v33   ;;  %v2182_v42 = vpack.c.bf16 %v753_v34, %v752_v28  ;;  %v755_v43 = vmax.f32 %v627_v35, 0.0  ;;  %v495_v44 = vmul.f32 %v1911_v36, %v2554_v0  ;;  %v1915_v45 = vunpack.c.l.bf16 %v2398_v32  ;;  %v2404_v28 = vld [vmem:[%s2549_s18 + $0x120] sm:$0xff]  }
  0x52   : > { %v629_v46 = vadd.f32 %v2563_v9, %v494_v38  ;;  %v756_v47 = vmax.f32 %v628_v39, 0.0  ;;  %v496_v48 = vmul.f32 %v1912_v40, %v2554_v0  ;;  %v1916_v49 = vunpack.c.h.bf16 %v2398_v32 }
  0x53   : > { %2457 = vst [vmem:[%s2588_s25 + $0xd0] sm:$0xff] %v2182_v42   ;;  %v2187_v51 = vpack.c.bf16 %v755_v43, %v754_v37  ;;  %v630_v52 = vadd.f32 %v2563_v9, %v495_v44  ;;  %v497_v53 = vmul.f32 %v1915_v45, %v2554_v0  ;;  %v1919_v54 = vunpack.c.l.bf16 %v2399_v41 }
  0x54   : > { %v757_v55 = vmax.f32 %v629_v46, 0.0  ;;  %v631_v56 = vadd.f32 %v2563_v9, %v496_v48  ;;  %v498_v57 = vmul.f32 %v1916_v49, %v2554_v0  ;;  %v1920_v58 = vunpack.c.h.bf16 %v2399_v41  ;;  %v2405_v41 = vld [vmem:[%s2549_s18 + $0x128] sm:$0xff]  }
  0x55   : > { %2458 = vst [vmem:[%s2588_s25 + $0xd8] sm:$0xff] %v2187_v51   ;;  %v758_v59 = vmax.f32 %v630_v52, 0.0  ;;  %v632_v60 = vadd.f32 %v2563_v9, %v497_v53  ;;  %v499_v61 = vmul.f32 %v1919_v54, %v2554_v0  ;;  %v1923_v62 = vunpack.c.l.bf16 %v2400_v50 }
  0x56   : > { %v2192_v1 = vpack.c.bf16 %v757_v55, %v756_v47  ;;  %v759_v2 = vmax.f32 %v631_v56, 0.0  ;;  %v633_v3 = vadd.f32 %v2563_v9, %v498_v57  ;;  %v500_v4 = vmul.f32 %v1920_v58, %v2554_v0 }
  0x57   : > { %v760_v5 = vmax.f32 %v632_v60, 0.0  ;;  %v634_v6 = vadd.f32 %v2563_v9, %v499_v61  ;;  %v1924_v7 = vunpack.c.h.bf16 %v2400_v50  ;;  %v501_v8 = vmul.f32 %v1923_v62, %v2554_v0  ;;  %v2406_v50 = vld [vmem:[%s2549_s18 + $0x130] sm:$0xff]  }
  0x58   : > { %2459 = vst [vmem:[%s2588_s25 + $0xe0] sm:$0xff] %v2192_v1   ;;  %v2197_v11 = vpack.c.bf16 %v759_v2, %v758_v59  ;;  %v761_v12 = vmax.f32 %v633_v3, 0.0  ;;  %v635_v13 = vadd.f32 %v2563_v9, %v500_v4  ;;  %v1927_v14 = vunpack.c.l.bf16 %v2401_v63  ;;  %v2407_v59 = vld [vmem:[%s2549_s18 + $0x138] sm:$0xff]  }
  0x59   : > { %v762_v15 = vmax.f32 %v634_v6, 0.0  ;;  %v502_v16 = vmul.f32 %v1924_v7, %v2554_v0  ;;  %v636_v17 = vadd.f32 %v2563_v9, %v501_v8  ;;  %v1928_v18 = vunpack.c.h.bf16 %v2401_v63 }
  0x5a   : > { %2460 = vst [vmem:[%s2588_s25 + $0xe8] sm:$0xff] %v2197_v11   ;;  %v2202_v20 = vpack.c.bf16 %v761_v12, %v760_v5  ;;  %v763_v21 = vmax.f32 %v635_v13, 0.0  ;;  %v503_v22 = vmul.f32 %v1927_v14, %v2554_v0  ;;  %v1931_v23 = vunpack.c.l.bf16 %v2402_v10  ;;  %v2408_v5 = vld [vmem:[%s2549_s18 + $0x140] sm:$0xff]  }
  0x5b   : > { %v637_v24 = vadd.f32 %v2563_v9, %v502_v16  ;;  %v764_v25 = vmax.f32 %v636_v17, 0.0  ;;  %v504_v26 = vmul.f32 %v1928_v18, %v2554_v0  ;;  %v1932_v27 = vunpack.c.h.bf16 %v2402_v10 }
  0x5c   : > { %2461 = vst [vmem:[%s2588_s25 + $0xf0] sm:$0xff] %v2202_v20   ;;  %v2207_v29 = vpack.c.bf16 %v763_v21, %v762_v15  ;;  %v638_v30 = vadd.f32 %v2563_v9, %v503_v22  ;;  %v505_v31 = vmul.f32 %v1931_v23, %v2554_v0  ;;  %v1935_v32 = vunpack.c.l.bf16 %v2403_v19 }
  0x5d   : > { %v765_v33 = vmax.f32 %v637_v24, 0.0  ;;  %v639_v34 = vadd.f32 %v2563_v9, %v504_v26  ;;  %v506_v35 = vmul.f32 %v1932_v27, %v2554_v0  ;;  %v1936_v36 = vunpack.c.h.bf16 %v2403_v19  ;;  %v2409_v19 = vld [vmem:[%s2549_s18 + $0x148] sm:$0xff]  }
  0x5e   : > { %2462 = vst [vmem:[%s2588_s25 + $0xf8] sm:$0xff] %v2207_v29   ;;  %v766_v37 = vmax.f32 %v638_v30, 0.0  ;;  %v640_v38 = vadd.f32 %v2563_v9, %v505_v31  ;;  %v507_v39 = vmul.f32 %v1935_v32, %v2554_v0  ;;  %v1939_v40 = vunpack.c.l.bf16 %v2404_v28 }
  0x5f   : > { %v2212_v42 = vpack.c.bf16 %v765_v33, %v764_v25  ;;  %v767_v43 = vmax.f32 %v639_v34, 0.0  ;;  %v641_v44 = vadd.f32 %v2563_v9, %v506_v35  ;;  %v508_v45 = vmul.f32 %v1936_v36, %v2554_v0 }
  0x60   : > { %v768_v46 = vmax.f32 %v640_v38, 0.0  ;;  %v642_v47 = vadd.f32 %v2563_v9, %v507_v39  ;;  %v1940_v48 = vunpack.c.h.bf16 %v2404_v28  ;;  %v509_v49 = vmul.f32 %v1939_v40, %v2554_v0  ;;  %v2410_v28 = vld [vmem:[%s2549_s18 + $0x150] sm:$0xff]  }
  0x61   : > { %2463 = vst [vmem:[%s2588_s25 + $0x100] sm:$0xff] %v2212_v42   ;;  %v2217_v51 = vpack.c.bf16 %v767_v43, %v766_v37  ;;  %v769_v52 = vmax.f32 %v641_v44, 0.0  ;;  %v643_v53 = vadd.f32 %v2563_v9, %v508_v45  ;;  %v1943_v54 = vunpack.c.l.bf16 %v2405_v41  ;;  %v2411_v37 = vld [vmem:[%s2549_s18 + $0x158] sm:$0xff]  }
  0x62   : > { %v770_v55 = vmax.f32 %v642_v47, 0.0  ;;  %v510_v56 = vmul.f32 %v1940_v48, %v2554_v0  ;;  %v644_v57 = vadd.f32 %v2563_v9, %v509_v49  ;;  %v1944_v58 = vunpack.c.h.bf16 %v2405_v41 }
  0x63   : > { %2464 = vst [vmem:[%s2588_s25 + $0x108] sm:$0xff] %v2217_v51   ;;  %v2222_v60 = vpack.c.bf16 %v769_v52, %v768_v46  ;;  %v771_v61 = vmax.f32 %v643_v53, 0.0  ;;  %v511_v62 = vmul.f32 %v1943_v54, %v2554_v0  ;;  %v1947_v63 = vunpack.c.l.bf16 %v2406_v50  ;;  %v2412_v46 = vld [vmem:[%s2549_s18 + $0x160] sm:$0xff]  }
  0x64   : > { %v645_v1 = vadd.f32 %v2563_v9, %v510_v56  ;;  %v772_v2 = vmax.f32 %v644_v57, 0.0  ;;  %v512_v3 = vmul.f32 %v1944_v58, %v2554_v0  ;;  %v1948_v4 = vunpack.c.h.bf16 %v2406_v50 }
  0x65   : > { %2465 = vst [vmem:[%s2588_s25 + $0x110] sm:$0xff] %v2222_v60   ;;  %v2227_v6 = vpack.c.bf16 %v771_v61, %v770_v55  ;;  %v646_v7 = vadd.f32 %v2563_v9, %v511_v62  ;;  %v513_v8 = vmul.f32 %v1947_v63, %v2554_v0  ;;  %v1951_v10 = vunpack.c.l.bf16 %v2407_v59 }
  0x66   : > { %v773_v11 = vmax.f32 %v645_v1, 0.0  ;;  %v647_v12 = vadd.f32 %v2563_v9, %v512_v3  ;;  %v514_v13 = vmul.f32 %v1948_v4, %v2554_v0  ;;  %v1952_v14 = vunpack.c.h.bf16 %v2407_v59  ;;  %v2413_v59 = vld [vmem:[%s2549_s18 + $0x168] sm:$0xff]  }
  0x67   : > { %2466 = vst [vmem:[%s2588_s25 + $0x118] sm:$0xff] %v2227_v6   ;;  %v774_v15 = vmax.f32 %v646_v7, 0.0  ;;  %v648_v16 = vadd.f32 %v2563_v9, %v513_v8  ;;  %v515_v17 = vmul.f32 %v1951_v10, %v2554_v0  ;;  %v1955_v18 = vunpack.c.l.bf16 %v2408_v5 }
  0x68   : > { %v2232_v20 = vpack.c.bf16 %v773_v11, %v772_v2  ;;  %v775_v21 = vmax.f32 %v647_v12, 0.0  ;;  %v649_v22 = vadd.f32 %v2563_v9, %v514_v13  ;;  %v516_v23 = vmul.f32 %v1952_v14, %v2554_v0 }
  0x69   : > { %v776_v24 = vmax.f32 %v648_v16, 0.0  ;;  %v650_v25 = vadd.f32 %v2563_v9, %v515_v17  ;;  %v1956_v26 = vunpack.c.h.bf16 %v2408_v5  ;;  %v517_v27 = vmul.f32 %v1955_v18, %v2554_v0  ;;  %v2414_v5 = vld [vmem:[%s2549_s18 + $0x170] sm:$0xff]  }
  0x6a   : > { %2467 = vst [vmem:[%s2588_s25 + $0x120] sm:$0xff] %v2232_v20   ;;  %v2237_v29 = vpack.c.bf16 %v775_v21, %v774_v15  ;;  %v777_v30 = vmax.f32 %v649_v22, 0.0  ;;  %v651_v31 = vadd.f32 %v2563_v9, %v516_v23  ;;  %v1959_v32 = vunpack.c.l.bf16 %v2409_v19  ;;  %v2415_v15 = vld [vmem:[%s2549_s18 + $0x178] sm:$0xff]  }
  0x6b   : > { %v778_v33 = vmax.f32 %v650_v25, 0.0  ;;  %v518_v34 = vmul.f32 %v1956_v26, %v2554_v0  ;;  %v652_v35 = vadd.f32 %v2563_v9, %v517_v27  ;;  %v1960_v36 = vunpack.c.h.bf16 %v2409_v19 }
  0x6c   : > { %2468 = vst [vmem:[%s2588_s25 + $0x128] sm:$0xff] %v2237_v29   ;;  %v2242_v38 = vpack.c.bf16 %v777_v30, %v776_v24  ;;  %v779_v39 = vmax.f32 %v651_v31, 0.0  ;;  %v519_v40 = vmul.f32 %v1959_v32, %v2554_v0  ;;  %v1963_v41 = vunpack.c.l.bf16 %v2410_v28  ;;  %v2416_v24 = vld [vmem:[%s2549_s18 + $0x180] sm:$0xff]  }
  0x6d   : > { %v653_v42 = vadd.f32 %v2563_v9, %v518_v34  ;;  %v780_v43 = vmax.f32 %v652_v35, 0.0  ;;  %v520_v44 = vmul.f32 %v1960_v36, %v2554_v0  ;;  %v1964_v45 = vunpack.c.h.bf16 %v2410_v28  ;;  %v2851_v35 = vld [vmem:[%s2966_s1] ss:$0 sm:$0xff] }
  0x6e   : > { %2469 = vst [vmem:[%s2588_s25 + $0x130] sm:$0xff] %v2242_v38   ;;  %v2247_v47 = vpack.c.bf16 %v779_v39, %v778_v33  ;;  %v654_v48 = vadd.f32 %v2563_v9, %v519_v40  ;;  %v521_v49 = vmul.f32 %v1963_v41, %v2554_v0  ;;  %v1967_v50 = vunpack.c.l.bf16 %v2411_v37  ;;  %v2417_v38 = vld [vmem:[%s2549_s18 + $0x188] sm:$0xff]  }
  0x6f   : > { %v781_v51 = vmax.f32 %v653_v42, 0.0  ;;  %v655_v52 = vadd.f32 %v2563_v9, %v520_v44  ;;  %v522_v53 = vmul.f32 %v1964_v45, %v2554_v0  ;;  %v1968_v54 = vunpack.c.h.bf16 %v2411_v37 }
  0x70   : > { %2470 = vst [vmem:[%s2588_s25 + $0x138] sm:$0xff] %v2247_v47   ;;  %v782_v55 = vmax.f32 %v654_v48, 0.0  ;;  %v656_v56 = vadd.f32 %v2563_v9, %v521_v49  ;;  %v523_v57 = vmul.f32 %v1967_v50, %v2554_v0  ;;  %v1971_v58 = vunpack.c.l.bf16 %v2412_v46  ;;  %v2418_v47 = vld [vmem:[%s2549_s18 + $0x190] sm:$0xff]  }
  0x71   : > { %v2252_v60 = vpack.c.bf16 %v781_v51, %v780_v43  ;;  %v783_v61 = vmax.f32 %v655_v52, 0.0  ;;  %v657_v62 = vadd.f32 %v2563_v9, %v522_v53  ;;  %v524_v63 = vmul.f32 %v1968_v54, %v2554_v0  ;;  %v2860_v43 = vld [vmem:[%s2967_s2] ss:$0 sm:$0xff] }
  0x72   : > { %v784_v1 = vmax.f32 %v656_v56, 0.0  ;;  %v658_v2 = vadd.f32 %v2563_v9, %v523_v57  ;;  %v1972_v3 = vunpack.c.h.bf16 %v2412_v46  ;;  %v525_v4 = vmul.f32 %v1971_v58, %v2554_v0 }
  0x73   : > { %2471 = vst [vmem:[%s2588_s25 + $0x140] sm:$0xff] %v2252_v60   ;;  %v2257_v6 = vpack.c.bf16 %v783_v61, %v782_v55  ;;  %v785_v7 = vmax.f32 %v657_v62, 0.0  ;;  %v659_v8 = vadd.f32 %v2563_v9, %v524_v63  ;;  %v1975_v10 = vunpack.c.l.bf16 %v2413_v59  ;;  %v2419_v55 = vld [vmem:[%s2549_s18 + $0x198] sm:$0xff]  }
  0x74   : > { %v786_v11 = vmax.f32 %v658_v2, 0.0  ;;  %v526_v12 = vmul.f32 %v1972_v3, %v2554_v0  ;;  %v660_v13 = vadd.f32 %v2563_v9, %v525_v4  ;;  %v1976_v14 = vunpack.c.h.bf16 %v2413_v59 }
  0x75   : > { %2472 = vst [vmem:[%s2588_s25 + $0x148] sm:$0xff] %v2257_v6   ;;  %v2262_v16 = vpack.c.bf16 %v785_v7, %v784_v1  ;;  %v787_v17 = vmax.f32 %v659_v8, 0.0  ;;  %v527_v18 = vmul.f32 %v1975_v10, %v2554_v0  ;;  %v1979_v19 = vunpack.c.l.bf16 %v2414_v5  ;;  %v2420_v1 = vld [vmem:[%s2549_s18 + $0x1a0] sm:$0xff]  }
  0x76   : > { %v661_v20 = vadd.f32 %v2563_v9, %v526_v12  ;;  %v788_v21 = vmax.f32 %v660_v13, 0.0  ;;  %v528_v22 = vmul.f32 %v1976_v14, %v2554_v0  ;;  %v1980_v23 = vunpack.c.h.bf16 %v2414_v5 }
  0x77   : > { %2473 = vst [vmem:[%s2588_s25 + $0x150] sm:$0xff] %v2262_v16   ;;  %v2267_v25 = vpack.c.bf16 %v787_v17, %v786_v11  ;;  %v662_v26 = vadd.f32 %v2563_v9, %v527_v18  ;;  %v529_v27 = vmul.f32 %v1979_v19, %v2554_v0  ;;  %v1983_v28 = vunpack.c.l.bf16 %v2415_v15 }
  0x78   : > { %v789_v29 = vmax.f32 %v661_v20, 0.0  ;;  %v663_v30 = vadd.f32 %v2563_v9, %v528_v22  ;;  %v530_v31 = vmul.f32 %v1980_v23, %v2554_v0  ;;  %v1984_v32 = vunpack.c.h.bf16 %v2415_v15  ;;  %v2421_v15 = vld [vmem:[%s2549_s18 + $0x1a8] sm:$0xff]  }
  0x79   : > { %2474 = vst [vmem:[%s2588_s25 + $0x158] sm:$0xff] %v2267_v25   ;;  %v790_v33 = vmax.f32 %v662_v26, 0.0  ;;  %v664_v34 = vadd.f32 %v2563_v9, %v529_v27  ;;  %v531_v36 = vmul.f32 %v2851_v35, %v1983_v28  ;;  %v1987_v37 = vunpack.c.l.bf16 %v2416_v24 }
  0x7a   : > { %v2272_v39 = vpack.c.bf16 %v789_v29, %v788_v21  ;;  %v791_v40 = vmax.f32 %v663_v30, 0.0  ;;  %v665_v0 = vadd.f32 %v2563_v9, %v530_v31  ;;  %v532_v41 = vmul.f32 %v2851_v35, %v1984_v32 }
  0x7b   : > { %v792_v42 = vmax.f32 %v664_v34, 0.0  ;;  %v666_v44 = vadd.f32 %v2860_v43, %v531_v36  ;;  %v1988_v45 = vunpack.c.h.bf16 %v2416_v24  ;;  %v533_v46 = vmul.f32 %v2851_v35, %v1987_v37  ;;  %v2422_v24 = vld [vmem:[%s2549_s18 + $0x1b0] sm:$0xff]  }
  0x7c   : > { %2475 = vst [vmem:[%s2588_s25 + $0x160] sm:$0xff] %v2272_v39   ;;  %v2277_v48 = vpack.c.bf16 %v791_v40, %v790_v33  ;;  %v793_v49 = vmax.f32 %v665_v0, 0.0  ;;  %v667_v9 = vadd.f32 %v2860_v43, %v532_v41  ;;  %v1991_v50 = vunpack.c.l.bf16 %v2417_v38  ;;  %v2423_v33 = vld [vmem:[%s2549_s18 + $0x1b8] sm:$0xff]  }
  0x7d   : > { %v794_v51 = vmax.f32 %v666_v44, 0.0  ;;  %v534_v52 = vmul.f32 %v2851_v35, %v1988_v45  ;;  %v668_v53 = vadd.f32 %v2860_v43, %v533_v46  ;;  %v1992_v54 = vunpack.c.h.bf16 %v2417_v38 }
  0x7e   : > { %2476 = vst [vmem:[%s2588_s25 + $0x168] sm:$0xff] %v2277_v48   ;;  %v2282_v56 = vpack.c.bf16 %v793_v49, %v792_v42  ;;  %v795_v57 = vmax.f32 %v667_v9, 0.0  ;;  %v535_v58 = vmul.f32 %v2851_v35, %v1991_v50  ;;  %v1995_v59 = vunpack.c.l.bf16 %v2418_v47  ;;  %v2424_v42 = vld [vmem:[%s2549_s18 + $0x1c0] sm:$0xff]  }
  0x7f   : > { %v669_v60 = vadd.f32 %v2860_v43, %v534_v52  ;;  %v796_v61 = vmax.f32 %v668_v53, 0.0  ;;  %v536_v62 = vmul.f32 %v2851_v35, %v1992_v54  ;;  %v1996_v63 = vunpack.c.h.bf16 %v2418_v47 }
  0x80   : > { %2477 = vst [vmem:[%s2588_s25 + $0x170] sm:$0xff] %v2282_v56   ;;  %v2287_v2 = vpack.c.bf16 %v795_v57, %v794_v51  ;;  %v670_v3 = vadd.f32 %v2860_v43, %v535_v58  ;;  %v537_v4 = vmul.f32 %v2851_v35, %v1995_v59  ;;  %v1999_v5 = vunpack.c.l.bf16 %v2419_v55 }
  0x81   : > { %v797_v6 = vmax.f32 %v669_v60, 0.0  ;;  %v671_v7 = vadd.f32 %v2860_v43, %v536_v62  ;;  %v538_v8 = vmul.f32 %v2851_v35, %v1996_v63  ;;  %v2000_v10 = vunpack.c.h.bf16 %v2419_v55  ;;  %v2425_v55 = vld [vmem:[%s2549_s18 + $0x1c8] sm:$0xff]  }
  0x82   : > { %2478 = vst [vmem:[%s2588_s25 + $0x178] sm:$0xff] %v2287_v2   ;;  %v798_v11 = vmax.f32 %v670_v3, 0.0  ;;  %v672_v12 = vadd.f32 %v2860_v43, %v537_v4  ;;  %v539_v13 = vmul.f32 %v2851_v35, %v1999_v5  ;;  %v2003_v14 = vunpack.c.l.bf16 %v2420_v1 }
  0x83   : > { %v2292_v16 = vpack.c.bf16 %v797_v6, %v796_v61  ;;  %v799_v17 = vmax.f32 %v671_v7, 0.0  ;;  %v673_v18 = vadd.f32 %v2860_v43, %v538_v8  ;;  %v540_v19 = vmul.f32 %v2851_v35, %v2000_v10 }
  0x84   : > { %v800_v20 = vmax.f32 %v672_v12, 0.0  ;;  %v674_v21 = vadd.f32 %v2860_v43, %v539_v13  ;;  %v2004_v22 = vunpack.c.h.bf16 %v2420_v1  ;;  %v541_v23 = vmul.f32 %v2851_v35, %v2003_v14  ;;  %v2426_v1 = vld [vmem:[%s2549_s18 + $0x1d0] sm:$0xff]  }
  0x85   : > { %2479 = vst [vmem:[%s2588_s25 + $0x180] sm:$0xff] %v2292_v16   ;;  %v2297_v25 = vpack.c.bf16 %v799_v17, %v798_v11  ;;  %v801_v26 = vmax.f32 %v673_v18, 0.0  ;;  %v675_v27 = vadd.f32 %v2860_v43, %v540_v19  ;;  %v2007_v28 = vunpack.c.l.bf16 %v2421_v15  ;;  %v2427_v11 = vld [vmem:[%s2549_s18 + $0x1d8] sm:$0xff]  }
  0x86   : > { %v802_v29 = vmax.f32 %v674_v21, 0.0  ;;  %v542_v30 = vmul.f32 %v2851_v35, %v2004_v22  ;;  %v676_v31 = vadd.f32 %v2860_v43, %v541_v23  ;;  %v2008_v32 = vunpack.c.h.bf16 %v2421_v15 }
  0x87   : > { %2480 = vst [vmem:[%s2588_s25 + $0x188] sm:$0xff] %v2297_v25   ;;  %v2302_v34 = vpack.c.bf16 %v801_v26, %v800_v20  ;;  %v803_v36 = vmax.f32 %v675_v27, 0.0  ;;  %v543_v37 = vmul.f32 %v2851_v35, %v2007_v28  ;;  %v2011_v38 = vunpack.c.l.bf16 %v2422_v24  ;;  %v2428_v20 = vld [vmem:[%s2549_s18 + $0x1e0] sm:$0xff]  }
  0x88   : > { %v677_v39 = vadd.f32 %v2860_v43, %v542_v30  ;;  %v804_v40 = vmax.f32 %v676_v31, 0.0  ;;  %v544_v0 = vmul.f32 %v2851_v35, %v2008_v32  ;;  %v2012_v41 = vunpack.c.h.bf16 %v2422_v24 }
  0x89   : > { %2481 = vst [vmem:[%s2588_s25 + $0x190] sm:$0xff] %v2302_v34   ;;  %v2307_v44 = vpack.c.bf16 %v803_v36, %v802_v29  ;;  %v678_v45 = vadd.f32 %v2860_v43, %v543_v37  ;;  %v545_v46 = vmul.f32 %v2851_v35, %v2011_v38  ;;  %v2015_v47 = vunpack.c.l.bf16 %v2423_v33 }
  0x8a   : > { %v805_v48 = vmax.f32 %v677_v39, 0.0  ;;  %v679_v49 = vadd.f32 %v2860_v43, %v544_v0  ;;  %v546_v9 = vmul.f32 %v2851_v35, %v2012_v41  ;;  %v2016_v50 = vunpack.c.h.bf16 %v2423_v33  ;;  %v2429_v33 = vld [vmem:[%s2549_s18 + $0x1e8] sm:$0xff]  }
  0x8b   : > { %2482 = vst [vmem:[%s2588_s25 + $0x198] sm:$0xff] %v2307_v44   ;;  %v806_v51 = vmax.f32 %v678_v45, 0.0  ;;  %v680_v52 = vadd.f32 %v2860_v43, %v545_v46  ;;  %v547_v53 = vmul.f32 %v2851_v35, %v2015_v47  ;;  %v2019_v54 = vunpack.c.l.bf16 %v2424_v42 }
  0x8c   : > { %v2312_v56 = vpack.c.bf16 %v805_v48, %v804_v40  ;;  %v807_v57 = vmax.f32 %v679_v49, 0.0  ;;  %v681_v58 = vadd.f32 %v2860_v43, %v546_v9  ;;  %v548_v59 = vmul.f32 %v2851_v35, %v2016_v50 }
  0x8d   : > { %v808_v60 = vmax.f32 %v680_v52, 0.0  ;;  %v682_v61 = vadd.f32 %v2860_v43, %v547_v53  ;;  %v2020_v62 = vunpack.c.h.bf16 %v2424_v42  ;;  %v549_v63 = vmul.f32 %v2851_v35, %v2019_v54  ;;  %v2430_v42 = vld [vmem:[%s2549_s18 + $0x1f0] sm:$0xff]  }
  0x8e   : > { %2483 = vst [vmem:[%s2588_s25 + $0x1a0] sm:$0xff] %v2312_v56   ;;  %v2317_v2 = vpack.c.bf16 %v807_v57, %v806_v51  ;;  %v809_v3 = vmax.f32 %v681_v58, 0.0  ;;  %v683_v4 = vadd.f32 %v2860_v43, %v548_v59  ;;  %v2023_v5 = vunpack.c.l.bf16 %v2425_v55  ;;  %v2431_v51 = vld [vmem:[%s2549_s18 + $0x1f8] sm:$0xff]  }
  0x8f   : > { %v810_v6 = vmax.f32 %v682_v61, 0.0  ;;  %v550_v7 = vmul.f32 %v2851_v35, %v2020_v62  ;;  %v684_v8 = vadd.f32 %v2860_v43, %v549_v63  ;;  %v2024_v10 = vunpack.c.h.bf16 %v2425_v55 }
  0x90   : > { %2484 = vst [vmem:[%s2588_s25 + $0x1a8] sm:$0xff] %v2317_v2   ;;  %v2322_v12 = vpack.c.bf16 %v809_v3, %v808_v60  ;;  %v811_v13 = vmax.f32 %v683_v4, 0.0  ;;  %v551_v14 = vmul.f32 %v2851_v35, %v2023_v5  ;;  %v2027_v15 = vunpack.c.l.bf16 %v2426_v1 }
  0x91   : > { %v685_v16 = vadd.f32 %v2860_v43, %v550_v7  ;;  %v812_v17 = vmax.f32 %v684_v8, 0.0  ;;  %v552_v18 = vmul.f32 %v2851_v35, %v2024_v10  ;;  %v2028_v19 = vunpack.c.h.bf16 %v2426_v1 }
  0x92   : > { %2485 = vst [vmem:[%s2588_s25 + $0x1b0] sm:$0xff] %v2322_v12   ;;  %v2327_v21 = vpack.c.bf16 %v811_v13, %v810_v6  ;;  %v686_v22 = vadd.f32 %v2860_v43, %v551_v14  ;;  %v553_v23 = vmul.f32 %v2851_v35, %v2027_v15  ;;  %v2031_v24 = vunpack.c.l.bf16 %v2427_v11 }
  0x93   : > { %v813_v25 = vmax.f32 %v685_v16, 0.0  ;;  %v687_v26 = vadd.f32 %v2860_v43, %v552_v18  ;;  %v554_v27 = vmul.f32 %v2851_v35, %v2028_v19  ;;  %v2032_v28 = vunpack.c.h.bf16 %v2427_v11 }
  0x94   : > { %2486 = vst [vmem:[%s2588_s25 + $0x1b8] sm:$0xff] %v2327_v21   ;;  %v814_v29 = vmax.f32 %v686_v22, 0.0  ;;  %v688_v30 = vadd.f32 %v2860_v43, %v553_v23  ;;  %v555_v31 = vmul.f32 %v2851_v35, %v2031_v24  ;;  %v2035_v32 = vunpack.c.l.bf16 %v2428_v20 }
  0x95   : > { %v2332_v34 = vpack.c.bf16 %v813_v25, %v812_v17  ;;  %v815_v36 = vmax.f32 %v687_v26, 0.0  ;;  %v689_v37 = vadd.f32 %v2860_v43, %v554_v27  ;;  %v556_v38 = vmul.f32 %v2851_v35, %v2032_v28 }
  0x96   : > { %v816_v39 = vmax.f32 %v688_v30, 0.0  ;;  %v690_v40 = vadd.f32 %v2860_v43, %v555_v31  ;;  %v2036_v0 = vunpack.c.h.bf16 %v2428_v20  ;;  %v557_v41 = vmul.f32 %v2851_v35, %v2035_v32 }
  0x97   : > { %2487 = vst [vmem:[%s2588_s25 + $0x1c0] sm:$0xff] %v2332_v34   ;;  %v2337_v44 = vpack.c.bf16 %v815_v36, %v814_v29  ;;  %v817_v45 = vmax.f32 %v689_v37, 0.0  ;;  %v691_v46 = vadd.f32 %v2860_v43, %v556_v38  ;;  %v2039_v47 = vunpack.c.l.bf16 %v2429_v33 }
  0x98   : > { %v818_v48 = vmax.f32 %v690_v40, 0.0  ;;  %v558_v49 = vmul.f32 %v2851_v35, %v2036_v0  ;;  %v692_v9 = vadd.f32 %v2860_v43, %v557_v41  ;;  %v2040_v50 = vunpack.c.h.bf16 %v2429_v33 }
  0x99   : > { %2488 = vst [vmem:[%s2588_s25 + $0x1c8] sm:$0xff] %v2337_v44   ;;  %v2342_v52 = vpack.c.bf16 %v817_v45, %v816_v39  ;;  %v819_v53 = vmax.f32 %v691_v46, 0.0  ;;  %v559_v54 = vmul.f32 %v2851_v35, %v2039_v47  ;;  %v2043_v55 = vunpack.c.l.bf16 %v2430_v42 }
  0x9a   : > { %v693_v56 = vadd.f32 %v2860_v43, %v558_v49  ;;  %v820_v57 = vmax.f32 %v692_v9, 0.0  ;;  %v560_v58 = vmul.f32 %v2851_v35, %v2040_v50  ;;  %v2044_v59 = vunpack.c.h.bf16 %v2430_v42 }
  0x9b   : > { %2489 = vst [vmem:[%s2588_s25 + $0x1d0] sm:$0xff] %v2342_v52   ;;  %v2347_v60 = vpack.c.bf16 %v819_v53, %v818_v48  ;;  %v694_v61 = vadd.f32 %v2860_v43, %v559_v54  ;;  %v561_v62 = vmul.f32 %v2851_v35, %v2043_v55  ;;  %v2047_v63 = vunpack.c.l.bf16 %v2431_v51 }
  0x9c   : > { %v821_v1 = vmax.f32 %v693_v56, 0.0  ;;  %v695_v2 = vadd.f32 %v2860_v43, %v560_v58  ;;  %v562_v3 = vmul.f32 %v2851_v35, %v2044_v59  ;;  %v2048_v4 = vunpack.c.h.bf16 %v2431_v51 }
  0x9d   : > { %2490 = vst [vmem:[%s2588_s25 + $0x1d8] sm:$0xff] %v2347_v60   ;;  %v822_v5 = vmax.f32 %v694_v61, 0.0  ;;  %v696_v6 = vadd.f32 %v2860_v43, %v561_v62  ;;  %v563_v7 = vmul.f32 %v2851_v35, %v2047_v63 }
  0x9e   : > { %v2352_v8 = vpack.c.bf16 %v821_v1, %v820_v57  ;;  %v823_v10 = vmax.f32 %v695_v2, 0.0  ;;  %v697_v11 = vadd.f32 %v2860_v43, %v562_v3  ;;  %v564_v12 = vmul.f32 %v2851_v35, %v2048_v4 }
  0x9f   : > { %v824_v13 = vmax.f32 %v696_v6, 0.0  ;;  %v698_v14 = vadd.f32 %v2860_v43, %v563_v7 }
  0xa0   : > { %2491 = vst [vmem:[%s2588_s25 + $0x1e0] sm:$0xff] %v2352_v8   ;;  %v2357_v15 = vpack.c.bf16 %v823_v10, %v822_v5  ;;  %v825_v16 = vmax.f32 %v697_v11, 0.0  ;;  %v699_v17 = vadd.f32 %v2860_v43, %v564_v12 }
  0xa1   : > { %v826_v18 = vmax.f32 %v698_v14, 0.0 }
  0xa2   : > { %2492 = vst [vmem:[%s2588_s25 + $0x1e8] sm:$0xff] %v2357_v15   ;;  %v2362_v19 = vpack.c.bf16 %v825_v16, %v824_v13  ;;  %v827_v20 = vmax.f32 %v699_v17, 0.0 }
  0xa4   : > { %2493 = vst [vmem:[%s2588_s25 + $0x1f0] sm:$0xff] %v2362_v19   ;;  %v2367_v21 = vpack.c.bf16 %v827_v20, %v826_v18 }
  0xa6   : > { %2494 = vst [vmem:[%s2588_s25 + $0x1f8] sm:$0xff] %v2367_v21  }
  0xa7 PF: > { %s13_s12 = sadd.s32 1, %s2511_s12  }
  0xa8   : > { %p10_p4 = scmp.ge.s32.totalorder %s13_s12, 4  }
  0xaa   :  { %12 = sbr.rel (!%p10_p4) target bundleno = 1 (0x1), region = 62 }

// kernel: generator_forward.17
= control target key start
LH: loop header
LB: loop body
LE: loop exit
PB: predicated region body
PF: predicated region fallthrough
CT: control target
= control target key end

     0   :  { %s3965_s0 = inlined_call_operand.vmem [shape: s32[4,4], index: 0, kind: input, shape index: {}]   ;;  %s3966_s1 = inlined_call_operand.vmem [shape: bf16[9,2048,128], index: 1, kind: input, shape index: {}]   ;;  %s3967_s2 = inlined_call_operand.vmem [shape: bf16[4,4,128,128], index: 2, kind: input, shape index: {}]   ;;  %s3968_s3 = inlined_call_operand.vmem [shape: f32[1,128], index: 3, kind: input, shape index: {}]   ;;  %s3969_s4 = inlined_call_operand.vmem [shape: f32[4,2048,128], index: 4, kind: output, shape index: {}]  }
   0x1   :  { %s9_s17 = sshll.u32 %s3965_s0, 4  ;;  %s10_s17 = int_to_ptr.vmem [resolvable:$true] %s9_s17 }
   0x2   :  { %s3305_s18 = scalar_lea.vmem %s10_s17, 64  ;;  %p3310_p1 = scmp.lt.s32.totalorder %s10_s17, %s10_s17 }
   0x3   :  { %p3306_p0 = scmp.ne.s32.totalorder %s10_s17, %s3305_s18  ;;  %p3311_p2 = scmp.lt.s32.totalorder %s3305_s18, %s3305_s18 }
   0x5   :  { %p3312_p3 = por %p3311_p2, %p3310_p1 }
   0x7   :  { %p3313_p4 = pnand %p3312_p3, %p3306_p0 }
   0x9   :  { %3316 = shalt.err (!%p3313_p4)  }
   0xa   :  { %s3375_s19 = smov [#allocation4]  }
   0xb   :  { %12 = dma.vmem_to_smem %s10_s17, 64, %s3375_s19, [#allocation3] }
   0xc   :  { %3345 = dma.done.wait [#allocation3], 64 }
   0xd   :  { %3346 = vsyncadd [#allocation3], 4294967232 }
   0xe   :  { %14 = sfence }
   0xf   :  { %s3405_s20 = smov 0   ;;  %s3407_s21 = smov 0  }
  0x10   :  { %s3409_s22 = smov 0   ;;  %s3411_s0 = smov 0  }
  0x11   :  { %s3413_s23 = smov 0   ;;  %s3415_s24 = smov 0  }
  0x12   :  { %s3417_s25 = smov 0  }
  0x13 LB: > { %s32_s26 = sadd.s32 1, %s3361_s0  ;;  %s35_s27 = sadd.s32 1, %s3365_s23  ;;  %s3373_s25 = sphi %s3417_s25, %s20_s25   ;;  %s3369_s24 = sphi %s3415_s24, %s3975_s24   ;;  %s3365_s23 = sphi %s3413_s23, %s3974_s23   ;;  %s3361_s0 = sphi %s3411_s0, %s3973_s0   ;;  %s3357_s22 = sphi %s3409_s22, %s3972_s22   ;;  %s3353_s21 = sphi %s3407_s21, %s3971_s21   ;;  %s3349_s20 = sphi %s3405_s20, %s3970_s20  }
  0x14   : > { %p33_p5 = scmp.ge.s32.totalorder %s32_s26, 4  ;;  %p2598_p6 = scmp.ge.s32.totalorder %s3373_s25, 1 }
  0x15   : > { %p220_p7 = scmp.lt.s32.totalorder %s3373_s25, 33  ;;  %s39_s28 = sadd.s32 1, %s3369_s24 }
  0x16   : > { %s3977_s26 = smov (%p33_p5, %s32_s26), 0  ;;  %s3979_s27 = smov (!%p33_p5, %s35_s27), %s3365_s23 }
  0x17   : > { %p221_p8 = pnand %p2598_p6, %p220_p7  ;;  %p37_p9 = scmp.ge.s32.totalorder %s3979_s27, 2 }
  0x18   : > { %s269_s29 = sshra.s32 (!%p221_p8), %s3349_s20, 7  ;;  %s274_s30 = sand.u32 (!%p221_p8), 127, %s3349_s20 }
  0x19   : > { %s3981_s27 = smov (%p37_p9, %s3979_s27), 0  ;;  %s3983_s28 = smov (!%p37_p9, %s39_s28), %s3369_s24 }
  0x1a   : > { %p41_p10 = scmp.ge.s32.totalorder %s3983_s28, 4  ;;  %224 = sbr.rel (%p221_p8) target bundleno = 597 (0x255), region = 32 }
  0x1b   : > { %s271_s5 = sadd.s32 (!%p221_p8), %s3357_s22, %s269_s29  ;;  %s2600_s6 = sshll.u32 (!%p221_p8), %s3353_s21, 7 }
  0x1c   : > { %s3985_s28 = smov (%p41_p10, %s3983_s28), 0  ;;  %s2599_s7 = sshll.u32 (!%p221_p8), %s271_s5, 7 }
  0x1d   : > { %p280_p11 = scmp.lt.s32.totalorder (!%p221_p8), %s2600_s6, 255  ;;  %s275_s8 = sadd.s32 (!%p221_p8), %s2599_s7, %s274_s30 }
  0x1e   : > { %p295_p12 = scmp.lt.s32.totalorder (!%p221_p8), %s3357_s22, 3  ;;  %s276_s9 = sld [smem:[#allocation4 + %s275_s8]] (!%p221_p8) }
  0x1f   : > { %p297_p13 = scmp.lt.s32.totalorder (!%p221_p8), %s3349_s20, 3  ;;  %p2609_p1 = scmp.ne.s32.totalorder (!%p221_p8), %s3349_s20, 0 }
  0x21   : > { %s3987_s6 = smov (!%p280_p11, %s2600_s6), 255  ;;  %s3989_s22 = smov (!%p295_p12, %s3357_s22), 3 }
  0x22   : > { %s298_s10 = scalar_select %p297_p13, %s3349_s20, 3 }
  0x23   : > { %s2604_s11 = sshll.u32 %s3989_s22, 6  ;;  %s2607_s12 = sshll.u32 %s3989_s22, 8  ;;  %v3376_v0 = vmov (!%p2609_p1), 0.0  }
  0x24   : > { %s2603_s13 = sshll.u32 %s298_s10, 4  ;;  %s310_s14 = sadd.s32 %s2607_s12, %s3987_s6  ;;  %319 = vst [vmem:[#allocation2] sm:$0xff] (!%p2609_p1), %v3376_v0  ;;  %320 = vst [vmem:[#allocation2 + $0x8] sm:$0xff] (!%p2609_p1), %v3376_v0 }
  0x25   : > { %p278_p0 = scmp.lt.s32.totalorder %s276_s9, 8  ;;  %s301_s15 = sadd.s32 %s2604_s11, %s2603_s13  ;;  %321 = vst [vmem:[#allocation2 + $0x10] sm:$0xff] (!%p2609_p1), %v3376_v0  ;;  %322 = vst [vmem:[#allocation2 + $0x18] sm:$0xff] (!%p2609_p1), %v3376_v0 }
  0x26   : > { %s2605_s16 = sshll.u32 %s301_s15, 2  ;;  %s2608_s17 = sshll.u32 %s310_s14, 3  ;;  %323 = vst [vmem:[#allocation2 + $0x20] sm:$0xff] (!%p2609_p1), %v3376_v0  ;;  %324 = vst [vmem:[#allocation2 + $0x28] sm:$0xff] (!%p2609_p1), %v3376_v0 }
  0x27   : > { %s3991_s9 = smov (!%p278_p0, %s276_s9), 8  ;;  %s3464_s21 = scalar_lea.vmem %s3967_s2, %s2605_s16  ;;  %325 = vst [vmem:[#allocation2 + $0x30] sm:$0xff] (!%p2609_p1), %v3376_v0  ;;  %326 = vst [vmem:[#allocation2 + $0x38] sm:$0xff] (!%p2609_p1), %v3376_v0 }
  0x28   : > { %s3469_s5 = scalar_lea.vmem %s3969_s4, %s2608_s17  ;;  %s2601_s7 = sshll.u32 %s3991_s9, 8  ;;  %327 = vst [vmem:[#allocation2 + $0x40] sm:$0xff] (!%p2609_p1), %v3376_v0  ;;  %328 = vst [vmem:[#allocation2 + $0x48] sm:$0xff] (!%p2609_p1), %v3376_v0 }
  0x29   : > { %s283_s8 = sadd.s32 %s2601_s7, %s3987_s6  ;;  %318 = sbr.rel (%p2609_p1) target bundleno = 100 (0x64), region = 36  ;;  %329 = vst [vmem:[#allocation2 + $0x50] sm:$0xff] (!%p2609_p1), %v3376_v0  ;;  %330 = vst [vmem:[#allocation2 + $0x58] sm:$0xff] (!%p2609_p1), %v3376_v0 }
  0x2a   : > { %s2602_s22 = sshll.u32 %s283_s8, 2  ;;  %331 = vst [vmem:[#allocation2 + $0x60] sm:$0xff] (!%p2609_p1), %v3376_v0  ;;  %332 = vst [vmem:[#allocation2 + $0x68] sm:$0xff] (!%p2609_p1), %v3376_v0 }
  0x2b   : > { %s3474_s11 = scalar_lea.vmem %s3966_s1, %s2602_s22  ;;  %333 = vst [vmem:[#allocation2 + $0x70] sm:$0xff] (!%p2609_p1), %v3376_v0  ;;  %334 = vst [vmem:[#allocation2 + $0x78] sm:$0xff] (!%p2609_p1), %v3376_v0 }
  0x2c   : > { %335 = vst [vmem:[#allocation2 + $0x80] sm:$0xff] (!%p2609_p1), %v3376_v0  ;;  %336 = vst [vmem:[#allocation2 + $0x88] sm:$0xff] (!%p2609_p1), %v3376_v0 }
  0x2d   : > { %337 = vst [vmem:[#allocation2 + $0x90] sm:$0xff] (!%p2609_p1), %v3376_v0  ;;  %338 = vst [vmem:[#allocation2 + $0x98] sm:$0xff] (!%p2609_p1), %v3376_v0 }
  0x2e   : > { %339 = vst [vmem:[#allocation2 + $0xa0] sm:$0xff] (!%p2609_p1), %v3376_v0  ;;  %340 = vst [vmem:[#allocation2 + $0xa8] sm:$0xff] (!%p2609_p1), %v3376_v0 }
  0x2f   : > { %341 = vst [vmem:[#allocation2 + $0xb0] sm:$0xff] (!%p2609_p1), %v3376_v0  ;;  %342 = vst [vmem:[#allocation2 + $0xb8] sm:$0xff] (!%p2609_p1), %v3376_v0 }
  0x30   : > { %343 = vst [vmem:[#allocation2 + $0xc0] sm:$0xff] %v3376_v0  ;;  %344 = vst [vmem:[#allocation2 + $0xc8] sm:$0xff] %v3376_v0 }
  0x31   : > { %345 = vst [vmem:[#allocation2 + $0xd0] sm:$0xff] %v3376_v0  ;;  %346 = vst [vmem:[#allocation2 + $0xd8] sm:$0xff] %v3376_v0 }
  0x32   : > { %347 = vst [vmem:[#allocation2 + $0xe0] sm:$0xff] %v3376_v0  ;;  %348 = vst [vmem:[#allocation2 + $0xe8] sm:$0xff] %v3376_v0 }
  0x33   : > { %349 = vst [vmem:[#allocation2 + $0xf0] sm:$0xff] %v3376_v0  ;;  %350 = vst [vmem:[#allocation2 + $0xf8] sm:$0xff] %v3376_v0 }
  0x34   : > { %351 = vst [vmem:[#allocation2 + $0x100] sm:$0xff] %v3376_v0  ;;  %352 = vst [vmem:[#allocation2 + $0x108] sm:$0xff] %v3376_v0 }
  0x35   : > { %353 = vst [vmem:[#allocation2 + $0x110] sm:$0xff] %v3376_v0  ;;  %354 = vst [vmem:[#allocation2 + $0x118] sm:$0xff] %v3376_v0 }
  0x36   : > { %355 = vst [vmem:[#allocation2 + $0x120] sm:$0xff] %v3376_v0  ;;  %356 = vst [vmem:[#allocation2 + $0x128] sm:$0xff] %v3376_v0 }
  0x37   : > { %357 = vst [vmem:[#allocation2 + $0x130] sm:$0xff] %v3376_v0  ;;  %358 = vst [vmem:[#allocation2 + $0x138] sm:$0xff] %v3376_v0 }
  0x38   : > { %359 = vst [vmem:[#allocation2 + $0x140] sm:$0xff] %v3376_v0  ;;  %360 = vst [vmem:[#allocation2 + $0x148] sm:$0xff] %v3376_v0 }
  0x39   : > { %361 = vst [vmem:[#allocation2 + $0x150] sm:$0xff] %v3376_v0  ;;  %362 = vst [vmem:[#allocation2 + $0x158] sm:$0xff] %v3376_v0 }
  0x3a   : > { %363 = vst [vmem:[#allocation2 + $0x160] sm:$0xff] %v3376_v0  ;;  %364 = vst [vmem:[#allocation2 + $0x168] sm:$0xff] %v3376_v0 }
  0x3b   : > { %365 = vst [vmem:[#allocation2 + $0x170] sm:$0xff] %v3376_v0  ;;  %366 = vst [vmem:[#allocation2 + $0x178] sm:$0xff] %v3376_v0 }
  0x3c   : > { %367 = vst [vmem:[#allocation2 + $0x180] sm:$0xff] %v3376_v0  ;;  %368 = vst [vmem:[#allocation2 + $0x188] sm:$0xff] %v3376_v0 }
  0x3d   : > { %369 = vst [vmem:[#allocation2 + $0x190] sm:$0xff] %v3376_v0  ;;  %370 = vst [vmem:[#allocation2 + $0x198] sm:$0xff] %v3376_v0 }
  0x3e   : > { %371 = vst [vmem:[#allocation2 + $0x1a0] sm:$0xff] %v3376_v0  ;;  %372 = vst [vmem:[#allocation2 + $0x1a8] sm:$0xff] %v3376_v0 }
  0x3f   : > { %373 = vst [vmem:[#allocation2 + $0x1b0] sm:$0xff] %v3376_v0  ;;  %374 = vst [vmem:[#allocation2 + $0x1b8] sm:$0xff] %v3376_v0 }
  0x40   : > { %375 = vst [vmem:[#allocation2 + $0x1c0] sm:$0xff] %v3376_v0  ;;  %376 = vst [vmem:[#allocation2 + $0x1c8] sm:$0xff] %v3376_v0 }
  0x41   : > { %377 = vst [vmem:[#allocation2 + $0x1d0] sm:$0xff] %v3376_v0  ;;  %378 = vst [vmem:[#allocation2 + $0x1d8] sm:$0xff] %v3376_v0 }
  0x42   : > { %379 = vst [vmem:[#allocation2 + $0x1e0] sm:$0xff] %v3376_v0  ;;  %380 = vst [vmem:[#allocation2 + $0x1e8] sm:$0xff] %v3376_v0 }
  0x43   : > { %381 = vst [vmem:[#allocation2 + $0x1f0] sm:$0xff] %v3376_v0  ;;  %382 = vst [vmem:[#allocation2 + $0x1f8] sm:$0xff] %v3376_v0 }
  0x44   : > { %383 = vst [vmem:[#allocation2 + $0x200] sm:$0xff] %v3376_v0  ;;  %384 = vst [vmem:[#allocation2 + $0x208] sm:$0xff] %v3376_v0 }
  0x45   : > { %385 = vst [vmem:[#allocation2 + $0x210] sm:$0xff] %v3376_v0  ;;  %386 = vst [vmem:[#allocation2 + $0x218] sm:$0xff] %v3376_v0 }
  0x46   : > { %387 = vst [vmem:[#allocation2 + $0x220] sm:$0xff] %v3376_v0  ;;  %388 = vst [vmem:[#allocation2 + $0x228] sm:$0xff] %v3376_v0 }
  0x47   : > { %389 = vst [vmem:[#allocation2 + $0x230] sm:$0xff] %v3376_v0  ;;  %390 = vst [vmem:[#allocation2 + $0x238] sm:$0xff] %v3376_v0 }
  0x48   : > { %391 = vst [vmem:[#allocation2 + $0x240] sm:$0xff] %v3376_v0  ;;  %392 = vst [vmem:[#allocation2 + $0x248] sm:$0xff] %v3376_v0 }
  0x49   : > { %393 = vst [vmem:[#allocation2 + $0x250] sm:$0xff] %v3376_v0  ;;  %394 = vst [vmem:[#allocation2 + $0x258] sm:$0xff] %v3376_v0 }
  0x4a   : > { %395 = vst [vmem:[#allocation2 + $0x260] sm:$0xff] %v3376_v0  ;;  %396 = vst [vmem:[#allocation2 + $0x268] sm:$0xff] %v3376_v0 }
  0x4b   : > { %397 = vst [vmem:[#allocation2 + $0x270] sm:$0xff] %v3376_v0  ;;  %398 = vst [vmem:[#allocation2 + $0x278] sm:$0xff] %v3376_v0 }
  0x4c   : > { %399 = vst [vmem:[#allocation2 + $0x280] sm:$0xff] %v3376_v0  ;;  %400 = vst [vmem:[#allocation2 + $0x288] sm:$0xff] %v3376_v0 }
  0x4d   : > { %401 = vst [vmem:[#allocation2 + $0x290] sm:$0xff] %v3376_v0  ;;  %402 = vst [vmem:[#allocation2 + $0x298] sm:$0xff] %v3376_v0 }
  0x4e   : > { %403 = vst [vmem:[#allocation2 + $0x2a0] sm:$0xff] %v3376_v0  ;;  %404 = vst [vmem:[#allocation2 + $0x2a8] sm:$0xff] %v3376_v0 }
  0x4f   : > { %405 = vst [vmem:[#allocation2 + $0x2b0] sm:$0xff] %v3376_v0  ;;  %406 = vst [vmem:[#allocation2 + $0x2b8] sm:$0xff] %v3376_v0 }
  0x50   : > { %407 = vst [vmem:[#allocation2 + $0x2c0] sm:$0xff] %v3376_v0  ;;  %408 = vst [vmem:[#allocation2 + $0x2c8] sm:$0xff] %v3376_v0 }
  0x51   : > { %409 = vst [vmem:[#allocation2 + $0x2d0] sm:$0xff] %v3376_v0  ;;  %410 = vst [vmem:[#allocation2 + $0x2d8] sm:$0xff] %v3376_v0 }
  0x52   : > { %411 = vst [vmem:[#allocation2 + $0x2e0] sm:$0xff] %v3376_v0  ;;  %412 = vst [vmem:[#allocation2 + $0x2e8] sm:$0xff] %v3376_v0 }
  0x53   : > { %413 = vst [vmem:[#allocation2 + $0x2f0] sm:$0xff] %v3376_v0  ;;  %414 = vst [vmem:[#allocation2 + $0x2f8] sm:$0xff] %v3376_v0 }
  0x54   : > { %415 = vst [vmem:[#allocation2 + $0x300] sm:$0xff] %v3376_v0  ;;  %416 = vst [vmem:[#allocation2 + $0x308] sm:$0xff] %v3376_v0 }
  0x55   : > { %417 = vst [vmem:[#allocation2 + $0x310] sm:$0xff] %v3376_v0  ;;  %418 = vst [vmem:[#allocation2 + $0x318] sm:$0xff] %v3376_v0 }
  0x56   : > { %419 = vst [vmem:[#allocation2 + $0x320] sm:$0xff] %v3376_v0  ;;  %420 = vst [vmem:[#allocation2 + $0x328] sm:$0xff] %v3376_v0 }
  0x57   : > { %421 = vst [vmem:[#allocation2 + $0x330] sm:$0xff] %v3376_v0  ;;  %422 = vst [vmem:[#allocation2 + $0x338] sm:$0xff] %v3376_v0 }
  0x58   : > { %423 = vst [vmem:[#allocation2 + $0x340] sm:$0xff] %v3376_v0  ;;  %424 = vst [vmem:[#allocation2 + $0x348] sm:$0xff] %v3376_v0 }
  0x59   : > { %425 = vst [vmem:[#allocation2 + $0x350] sm:$0xff] %v3376_v0  ;;  %426 = vst [vmem:[#allocation2 + $0x358] sm:$0xff] %v3376_v0 }
  0x5a   : > { %427 = vst [vmem:[#allocation2 + $0x360] sm:$0xff] %v3376_v0  ;;  %428 = vst [vmem:[#allocation2 + $0x368] sm:$0xff] %v3376_v0 }
  0x5b   : > { %429 = vst [vmem:[#allocation2 + $0x370] sm:$0xff] %v3376_v0  ;;  %430 = vst [vmem:[#allocation2 + $0x378] sm:$0xff] %v3376_v0 }
  0x5c   : > { %431 = vst [vmem:[#allocation2 + $0x380] sm:$0xff] %v3376_v0  ;;  %432 = vst [vmem:[#allocation2 + $0x388] sm:$0xff] %v3376_v0 }
  0x5d   : > { %433 = vst [vmem:[#allocation2 + $0x390] sm:$0xff] %v3376_v0  ;;  %434 = vst [vmem:[#allocation2 + $0x398] sm:$0xff] %v3376_v0 }
  0x5e   : > { %435 = vst [vmem:[#allocation2 + $0x3a0] sm:$0xff] %v3376_v0  ;;  %436 = vst [vmem:[#allocation2 + $0x3a8] sm:$0xff] %v3376_v0 }
  0x5f   : > { %437 = vst [vmem:[#allocation2 + $0x3b0] sm:$0xff] %v3376_v0  ;;  %438 = vst [vmem:[#allocation2 + $0x3b8] sm:$0xff] %v3376_v0 }
  0x60   : > { %439 = vst [vmem:[#allocation2 + $0x3c0] sm:$0xff] %v3376_v0  ;;  %440 = vst [vmem:[#allocation2 + $0x3c8] sm:$0xff] %v3376_v0 }
  0x61   : > { %441 = vst [vmem:[#allocation2 + $0x3d0] sm:$0xff] %v3376_v0  ;;  %442 = vst [vmem:[#allocation2 + $0x3d8] sm:$0xff] %v3376_v0 }
  0x62   : > { %443 = vst [vmem:[#allocation2 + $0x3e0] sm:$0xff] %v3376_v0  ;;  %444 = vst [vmem:[#allocation2 + $0x3e8] sm:$0xff] %v3376_v0 }
  0x63   : > { %445 = vst [vmem:[#allocation2 + $0x3f0] sm:$0xff] %v3376_v0  ;;  %446 = vst [vmem:[#allocation2 + $0x3f8] sm:$0xff] %v3376_v0 }
  0x64 PF: > { %v2976_v1 = vld [vmem:[%s3464_s21] sm:$0xff]   ;;  %v2977_v2 = vld [vmem:[%s3464_s21 + $0x8] sm:$0xff]   ;;  %v2978_v3 = vld [vmem:[%s3464_s21 + $0x10] sm:$0xff]   ;;  %p2682_p2 = scmp.ne.s32.totalorder %s3349_s20, 3 }
  0x65   : > { %2758 = vmatprep.subr.bf16.mxu0 %v2976_v1  ;;  %2902 = vmatprep.subr.bf16.mxu1 %v2976_v1  ;;  %v2979_v4 = vld [vmem:[%s3464_s21 + $0x18] sm:$0xff]   ;;  %v2984_v5 = vld [vmem:[%s3474_s11] sm:$0xff]   ;;  %v2981_v8 = vld [vmem:[%s3464_s21 + $0x28] sm:$0xff]  }
  0x66   : > { %2759 = vmatpush3.bf16.msra.mxu0 %v2976_v1  ;;  %2910 = vmatpush3.bf16.msra.mxu1 %v2976_v1  ;;  %v2985_v6 = vld [vmem:[%s3474_s11 + $0x100] sm:$0xff]   ;;  %v2982_v9 = vld [vmem:[%s3464_s21 + $0x30] sm:$0xff]   ;;  %v2983_v10 = vld [vmem:[%s3464_s21 + $0x38] sm:$0xff]  }
  0x67   : > { %2760 = vmatprep.subr.bf16.mxu0 %v2977_v2  ;;  %2903 = vmatprep.subr.bf16.mxu1 %v2977_v2  ;;  %v2980_v7 = vld [vmem:[%s3464_s21 + $0x20] sm:$0xff]   ;;  %v2986_v11 = vld [vmem:[%s3474_s11 + $0x8] sm:$0xff]   ;;  %v2988_v13 = vld [vmem:[%s3474_s11 + $0x10] sm:$0xff]  }
  0x68   : > { %2774 = vmatprep.mubr.bf16.mxu0 %v2984_v5  ;;  %2838 = vmatprep.mubr.bf16.mxu1 %v2985_v6  ;;  %v2987_v12 = vld [vmem:[%s3474_s11 + $0x108] sm:$0xff]   ;;  %v2989_v14 = vld [vmem:[%s3474_s11 + $0x110] sm:$0xff]   ;;  %v2990_v15 = vld [vmem:[%s3474_s11 + $0x18] sm:$0xff]  }
  0x69   : > { %v2991_v16 = vld [vmem:[%s3474_s11 + $0x118] sm:$0xff]   ;;  %v2992_v17 = vld [vmem:[%s3474_s11 + $0x20] sm:$0xff]   ;;  %v2994_v19 = vld [vmem:[%s3474_s11 + $0x28] sm:$0xff]  }
  0x6a   : > { %2761 = vmatpush3.bf16.msra.mxu0 %v2977_v2  ;;  %2911 = vmatpush3.bf16.msra.mxu1 %v2977_v2  ;;  %v2993_v18 = vld [vmem:[%s3474_s11 + $0x120] sm:$0xff]   ;;  %v2995_v20 = vld [vmem:[%s3474_s11 + $0x128] sm:$0xff]   ;;  %v2996_v21 = vld [vmem:[%s3474_s11 + $0x30] sm:$0xff]  }
  0x6b   : > { %2762 = vmatprep.subr.bf16.mxu0 %v2978_v3  ;;  %2904 = vmatprep.subr.bf16.mxu1 %v2978_v3  ;;  %v2997_v22 = vld [vmem:[%s3474_s11 + $0x130] sm:$0xff]   ;;  %v2998_v23 = vld [vmem:[%s3474_s11 + $0x38] sm:$0xff]   ;;  %v3000_v25 = vld [vmem:[%s3474_s11 + $0x40] sm:$0xff]  }
  0x6c   : > { %v2999_v24 = vld [vmem:[%s3474_s11 + $0x138] sm:$0xff]   ;;  %v3001_v26 = vld [vmem:[%s3474_s11 + $0x140] sm:$0xff]   ;;  %v3002_v27 = vld [vmem:[%s3474_s11 + $0x48] sm:$0xff]  }
  0x6d   : > { %v3003_v28 = vld [vmem:[%s3474_s11 + $0x148] sm:$0xff]   ;;  %v3004_v29 = vld [vmem:[%s3474_s11 + $0x50] sm:$0xff]   ;;  %v3006_v31 = vld [vmem:[%s3474_s11 + $0x58] sm:$0xff]  }
  0x6e   : > { %2763 = vmatpush3.bf16.msra.mxu0 %v2978_v3  ;;  %2912 = vmatpush3.bf16.msra.mxu1 %v2978_v3  ;;  %v3005_v30 = vld [vmem:[%s3474_s11 + $0x150] sm:$0xff]   ;;  %v3007_v32 = vld [vmem:[%s3474_s11 + $0x158] sm:$0xff]   ;;  %v3008_v33 = vld [vmem:[%s3474_s11 + $0x60] sm:$0xff]  }
  0x6f   : > { %2764 = vmatprep.subr.bf16.mxu0 %v2979_v4  ;;  %2905 = vmatprep.subr.bf16.mxu1 %v2979_v4  ;;  %v3009_v34 = vld [vmem:[%s3474_s11 + $0x160] sm:$0xff]   ;;  %v3010_v35 = vld [vmem:[%s3474_s11 + $0x68] sm:$0xff]   ;;  %v3012_v37 = vld [vmem:[%s3474_s11 + $0x70] sm:$0xff]  }
  0x70   : > { %v3011_v36 = vld [vmem:[%s3474_s11 + $0x168] sm:$0xff]   ;;  %v3013_v38 = vld [vmem:[%s3474_s11 + $0x170] sm:$0xff]   ;;  %v3014_v39 = vld [vmem:[%s3474_s11 + $0x78] sm:$0xff]  }
  0x71   : > { %v3015_v40 = vld [vmem:[%s3474_s11 + $0x178] sm:$0xff]   ;;  %v3016_v41 = vld [vmem:[%s3474_s11 + $0x80] sm:$0xff]   ;;  %v3018_v43 = vld [vmem:[%s3474_s11 + $0x88] sm:$0xff]  }
  0x72   : > { %2765 = vmatpush3.bf16.msra.mxu0 %v2979_v4  ;;  %2913 = vmatpush3.bf16.msra.mxu1 %v2979_v4  ;;  %v3017_v42 = vld [vmem:[%s3474_s11 + $0x180] sm:$0xff]   ;;  %v3019_v44 = vld [vmem:[%s3474_s11 + $0x188] sm:$0xff]   ;;  %v3020_v45 = vld [vmem:[%s3474_s11 + $0x90] sm:$0xff]  }
  0x73   : > { %2766 = vmatprep.subr.bf16.mxu0 %v2980_v7  ;;  %2906 = vmatprep.subr.bf16.mxu1 %v2980_v7  ;;  %v3021_v46 = vld [vmem:[%s3474_s11 + $0x190] sm:$0xff]   ;;  %v3022_v47 = vld [vmem:[%s3474_s11 + $0x98] sm:$0xff]   ;;  %v3024_v49 = vld [vmem:[%s3474_s11 + $0xa0] sm:$0xff]  }
  0x74   : > { %v3023_v48 = vld [vmem:[%s3474_s11 + $0x198] sm:$0xff]   ;;  %v3025_v50 = vld [vmem:[%s3474_s11 + $0x1a0] sm:$0xff]   ;;  %v3026_v51 = vld [vmem:[%s3474_s11 + $0xa8] sm:$0xff]  }
  0x75   : > { %v3027_v52 = vld [vmem:[%s3474_s11 + $0x1a8] sm:$0xff]   ;;  %v3028_v53 = vld [vmem:[%s3474_s11 + $0xb0] sm:$0xff]   ;;  %v3030_v55 = vld [vmem:[%s3474_s11 + $0xb8] sm:$0xff]  }
  0x76   : > { %2767 = vmatpush3.bf16.msra.mxu0 %v2980_v7  ;;  %2914 = vmatpush3.bf16.msra.mxu1 %v2980_v7  ;;  %v3029_v54 = vld [vmem:[%s3474_s11 + $0x1b0] sm:$0xff]   ;;  %v3031_v56 = vld [vmem:[%s3474_s11 + $0x1b8] sm:$0xff]   ;;  %v3032_v57 = vld [vmem:[%s3474_s11 + $0xc0] sm:$0xff]  }
  0x77   : > { %2768 = vmatprep.subr.bf16.mxu0 %v2981_v8  ;;  %2907 = vmatprep.subr.bf16.mxu1 %v2981_v8  ;;  %v3033_v58 = vld [vmem:[%s3474_s11 + $0x1c0] sm:$0xff]   ;;  %v3034_v59 = vld [vmem:[%s3474_s11 + $0xc8] sm:$0xff]   ;;  %v3036_v61 = vld [vmem:[%s3474_s11 + $0xd0] sm:$0xff]  }
  0x78   : > { %v3035_v60 = vld [vmem:[%s3474_s11 + $0x1c8] sm:$0xff]   ;;  %v3037_v62 = vld [vmem:[%s3474_s11 + $0x1d0] sm:$0xff]   ;;  %v3038_v63 = vld [vmem:[%s3474_s11 + $0xd8] sm:$0xff]  }
  0x79   : > { %v3039_v0 = vld [vmem:[%s3474_s11 + $0x1d8] sm:$0xff]   ;;  %v3040_v1 = vld [vmem:[%s3474_s11 + $0xe0] sm:$0xff]   ;;  %v3042_v3 = vld [vmem:[%s3474_s11 + $0xe8] sm:$0xff]  }
  0x7a   : > { %2769 = vmatpush3.bf16.msra.mxu0 %v2981_v8  ;;  %2915 = vmatpush3.bf16.msra.mxu1 %v2981_v8  ;;  %v3041_v2 = vld [vmem:[%s3474_s11 + $0x1e0] sm:$0xff]   ;;  %v3043_v4 = vld [vmem:[%s3474_s11 + $0x1e8] sm:$0xff]   ;;  %v3044_v5 = vld [vmem:[%s3474_s11 + $0xf0] sm:$0xff]  }
  0x7b   : > { %2770 = vmatprep.subr.bf16.mxu0 %v2982_v9  ;;  %2908 = vmatprep.subr.bf16.mxu1 %v2982_v9  ;;  %v3045_v6 = vld [vmem:[%s3474_s11 + $0x1f0] sm:$0xff]   ;;  %v3046_v7 = vld [vmem:[%s3474_s11 + $0xf8] sm:$0xff]  }
  0x7c   : > { %v3047_v8 = vld [vmem:[%s3474_s11 + $0x1f8] sm:$0xff]  }
  0x7e   : > { %2771 = vmatpush3.bf16.msra.mxu0 %v2982_v9  ;;  %2916 = vmatpush3.bf16.msra.mxu1 %v2982_v9  ;;  %v449_v9 = vld [vmem:[#allocation2 + $0x10] sm:$0xff] }
  0x7f   : > { %2772 = vmatprep.subr.bf16.mxu0 %v2983_v10  ;;  %2909 = vmatprep.subr.bf16.mxu1 %v2983_v10 }
  0x82   : > { %2773 = vmatpush3.bf16.msra.mxu0 %v2983_v10  ;;  %2917 = vmatpush3.bf16.msra.mxu1 %v2983_v10  ;;  %v513_v10 = vld [vmem:[#allocation2 + $0x210] sm:$0xff] }
  0x85   : > { %2775 = vmatmul.mubr.bf16.vlgmr.msra.gmra.mrb[0].mxu0 %v2986_v11  ;;  %2839 = vmatmul.mubr.bf16.vlgmr.msra.gmra.mrb[0].mxu1 %v2987_v12  ;;  %v447_v11 = vld [vmem:[#allocation2] sm:$0xff] }
  0x86   : > { %2778 = vmatprep.mubr.bf16.mxu0 %v2988_v13  ;;  %2842 = vmatprep.mubr.bf16.mxu1 %v2989_v14  ;;  %v511_v12 = vld [vmem:[#allocation2 + $0x200] sm:$0xff] }
  0x8d   : > { %2779 = vmatmul.mubr.bf16.gmra.mrb[4].mxu0 %v2990_v15  ;;  %2843 = vmatmul.mubr.bf16.gmra.mrb[4].mxu1 %v2991_v16  ;;  %v450_v15 = vld [vmem:[#allocation2 + $0x18] sm:$0xff] }
  0x8e   : > { %2782 = vmatprep.mubr.bf16.mxu0 %v2992_v17  ;;  %2846 = vmatprep.mubr.bf16.mxu1 %v2993_v18  ;;  %v514_v16 = vld [vmem:[#allocation2 + $0x218] sm:$0xff] }
  0x95   : > { %2783 = vmatmul.mubr.bf16.gmra.mrb[8].mxu0 %v2994_v19  ;;  %2847 = vmatmul.mubr.bf16.gmra.mrb[8].mxu1 %v2995_v20 }
  0x96   : > { %2786 = vmatprep.mubr.bf16.mxu0 %v2996_v21  ;;  %2850 = vmatprep.mubr.bf16.mxu1 %v2997_v22  ;;  %v448_v21 = vld [vmem:[#allocation2 + $0x8] sm:$0xff] }
  0x97   : > { %v512_v22 = vld [vmem:[#allocation2 + $0x208] sm:$0xff] }
  0x9d   : > { %2787 = vmatmul.mubr.bf16.gmra.mrb[12].mxu0 %v2998_v23  ;;  %2851 = vmatmul.mubr.bf16.gmra.mrb[12].mxu1 %v2999_v24 }
  0x9e   : > { %2790 = vmatprep.mubr.bf16.mxu0 %v3000_v25  ;;  %2854 = vmatprep.mubr.bf16.mxu1 %v3001_v26 }
  0xa5   : > { %2791 = vmatmul.mubr.bf16.gmra.mrb[16].mxu0 %v3002_v27  ;;  %2855 = vmatmul.mubr.bf16.gmra.mrb[16].mxu1 %v3003_v28 }
  0xa6   : > { %2794 = vmatprep.mubr.bf16.mxu0 %v3004_v29  ;;  %2858 = vmatprep.mubr.bf16.mxu1 %v3005_v30 }
  0xad   : > { %2795 = vmatmul.mubr.bf16.gmra.mrb[20].mxu0 %v3006_v31  ;;  %2859 = vmatmul.mubr.bf16.gmra.mrb[20].mxu1 %v3007_v32 }
  0xae   : > { %2798 = vmatprep.mubr.bf16.mxu0 %v3008_v33  ;;  %2862 = vmatprep.mubr.bf16.mxu1 %v3009_v34  ;;  %v453_v33 = vld [vmem:[#allocation2 + $0x30] sm:$0xff] }
  0xaf   : > { %v517_v34 = vld [vmem:[#allocation2 + $0x230] sm:$0xff] }
  0xb5   : > { %2799 = vmatmul.mubr.bf16.gmra.mrb[24].mxu0 %v3010_v35  ;;  %2863 = vmatmul.mubr.bf16.gmra.mrb[24].mxu1 %v3011_v36  ;;  %v451_v35 = vld [vmem:[#allocation2 + $0x20] sm:$0xff] }
  0xb6   : > { %2802 = vmatprep.mubr.bf16.mxu0 %v3012_v37  ;;  %2866 = vmatprep.mubr.bf16.mxu1 %v3013_v38  ;;  %v515_v36 = vld [vmem:[#allocation2 + $0x220] sm:$0xff] }
  0xbd   : > { %2803 = vmatmul.mubr.bf16.gmra.mrb[28].mxu0 %v3014_v39  ;;  %2867 = vmatmul.mubr.bf16.gmra.mrb[28].mxu1 %v3015_v40  ;;  %v454_v39 = vld [vmem:[#allocation2 + $0x38] sm:$0xff] }
  0xbe   : > { %2806 = vmatprep.mubr.bf16.mxu0 %v3016_v41  ;;  %2870 = vmatprep.mubr.bf16.mxu1 %v3017_v42  ;;  %v518_v40 = vld [vmem:[#allocation2 + $0x238] sm:$0xff] }
  0xc5   : > { %2807 = vmatmul.mubr.bf16.gmra.mrb[32].mxu0 %v3018_v43  ;;  %2871 = vmatmul.mubr.bf16.gmra.mrb[32].mxu1 %v3019_v44 }
  0xc6   : > { %2810 = vmatprep.mubr.bf16.mxu0 %v3020_v45  ;;  %2874 = vmatprep.mubr.bf16.mxu1 %v3021_v46  ;;  %v452_v45 = vld [vmem:[#allocation2 + $0x28] sm:$0xff] }
  0xc7   : > { %v516_v46 = vld [vmem:[#allocation2 + $0x228] sm:$0xff] }
  0xcd   : > { %2811 = vmatmul.mubr.bf16.gmra.mrb[36].mxu0 %v3022_v47  ;;  %2875 = vmatmul.mubr.bf16.gmra.mrb[36].mxu1 %v3023_v48 }
  0xce   : > { %2814 = vmatprep.mubr.bf16.mxu0 %v3024_v49  ;;  %2878 = vmatprep.mubr.bf16.mxu1 %v3025_v50 }
  0xd5   : > { %2815 = vmatmul.mubr.bf16.gmra.mrb[40].mxu0 %v3026_v51  ;;  %2879 = vmatmul.mubr.bf16.gmra.mrb[40].mxu1 %v3027_v52 }
  0xd6   : > { %2818 = vmatprep.mubr.bf16.mxu0 %v3028_v53  ;;  %2882 = vmatprep.mubr.bf16.mxu1 %v3029_v54 }
  0xdd   : > { %2819 = vmatmul.mubr.bf16.gmra.mrb[44].mxu0 %v3030_v55  ;;  %2883 = vmatmul.mubr.bf16.gmra.mrb[44].mxu1 %v3031_v56 }
  0xde   : > { %2822 = vmatprep.mubr.bf16.mxu0 %v3032_v57  ;;  %2886 = vmatprep.mubr.bf16.mxu1 %v3033_v58  ;;  %v457_v57 = vld [vmem:[#allocation2 + $0x50] sm:$0xff] }
  0xdf   : > { %v521_v58 = vld [vmem:[#allocation2 + $0x250] sm:$0xff] }
  0xe5   : > { %2823 = vmatmul.mubr.bf16.gmra.mrb[48].mxu0 %v3034_v59  ;;  %2887 = vmatmul.mubr.bf16.gmra.mrb[48].mxu1 %v3035_v60  ;;  %v455_v59 = vld [vmem:[#allocation2 + $0x40] sm:$0xff] }
  0xe6   : > { %2826 = vmatprep.mubr.bf16.mxu0 %v3036_v61  ;;  %2890 = vmatprep.mubr.bf16.mxu1 %v3037_v62  ;;  %v519_v60 = vld [vmem:[#allocation2 + $0x240] sm:$0xff] }
  0xed   : > { %2827 = vmatmul.mubr.bf16.gmra.mrb[52].mxu0 %v3038_v63  ;;  %2891 = vmatmul.mubr.bf16.gmra.mrb[52].mxu1 %v3039_v0  ;;  %v458_v63 = vld [vmem:[#allocation2 + $0x58] sm:$0xff] }
  0xee   : > { %2830 = vmatprep.mubr.bf16.mxu0 %v3040_v1  ;;  %2894 = vmatprep.mubr.bf16.mxu1 %v3041_v2  ;;  %v522_v0 = vld [vmem:[#allocation2 + $0x258] sm:$0xff] }
  0xf5   : > { %2831 = vmatmul.mubr.bf16.gmra.mrb[56].mxu0 %v3042_v3  ;;  %2895 = vmatmul.mubr.bf16.gmra.mrb[56].mxu1 %v3043_v4 }
  0xf6   : > { %2834 = vmatprep.mubr.bf16.mxu0 %v3044_v5  ;;  %2898 = vmatprep.mubr.bf16.mxu1 %v3045_v6  ;;  %v456_v5 = vld [vmem:[#allocation2 + $0x48] sm:$0xff] }
  0xf7   : > { %v520_v6 = vld [vmem:[#allocation2 + $0x248] sm:$0xff] }
  0xfd   : > { %2835 = vmatmul.mubr.bf16.gmra.mrb[60].mxu0 %v3046_v7  ;;  %2899 = vmatmul.mubr.bf16.gmra.mrb[60].mxu1 %v3047_v8 }
 0x158   : > { %v2776_v13 = vpop.f32.mrb[0].mxu0  ;;  %v2840_v14 = vpop.f32.mrb[0].mxu1 }
 0x159   : > { %v1698_v17 = vadd.f32 %v2776_v13, %v449_v9  ;;  %v1762_v18 = vadd.f32 %v2840_v14, %v513_v10  ;;  %v1185_v19 = vpop.f32.mrb[1].mxu0  ;;  %v1441_v20 = vpop.f32.mrb[1].mxu1 }
 0x15a   : > { %v1696_v23 = vadd.f32 %v1185_v19, %v447_v11  ;;  %v1760_v24 = vadd.f32 %v1441_v20, %v511_v12  ;;  %v2777_v25 = vpop.f32.mrb[2].mxu0  ;;  %v2841_v26 = vpop.f32.mrb[2].mxu1  ;;  %v459_v19 = vld [vmem:[#allocation2 + $0x60] sm:$0xff] }
 0x15b   : > { %1826 = vst [vmem:[#allocation2 + $0x10] sm:$0xff] %v1698_v17  ;;  %1890 = vst [vmem:[#allocation2 + $0x210] sm:$0xff] %v1762_v18  ;;  %v1699_v27 = vadd.f32 %v2777_v25, %v450_v15  ;;  %v1763_v28 = vadd.f32 %v2841_v26, %v514_v16  ;;  %v1188_v29 = vpop.f32.mrb[3].mxu0  ;;  %v1444_v30 = vpop.f32.mrb[3].mxu1  ;;  %v461_v17 = vld [vmem:[#allocation2 + $0x70] sm:$0xff]  ;;  %v523_v20 = vld [vmem:[#allocation2 + $0x260] sm:$0xff] }
 0x15c   : > { %1824 = vst [vmem:[#allocation2] sm:$0xff] %v1696_v23  ;;  %1888 = vst [vmem:[#allocation2 + $0x200] sm:$0xff] %v1760_v24  ;;  %v1697_v31 = vadd.f32 %v1188_v29, %v448_v21  ;;  %v1761_v32 = vadd.f32 %v1444_v30, %v512_v22  ;;  %v525_v18 = vld [vmem:[#allocation2 + $0x270] sm:$0xff]  ;;  %v462_v23 = vld [vmem:[#allocation2 + $0x78] sm:$0xff] }
 0x15d   : > { %1827 = vst [vmem:[#allocation2 + $0x18] sm:$0xff] %v1699_v27  ;;  %1891 = vst [vmem:[#allocation2 + $0x218] sm:$0xff] %v1763_v28  ;;  %v526_v24 = vld [vmem:[#allocation2 + $0x278] sm:$0xff]  ;;  %v460_v29 = vld [vmem:[#allocation2 + $0x68] sm:$0xff] }
 0x15e   : > { %1825 = vst [vmem:[#allocation2 + $0x8] sm:$0xff] %v1697_v31  ;;  %1889 = vst [vmem:[#allocation2 + $0x208] sm:$0xff] %v1761_v32  ;;  %v524_v30 = vld [vmem:[#allocation2 + $0x268] sm:$0xff] }
 0x160   : > { %v2780_v37 = vpop.f32.mrb[4].mxu0  ;;  %v2844_v38 = vpop.f32.mrb[4].mxu1 }
 0x161   : > { %v1702_v41 = vadd.f32 %v2780_v37, %v453_v33  ;;  %v1766_v42 = vadd.f32 %v2844_v38, %v517_v34  ;;  %v1201_v43 = vpop.f32.mrb[5].mxu0  ;;  %v1457_v44 = vpop.f32.mrb[5].mxu1 }
 0x162   : > { %v1700_v47 = vadd.f32 %v1201_v43, %v451_v35  ;;  %v1764_v48 = vadd.f32 %v1457_v44, %v515_v36  ;;  %v2781_v49 = vpop.f32.mrb[6].mxu0  ;;  %v2845_v50 = vpop.f32.mrb[6].mxu1  ;;  %v463_v43 = vld [vmem:[#allocation2 + $0x80] sm:$0xff] }
 0x163   : > { %1830 = vst [vmem:[#allocation2 + $0x30] sm:$0xff] %v1702_v41  ;;  %1894 = vst [vmem:[#allocation2 + $0x230] sm:$0xff] %v1766_v42  ;;  %v1703_v51 = vadd.f32 %v2781_v49, %v454_v39  ;;  %v1767_v52 = vadd.f32 %v2845_v50, %v518_v40  ;;  %v1204_v53 = vpop.f32.mrb[7].mxu0  ;;  %v1460_v54 = vpop.f32.mrb[7].mxu1  ;;  %v465_v41 = vld [vmem:[#allocation2 + $0x90] sm:$0xff]  ;;  %v527_v44 = vld [vmem:[#allocation2 + $0x280] sm:$0xff] }
 0x164   : > { %1828 = vst [vmem:[#allocation2 + $0x20] sm:$0xff] %v1700_v47  ;;  %1892 = vst [vmem:[#allocation2 + $0x220] sm:$0xff] %v1764_v48  ;;  %v1701_v55 = vadd.f32 %v1204_v53, %v452_v45  ;;  %v1765_v56 = vadd.f32 %v1460_v54, %v516_v46  ;;  %v529_v42 = vld [vmem:[#allocation2 + $0x290] sm:$0xff]  ;;  %v466_v47 = vld [vmem:[#allocation2 + $0x98] sm:$0xff] }
 0x165   : > { %1831 = vst [vmem:[#allocation2 + $0x38] sm:$0xff] %v1703_v51  ;;  %1895 = vst [vmem:[#allocation2 + $0x238] sm:$0xff] %v1767_v52  ;;  %v530_v48 = vld [vmem:[#allocation2 + $0x298] sm:$0xff]  ;;  %v464_v53 = vld [vmem:[#allocation2 + $0x88] sm:$0xff] }
 0x166   : > { %1829 = vst [vmem:[#allocation2 + $0x28] sm:$0xff] %v1701_v55  ;;  %1893 = vst [vmem:[#allocation2 + $0x228] sm:$0xff] %v1765_v56  ;;  %v528_v54 = vld [vmem:[#allocation2 + $0x288] sm:$0xff] }
 0x168   : > { %v2784_v61 = vpop.f32.mrb[8].mxu0  ;;  %v2848_v62 = vpop.f32.mrb[8].mxu1 }
 0x169   : > { %v1706_v1 = vadd.f32 %v2784_v61, %v457_v57  ;;  %v1770_v2 = vadd.f32 %v2848_v62, %v521_v58  ;;  %v1217_v3 = vpop.f32.mrb[9].mxu0  ;;  %v1473_v4 = vpop.f32.mrb[9].mxu1 }
 0x16a   : > { %v1704_v7 = vadd.f32 %v1217_v3, %v455_v59  ;;  %v1768_v8 = vadd.f32 %v1473_v4, %v519_v60  ;;  %v2785_v9 = vpop.f32.mrb[10].mxu0  ;;  %v2849_v10 = vpop.f32.mrb[10].mxu1  ;;  %v467_v3 = vld [vmem:[#allocation2 + $0xa0] sm:$0xff] }
 0x16b   : > { %1834 = vst [vmem:[#allocation2 + $0x50] sm:$0xff] %v1706_v1  ;;  %1898 = vst [vmem:[#allocation2 + $0x250] sm:$0xff] %v1770_v2  ;;  %v1707_v11 = vadd.f32 %v2785_v9, %v458_v63  ;;  %v1771_v12 = vadd.f32 %v2849_v10, %v522_v0  ;;  %v1220_v13 = vpop.f32.mrb[11].mxu0  ;;  %v1476_v14 = vpop.f32.mrb[11].mxu1  ;;  %v469_v1 = vld [vmem:[#allocation2 + $0xb0] sm:$0xff]  ;;  %v531_v4 = vld [vmem:[#allocation2 + $0x2a0] sm:$0xff] }
 0x16c   : > { %1832 = vst [vmem:[#allocation2 + $0x40] sm:$0xff] %v1704_v7  ;;  %1896 = vst [vmem:[#allocation2 + $0x240] sm:$0xff] %v1768_v8  ;;  %v1705_v15 = vadd.f32 %v1220_v13, %v456_v5  ;;  %v1769_v16 = vadd.f32 %v1476_v14, %v520_v6  ;;  %v533_v2 = vld [vmem:[#allocation2 + $0x2b0] sm:$0xff]  ;;  %v470_v7 = vld [vmem:[#allocation2 + $0xb8] sm:$0xff] }
 0x16d   : > { %1835 = vst [vmem:[#allocation2 + $0x58] sm:$0xff] %v1707_v11  ;;  %1899 = vst [vmem:[#allocation2 + $0x258] sm:$0xff] %v1771_v12  ;;  %v534_v8 = vld [vmem:[#allocation2 + $0x2b8] sm:$0xff]  ;;  %v468_v13 = vld [vmem:[#allocation2 + $0xa8] sm:$0xff] }
 0x16e   : > { %1833 = vst [vmem:[#allocation2 + $0x48] sm:$0xff] %v1705_v15  ;;  %1897 = vst [vmem:[#allocation2 + $0x248] sm:$0xff] %v1769_v16  ;;  %v532_v14 = vld [vmem:[#allocation2 + $0x2a8] sm:$0xff] }
 0x170   : > { %v2788_v21 = vpop.f32.mrb[12].mxu0  ;;  %v2852_v22 = vpop.f32.mrb[12].mxu1 }
 0x171   : > { %v1710_v25 = vadd.f32 %v2788_v21, %v461_v17  ;;  %v1774_v26 = vadd.f32 %v2852_v22, %v525_v18  ;;  %v1233_v27 = vpop.f32.mrb[13].mxu0  ;;  %v1489_v28 = vpop.f32.mrb[13].mxu1 }
 0x172   : > { %v1708_v31 = vadd.f32 %v1233_v27, %v459_v19  ;;  %v1772_v32 = vadd.f32 %v1489_v28, %v523_v20  ;;  %v2789_v33 = vpop.f32.mrb[14].mxu0  ;;  %v2853_v34 = vpop.f32.mrb[14].mxu1  ;;  %v471_v27 = vld [vmem:[#allocation2 + $0xc0] sm:$0xff] }
 0x173   : > { %1838 = vst [vmem:[#allocation2 + $0x70] sm:$0xff] %v1710_v25  ;;  %1902 = vst [vmem:[#allocation2 + $0x270] sm:$0xff] %v1774_v26  ;;  %v1711_v35 = vadd.f32 %v2789_v33, %v462_v23  ;;  %v1775_v36 = vadd.f32 %v2853_v34, %v526_v24  ;;  %v1236_v37 = vpop.f32.mrb[15].mxu0  ;;  %v1492_v38 = vpop.f32.mrb[15].mxu1  ;;  %v473_v25 = vld [vmem:[#allocation2 + $0xd0] sm:$0xff]  ;;  %v535_v28 = vld [vmem:[#allocation2 + $0x2c0] sm:$0xff] }
 0x174   : > { %1836 = vst [vmem:[#allocation2 + $0x60] sm:$0xff] %v1708_v31  ;;  %1900 = vst [vmem:[#allocation2 + $0x260] sm:$0xff] %v1772_v32  ;;  %v1709_v39 = vadd.f32 %v1236_v37, %v460_v29  ;;  %v1773_v40 = vadd.f32 %v1492_v38, %v524_v30  ;;  %v537_v26 = vld [vmem:[#allocation2 + $0x2d0] sm:$0xff]  ;;  %v474_v31 = vld [vmem:[#allocation2 + $0xd8] sm:$0xff] }
 0x175   : > { %1839 = vst [vmem:[#allocation2 + $0x78] sm:$0xff] %v1711_v35  ;;  %1903 = vst [vmem:[#allocation2 + $0x278] sm:$0xff] %v1775_v36  ;;  %v538_v32 = vld [vmem:[#allocation2 + $0x2d8] sm:$0xff]  ;;  %v472_v37 = vld [vmem:[#allocation2 + $0xc8] sm:$0xff] }
 0x176   : > { %1837 = vst [vmem:[#allocation2 + $0x68] sm:$0xff] %v1709_v39  ;;  %1901 = vst [vmem:[#allocation2 + $0x268] sm:$0xff] %v1773_v40  ;;  %v536_v38 = vld [vmem:[#allocation2 + $0x2c8] sm:$0xff] }
 0x178   : > { %v2792_v45 = vpop.f32.mrb[16].mxu0  ;;  %v2856_v46 = vpop.f32.mrb[16].mxu1 }
 0x179   : > { %v1714_v49 = vadd.f32 %v2792_v45, %v465_v41  ;;  %v1778_v50 = vadd.f32 %v2856_v46, %v529_v42  ;;  %v1249_v51 = vpop.f32.mrb[17].mxu0  ;;  %v1505_v52 = vpop.f32.mrb[17].mxu1 }
 0x17a   : > { %v1712_v55 = vadd.f32 %v1249_v51, %v463_v43  ;;  %v1776_v56 = vadd.f32 %v1505_v52, %v527_v44  ;;  %v2793_v57 = vpop.f32.mrb[18].mxu0  ;;  %v2857_v58 = vpop.f32.mrb[18].mxu1  ;;  %v475_v51 = vld [vmem:[#allocation2 + $0xe0] sm:$0xff] }
 0x17b   : > { %1842 = vst [vmem:[#allocation2 + $0x90] sm:$0xff] %v1714_v49  ;;  %1906 = vst [vmem:[#allocation2 + $0x290] sm:$0xff] %v1778_v50  ;;  %v1715_v59 = vadd.f32 %v2793_v57, %v466_v47  ;;  %v1779_v60 = vadd.f32 %v2857_v58, %v530_v48  ;;  %v1252_v61 = vpop.f32.mrb[19].mxu0  ;;  %v1508_v62 = vpop.f32.mrb[19].mxu1  ;;  %v477_v49 = vld [vmem:[#allocation2 + $0xf0] sm:$0xff]  ;;  %v539_v52 = vld [vmem:[#allocation2 + $0x2e0] sm:$0xff] }
 0x17c   : > { %1840 = vst [vmem:[#allocation2 + $0x80] sm:$0xff] %v1712_v55  ;;  %1904 = vst [vmem:[#allocation2 + $0x280] sm:$0xff] %v1776_v56  ;;  %v1713_v63 = vadd.f32 %v1252_v61, %v464_v53  ;;  %v1777_v0 = vadd.f32 %v1508_v62, %v528_v54  ;;  %v541_v50 = vld [vmem:[#allocation2 + $0x2f0] sm:$0xff]  ;;  %v478_v55 = vld [vmem:[#allocation2 + $0xf8] sm:$0xff] }
 0x17d   : > { %1843 = vst [vmem:[#allocation2 + $0x98] sm:$0xff] %v1715_v59  ;;  %1907 = vst [vmem:[#allocation2 + $0x298] sm:$0xff] %v1779_v60  ;;  %v542_v56 = vld [vmem:[#allocation2 + $0x2f8] sm:$0xff]  ;;  %v476_v61 = vld [vmem:[#allocation2 + $0xe8] sm:$0xff] }
 0x17e   : > { %1841 = vst [vmem:[#allocation2 + $0x88] sm:$0xff] %v1713_v63  ;;  %1905 = vst [vmem:[#allocation2 + $0x288] sm:$0xff] %v1777_v0  ;;  %v540_v62 = vld [vmem:[#allocation2 + $0x2e8] sm:$0xff] }
 0x180   : > { %v2796_v5 = vpop.f32.mrb[20].mxu0  ;;  %v2860_v6 = vpop.f32.mrb[20].mxu1 }
 0x181   : > { %v1718_v9 = vadd.f32 %v2796_v5, %v469_v1  ;;  %v1782_v10 = vadd.f32 %v2860_v6, %v533_v2  ;;  %v1265_v11 = vpop.f32.mrb[21].mxu0  ;;  %v1521_v12 = vpop.f32.mrb[21].mxu1 }
 0x182   : > { %v1716_v15 = vadd.f32 %v1265_v11, %v467_v3  ;;  %v1780_v16 = vadd.f32 %v1521_v12, %v531_v4  ;;  %v2797_v17 = vpop.f32.mrb[22].mxu0  ;;  %v2861_v18 = vpop.f32.mrb[22].mxu1  ;;  %v479_v11 = vld [vmem:[#allocation2 + $0x100] sm:$0xff] }
 0x183   : > { %1846 = vst [vmem:[#allocation2 + $0xb0] sm:$0xff] %v1718_v9  ;;  %1910 = vst [vmem:[#allocation2 + $0x2b0] sm:$0xff] %v1782_v10  ;;  %v1719_v19 = vadd.f32 %v2797_v17, %v470_v7  ;;  %v1783_v20 = vadd.f32 %v2861_v18, %v534_v8  ;;  %v1268_v21 = vpop.f32.mrb[23].mxu0  ;;  %v1524_v22 = vpop.f32.mrb[23].mxu1  ;;  %v481_v9 = vld [vmem:[#allocation2 + $0x110] sm:$0xff]  ;;  %v543_v12 = vld [vmem:[#allocation2 + $0x300] sm:$0xff] }
 0x184   : > { %1844 = vst [vmem:[#allocation2 + $0xa0] sm:$0xff] %v1716_v15  ;;  %1908 = vst [vmem:[#allocation2 + $0x2a0] sm:$0xff] %v1780_v16  ;;  %v1717_v23 = vadd.f32 %v1268_v21, %v468_v13  ;;  %v1781_v24 = vadd.f32 %v1524_v22, %v532_v14  ;;  %v545_v10 = vld [vmem:[#allocation2 + $0x310] sm:$0xff]  ;;  %v482_v15 = vld [vmem:[#allocation2 + $0x118] sm:$0xff] }
 0x185   : > { %1847 = vst [vmem:[#allocation2 + $0xb8] sm:$0xff] %v1719_v19  ;;  %1911 = vst [vmem:[#allocation2 + $0x2b8] sm:$0xff] %v1783_v20  ;;  %v546_v16 = vld [vmem:[#allocation2 + $0x318] sm:$0xff]  ;;  %v480_v21 = vld [vmem:[#allocation2 + $0x108] sm:$0xff] }
 0x186   : > { %1845 = vst [vmem:[#allocation2 + $0xa8] sm:$0xff] %v1717_v23  ;;  %1909 = vst [vmem:[#allocation2 + $0x2a8] sm:$0xff] %v1781_v24  ;;  %v544_v22 = vld [vmem:[#allocation2 + $0x308] sm:$0xff] }
 0x188   : > { %v2800_v29 = vpop.f32.mrb[24].mxu0  ;;  %v2864_v30 = vpop.f32.mrb[24].mxu1 }
 0x189   : > { %v1722_v33 = vadd.f32 %v2800_v29, %v473_v25  ;;  %v1786_v34 = vadd.f32 %v2864_v30, %v537_v26  ;;  %v1281_v35 = vpop.f32.mrb[25].mxu0  ;;  %v1537_v36 = vpop.f32.mrb[25].mxu1 }
 0x18a   : > { %v1720_v39 = vadd.f32 %v1281_v35, %v471_v27  ;;  %v1784_v40 = vadd.f32 %v1537_v36, %v535_v28  ;;  %v2801_v41 = vpop.f32.mrb[26].mxu0  ;;  %v2865_v42 = vpop.f32.mrb[26].mxu1  ;;  %v483_v35 = vld [vmem:[#allocation2 + $0x120] sm:$0xff] }
 0x18b   : > { %1850 = vst [vmem:[#allocation2 + $0xd0] sm:$0xff] %v1722_v33  ;;  %1914 = vst [vmem:[#allocation2 + $0x2d0] sm:$0xff] %v1786_v34  ;;  %v1723_v43 = vadd.f32 %v2801_v41, %v474_v31  ;;  %v1787_v44 = vadd.f32 %v2865_v42, %v538_v32  ;;  %v1284_v45 = vpop.f32.mrb[27].mxu0  ;;  %v1540_v46 = vpop.f32.mrb[27].mxu1  ;;  %v485_v33 = vld [vmem:[#allocation2 + $0x130] sm:$0xff]  ;;  %v547_v36 = vld [vmem:[#allocation2 + $0x320] sm:$0xff] }
 0x18c   : > { %1848 = vst [vmem:[#allocation2 + $0xc0] sm:$0xff] %v1720_v39  ;;  %1912 = vst [vmem:[#allocation2 + $0x2c0] sm:$0xff] %v1784_v40  ;;  %v1721_v47 = vadd.f32 %v1284_v45, %v472_v37  ;;  %v1785_v48 = vadd.f32 %v1540_v46, %v536_v38  ;;  %v549_v34 = vld [vmem:[#allocation2 + $0x330] sm:$0xff]  ;;  %v486_v39 = vld [vmem:[#allocation2 + $0x138] sm:$0xff] }
 0x18d   : > { %1851 = vst [vmem:[#allocation2 + $0xd8] sm:$0xff] %v1723_v43  ;;  %1915 = vst [vmem:[#allocation2 + $0x2d8] sm:$0xff] %v1787_v44  ;;  %v550_v40 = vld [vmem:[#allocation2 + $0x338] sm:$0xff]  ;;  %v484_v45 = vld [vmem:[#allocation2 + $0x128] sm:$0xff] }
 0x18e   : > { %1849 = vst [vmem:[#allocation2 + $0xc8] sm:$0xff] %v1721_v47  ;;  %1913 = vst [vmem:[#allocation2 + $0x2c8] sm:$0xff] %v1785_v48  ;;  %v548_v46 = vld [vmem:[#allocation2 + $0x328] sm:$0xff] }
 0x190   : > { %v2804_v53 = vpop.f32.mrb[28].mxu0  ;;  %v2868_v54 = vpop.f32.mrb[28].mxu1 }
 0x191   : > { %v1726_v57 = vadd.f32 %v2804_v53, %v477_v49  ;;  %v1790_v58 = vadd.f32 %v2868_v54, %v541_v50  ;;  %v1297_v59 = vpop.f32.mrb[29].mxu0  ;;  %v1553_v60 = vpop.f32.mrb[29].mxu1 }
 0x192   : > { %v1724_v63 = vadd.f32 %v1297_v59, %v475_v51  ;;  %v1788_v0 = vadd.f32 %v1553_v60, %v539_v52  ;;  %v2805_v1 = vpop.f32.mrb[30].mxu0  ;;  %v2869_v2 = vpop.f32.mrb[30].mxu1  ;;  %v487_v59 = vld [vmem:[#allocation2 + $0x140] sm:$0xff] }
 0x193   : > { %1854 = vst [vmem:[#allocation2 + $0xf0] sm:$0xff] %v1726_v57  ;;  %1918 = vst [vmem:[#allocation2 + $0x2f0] sm:$0xff] %v1790_v58  ;;  %v1727_v3 = vadd.f32 %v2805_v1, %v478_v55  ;;  %v1791_v4 = vadd.f32 %v2869_v2, %v542_v56  ;;  %v1300_v5 = vpop.f32.mrb[31].mxu0  ;;  %v1556_v6 = vpop.f32.mrb[31].mxu1  ;;  %v489_v57 = vld [vmem:[#allocation2 + $0x150] sm:$0xff]  ;;  %v551_v60 = vld [vmem:[#allocation2 + $0x340] sm:$0xff] }
 0x194   : > { %1852 = vst [vmem:[#allocation2 + $0xe0] sm:$0xff] %v1724_v63  ;;  %1916 = vst [vmem:[#allocation2 + $0x2e0] sm:$0xff] %v1788_v0  ;;  %v1725_v7 = vadd.f32 %v1300_v5, %v476_v61  ;;  %v1789_v8 = vadd.f32 %v1556_v6, %v540_v62  ;;  %v553_v58 = vld [vmem:[#allocation2 + $0x350] sm:$0xff]  ;;  %v490_v63 = vld [vmem:[#allocation2 + $0x158] sm:$0xff] }
 0x195   : > { %1855 = vst [vmem:[#allocation2 + $0xf8] sm:$0xff] %v1727_v3  ;;  %1919 = vst [vmem:[#allocation2 + $0x2f8] sm:$0xff] %v1791_v4  ;;  %v554_v0 = vld [vmem:[#allocation2 + $0x358] sm:$0xff]  ;;  %v488_v5 = vld [vmem:[#allocation2 + $0x148] sm:$0xff] }
 0x196   : > { %1853 = vst [vmem:[#allocation2 + $0xe8] sm:$0xff] %v1725_v7  ;;  %1917 = vst [vmem:[#allocation2 + $0x2e8] sm:$0xff] %v1789_v8  ;;  %v552_v6 = vld [vmem:[#allocation2 + $0x348] sm:$0xff] }
 0x198   : > { %v2808_v13 = vpop.f32.mrb[32].mxu0  ;;  %v2872_v14 = vpop.f32.mrb[32].mxu1 }
 0x199   : > { %v1730_v17 = vadd.f32 %v2808_v13, %v481_v9  ;;  %v1794_v18 = vadd.f32 %v2872_v14, %v545_v10  ;;  %v1313_v19 = vpop.f32.mrb[33].mxu0  ;;  %v1569_v20 = vpop.f32.mrb[33].mxu1 }
 0x19a   : > { %v1728_v23 = vadd.f32 %v1313_v19, %v479_v11  ;;  %v1792_v24 = vadd.f32 %v1569_v20, %v543_v12  ;;  %v2809_v25 = vpop.f32.mrb[34].mxu0  ;;  %v2873_v26 = vpop.f32.mrb[34].mxu1  ;;  %v491_v19 = vld [vmem:[#allocation2 + $0x160] sm:$0xff] }
 0x19b   : > { %1858 = vst [vmem:[#allocation2 + $0x110] sm:$0xff] %v1730_v17  ;;  %1922 = vst [vmem:[#allocation2 + $0x310] sm:$0xff] %v1794_v18  ;;  %v1731_v27 = vadd.f32 %v2809_v25, %v482_v15  ;;  %v1795_v28 = vadd.f32 %v2873_v26, %v546_v16  ;;  %v1316_v29 = vpop.f32.mrb[35].mxu0  ;;  %v1572_v30 = vpop.f32.mrb[35].mxu1  ;;  %v493_v17 = vld [vmem:[#allocation2 + $0x170] sm:$0xff]  ;;  %v555_v20 = vld [vmem:[#allocation2 + $0x360] sm:$0xff] }
 0x19c   : > { %1856 = vst [vmem:[#allocation2 + $0x100] sm:$0xff] %v1728_v23  ;;  %1920 = vst [vmem:[#allocation2 + $0x300] sm:$0xff] %v1792_v24  ;;  %v1729_v31 = vadd.f32 %v1316_v29, %v480_v21  ;;  %v1793_v32 = vadd.f32 %v1572_v30, %v544_v22  ;;  %v557_v18 = vld [vmem:[#allocation2 + $0x370] sm:$0xff]  ;;  %v494_v23 = vld [vmem:[#allocation2 + $0x178] sm:$0xff] }
 0x19d   : > { %1859 = vst [vmem:[#allocation2 + $0x118] sm:$0xff] %v1731_v27  ;;  %1923 = vst [vmem:[#allocation2 + $0x318] sm:$0xff] %v1795_v28  ;;  %v558_v24 = vld [vmem:[#allocation2 + $0x378] sm:$0xff]  ;;  %v492_v29 = vld [vmem:[#allocation2 + $0x168] sm:$0xff] }
 0x19e   : > { %1857 = vst [vmem:[#allocation2 + $0x108] sm:$0xff] %v1729_v31  ;;  %1921 = vst [vmem:[#allocation2 + $0x308] sm:$0xff] %v1793_v32  ;;  %v556_v30 = vld [vmem:[#allocation2 + $0x368] sm:$0xff] }
 0x1a0   : > { %v2812_v37 = vpop.f32.mrb[36].mxu0  ;;  %v2876_v38 = vpop.f32.mrb[36].mxu1 }
 0x1a1   : > { %v1734_v41 = vadd.f32 %v2812_v37, %v485_v33  ;;  %v1798_v42 = vadd.f32 %v2876_v38, %v549_v34  ;;  %v1329_v43 = vpop.f32.mrb[37].mxu0  ;;  %v1585_v44 = vpop.f32.mrb[37].mxu1 }
 0x1a2   : > { %v1732_v47 = vadd.f32 %v1329_v43, %v483_v35  ;;  %v1796_v48 = vadd.f32 %v1585_v44, %v547_v36  ;;  %v2813_v49 = vpop.f32.mrb[38].mxu0  ;;  %v2877_v50 = vpop.f32.mrb[38].mxu1  ;;  %v495_v43 = vld [vmem:[#allocation2 + $0x180] sm:$0xff] }
 0x1a3   : > { %1862 = vst [vmem:[#allocation2 + $0x130] sm:$0xff] %v1734_v41  ;;  %1926 = vst [vmem:[#allocation2 + $0x330] sm:$0xff] %v1798_v42  ;;  %v1735_v51 = vadd.f32 %v2813_v49, %v486_v39  ;;  %v1799_v52 = vadd.f32 %v2877_v50, %v550_v40  ;;  %v1332_v53 = vpop.f32.mrb[39].mxu0  ;;  %v1588_v54 = vpop.f32.mrb[39].mxu1  ;;  %v497_v41 = vld [vmem:[#allocation2 + $0x190] sm:$0xff]  ;;  %v559_v44 = vld [vmem:[#allocation2 + $0x380] sm:$0xff] }
 0x1a4   : > { %1860 = vst [vmem:[#allocation2 + $0x120] sm:$0xff] %v1732_v47  ;;  %1924 = vst [vmem:[#allocation2 + $0x320] sm:$0xff] %v1796_v48  ;;  %v1733_v55 = vadd.f32 %v1332_v53, %v484_v45  ;;  %v1797_v56 = vadd.f32 %v1588_v54, %v548_v46  ;;  %v561_v42 = vld [vmem:[#allocation2 + $0x390] sm:$0xff]  ;;  %v498_v47 = vld [vmem:[#allocation2 + $0x198] sm:$0xff] }
 0x1a5   : > { %1863 = vst [vmem:[#allocation2 + $0x138] sm:$0xff] %v1735_v51  ;;  %1927 = vst [vmem:[#allocation2 + $0x338] sm:$0xff] %v1799_v52  ;;  %v562_v48 = vld [vmem:[#allocation2 + $0x398] sm:$0xff]  ;;  %v496_v53 = vld [vmem:[#allocation2 + $0x188] sm:$0xff] }
 0x1a6   : > { %1861 = vst [vmem:[#allocation2 + $0x128] sm:$0xff] %v1733_v55  ;;  %1925 = vst [vmem:[#allocation2 + $0x328] sm:$0xff] %v1797_v56  ;;  %v560_v54 = vld [vmem:[#allocation2 + $0x388] sm:$0xff] }
 0x1a8   : > { %v2816_v61 = vpop.f32.mrb[40].mxu0  ;;  %v2880_v62 = vpop.f32.mrb[40].mxu1 }
 0x1a9   : > { %v1738_v1 = vadd.f32 %v2816_v61, %v489_v57  ;;  %v1802_v2 = vadd.f32 %v2880_v62, %v553_v58  ;;  %v1345_v3 = vpop.f32.mrb[41].mxu0  ;;  %v1601_v4 = vpop.f32.mrb[41].mxu1 }
 0x1aa   : > { %v1736_v7 = vadd.f32 %v1345_v3, %v487_v59  ;;  %v1800_v8 = vadd.f32 %v1601_v4, %v551_v60  ;;  %v2817_v9 = vpop.f32.mrb[42].mxu0  ;;  %v2881_v10 = vpop.f32.mrb[42].mxu1  ;;  %v499_v3 = vld [vmem:[#allocation2 + $0x1a0] sm:$0xff] }
 0x1ab   : > { %1866 = vst [vmem:[#allocation2 + $0x150] sm:$0xff] %v1738_v1  ;;  %1930 = vst [vmem:[#allocation2 + $0x350] sm:$0xff] %v1802_v2  ;;  %v1739_v11 = vadd.f32 %v2817_v9, %v490_v63  ;;  %v1803_v12 = vadd.f32 %v2881_v10, %v554_v0  ;;  %v1348_v13 = vpop.f32.mrb[43].mxu0  ;;  %v1604_v14 = vpop.f32.mrb[43].mxu1  ;;  %v501_v1 = vld [vmem:[#allocation2 + $0x1b0] sm:$0xff]  ;;  %v563_v4 = vld [vmem:[#allocation2 + $0x3a0] sm:$0xff] }
 0x1ac   : > { %1864 = vst [vmem:[#allocation2 + $0x140] sm:$0xff] %v1736_v7  ;;  %1928 = vst [vmem:[#allocation2 + $0x340] sm:$0xff] %v1800_v8  ;;  %v1737_v15 = vadd.f32 %v1348_v13, %v488_v5  ;;  %v1801_v16 = vadd.f32 %v1604_v14, %v552_v6  ;;  %v565_v2 = vld [vmem:[#allocation2 + $0x3b0] sm:$0xff]  ;;  %v502_v7 = vld [vmem:[#allocation2 + $0x1b8] sm:$0xff] }
 0x1ad   : > { %1867 = vst [vmem:[#allocation2 + $0x158] sm:$0xff] %v1739_v11  ;;  %1931 = vst [vmem:[#allocation2 + $0x358] sm:$0xff] %v1803_v12  ;;  %v566_v8 = vld [vmem:[#allocation2 + $0x3b8] sm:$0xff]  ;;  %v500_v13 = vld [vmem:[#allocation2 + $0x1a8] sm:$0xff] }
 0x1ae   : > { %1865 = vst [vmem:[#allocation2 + $0x148] sm:$0xff] %v1737_v15  ;;  %1929 = vst [vmem:[#allocation2 + $0x348] sm:$0xff] %v1801_v16  ;;  %v564_v14 = vld [vmem:[#allocation2 + $0x3a8] sm:$0xff] }
 0x1b0   : > { %v2820_v21 = vpop.f32.mrb[44].mxu0  ;;  %v2884_v22 = vpop.f32.mrb[44].mxu1 }
 0x1b1   : > { %v1742_v25 = vadd.f32 %v2820_v21, %v493_v17  ;;  %v1806_v26 = vadd.f32 %v2884_v22, %v557_v18  ;;  %v1361_v27 = vpop.f32.mrb[45].mxu0  ;;  %v1617_v28 = vpop.f32.mrb[45].mxu1 }
 0x1b2   : > { %v1740_v31 = vadd.f32 %v1361_v27, %v491_v19  ;;  %v1804_v32 = vadd.f32 %v1617_v28, %v555_v20  ;;  %v2821_v33 = vpop.f32.mrb[46].mxu0  ;;  %v2885_v34 = vpop.f32.mrb[46].mxu1  ;;  %v503_v27 = vld [vmem:[#allocation2 + $0x1c0] sm:$0xff] }
 0x1b3   : > { %1870 = vst [vmem:[#allocation2 + $0x170] sm:$0xff] %v1742_v25  ;;  %1934 = vst [vmem:[#allocation2 + $0x370] sm:$0xff] %v1806_v26  ;;  %v1743_v35 = vadd.f32 %v2821_v33, %v494_v23  ;;  %v1807_v36 = vadd.f32 %v2885_v34, %v558_v24  ;;  %v1364_v37 = vpop.f32.mrb[47].mxu0  ;;  %v1620_v38 = vpop.f32.mrb[47].mxu1  ;;  %v505_v25 = vld [vmem:[#allocation2 + $0x1d0] sm:$0xff]  ;;  %v567_v28 = vld [vmem:[#allocation2 + $0x3c0] sm:$0xff] }
 0x1b4   : > { %1868 = vst [vmem:[#allocation2 + $0x160] sm:$0xff] %v1740_v31  ;;  %1932 = vst [vmem:[#allocation2 + $0x360] sm:$0xff] %v1804_v32  ;;  %v1741_v39 = vadd.f32 %v1364_v37, %v492_v29  ;;  %v1805_v40 = vadd.f32 %v1620_v38, %v556_v30  ;;  %v569_v26 = vld [vmem:[#allocation2 + $0x3d0] sm:$0xff]  ;;  %v506_v31 = vld [vmem:[#allocation2 + $0x1d8] sm:$0xff] }
 0x1b5   : > { %1871 = vst [vmem:[#allocation2 + $0x178] sm:$0xff] %v1743_v35  ;;  %1935 = vst [vmem:[#allocation2 + $0x378] sm:$0xff] %v1807_v36  ;;  %v570_v32 = vld [vmem:[#allocation2 + $0x3d8] sm:$0xff]  ;;  %v504_v37 = vld [vmem:[#allocation2 + $0x1c8] sm:$0xff] }
 0x1b6   : > { %1869 = vst [vmem:[#allocation2 + $0x168] sm:$0xff] %v1741_v39  ;;  %1933 = vst [vmem:[#allocation2 + $0x368] sm:$0xff] %v1805_v40  ;;  %v568_v38 = vld [vmem:[#allocation2 + $0x3c8] sm:$0xff] }
 0x1b8   : > { %v2824_v45 = vpop.f32.mrb[48].mxu0  ;;  %v2888_v46 = vpop.f32.mrb[48].mxu1 }
 0x1b9   : > { %v1746_v49 = vadd.f32 %v2824_v45, %v497_v41  ;;  %v1810_v50 = vadd.f32 %v2888_v46, %v561_v42  ;;  %v1377_v51 = vpop.f32.mrb[49].mxu0  ;;  %v1633_v52 = vpop.f32.mrb[49].mxu1 }
 0x1ba   : > { %v1744_v55 = vadd.f32 %v1377_v51, %v495_v43  ;;  %v1808_v56 = vadd.f32 %v1633_v52, %v559_v44  ;;  %v2825_v57 = vpop.f32.mrb[50].mxu0  ;;  %v2889_v58 = vpop.f32.mrb[50].mxu1  ;;  %v507_v51 = vld [vmem:[#allocation2 + $0x1e0] sm:$0xff] }
 0x1bb   : > { %1874 = vst [vmem:[#allocation2 + $0x190] sm:$0xff] %v1746_v49  ;;  %1938 = vst [vmem:[#allocation2 + $0x390] sm:$0xff] %v1810_v50  ;;  %v1747_v59 = vadd.f32 %v2825_v57, %v498_v47  ;;  %v1811_v60 = vadd.f32 %v2889_v58, %v562_v48  ;;  %v1380_v61 = vpop.f32.mrb[51].mxu0  ;;  %v1636_v62 = vpop.f32.mrb[51].mxu1  ;;  %v509_v49 = vld [vmem:[#allocation2 + $0x1f0] sm:$0xff]  ;;  %v571_v52 = vld [vmem:[#allocation2 + $0x3e0] sm:$0xff] }
 0x1bc   : > { %1872 = vst [vmem:[#allocation2 + $0x180] sm:$0xff] %v1744_v55  ;;  %1936 = vst [vmem:[#allocation2 + $0x380] sm:$0xff] %v1808_v56  ;;  %v1745_v63 = vadd.f32 %v1380_v61, %v496_v53  ;;  %v1809_v0 = vadd.f32 %v1636_v62, %v560_v54  ;;  %v573_v50 = vld [vmem:[#allocation2 + $0x3f0] sm:$0xff]  ;;  %v510_v55 = vld [vmem:[#allocation2 + $0x1f8] sm:$0xff] }
 0x1bd   : > { %1875 = vst [vmem:[#allocation2 + $0x198] sm:$0xff] %v1747_v59  ;;  %1939 = vst [vmem:[#allocation2 + $0x398] sm:$0xff] %v1811_v60  ;;  %v574_v56 = vld [vmem:[#allocation2 + $0x3f8] sm:$0xff]  ;;  %v508_v61 = vld [vmem:[#allocation2 + $0x1e8] sm:$0xff] }
 0x1be   : > { %1873 = vst [vmem:[#allocation2 + $0x188] sm:$0xff] %v1745_v63  ;;  %1937 = vst [vmem:[#allocation2 + $0x388] sm:$0xff] %v1809_v0  ;;  %v572_v62 = vld [vmem:[#allocation2 + $0x3e8] sm:$0xff] }
 0x1c0   : > { %v2828_v5 = vpop.f32.mrb[52].mxu0  ;;  %v2892_v6 = vpop.f32.mrb[52].mxu1 }
 0x1c1   : > { %v1750_v9 = vadd.f32 %v2828_v5, %v501_v1  ;;  %v1814_v10 = vadd.f32 %v2892_v6, %v565_v2  ;;  %v1393_v11 = vpop.f32.mrb[53].mxu0  ;;  %v1649_v12 = vpop.f32.mrb[53].mxu1 }
 0x1c2   : > { %v1748_v15 = vadd.f32 %v1393_v11, %v499_v3  ;;  %v1812_v16 = vadd.f32 %v1649_v12, %v563_v4  ;;  %v2829_v17 = vpop.f32.mrb[54].mxu0  ;;  %v2893_v18 = vpop.f32.mrb[54].mxu1  ;;  %v1957_v11 = vld [vmem:[#allocation2 + $0x8] sm:$0xff] (!%p2682_p2) }
 0x1c3   : > { %1878 = vst [vmem:[#allocation2 + $0x1b0] sm:$0xff] %v1750_v9  ;;  %1942 = vst [vmem:[#allocation2 + $0x3b0] sm:$0xff] %v1814_v10  ;;  %v1751_v19 = vadd.f32 %v2829_v17, %v502_v7  ;;  %v1815_v20 = vadd.f32 %v2893_v18, %v566_v8  ;;  %v1396_v21 = vpop.f32.mrb[55].mxu0  ;;  %v1652_v22 = vpop.f32.mrb[55].mxu1  ;;  %v1956_v9 = vld [vmem:[#allocation2] sm:$0xff] (!%p2682_p2) }
 0x1c4   : > { %1876 = vst [vmem:[#allocation2 + $0x1a0] sm:$0xff] %v1748_v15  ;;  %1940 = vst [vmem:[#allocation2 + $0x3a0] sm:$0xff] %v1812_v16  ;;  %v1749_v23 = vadd.f32 %v1396_v21, %v500_v13  ;;  %v1813_v24 = vadd.f32 %v1652_v22, %v564_v14  ;;  %v3681_v10 = vld [vmem:[%s3968_s3] ss:$0 sm:$0xff] (!%p2682_p2)  ;;  %v1958_v14 = vld [vmem:[#allocation2 + $0x10] sm:$0xff] (!%p2682_p2) }
 0x1c5   : > { %1879 = vst [vmem:[#allocation2 + $0x1b8] sm:$0xff] %v1751_v19  ;;  %1943 = vst [vmem:[#allocation2 + $0x3b8] sm:$0xff] %v1815_v20  ;;  %v2091_v12 = vadd.f32 (!%p2682_p2), %v3681_v10, %v1956_v9  ;;  %v2092_v13 = vadd.f32 (!%p2682_p2), %v3681_v10, %v1957_v11  ;;  %v1959_v15 = vld [vmem:[#allocation2 + $0x18] sm:$0xff] (!%p2682_p2)  ;;  %v1960_v16 = vld [vmem:[#allocation2 + $0x20] sm:$0xff] (!%p2682_p2)  ;;  %v2093_v17 = vadd.f32 (!%p2682_p2), %v3681_v10, %v1958_v14 }
 0x1c6   : > { %1877 = vst [vmem:[#allocation2 + $0x1a8] sm:$0xff] %v1749_v23  ;;  %1941 = vst [vmem:[#allocation2 + $0x3a8] sm:$0xff] %v1813_v24  ;;  %v2094_v18 = vadd.f32 (!%p2682_p2), %v3681_v10, %v1959_v15  ;;  %v1961_v19 = vld [vmem:[#allocation2 + $0x28] sm:$0xff] (!%p2682_p2)  ;;  %v1962_v20 = vld [vmem:[#allocation2 + $0x30] sm:$0xff] (!%p2682_p2)  ;;  %v2095_v21 = vadd.f32 (!%p2682_p2), %v3681_v10, %v1960_v16 }
 0x1c7   : > { %3048 = vtanh.f32 (!%p2682_p2), %v2091_v12  ;;  %v1963_v22 = vld [vmem:[#allocation2 + $0x38] sm:$0xff] (!%p2682_p2)  ;;  %v2096_v23 = vadd.f32 (!%p2682_p2), %v3681_v10, %v1961_v19  ;;  %v1964_v24 = vld [vmem:[#allocation2 + $0x40] sm:$0xff] (!%p2682_p2)  ;;  %v1985_v16 = vld [vmem:[#allocation2 + $0xe8] sm:$0xff] (!%p2682_p2) }
 0x1c8   : > { %v2832_v29 = vpop.f32.mrb[56].mxu0  ;;  %v2896_v30 = vpop.f32.mrb[56].mxu1  ;;  %3050 = vtanh.f32 (!%p2682_p2), %v2092_v13  ;;  %v1983_v9 = vld [vmem:[#allocation2 + $0xd8] sm:$0xff] (!%p2682_p2)  ;;  %v1984_v13 = vld [vmem:[#allocation2 + $0xe0] sm:$0xff] (!%p2682_p2)  ;;  %v1986_v19 = vld [vmem:[#allocation2 + $0xf0] sm:$0xff] (!%p2682_p2) }
 0x1c9   : > { %v1754_v33 = vadd.f32 %v2832_v29, %v505_v25  ;;  %v1818_v34 = vadd.f32 %v2896_v30, %v569_v26  ;;  %v1409_v35 = vpop.f32.mrb[57].mxu0  ;;  %v1665_v36 = vpop.f32.mrb[57].mxu1  ;;  %3052 = vtanh.f32 (!%p2682_p2), %v2093_v17  ;;  %v2097_v25 = vadd.f32 (!%p2682_p2), %v3681_v10, %v1962_v20  ;;  %v1965_v26 = vld [vmem:[#allocation2 + $0x48] sm:$0xff] (!%p2682_p2)  ;;  %v1967_v30 = vld [vmem:[#allocation2 + $0x58] sm:$0xff] (!%p2682_p2) }
 0x1ca   : > { %v1752_v39 = vadd.f32 %v1409_v35, %v503_v27  ;;  %v1816_v40 = vadd.f32 %v1665_v36, %v567_v28  ;;  %v2833_v41 = vpop.f32.mrb[58].mxu0  ;;  %v2897_v42 = vpop.f32.mrb[58].mxu1  ;;  %3054 = vtanh.f32 (!%p2682_p2), %v2094_v18  ;;  %v2098_v27 = vadd.f32 (!%p2682_p2), %v3681_v10, %v1963_v22  ;;  %v1966_v28 = vld [vmem:[#allocation2 + $0x50] sm:$0xff] (!%p2682_p2)  ;;  %v1987_v22 = vld [vmem:[#allocation2 + $0xf8] sm:$0xff] (!%p2682_p2) }
 0x1cb   : > { %1882 = vst [vmem:[#allocation2 + $0x1d0] sm:$0xff] %v1754_v33  ;;  %1946 = vst [vmem:[#allocation2 + $0x3d0] sm:$0xff] %v1818_v34  ;;  %v1755_v43 = vadd.f32 %v2833_v41, %v506_v31  ;;  %v1819_v44 = vadd.f32 %v2897_v42, %v570_v32  ;;  %v1412_v45 = vpop.f32.mrb[59].mxu0  ;;  %v1668_v46 = vpop.f32.mrb[59].mxu1  ;;  %3056 = vtanh.f32 (!%p2682_p2), %v2095_v21  ;;  %v2099_v29 = vadd.f32 (!%p2682_p2), %v3681_v10, %v1964_v24  ;;  %v1968_v32 = vld [vmem:[#allocation2 + $0x60] sm:$0xff] (!%p2682_p2)  ;;  %v1969_v34 = vld [vmem:[#allocation2 + $0x68] sm:$0xff] (!%p2682_p2) }
 0x1cc   : > { %1880 = vst [vmem:[#allocation2 + $0x1c0] sm:$0xff] %v1752_v39  ;;  %1944 = vst [vmem:[#allocation2 + $0x3c0] sm:$0xff] %v1816_v40  ;;  %v1753_v47 = vadd.f32 %v1412_v45, %v504_v37  ;;  %v1817_v48 = vadd.f32 %v1668_v46, %v568_v38  ;;  %3058 = vtanh.f32 (!%p2682_p2), %v2096_v23  ;;  %v2100_v31 = vadd.f32 (!%p2682_p2), %v3681_v10, %v1965_v26  ;;  %v1970_v36 = vld [vmem:[#allocation2 + $0x70] sm:$0xff] (!%p2682_p2)  ;;  %v1971_v38 = vld [vmem:[#allocation2 + $0x78] sm:$0xff] (!%p2682_p2) }
 0x1cd   : > { %1883 = vst [vmem:[#allocation2 + $0x1d8] sm:$0xff] %v1755_v43  ;;  %1947 = vst [vmem:[#allocation2 + $0x3d8] sm:$0xff] %v1819_v44  ;;  %3060 = vtanh.f32 (!%p2682_p2), %v2097_v25  ;;  %v2101_v33 = vadd.f32 (!%p2682_p2), %v3681_v10, %v1966_v28  ;;  %v2102_v35 = vadd.f32 (!%p2682_p2), %v3681_v10, %v1967_v30  ;;  %v2103_v37 = vadd.f32 (!%p2682_p2), %v3681_v10, %v1968_v32  ;;  %v1972_v40 = vld [vmem:[#allocation2 + $0x80] sm:$0xff] (!%p2682_p2)  ;;  %v1973_v43 = vld [vmem:[#allocation2 + $0x88] sm:$0xff] (!%p2682_p2) }
 0x1ce   : > { %1881 = vst [vmem:[#allocation2 + $0x1c8] sm:$0xff] %v1753_v47  ;;  %1945 = vst [vmem:[#allocation2 + $0x3c8] sm:$0xff] %v1817_v48  ;;  %3062 = vtanh.f32 (!%p2682_p2), %v2098_v27  ;;  %v2104_v39 = vadd.f32 (!%p2682_p2), %v3681_v10, %v1969_v34  ;;  %v2105_v42 = vadd.f32 (!%p2682_p2), %v3681_v10, %v1970_v36  ;;  %v2106_v45 = vadd.f32 (!%p2682_p2), %v3681_v10, %v1971_v38  ;;  %v1974_v46 = vld [vmem:[#allocation2 + $0x90] sm:$0xff] (!%p2682_p2)  ;;  %v1988_v25 = vld [vmem:[#allocation2 + $0x100] sm:$0xff] (!%p2682_p2) }
 0x1cf   : > { %3064 = vtanh.f32 (!%p2682_p2), %v2099_v29  ;;  %v2107_v48 = vadd.f32 (!%p2682_p2), %v3681_v10, %v1972_v40  ;;  %v2118_v18 = vadd.f32 (!%p2682_p2), %v3681_v10, %v1983_v9  ;;  %v2119_v21 = vadd.f32 (!%p2682_p2), %v3681_v10, %v1984_v13  ;;  %v1989_v28 = vld [vmem:[#allocation2 + $0x108] sm:$0xff] (!%p2682_p2)  ;;  %v1991_v34 = vld [vmem:[#allocation2 + $0x118] sm:$0xff] (!%p2682_p2)  ;;  %v2004_v9 = vld [vmem:[#allocation2 + $0x180] sm:$0xff] (!%p2682_p2) }
 0x1d0   : > { %v2836_v53 = vpop.f32.mrb[60].mxu0  ;;  %v2900_v54 = vpop.f32.mrb[60].mxu1  ;;  %1955 = sbr.rel (%p2682_p2) target bundleno = 597 (0x255), region = 40  ;;  %3066 = vtanh.f32 (!%p2682_p2), %v2100_v31  ;;  %v2120_v24 = vadd.f32 (!%p2682_p2), %v3681_v10, %v1985_v16  ;;  %v2121_v27 = vadd.f32 (!%p2682_p2), %v3681_v10, %v1986_v19  ;;  %v2122_v30 = vadd.f32 (!%p2682_p2), %v3681_v10, %v1987_v22  ;;  %v1990_v31 = vld [vmem:[#allocation2 + $0x110] sm:$0xff] (!%p2682_p2)  ;;  %v1993_v40 = vld [vmem:[#allocation2 + $0x128] sm:$0xff] (!%p2682_p2)  ;;  %v2007_v19 = vld [vmem:[#allocation2 + $0x198] sm:$0xff] (!%p2682_p2) }
 0x1d1   : > { %v1758_v57 = vadd.f32 %v2836_v53, %v509_v49  ;;  %v1822_v58 = vadd.f32 %v2900_v54, %v573_v50  ;;  %v1425_v59 = vpop.f32.mrb[61].mxu0  ;;  %v1681_v60 = vpop.f32.mrb[61].mxu1  ;;  %3068 = vtanh.f32 (!%p2682_p2), %v2101_v33  ;;  %v1975_v49 = vld [vmem:[#allocation2 + $0x98] sm:$0xff] (!%p2682_p2)  ;;  %v2109_v54 = vadd.f32 (!%p2682_p2), %v3681_v10, %v1974_v46  ;;  %v2005_v13 = vld [vmem:[#allocation2 + $0x188] sm:$0xff] (!%p2682_p2)  ;;  %v2006_v16 = vld [vmem:[#allocation2 + $0x190] sm:$0xff] (!%p2682_p2) }
 0x1d2   : > { %v1756_v63 = vadd.f32 %v1425_v59, %v507_v51  ;;  %v1820_v0 = vadd.f32 %v1681_v60, %v571_v52  ;;  %v2837_v1 = vpop.f32.mrb[62].mxu0  ;;  %v2901_v2 = vpop.f32.mrb[62].mxu1  ;;  %3070 = vtanh.f32 (!%p2682_p2), %v2102_v35  ;;  %v2108_v51 = vadd.f32 (!%p2682_p2), %v3681_v10, %v1973_v43  ;;  %v1976_v52 = vld [vmem:[#allocation2 + $0xa0] sm:$0xff] (!%p2682_p2)  ;;  %v1994_v43 = vld [vmem:[#allocation2 + $0x130] sm:$0xff] (!%p2682_p2)  ;;  %v1995_v46 = vld [vmem:[#allocation2 + $0x138] sm:$0xff] (!%p2682_p2) }
 0x1d3   : > { %1886 = vst [vmem:[#allocation2 + $0x1f0] sm:$0xff] %v1758_v57  ;;  %1950 = vst [vmem:[#allocation2 + $0x3f0] sm:$0xff] %v1822_v58  ;;  %v1759_v3 = vadd.f32 %v2837_v1, %v510_v55  ;;  %v1823_v4 = vadd.f32 %v2901_v2, %v574_v56  ;;  %v1428_v5 = vpop.f32.mrb[63].mxu0  ;;  %v1684_v6 = vpop.f32.mrb[63].mxu1  ;;  %3072 = vtanh.f32 (!%p2682_p2), %v2103_v37  ;;  %v1977_v55 = vld [vmem:[#allocation2 + $0xa8] sm:$0xff] (!%p2682_p2)  ;;  %v2110_v57 = vadd.f32 (!%p2682_p2), %v3681_v10, %v1975_v49  ;;  %v1978_v58 = vld [vmem:[#allocation2 + $0xb0] sm:$0xff] (!%p2682_p2) }
 0x1d4   : > { %1884 = vst [vmem:[#allocation2 + $0x1e0] sm:$0xff] %v1756_v63  ;;  %1948 = vst [vmem:[#allocation2 + $0x3e0] sm:$0xff] %v1820_v0  ;;  %v1757_v7 = vadd.f32 %v1428_v5, %v508_v61  ;;  %v1821_v8 = vadd.f32 %v1684_v6, %v572_v62  ;;  %v3049_v41 = vpop.eup (!%p2682_p2), %3048  ;;  %3074 = vtanh.f32 (!%p2682_p2), %v2104_v39  ;;  %v2111_v60 = vadd.f32 (!%p2682_p2), %v3681_v10, %v1976_v52  ;;  %v1979_v61 = vld [vmem:[#allocation2 + $0xb8] sm:$0xff] (!%p2682_p2)  ;;  %v1980_v0 = vld [vmem:[#allocation2 + $0xc0] sm:$0xff] (!%p2682_p2) }
 0x1d5   : > { %1887 = vst [vmem:[#allocation2 + $0x1f8] sm:$0xff] %v1759_v3  ;;  %1951 = vst [vmem:[#allocation2 + $0x3f8] sm:$0xff] %v1823_v4  ;;  %v3051_v44 = vpop.eup (!%p2682_p2), %3050  ;;  %3076 = vtanh.f32 (!%p2682_p2), %v2105_v42  ;;  %v2112_v63 = vadd.f32 (!%p2682_p2), %v3681_v10, %v1977_v55  ;;  %v2113_v2 = vadd.f32 (!%p2682_p2), %v3681_v10, %v1978_v58  ;;  %v1981_v3 = vld [vmem:[#allocation2 + $0xc8] sm:$0xff] (!%p2682_p2)  ;;  %v2114_v5 = vadd.f32 (!%p2682_p2), %v3681_v10, %v1979_v61  ;;  %v1982_v6 = vld [vmem:[#allocation2 + $0xd0] sm:$0xff] (!%p2682_p2) }
 0x1d6   : > { %1885 = vst [vmem:[#allocation2 + $0x1e8] sm:$0xff] %v1757_v7  ;;  %1949 = vst [vmem:[#allocation2 + $0x3e8] sm:$0xff] %v1821_v8  ;;  %v3053_v47 = vpop.eup (!%p2682_p2), %3052  ;;  %3078 = vtanh.f32 (!%p2682_p2), %v2106_v45  ;;  %v2115_v8 = vadd.f32 (!%p2682_p2), %v3681_v10, %v1980_v0  ;;  %v2116_v12 = vadd.f32 (!%p2682_p2), %v3681_v10, %v1981_v3  ;;  %v2117_v15 = vadd.f32 (!%p2682_p2), %v3681_v10, %v1982_v6  ;;  %v1992_v37 = vld [vmem:[#allocation2 + $0x120] sm:$0xff] (!%p2682_p2)  ;;  %v1997_v52 = vld [vmem:[#allocation2 + $0x148] sm:$0xff] (!%p2682_p2) }
 0x1d7   : > { %2347 = vst [vmem:[%s3469_s5] sm:$0xff] %v3049_v41  ;;  %2348 = vst [vmem:[%s3469_s5 + $0x8] sm:$0xff] %v3051_v44  ;;  %v3055_v50 = vpop.eup %3054  ;;  %3080 = vtanh.f32 %v2107_v48  ;;  %v2123_v33 = vadd.f32 %v3681_v10, %v1988_v25  ;;  %v2124_v36 = vadd.f32 %v3681_v10, %v1989_v28  ;;  %v2125_v39 = vadd.f32 %v3681_v10, %v1990_v31  ;;  %v1996_v49 = vld [vmem:[#allocation2 + $0x140] sm:$0xff]  ;;  %v1998_v55 = vld [vmem:[#allocation2 + $0x150] sm:$0xff] }
 0x1d8   : > { %2349 = vst [vmem:[%s3469_s5 + $0x10] sm:$0xff] %v3053_v47  ;;  %v3057_v53 = vpop.eup %3056  ;;  %2350 = vst [vmem:[%s3469_s5 + $0x18] sm:$0xff] %v3055_v50  ;;  %3082 = vtanh.f32 %v2108_v51  ;;  %v2126_v42 = vadd.f32 %v3681_v10, %v1991_v34  ;;  %v2127_v45 = vadd.f32 %v3681_v10, %v1992_v37  ;;  %v2128_v48 = vadd.f32 %v3681_v10, %v1993_v40  ;;  %v1999_v58 = vld [vmem:[#allocation2 + $0x158] sm:$0xff]  ;;  %v2000_v61 = vld [vmem:[#allocation2 + $0x160] sm:$0xff] }
 0x1d9   : > { %v3059_v56 = vpop.eup %3058  ;;  %2351 = vst [vmem:[%s3469_s5 + $0x20] sm:$0xff] %v3057_v53  ;;  %3084 = vtanh.f32 %v2109_v54  ;;  %v2129_v51 = vadd.f32 %v3681_v10, %v1994_v43  ;;  %v2130_v54 = vadd.f32 %v3681_v10, %v1995_v46  ;;  %v2001_v0 = vld [vmem:[#allocation2 + $0x168] sm:$0xff]  ;;  %v2002_v3 = vld [vmem:[#allocation2 + $0x170] sm:$0xff]  ;;  %v2003_v6 = vld [vmem:[#allocation2 + $0x178] sm:$0xff] }
 0x1da   : > { %v3061_v59 = vpop.eup %3060  ;;  %2352 = vst [vmem:[%s3469_s5 + $0x28] sm:$0xff] %v3059_v56  ;;  %3086 = vtanh.f32 %v2110_v57  ;;  %v2131_v57 = vadd.f32 %v3681_v10, %v1996_v49  ;;  %v2008_v22 = vld [vmem:[#allocation2 + $0x1a0] sm:$0xff]  ;;  %v2009_v25 = vld [vmem:[#allocation2 + $0x1a8] sm:$0xff]  ;;  %v2010_v28 = vld [vmem:[#allocation2 + $0x1b0] sm:$0xff] }
 0x1db   : > { %v3063_v62 = vpop.eup %3062  ;;  %2353 = vst [vmem:[%s3469_s5 + $0x30] sm:$0xff] %v3061_v59  ;;  %3088 = vtanh.f32 %v2111_v60  ;;  %v2132_v60 = vadd.f32 %v3681_v10, %v1997_v52  ;;  %v2011_v31 = vld [vmem:[#allocation2 + $0x1b8] sm:$0xff]  ;;  %v2012_v34 = vld [vmem:[#allocation2 + $0x1c0] sm:$0xff]  ;;  %v2013_v37 = vld [vmem:[#allocation2 + $0x1c8] sm:$0xff] }
 0x1dc   : > { %v3065_v1 = vpop.eup %3064  ;;  %2354 = vst [vmem:[%s3469_s5 + $0x38] sm:$0xff] %v3063_v62  ;;  %3090 = vtanh.f32 %v2112_v63  ;;  %v2133_v63 = vadd.f32 %v3681_v10, %v1998_v55  ;;  %v2014_v40 = vld [vmem:[#allocation2 + $0x1d0] sm:$0xff]  ;;  %v2015_v43 = vld [vmem:[#allocation2 + $0x1d8] sm:$0xff]  ;;  %v2016_v46 = vld [vmem:[#allocation2 + $0x1e0] sm:$0xff] }
 0x1dd   : > { %v3067_v4 = vpop.eup %3066  ;;  %2355 = vst [vmem:[%s3469_s5 + $0x40] sm:$0xff] %v3065_v1  ;;  %3092 = vtanh.f32 %v2113_v2  ;;  %v2134_v2 = vadd.f32 %v3681_v10, %v1999_v58  ;;  %v2017_v49 = vld [vmem:[#allocation2 + $0x1e8] sm:$0xff]  ;;  %v2018_v52 = vld [vmem:[#allocation2 + $0x1f0] sm:$0xff]  ;;  %v2019_v55 = vld [vmem:[#allocation2 + $0x1f8] sm:$0xff] }
 0x1de   : > { %v3069_v7 = vpop.eup %3068  ;;  %2356 = vst [vmem:[%s3469_s5 + $0x48] sm:$0xff] %v3067_v4  ;;  %3094 = vtanh.f32 %v2114_v5  ;;  %v2135_v5 = vadd.f32 %v3681_v10, %v2000_v61  ;;  %v2020_v58 = vld [vmem:[#allocation2 + $0x200] sm:$0xff]  ;;  %v2021_v61 = vld [vmem:[#allocation2 + $0x208] sm:$0xff] }
 0x1df   : > { %v3071_v11 = vpop.eup %3070  ;;  %2357 = vst [vmem:[%s3469_s5 + $0x50] sm:$0xff] %v3069_v7  ;;  %3096 = vtanh.f32 %v2115_v8  ;;  %v2136_v8 = vadd.f32 %v3681_v10, %v2001_v0  ;;  %v2022_v0 = vld [vmem:[#allocation2 + $0x210] sm:$0xff] }
 0x1e0   : > { %v3073_v14 = vpop.eup %3072  ;;  %2358 = vst [vmem:[%s3469_s5 + $0x58] sm:$0xff] %v3071_v11  ;;  %3098 = vtanh.f32 %v2116_v12  ;;  %v2137_v12 = vadd.f32 %v3681_v10, %v2002_v3  ;;  %v2023_v3 = vld [vmem:[#allocation2 + $0x218] sm:$0xff] }
 0x1e1   : > { %v3075_v17 = vpop.eup %3074  ;;  %2359 = vst [vmem:[%s3469_s5 + $0x60] sm:$0xff] %v3073_v14  ;;  %3100 = vtanh.f32 %v2117_v15  ;;  %v2138_v15 = vadd.f32 %v3681_v10, %v2003_v6  ;;  %v2024_v6 = vld [vmem:[#allocation2 + $0x220] sm:$0xff] }
 0x1e2   : > { %v3077_v20 = vpop.eup %3076  ;;  %2360 = vst [vmem:[%s3469_s5 + $0x68] sm:$0xff] %v3075_v17  ;;  %3102 = vtanh.f32 %v2118_v18  ;;  %v2139_v18 = vadd.f32 %v3681_v10, %v2004_v9  ;;  %v2025_v9 = vld [vmem:[#allocation2 + $0x228] sm:$0xff] }
 0x1e3   : > { %v3079_v23 = vpop.eup %3078  ;;  %2361 = vst [vmem:[%s3469_s5 + $0x70] sm:$0xff] %v3077_v20  ;;  %3104 = vtanh.f32 %v2119_v21  ;;  %v2140_v21 = vadd.f32 %v3681_v10, %v2005_v13  ;;  %v2026_v13 = vld [vmem:[#allocation2 + $0x230] sm:$0xff] }
 0x1e4   : > { %v3081_v26 = vpop.eup %3080  ;;  %2362 = vst [vmem:[%s3469_s5 + $0x78] sm:$0xff] %v3079_v23  ;;  %3106 = vtanh.f32 %v2120_v24  ;;  %v2141_v24 = vadd.f32 %v3681_v10, %v2006_v16  ;;  %v2027_v16 = vld [vmem:[#allocation2 + $0x238] sm:$0xff] }
 0x1e5   : > { %v3083_v29 = vpop.eup %3082  ;;  %2363 = vst [vmem:[%s3469_s5 + $0x80] sm:$0xff] %v3081_v26  ;;  %3108 = vtanh.f32 %v2121_v27  ;;  %v2142_v27 = vadd.f32 %v3681_v10, %v2007_v19  ;;  %v2028_v19 = vld [vmem:[#allocation2 + $0x240] sm:$0xff] }
 0x1e6   : > { %v3085_v32 = vpop.eup %3084  ;;  %2364 = vst [vmem:[%s3469_s5 + $0x88] sm:$0xff] %v3083_v29  ;;  %3110 = vtanh.f32 %v2122_v30  ;;  %v2143_v30 = vadd.f32 %v3681_v10, %v2008_v22  ;;  %v2029_v22 = vld [vmem:[#allocation2 + $0x248] sm:$0xff] }
 0x1e7   : > { %v3087_v35 = vpop.eup %3086  ;;  %2365 = vst [vmem:[%s3469_s5 + $0x90] sm:$0xff] %v3085_v32  ;;  %3112 = vtanh.f32 %v2123_v33  ;;  %v2144_v33 = vadd.f32 %v3681_v10, %v2009_v25  ;;  %v2030_v25 = vld [vmem:[#allocation2 + $0x250] sm:$0xff] }
 0x1e8   : > { %v3089_v38 = vpop.eup %3088  ;;  %2366 = vst [vmem:[%s3469_s5 + $0x98] sm:$0xff] %v3087_v35  ;;  %3114 = vtanh.f32 %v2124_v36  ;;  %v2145_v36 = vadd.f32 %v3681_v10, %v2010_v28  ;;  %v2031_v28 = vld [vmem:[#allocation2 + $0x258] sm:$0xff] }
 0x1e9   : > { %v3091_v41 = vpop.eup %3090  ;;  %2367 = vst [vmem:[%s3469_s5 + $0xa0] sm:$0xff] %v3089_v38  ;;  %3116 = vtanh.f32 %v2125_v39  ;;  %v2146_v39 = vadd.f32 %v3681_v10, %v2011_v31  ;;  %v2032_v31 = vld [vmem:[#allocation2 + $0x260] sm:$0xff] }
 0x1ea   : > { %v3093_v44 = vpop.eup %3092  ;;  %2368 = vst [vmem:[%s3469_s5 + $0xa8] sm:$0xff] %v3091_v41  ;;  %3118 = vtanh.f32 %v2126_v42  ;;  %v2147_v42 = vadd.f32 %v3681_v10, %v2012_v34  ;;  %v2033_v34 = vld [vmem:[#allocation2 + $0x268] sm:$0xff] }
 0x1eb   : > { %v3095_v47 = vpop.eup %3094  ;;  %2369 = vst [vmem:[%s3469_s5 + $0xb0] sm:$0xff] %v3093_v44  ;;  %3120 = vtanh.f32 %v2127_v45  ;;  %v2148_v45 = vadd.f32 %v3681_v10, %v2013_v37  ;;  %v2034_v37 = vld [vmem:[#allocation2 + $0x270] sm:$0xff] }
 0x1ec   : > { %v3097_v50 = vpop.eup %3096  ;;  %2370 = vst [vmem:[%s3469_s5 + $0xb8] sm:$0xff] %v3095_v47  ;;  %3122 = vtanh.f32 %v2128_v48  ;;  %v2149_v48 = vadd.f32 %v3681_v10, %v2014_v40  ;;  %v2035_v40 = vld [vmem:[#allocation2 + $0x278] sm:$0xff] }
 0x1ed   : > { %v3099_v53 = vpop.eup %3098  ;;  %2371 = vst [vmem:[%s3469_s5 + $0xc0] sm:$0xff] %v3097_v50  ;;  %3124 = vtanh.f32 %v2129_v51  ;;  %v2150_v51 = vadd.f32 %v3681_v10, %v2015_v43  ;;  %v2036_v43 = vld [vmem:[#allocation2 + $0x280] sm:$0xff] }
 0x1ee   : > { %v3101_v56 = vpop.eup %3100  ;;  %2372 = vst [vmem:[%s3469_s5 + $0xc8] sm:$0xff] %v3099_v53  ;;  %3126 = vtanh.f32 %v2130_v54  ;;  %v2151_v54 = vadd.f32 %v3681_v10, %v2016_v46  ;;  %v2037_v46 = vld [vmem:[#allocation2 + $0x288] sm:$0xff] }
 0x1ef   : > { %v3103_v59 = vpop.eup %3102  ;;  %2373 = vst [vmem:[%s3469_s5 + $0xd0] sm:$0xff] %v3101_v56  ;;  %3128 = vtanh.f32 %v2131_v57  ;;  %v2152_v57 = vadd.f32 %v3681_v10, %v2017_v49  ;;  %v2038_v49 = vld [vmem:[#allocation2 + $0x290] sm:$0xff] }
 0x1f0   : > { %v3105_v62 = vpop.eup %3104  ;;  %2374 = vst [vmem:[%s3469_s5 + $0xd8] sm:$0xff] %v3103_v59  ;;  %3130 = vtanh.f32 %v2132_v60  ;;  %v2153_v60 = vadd.f32 %v3681_v10, %v2018_v52  ;;  %v2039_v52 = vld [vmem:[#allocation2 + $0x298] sm:$0xff] }
 0x1f1   : > { %v3107_v1 = vpop.eup %3106  ;;  %2375 = vst [vmem:[%s3469_s5 + $0xe0] sm:$0xff] %v3105_v62  ;;  %3132 = vtanh.f32 %v2133_v63  ;;  %v2154_v63 = vadd.f32 %v3681_v10, %v2019_v55  ;;  %v2040_v55 = vld [vmem:[#allocation2 + $0x2a0] sm:$0xff] }
 0x1f2   : > { %v3109_v4 = vpop.eup %3108  ;;  %2376 = vst [vmem:[%s3469_s5 + $0xe8] sm:$0xff] %v3107_v1  ;;  %3134 = vtanh.f32 %v2134_v2  ;;  %v2155_v2 = vadd.f32 %v3681_v10, %v2020_v58  ;;  %v2041_v58 = vld [vmem:[#allocation2 + $0x2a8] sm:$0xff] }
 0x1f3   : > { %v3111_v7 = vpop.eup %3110  ;;  %2377 = vst [vmem:[%s3469_s5 + $0xf0] sm:$0xff] %v3109_v4  ;;  %3136 = vtanh.f32 %v2135_v5  ;;  %v2156_v5 = vadd.f32 %v3681_v10, %v2021_v61  ;;  %v2042_v61 = vld [vmem:[#allocation2 + $0x2b0] sm:$0xff] }
 0x1f4   : > { %v3113_v11 = vpop.eup %3112  ;;  %2378 = vst [vmem:[%s3469_s5 + $0xf8] sm:$0xff] %v3111_v7  ;;  %3138 = vtanh.f32 %v2136_v8  ;;  %v2157_v8 = vadd.f32 %v3681_v10, %v2022_v0  ;;  %v2043_v0 = vld [vmem:[#allocation2 + $0x2b8] sm:$0xff] }
 0x1f5   : > { %v3115_v14 = vpop.eup %3114  ;;  %2379 = vst [vmem:[%s3469_s5 + $0x100] sm:$0xff] %v3113_v11  ;;  %3140 = vtanh.f32 %v2137_v12  ;;  %v2158_v12 = vadd.f32 %v3681_v10, %v2023_v3  ;;  %v2044_v3 = vld [vmem:[#allocation2 + $0x2c0] sm:$0xff] }
 0x1f6   : > { %v3117_v17 = vpop.eup %3116  ;;  %2380 = vst [vmem:[%s3469_s5 + $0x108] sm:$0xff] %v3115_v14  ;;  %3142 = vtanh.f32 %v2138_v15  ;;  %v2159_v15 = vadd.f32 %v3681_v10, %v2024_v6  ;;  %v2045_v6 = vld [vmem:[#allocation2 + $0x2c8] sm:$0xff] }
 0x1f7   : > { %v3119_v20 = vpop.eup %3118  ;;  %2381 = vst [vmem:[%s3469_s5 + $0x110] sm:$0xff] %v3117_v17  ;;  %3144 = vtanh.f32 %v2139_v18  ;;  %v2160_v18 = vadd.f32 %v3681_v10, %v2025_v9  ;;  %v2046_v9 = vld [vmem:[#allocation2 + $0x2d0] sm:$0xff] }
 0x1f8   : > { %v3121_v23 = vpop.eup %3120  ;;  %2382 = vst [vmem:[%s3469_s5 + $0x118] sm:$0xff] %v3119_v20  ;;  %3146 = vtanh.f32 %v2140_v21  ;;  %v2161_v21 = vadd.f32 %v3681_v10, %v2026_v13  ;;  %v2047_v13 = vld [vmem:[#allocation2 + $0x2d8] sm:$0xff] }
 0x1f9   : > { %v3123_v26 = vpop.eup %3122  ;;  %2383 = vst [vmem:[%s3469_s5 + $0x120] sm:$0xff] %v3121_v23  ;;  %3148 = vtanh.f32 %v2141_v24  ;;  %v2162_v24 = vadd.f32 %v3681_v10, %v2027_v16  ;;  %v2048_v16 = vld [vmem:[#allocation2 + $0x2e0] sm:$0xff] }
 0x1fa   : > { %v3125_v29 = vpop.eup %3124  ;;  %2384 = vst [vmem:[%s3469_s5 + $0x128] sm:$0xff] %v3123_v26  ;;  %3150 = vtanh.f32 %v2142_v27  ;;  %v2163_v27 = vadd.f32 %v3681_v10, %v2028_v19  ;;  %v2049_v19 = vld [vmem:[#allocation2 + $0x2e8] sm:$0xff] }
 0x1fb   : > { %v3127_v32 = vpop.eup %3126  ;;  %2385 = vst [vmem:[%s3469_s5 + $0x130] sm:$0xff] %v3125_v29  ;;  %3152 = vtanh.f32 %v2143_v30  ;;  %v2164_v30 = vadd.f32 %v3681_v10, %v2029_v22  ;;  %v2050_v22 = vld [vmem:[#allocation2 + $0x2f0] sm:$0xff] }
 0x1fc   : > { %v3129_v35 = vpop.eup %3128  ;;  %2386 = vst [vmem:[%s3469_s5 + $0x138] sm:$0xff] %v3127_v32  ;;  %3154 = vtanh.f32 %v2144_v33  ;;  %v2165_v33 = vadd.f32 %v3681_v10, %v2030_v25  ;;  %v2051_v25 = vld [vmem:[#allocation2 + $0x2f8] sm:$0xff] }
 0x1fd   : > { %v3131_v38 = vpop.eup %3130  ;;  %2387 = vst [vmem:[%s3469_s5 + $0x140] sm:$0xff] %v3129_v35  ;;  %3156 = vtanh.f32 %v2145_v36  ;;  %v2166_v36 = vadd.f32 %v3681_v10, %v2031_v28  ;;  %v2052_v28 = vld [vmem:[#allocation2 + $0x300] sm:$0xff] }
 0x1fe   : > { %v3133_v41 = vpop.eup %3132  ;;  %2388 = vst [vmem:[%s3469_s5 + $0x148] sm:$0xff] %v3131_v38  ;;  %3158 = vtanh.f32 %v2146_v39  ;;  %v2167_v39 = vadd.f32 %v3681_v10, %v2032_v31  ;;  %v2053_v31 = vld [vmem:[#allocation2 + $0x308] sm:$0xff] }
 0x1ff   : > { %v3135_v44 = vpop.eup %3134  ;;  %2389 = vst [vmem:[%s3469_s5 + $0x150] sm:$0xff] %v3133_v41  ;;  %3160 = vtanh.f32 %v2147_v42  ;;  %v2168_v42 = vadd.f32 %v3681_v10, %v2033_v34  ;;  %v2054_v34 = vld [vmem:[#allocation2 + $0x310] sm:$0xff] }
 0x200   : > { %v3137_v47 = vpop.eup %3136  ;;  %2390 = vst [vmem:[%s3469_s5 + $0x158] sm:$0xff] %v3135_v44  ;;  %3162 = vtanh.f32 %v2148_v45  ;;  %v2169_v45 = vadd.f32 %v3681_v10, %v2034_v37  ;;  %v2055_v37 = vld [vmem:[#allocation2 + $0x318] sm:$0xff] }
 0x201   : > { %v3139_v50 = vpop.eup %3138  ;;  %2391 = vst [vmem:[%s3469_s5 + $0x160] sm:$0xff] %v3137_v47  ;;  %3164 = vtanh.f32 %v2149_v48  ;;  %v2170_v48 = vadd.f32 %v3681_v10, %v2035_v40  ;;  %v2056_v40 = vld [vmem:[#allocation2 + $0x320] sm:$0xff] }
 0x202   : > { %v3141_v53 = vpop.eup %3140  ;;  %2392 = vst [vmem:[%s3469_s5 + $0x168] sm:$0xff] %v3139_v50  ;;  %3166 = vtanh.f32 %v2150_v51  ;;  %v2171_v51 = vadd.f32 %v3681_v10, %v2036_v43  ;;  %v2057_v43 = vld [vmem:[#allocation2 + $0x328] sm:$0xff] }
 0x203   : > { %v3143_v56 = vpop.eup %3142  ;;  %2393 = vst [vmem:[%s3469_s5 + $0x170] sm:$0xff] %v3141_v53  ;;  %3168 = vtanh.f32 %v2151_v54  ;;  %v2172_v54 = vadd.f32 %v3681_v10, %v2037_v46  ;;  %v2058_v46 = vld [vmem:[#allocation2 + $0x330] sm:$0xff] }
 0x204   : > { %v3145_v59 = vpop.eup %3144  ;;  %2394 = vst [vmem:[%s3469_s5 + $0x178] sm:$0xff] %v3143_v56  ;;  %3170 = vtanh.f32 %v2152_v57  ;;  %v2173_v57 = vadd.f32 %v3681_v10, %v2038_v49  ;;  %v2059_v49 = vld [vmem:[#allocation2 + $0x338] sm:$0xff] }
 0x205   : > { %v3147_v62 = vpop.eup %3146  ;;  %2395 = vst [vmem:[%s3469_s5 + $0x180] sm:$0xff] %v3145_v59  ;;  %3172 = vtanh.f32 %v2153_v60  ;;  %v2174_v60 = vadd.f32 %v3681_v10, %v2039_v52  ;;  %v2060_v52 = vld [vmem:[#allocation2 + $0x340] sm:$0xff] }
 0x206   : > { %v3149_v1 = vpop.eup %3148  ;;  %2396 = vst [vmem:[%s3469_s5 + $0x188] sm:$0xff] %v3147_v62  ;;  %3174 = vtanh.f32 %v2154_v63  ;;  %v2175_v63 = vadd.f32 %v3681_v10, %v2040_v55  ;;  %v2061_v55 = vld [vmem:[#allocation2 + $0x348] sm:$0xff] }
 0x207   : > { %v3151_v4 = vpop.eup %3150  ;;  %2397 = vst [vmem:[%s3469_s5 + $0x190] sm:$0xff] %v3149_v1  ;;  %3176 = vtanh.f32 %v2155_v2  ;;  %v2176_v2 = vadd.f32 %v3681_v10, %v2041_v58  ;;  %v2062_v58 = vld [vmem:[#allocation2 + $0x350] sm:$0xff] }
 0x208   : > { %v3153_v7 = vpop.eup %3152  ;;  %2398 = vst [vmem:[%s3469_s5 + $0x198] sm:$0xff] %v3151_v4  ;;  %3178 = vtanh.f32 %v2156_v5  ;;  %v2177_v5 = vadd.f32 %v3681_v10, %v2042_v61  ;;  %v2063_v61 = vld [vmem:[#allocation2 + $0x358] sm:$0xff] }
 0x209   : > { %v3155_v11 = vpop.eup %3154  ;;  %2399 = vst [vmem:[%s3469_s5 + $0x1a0] sm:$0xff] %v3153_v7  ;;  %3180 = vtanh.f32 %v2157_v8  ;;  %v2178_v8 = vadd.f32 %v3681_v10, %v2043_v0  ;;  %v2064_v0 = vld [vmem:[#allocation2 + $0x360] sm:$0xff] }
 0x20a   : > { %v3157_v14 = vpop.eup %3156  ;;  %2400 = vst [vmem:[%s3469_s5 + $0x1a8] sm:$0xff] %v3155_v11  ;;  %3182 = vtanh.f32 %v2158_v12  ;;  %v2179_v12 = vadd.f32 %v3681_v10, %v2044_v3  ;;  %v2065_v3 = vld [vmem:[#allocation2 + $0x368] sm:$0xff] }
 0x20b   : > { %v3159_v17 = vpop.eup %3158  ;;  %2401 = vst [vmem:[%s3469_s5 + $0x1b0] sm:$0xff] %v3157_v14  ;;  %3184 = vtanh.f32 %v2159_v15  ;;  %v2180_v15 = vadd.f32 %v3681_v10, %v2045_v6  ;;  %v2066_v6 = vld [vmem:[#allocation2 + $0x370] sm:$0xff] }
 0x20c   : > { %v3161_v20 = vpop.eup %3160  ;;  %2402 = vst [vmem:[%s3469_s5 + $0x1b8] sm:$0xff] %v3159_v17  ;;  %3186 = vtanh.f32 %v2160_v18  ;;  %v2181_v18 = vadd.f32 %v3681_v10, %v2046_v9 }
 0x20d   : > { %v3163_v23 = vpop.eup %3162  ;;  %2403 = vst [vmem:[%s3469_s5 + $0x1c0] sm:$0xff] %v3161_v20  ;;  %3188 = vtanh.f32 %v2161_v21  ;;  %v2182_v21 = vadd.f32 %v3681_v10, %v2047_v13 }
 0x20e   : > { %v3165_v26 = vpop.eup %3164  ;;  %2404 = vst [vmem:[%s3469_s5 + $0x1c8] sm:$0xff] %v3163_v23  ;;  %3190 = vtanh.f32 %v2162_v24  ;;  %v2183_v24 = vadd.f32 %v3681_v10, %v2048_v16  ;;  %v2069_v16 = vld [vmem:[#allocation2 + $0x388] sm:$0xff] }
 0x20f   : > { %v3167_v29 = vpop.eup %3166  ;;  %2405 = vst [vmem:[%s3469_s5 + $0x1d0] sm:$0xff] %v3165_v26  ;;  %3192 = vtanh.f32 %v2163_v27  ;;  %v2184_v27 = vadd.f32 %v3681_v10, %v2049_v19  ;;  %v2070_v19 = vld [vmem:[#allocation2 + $0x390] sm:$0xff] }
 0x210   : > { %v3169_v32 = vpop.eup %3168  ;;  %2406 = vst [vmem:[%s3469_s5 + $0x1d8] sm:$0xff] %v3167_v29  ;;  %3194 = vtanh.f32 %v2164_v30  ;;  %v2185_v30 = vadd.f32 %v3681_v10, %v2050_v22  ;;  %v2071_v22 = vld [vmem:[#allocation2 + $0x398] sm:$0xff] }
 0x211   : > { %v3171_v35 = vpop.eup %3170  ;;  %2407 = vst [vmem:[%s3469_s5 + $0x1e0] sm:$0xff] %v3169_v32  ;;  %3196 = vtanh.f32 %v2165_v33  ;;  %v2186_v33 = vadd.f32 %v3681_v10, %v2051_v25  ;;  %v2072_v25 = vld [vmem:[#allocation2 + $0x3a0] sm:$0xff] }
 0x212   : > { %v3173_v38 = vpop.eup %3172  ;;  %2408 = vst [vmem:[%s3469_s5 + $0x1e8] sm:$0xff] %v3171_v35  ;;  %3198 = vtanh.f32 %v2166_v36  ;;  %v2187_v36 = vadd.f32 %v3681_v10, %v2052_v28  ;;  %v2073_v28 = vld [vmem:[#allocation2 + $0x3a8] sm:$0xff] }
 0x213   : > { %v3175_v41 = vpop.eup %3174  ;;  %2409 = vst [vmem:[%s3469_s5 + $0x1f0] sm:$0xff] %v3173_v38  ;;  %3200 = vtanh.f32 %v2167_v39  ;;  %v2188_v39 = vadd.f32 %v3681_v10, %v2053_v31  ;;  %v2074_v31 = vld [vmem:[#allocation2 + $0x3b0] sm:$0xff] }
 0x214   : > { %v3177_v44 = vpop.eup %3176  ;;  %2410 = vst [vmem:[%s3469_s5 + $0x1f8] sm:$0xff] %v3175_v41  ;;  %3202 = vtanh.f32 %v2168_v42  ;;  %v2189_v42 = vadd.f32 %v3681_v10, %v2054_v34  ;;  %v2075_v34 = vld [vmem:[#allocation2 + $0x3b8] sm:$0xff] }
 0x215   : > { %v3179_v47 = vpop.eup %3178  ;;  %2411 = vst [vmem:[%s3469_s5 + $0x200] sm:$0xff] %v3177_v44  ;;  %3204 = vtanh.f32 %v2169_v45  ;;  %v2190_v45 = vadd.f32 %v3681_v10, %v2055_v37  ;;  %v2076_v37 = vld [vmem:[#allocation2 + $0x3c0] sm:$0xff] }
 0x216   : > { %v3181_v50 = vpop.eup %3180  ;;  %2412 = vst [vmem:[%s3469_s5 + $0x208] sm:$0xff] %v3179_v47  ;;  %3206 = vtanh.f32 %v2170_v48  ;;  %v2191_v48 = vadd.f32 %v3681_v10, %v2056_v40  ;;  %v2077_v40 = vld [vmem:[#allocation2 + $0x3c8] sm:$0xff] }
 0x217   : > { %v3183_v53 = vpop.eup %3182  ;;  %2413 = vst [vmem:[%s3469_s5 + $0x210] sm:$0xff] %v3181_v50  ;;  %3208 = vtanh.f32 %v2171_v51  ;;  %v2192_v51 = vadd.f32 %v3681_v10, %v2057_v43  ;;  %v2078_v43 = vld [vmem:[#allocation2 + $0x3d0] sm:$0xff] }
 0x218   : > { %v3185_v56 = vpop.eup %3184  ;;  %2414 = vst [vmem:[%s3469_s5 + $0x218] sm:$0xff] %v3183_v53  ;;  %3210 = vtanh.f32 %v2172_v54  ;;  %v2193_v54 = vadd.f32 %v3681_v10, %v2058_v46  ;;  %v2079_v46 = vld [vmem:[#allocation2 + $0x3d8] sm:$0xff] }
 0x219   : > { %v3187_v59 = vpop.eup %3186  ;;  %2415 = vst [vmem:[%s3469_s5 + $0x220] sm:$0xff] %v3185_v56  ;;  %3212 = vtanh.f32 %v2173_v57  ;;  %v2194_v57 = vadd.f32 %v3681_v10, %v2059_v49  ;;  %v2080_v49 = vld [vmem:[#allocation2 + $0x3e0] sm:$0xff] }
 0x21a   : > { %v3189_v62 = vpop.eup %3188  ;;  %2416 = vst [vmem:[%s3469_s5 + $0x228] sm:$0xff] %v3187_v59  ;;  %3214 = vtanh.f32 %v2174_v60  ;;  %v2195_v60 = vadd.f32 %v3681_v10, %v2060_v52  ;;  %v2081_v52 = vld [vmem:[#allocation2 + $0x3e8] sm:$0xff] }
 0x21b   : > { %v3191_v1 = vpop.eup %3190  ;;  %2417 = vst [vmem:[%s3469_s5 + $0x230] sm:$0xff] %v3189_v62  ;;  %3216 = vtanh.f32 %v2175_v63  ;;  %v2196_v63 = vadd.f32 %v3681_v10, %v2061_v55  ;;  %v2082_v55 = vld [vmem:[#allocation2 + $0x3f0] sm:$0xff] }
 0x21c   : > { %v3193_v4 = vpop.eup %3192  ;;  %2418 = vst [vmem:[%s3469_s5 + $0x238] sm:$0xff] %v3191_v1  ;;  %3218 = vtanh.f32 %v2176_v2  ;;  %v2197_v2 = vadd.f32 %v3681_v10, %v2062_v58  ;;  %v2083_v58 = vld [vmem:[#allocation2 + $0x3f8] sm:$0xff] }
 0x21d   : > { %v3195_v7 = vpop.eup %3194  ;;  %2419 = vst [vmem:[%s3469_s5 + $0x240] sm:$0xff] %v3193_v4  ;;  %3220 = vtanh.f32 %v2177_v5  ;;  %v2198_v5 = vadd.f32 %v3681_v10, %v2063_v61  ;;  %v2068_v10 = vld [vmem:[#allocation2 + $0x380] sm:$0xff] }
 0x21e   : > { %v3197_v11 = vpop.eup %3196  ;;  %2420 = vst [vmem:[%s3469_s5 + $0x248] sm:$0xff] %v3195_v7  ;;  %3222 = vtanh.f32 %v2178_v8  ;;  %v3888_v8 = vld [vmem:[%s3968_s3] ss:$0 sm:$0xff] }
 0x21f   : > { %v3199_v14 = vpop.eup %3198  ;;  %2421 = vst [vmem:[%s3469_s5 + $0x250] sm:$0xff] %v3197_v11  ;;  %3224 = vtanh.f32 %v2179_v12  ;;  %v2199_v9 = vadd.f32 %v3888_v8, %v2064_v0  ;;  %v2067_v11 = vld [vmem:[#allocation2 + $0x378] sm:$0xff]  ;;  %v2200_v13 = vadd.f32 %v3888_v8, %v2065_v3  ;;  %v2218_v0 = vadd.f32 %v3888_v8, %v2083_v58 }
 0x220   : > { %v3201_v17 = vpop.eup %3200  ;;  %2422 = vst [vmem:[%s3469_s5 + $0x258] sm:$0xff] %v3199_v14  ;;  %3226 = vtanh.f32 %v2180_v15  ;;  %v2201_v15 = vadd.f32 %v3888_v8, %v2066_v6 }
 0x221   : > { %v3203_v20 = vpop.eup %3202  ;;  %2423 = vst [vmem:[%s3469_s5 + $0x260] sm:$0xff] %v3201_v17  ;;  %3228 = vtanh.f32 %v2181_v18  ;;  %v2202_v18 = vadd.f32 %v3888_v8, %v2067_v11 }
 0x222   : > { %v3205_v23 = vpop.eup %3204  ;;  %2424 = vst [vmem:[%s3469_s5 + $0x268] sm:$0xff] %v3203_v20  ;;  %3230 = vtanh.f32 %v2182_v21  ;;  %v2203_v21 = vadd.f32 %v3888_v8, %v2068_v10 }
 0x223   : > { %v3207_v26 = vpop.eup %3206  ;;  %2425 = vst [vmem:[%s3469_s5 + $0x270] sm:$0xff] %v3205_v23  ;;  %3232 = vtanh.f32 %v2183_v24  ;;  %v2204_v24 = vadd.f32 %v3888_v8, %v2069_v16 }
 0x224   : > { %v3209_v29 = vpop.eup %3208  ;;  %2426 = vst [vmem:[%s3469_s5 + $0x278] sm:$0xff] %v3207_v26  ;;  %3234 = vtanh.f32 %v2184_v27  ;;  %v2205_v27 = vadd.f32 %v3888_v8, %v2070_v19 }
 0x225   : > { %v3211_v32 = vpop.eup %3210  ;;  %2427 = vst [vmem:[%s3469_s5 + $0x280] sm:$0xff] %v3209_v29  ;;  %3236 = vtanh.f32 %v2185_v30  ;;  %v2206_v30 = vadd.f32 %v3888_v8, %v2071_v22 }
 0x226   : > { %v3213_v35 = vpop.eup %3212  ;;  %2428 = vst [vmem:[%s3469_s5 + $0x288] sm:$0xff] %v3211_v32  ;;  %3238 = vtanh.f32 %v2186_v33  ;;  %v2207_v33 = vadd.f32 %v3888_v8, %v2072_v25 }
 0x227   : > { %v3215_v38 = vpop.eup %3214  ;;  %2429 = vst [vmem:[%s3469_s5 + $0x290] sm:$0xff] %v3213_v35  ;;  %3240 = vtanh.f32 %v2187_v36  ;;  %v2208_v36 = vadd.f32 %v3888_v8, %v2073_v28 }
 0x228   : > { %v3217_v41 = vpop.eup %3216  ;;  %2430 = vst [vmem:[%s3469_s5 + $0x298] sm:$0xff] %v3215_v38  ;;  %3242 = vtanh.f32 %v2188_v39  ;;  %v2209_v39 = vadd.f32 %v3888_v8, %v2074_v31 }
 0x229   : > { %v3219_v44 = vpop.eup %3218  ;;  %2431 = vst [vmem:[%s3469_s5 + $0x2a0] sm:$0xff] %v3217_v41  ;;  %3244 = vtanh.f32 %v2189_v42  ;;  %v2210_v42 = vadd.f32 %v3888_v8, %v2075_v34 }
 0x22a   : > { %v3221_v47 = vpop.eup %3220  ;;  %2432 = vst [vmem:[%s3469_s5 + $0x2a8] sm:$0xff] %v3219_v44  ;;  %3246 = vtanh.f32 %v2190_v45  ;;  %v2211_v45 = vadd.f32 %v3888_v8, %v2076_v37 }
 0x22b   : > { %v3223_v50 = vpop.eup %3222  ;;  %2433 = vst [vmem:[%s3469_s5 + $0x2b0] sm:$0xff] %v3221_v47  ;;  %3248 = vtanh.f32 %v2191_v48  ;;  %v2212_v48 = vadd.f32 %v3888_v8, %v2077_v40 }
 0x22c   : > { %v3225_v53 = vpop.eup %3224  ;;  %2434 = vst [vmem:[%s3469_s5 + $0x2b8] sm:$0xff] %v3223_v50  ;;  %3250 = vtanh.f32 %v2192_v51  ;;  %v2213_v51 = vadd.f32 %v3888_v8, %v2078_v43 }
 0x22d   : > { %v3227_v56 = vpop.eup %3226  ;;  %2435 = vst [vmem:[%s3469_s5 + $0x2c0] sm:$0xff] %v3225_v53  ;;  %3252 = vtanh.f32 %v2193_v54  ;;  %v2214_v54 = vadd.f32 %v3888_v8, %v2079_v46 }
 0x22e   : > { %v3229_v59 = vpop.eup %3228  ;;  %2436 = vst [vmem:[%s3469_s5 + $0x2c8] sm:$0xff] %v3227_v56  ;;  %3254 = vtanh.f32 %v2194_v57  ;;  %v2215_v57 = vadd.f32 %v3888_v8, %v2080_v49 }
 0x22f   : > { %v3231_v62 = vpop.eup %3230  ;;  %2437 = vst [vmem:[%s3469_s5 + $0x2d0] sm:$0xff] %v3229_v59  ;;  %3256 = vtanh.f32 %v2195_v60  ;;  %v2216_v60 = vadd.f32 %v3888_v8, %v2081_v52 }
 0x230   : > { %v3233_v1 = vpop.eup %3232  ;;  %2438 = vst [vmem:[%s3469_s5 + $0x2d8] sm:$0xff] %v3231_v62  ;;  %3258 = vtanh.f32 %v2196_v63  ;;  %v2217_v62 = vadd.f32 %v3888_v8, %v2082_v55 }
 0x231   : > { %v3235_v4 = vpop.eup %3234  ;;  %2439 = vst [vmem:[%s3469_s5 + $0x2e0] sm:$0xff] %v3233_v1  ;;  %3260 = vtanh.f32 %v2197_v2 }
 0x232   : > { %v3237_v7 = vpop.eup %3236  ;;  %2440 = vst [vmem:[%s3469_s5 + $0x2e8] sm:$0xff] %v3235_v4  ;;  %3262 = vtanh.f32 %v2198_v5 }
 0x233   : > { %v3239_v12 = vpop.eup %3238  ;;  %2441 = vst [vmem:[%s3469_s5 + $0x2f0] sm:$0xff] %v3237_v7  ;;  %3264 = vtanh.f32 %v2199_v9 }
 0x234   : > { %v3241_v14 = vpop.eup %3240  ;;  %2442 = vst [vmem:[%s3469_s5 + $0x2f8] sm:$0xff] %v3239_v12  ;;  %3266 = vtanh.f32 %v2200_v13 }
 0x235   : > { %v3243_v17 = vpop.eup %3242  ;;  %2443 = vst [vmem:[%s3469_s5 + $0x300] sm:$0xff] %v3241_v14  ;;  %3268 = vtanh.f32 %v2201_v15 }
 0x236   : > { %v3245_v20 = vpop.eup %3244  ;;  %2444 = vst [vmem:[%s3469_s5 + $0x308] sm:$0xff] %v3243_v17  ;;  %3270 = vtanh.f32 %v2202_v18 }
 0x237   : > { %v3247_v23 = vpop.eup %3246  ;;  %2445 = vst [vmem:[%s3469_s5 + $0x310] sm:$0xff] %v3245_v20  ;;  %3272 = vtanh.f32 %v2203_v21 }
 0x238   : > { %v3249_v26 = vpop.eup %3248  ;;  %2446 = vst [vmem:[%s3469_s5 + $0x318] sm:$0xff] %v3247_v23  ;;  %3274 = vtanh.f32 %v2204_v24 }
 0x239   : > { %v3251_v29 = vpop.eup %3250  ;;  %2447 = vst [vmem:[%s3469_s5 + $0x320] sm:$0xff] %v3249_v26  ;;  %3276 = vtanh.f32 %v2205_v27 }
 0x23a   : > { %v3253_v32 = vpop.eup %3252  ;;  %2448 = vst [vmem:[%s3469_s5 + $0x328] sm:$0xff] %v3251_v29  ;;  %3278 = vtanh.f32 %v2206_v30 }
 0x23b   : > { %v3255_v35 = vpop.eup %3254  ;;  %2449 = vst [vmem:[%s3469_s5 + $0x330] sm:$0xff] %v3253_v32  ;;  %3280 = vtanh.f32 %v2207_v33 }
 0x23c   : > { %v3257_v38 = vpop.eup %3256  ;;  %2450 = vst [vmem:[%s3469_s5 + $0x338] sm:$0xff] %v3255_v35  ;;  %3282 = vtanh.f32 %v2208_v36 }
 0x23d   : > { %v3259_v41 = vpop.eup %3258  ;;  %2451 = vst [vmem:[%s3469_s5 + $0x340] sm:$0xff] %v3257_v38  ;;  %3284 = vtanh.f32 %v2209_v39 }
 0x23e   : > { %v3261_v44 = vpop.eup %3260  ;;  %2452 = vst [vmem:[%s3469_s5 + $0x348] sm:$0xff] %v3259_v41  ;;  %3286 = vtanh.f32 %v2210_v42 }
 0x23f   : > { %v3263_v47 = vpop.eup %3262  ;;  %2453 = vst [vmem:[%s3469_s5 + $0x350] sm:$0xff] %v3261_v44  ;;  %3288 = vtanh.f32 %v2211_v45 }
 0x240   : > { %v3265_v50 = vpop.eup %3264  ;;  %2454 = vst [vmem:[%s3469_s5 + $0x358] sm:$0xff] %v3263_v47  ;;  %3290 = vtanh.f32 %v2212_v48 }
 0x241   : > { %v3267_v53 = vpop.eup %3266  ;;  %2455 = vst [vmem:[%s3469_s5 + $0x360] sm:$0xff] %v3265_v50  ;;  %3292 = vtanh.f32 %v2213_v51 }
 0x242   : > { %v3269_v56 = vpop.eup %3268  ;;  %2456 = vst [vmem:[%s3469_s5 + $0x368] sm:$0xff] %v3267_v53  ;;  %3294 = vtanh.f32 %v2214_v54 }
 0x243   : > { %v3271_v59 = vpop.eup %3270  ;;  %2457 = vst [vmem:[%s3469_s5 + $0x370] sm:$0xff] %v3269_v56  ;;  %3296 = vtanh.f32 %v2215_v57 }
 0x244   : > { %v3273_v61 = vpop.eup %3272  ;;  %2458 = vst [vmem:[%s3469_s5 + $0x378] sm:$0xff] %v3271_v59  ;;  %3298 = vtanh.f32 %v2216_v60 }
 0x245   : > { %v3275_v63 = vpop.eup %3274  ;;  %2459 = vst [vmem:[%s3469_s5 + $0x380] sm:$0xff] %v3273_v61  ;;  %3300 = vtanh.f32 %v2217_v62 }
 0x246   : > { %v3277_v1 = vpop.eup %3276  ;;  %2460 = vst [vmem:[%s3469_s5 + $0x388] sm:$0xff] %v3275_v63  ;;  %3302 = vtanh.f32 %v2218_v0 }
 0x247   : > { %v3279_v2 = vpop.eup %3278  ;;  %2461 = vst [vmem:[%s3469_s5 + $0x390] sm:$0xff] %v3277_v1 }
 0x248   : > { %v3281_v3 = vpop.eup %3280  ;;  %2462 = vst [vmem:[%s3469_s5 + $0x398] sm:$0xff] %v3279_v2 }
 0x249   : > { %v3283_v4 = vpop.eup %3282  ;;  %2463 = vst [vmem:[%s3469_s5 + $0x3a0] sm:$0xff] %v3281_v3 }
 0x24a   : > { %v3285_v5 = vpop.eup %3284  ;;  %2464 = vst [vmem:[%s3469_s5 + $0x3a8] sm:$0xff] %v3283_v4 }
 0x24b   : > { %v3287_v6 = vpop.eup %3286  ;;  %2465 = vst [vmem:[%s3469_s5 + $0x3b0] sm:$0xff] %v3285_v5 }
 0x24c   : > { %v3289_v7 = vpop.eup %3288  ;;  %2466 = vst [vmem:[%s3469_s5 + $0x3b8] sm:$0xff] %v3287_v6 }
 0x24d   : > { %v3291_v8 = vpop.eup %3290  ;;  %2467 = vst [vmem:[%s3469_s5 + $0x3c0] sm:$0xff] %v3289_v7 }
 0x24e   : > { %v3293_v9 = vpop.eup %3292  ;;  %2468 = vst [vmem:[%s3469_s5 + $0x3c8] sm:$0xff] %v3291_v8 }
 0x24f   : > { %v3295_v11 = vpop.eup %3294  ;;  %2469 = vst [vmem:[%s3469_s5 + $0x3d0] sm:$0xff] %v3293_v9 }
 0x250   : > { %v3297_v12 = vpop.eup %3296  ;;  %2470 = vst [vmem:[%s3469_s5 + $0x3d8] sm:$0xff] %v3295_v11 }
 0x251   : > { %v3299_v13 = vpop.eup %3298  ;;  %2471 = vst [vmem:[%s3469_s5 + $0x3e0] sm:$0xff] %v3297_v12 }
 0x252   : > { %v3301_v10 = vpop.eup %3300  ;;  %2472 = vst [vmem:[%s3469_s5 + $0x3e8] sm:$0xff] %v3299_v13 }
 0x253   : > { %v3303_v14 = vpop.eup %3302  ;;  %2473 = vst [vmem:[%s3469_s5 + $0x3f0] sm:$0xff] %v3301_v10 }
 0x254   : > { %2474 = vst [vmem:[%s3469_s5 + $0x3f8] sm:$0xff] %v3303_v14 }
 0x255 PF: > { %s20_s25 = sadd.s32 1, %s3373_s25   ;;  %s3970_s20 = smov %s3361_s0 }
 0x256   : > { %p17_p3 = scmp.ge.s32.totalorder %s20_s25, 34   ;;  %s3971_s21 = smov %s3365_s23 }
 0x257   : > { %s3972_s22 = smov %s3369_s24  ;;  %s3973_s0 = smov %s3977_s26 }
 0x258   : > { %s3974_s23 = smov %s3981_s27  ;;  %s3975_s24 = smov %s3985_s28 }
 0x259   :  { %19 = sbr.rel (!%p17_p3) target bundleno = 19 (0x13), region = 73 }

</bundles_post_ra>
